<compile_context>
chip_gen: v7x
topology: tpu7x:2x2x1
jax: 0.10.0
libtpu: 0.0.40
codegen_flags: <defaults>
</compile_context>

<pallas_src>
import jax
import jax.numpy as jnp
from jax import lax
from jax.experimental import pallas as pl
from jax.experimental.pallas import tpu as pltpu

# ---------------- small config (structure of PSTv2Config, shrunk sizes) ----------------
B = 2            # batch (crystals)
N = 8            # atoms / PDD rows per crystal
E = 32           # embedding_features
K = 4            # config.k (neighbors per PDD row)
EXP = 5          # config.expansion_size
KE = K * EXP
ATOM_DIM = 16    # atom_input_features (200 for mat2vec; shrunk for this synthetic demo)
N_ENCODERS = 2   # config.encoders
EPS = 1e-5       # torch.nn.LayerNorm default eps
MM_DTYPE = jnp.bfloat16   # MXU input dtype for the per-layer E x E matmuls

# weight-stack indices inside an encoder layer
#   linears   : 0:q 1:k 2:v 3:pm1 4:pm2 5:pb1 6:pb2 7:we1 8:we2 9:out 10:ffn
#   layernorms: 0:q 1:k 2:pm 3:pb 4:we 5:encoder.ln


# ---------------- in-kernel math helpers (pure jnp/pl, traced into the kernel) ----------------
def _mish(x):
    # mish(x) = x * tanh(softplus(x)); tanh(log(1+t)) == t(t+2) / (t(t+2)+2) with t = exp(x)
    # -> one EUP transcendental + one approx reciprocal instead of exp/log1p/tanh.
    t = jnp.exp(jnp.minimum(x, 20.0))          # for x > 20, mish(x) == x to f32 precision
    u = t * (t + 2.0)
    return x * u * pl.reciprocal(u + 2.0, approx=True)


def _layernorm(x, g, b):
    mu = jnp.mean(x, axis=-1, keepdims=True)
    var = jnp.mean(jnp.square(x - mu), axis=-1, keepdims=True)
    return (x - mu) * lax.rsqrt(var + EPS) * g + b


# ---------------- the single fused kernel ----------------
def _pst_fused_kernel(comp_ref, strf_ref, pd_ref, dist_ref,
                      wc_ref, bc_ref, wsa_ref, wsb_ref, cs_ref,
                      wpa_ref, wpb_ref, cp_ref,
                      We_ref, be_ref, ge_ref, bte_ref,
                      hg_ref, hb_ref, wd_ref, bd_ref, wo_ref, bo_ref,
                      out_ref, xatom_ref):
    f32 = jnp.float32
    b, n, _ = dist_ref.shape
    n_layers = We_ref.shape[0]
    e = wc_ref.shape[-1]
    bn = b * n
    bnn = b * n * n

    # ---- embedding stage (DistanceExpansion folded into the weights) ----
    comp = comp_ref[...]                                       # (B*N, ATOM_DIM)
    oms = 1.0 - strf_ref[...]                                  # (B*N, K)
    x = (jnp.dot(comp, wc_ref[...], preferred_element_type=f32) + bc_ref[...]
         + jnp.dot(oms * oms, wsa_ref[...], preferred_element_type=f32)
         + jnp.dot(oms, wsb_ref[...], preferred_element_type=f32) + cs_ref[...])
    omp = 1.0 - pd_ref[...]                                    # (B*N*N, K)
    pos = (jnp.dot(omp * omp, wpa_ref[...], preferred_element_type=f32)
           + jnp.dot(omp, wpb_ref[...], preferred_element_type=f32) + cp_ref[...])
    x_init = x

    # distribution broadcasts + mask: layer-invariant, computed once and reused
    dist = dist_ref[...]                                       # (B, N, 1)
    dj = dist[:, None, :, :]                                   # (B, 1, N, 1) softmax weights (over j)
    di = dist[:, :, None, :]                                   # (B, N, 1, 1)
    mask = ((di * dj) > 0.0).astype(f32)                       # (B, N, N, 1)

    def lin(h, l, i):
        # bf16 MXU inputs, f32 accumulation; biases/elementwise stay f32
        return (jnp.dot(h.astype(MM_DTYPE), We_ref[l, i],
                        preferred_element_type=f32) + be_ref[l, i])

    def ln(h, l, i):
        return _layernorm(h, ge_ref[l, i], bte_ref[l, i])

    # ---- encoder layers: x / pos stay VMEM-resident across the whole loop ----
    for l in range(n_layers):
        x_norm = ln(x, l, 5)                                   # shared encoder LayerNorm
        q = _mish(ln(lin(x_norm, l, 0), l, 0))                 # linear_q: Linear->LN->Mish
        k = _mish(ln(lin(x_norm, l, 1), l, 1))                 # linear_k
        v = lin(x_norm, l, 2)                                  # linear_v (plain Linear)

        q3 = q.reshape(b, n, e)
        k3 = k.reshape(b, n, e)
        v3 = v.reshape(b, n, e)
        # relation_qk[b, i, j] = k[b, j] - q[b, i]   (direct broadcast, no selector matmuls)
        rel = (k3[:, None, :, :] - q3[:, :, None, :]).reshape(bnn, e)

        pem = lin(_mish(ln(lin(pos, l, 3), l, 2)), l, 4)       # linear_p_multiplier(pos)
        peb = lin(_mish(ln(lin(pos, l, 5), l, 3)), l, 6)       # linear_p_bias(pos)
        rel = rel * pem + peb                                  # returned relation_qk (new pos)

        w = lin(_mish(ln(lin(rel, l, 7), l, 4)), l, 8)         # weight_encoding(relation_qk)
        w4 = w.reshape(b, n, n, e)
        # weighted_softmax over key axis j (dim=-2), weights = distribution; mask applied
        # after normalization, exactly as in the torch reference.
        m = jnp.max(w4, axis=2, keepdims=True)
        ex = jnp.exp(w4 - m) * dj
        denom = jnp.sum(ex, axis=2, keepdims=True)
        probs = ex * pl.reciprocal(denom, approx=True)
        probs = probs * mask
        # einsum('b i j k, b j k -> b i k', weight, value)
        att = jnp.sum(probs * v3[:, None, :, :], axis=2).reshape(bn, e)

        out1 = x + lin(att, l, 9)                              # x + self.out(att_output)
        out2 = _mish(lin(ln(out1, l, 5), l, 10))               # ffn(self.ln(output1))
        x = ln(out1 + out2, l, 5)                              # self.ln(output1 + output2)
        pos = rel

    xatom_ref[...] = x                                         # atom-level features

    # ---- pooling + decoder MLP + out head (fused; no separate launch) ----
    pooled = jnp.sum(dist * (x + x_init).reshape(b, n, e), axis=1)       # (B, E)
    h = _layernorm(pooled, hg_ref[...], hb_ref[...])                     # self.ln
    h = jnp.dot(h, wd_ref[0], preferred_element_type=f32) + bd_ref[0]    # MLP.embedding
    h = _mish(jnp.dot(h, wd_ref[1], preferred_element_type=f32) + bd_ref[1])
    out_ref[...] = jnp.dot(h, wo_ref[...], preferred_element_type=f32) + bo_ref[...]


# ---------------- wrapper ----------------
def pst_v2_forward(params, str_fea, comp_fea, pd, output_level="crystal"):
    b, n, a = comp_fea.shape
    e = params["w_comp"].shape[-1]
    distribution = str_fea[:, :, 0:1]                          # (B, N, 1) PDD row weights
    str_dists = str_fea[:, :, 1:]                              # (B, N, K) PDD distances
    # TODO(synk): AtomFeaturizer is a CSV/JSON-backed lookup; comp_fea is assumed to already be
    # the per-atom feature vectors (identity featurizer).
    # fold batch into the matmul M dimension; the kernel sees flat (B*N, .) / (B*N*N, .) slabs
    comp2 = comp_fea.reshape(b * n, a)
    str2 = str_dists.reshape(b * n, -1)
    pd2 = pd.reshape(b * n * n, -1)

    vmem = pl.BlockSpec(memory_space=pltpu.MemorySpace.VMEM)
    out, x_atoms = pl.pallas_call(
        _pst_fused_kernel,
        out_shape=(jax.ShapeDtypeStruct((b, 1), jnp.float32),
                   jax.ShapeDtypeStruct((b * n, e), jnp.float32)),
        in_specs=[vmem] * 22,
        out_specs=(vmem, vmem),
    )(comp2, str2, pd2, distribution,
      params["w_comp"], params["b_comp"],
      params["w_str_a"], params["w_str_b"], params["c_str"],
      params["w_pd_a"], params["w_pd_b"], params["c_pd"],
      params["W_enc"], params["b_enc"], params["g_enc"], params["beta_enc"],
      params["ln_g"], params["ln_b"], params["w_dec"], params["b_dec"],
      params["w_out"], params["b_out"])
    if output_level == "atom":
        return distribution, x_atoms.reshape(b, n, e)
    # TODO(synk): output_level == "property" would additionally apply self.final (Linear(1,1));
    # only the 'crystal' / 'atom' paths are implemented here.
    return out


# ---------------- deterministic parameter init ----------------
def _init_linear(key, fan_in, fan_out):
    kw, kb = jax.random.split(key)
    bound = 1.0 / (fan_in ** 0.5)
    w = jax.random.uniform(kw, (fan_in, fan_out), jnp.float32, -bound, bound)
    b = jax.random.uniform(kb, (1, fan_out), jnp.float32, -bound, bound)
    return w, b


def _fold_expansion(w, bias, size):
    # TODO(synk): crakn's DistanceExpansion source wasn't provided; assumes the standard
    #   e[..., d*size + s] = (1 - (x[..., d] - s/size))**2
    # which is quadratic in (1-x_d), so Linear(de(x)) folds exactly into:
    #   out = (1-x)^2 @ WA + (1-x) @ WB + c
    k = w.shape[0] // size
    e = w.shape[1]
    wr = w.reshape(k, size, e)
    starter = (jnp.arange(size, dtype=w.dtype) / size)[None, :, None]
    wa = jnp.sum(wr, axis=1)                               # coefficient of (1-x)^2
    wb = jnp.sum(2.0 * starter * wr, axis=1)               # coefficient of (1-x)
    c = jnp.sum((starter ** 2) * wr, axis=(0, 1))[None, :] + bias
    return wa, wb, c


def init_params(key):
    keys = jax.random.split(key, 2 + N_ENCODERS)
    # embedding stage: comp_embedding_layer, pdd_embedding_layer, pd_embedding
    ek = jax.random.split(keys[0], 3)
    w_comp, b_comp = _init_linear(ek[0], ATOM_DIM, E)
    w_pdd, b_pdd = _init_linear(ek[1], KE, E)
    w_pd, b_pd = _init_linear(ek[2], KE, E)
    w_str_a, w_str_b, c_str = _fold_expansion(w_pdd, b_pdd, EXP)
    w_pd_a, w_pd_b, c_pd = _fold_expansion(w_pd, b_pd, EXP)
    # encoders: 11 Linear(E,E) + 6 LayerNorm(E) each, stacked over layers
    Ws, bs = [], []
    for li in range(N_ENCODERS):
        lk = jax.random.split(keys[1 + li], 11)
        w_l, b_l = zip(*[_init_linear(lk[j], E, E) for j in range(11)])
        Ws.append(jnp.stack(w_l))
        bs.append(jnp.stack(b_l))
    W_enc = jnp.stack(Ws).astype(MM_DTYPE)                 # (L, 11, E, E) bf16 MXU inputs
    b_enc = jnp.stack(bs)                                  # (L, 11, 1, E) f32
    g_enc = jnp.ones((N_ENCODERS, 6, 1, E), jnp.float32)
    beta_enc = jnp.zeros((N_ENCODERS, 6, 1, E), jnp.float32)
    # head: top-level LayerNorm + MLP decoder (2 layers) + out Linear(E, 1)
    hk = jax.random.split(keys[-1], 3)
    wd0, bd0 = _init_linear(hk[0], E, E)
    wd1, bd1 = _init_linear(hk[1], E, E)
    w_out, b_out = _init_linear(hk[2], E, 1)
    return dict(w_comp=w_comp, b_comp=b_comp,
                w_str_a=w_str_a, w_str_b=w_str_b, c_str=c_str,
                w_pd_a=w_pd_a, w_pd_b=w_pd_b, c_pd=c_pd,
                W_enc=W_enc, b_enc=b_enc, g_enc=g_enc, beta_enc=beta_enc,
                ln_g=jnp.ones((1, E), jnp.float32), ln_b=jnp.zeros((1, E), jnp.float32),
                w_dec=jnp.stack([wd0, wd1]),               # (2, E, E)
                b_dec=jnp.stack([bd0, bd1]),               # (2, 1, E)
                w_out=w_out,                               # (E, 1)
                b_out=b_out)                               # (1, 1)


if __name__ == "__main__":
    key = jax.random.PRNGKey(0)
    kd, ks, kc, kp, kparams = jax.random.split(key, 5)
    # str_fea: column 0 is the PDD weight (distribution), remaining K columns are distances
    weights = jax.random.uniform(kd, (B, N), jnp.float32, 0.05, 1.0)
    distribution = weights / jnp.sum(weights, axis=1, keepdims=True)
    pdd_dists = jax.random.uniform(ks, (B, N, K), jnp.float32, 0.5, 3.0)
    str_fea = jnp.concatenate([distribution[..., None], pdd_dists], axis=-1)  # (B, N, 1+K)
    comp_fea = jax.random.normal(kc, (B, N, ATOM_DIM), jnp.float32)           # (B, N, ATOM_DIM)
    pd = jax.random.uniform(kp, (B, N, N, K), jnp.float32, 0.5, 3.0)          # (B, N, N, K)

    params = init_params(kparams)
    fwd = jax.jit(pst_v2_forward, static_argnames=("output_level",))
    out = fwd(params, str_fea, comp_fea, pd, output_level="crystal")
    out = jax.block_until_ready(out)
    assert out.shape == (B, 1) and bool(jnp.all(jnp.isfinite(out)))
    print("KERNEL_OK")
</pallas_src>

<mosaic_0001>
module attributes {stable_mosaic.version = 11 : i64} {
  func.func @_pst_fused_kernel(%arg0: memref<16x16xf32, #tpu.memory_space<vmem>>, %arg1: memref<16x4xf32, #tpu.memory_space<vmem>>, %arg2: memref<128x4xf32, #tpu.memory_space<vmem>>, %arg3: memref<2x8x1xf32, #tpu.memory_space<vmem>>, %arg4: memref<16x32xf32, #tpu.memory_space<vmem>>, %arg5: memref<1x32xf32, #tpu.memory_space<vmem>>, %arg6: memref<4x32xf32, #tpu.memory_space<vmem>>, %arg7: memref<4x32xf32, #tpu.memory_space<vmem>>, %arg8: memref<1x32xf32, #tpu.memory_space<vmem>>, %arg9: memref<4x32xf32, #tpu.memory_space<vmem>>, %arg10: memref<4x32xf32, #tpu.memory_space<vmem>>, %arg11: memref<1x32xf32, #tpu.memory_space<vmem>>, %arg12: memref<2x11x32x32xbf16, #tpu.memory_space<vmem>>, %arg13: memref<2x11x1x32xf32, #tpu.memory_space<vmem>>, %arg14: memref<2x6x1x32xf32, #tpu.memory_space<vmem>>, %arg15: memref<2x6x1x32xf32, #tpu.memory_space<vmem>>, %arg16: memref<1x32xf32, #tpu.memory_space<vmem>>, %arg17: memref<1x32xf32, #tpu.memory_space<vmem>>, %arg18: memref<2x32x32xf32, #tpu.memory_space<vmem>>, %arg19: memref<2x1x32xf32, #tpu.memory_space<vmem>>, %arg20: memref<32x1xf32, #tpu.memory_space<vmem>>, %arg21: memref<1x1xf32, #tpu.memory_space<vmem>>, %arg22: memref<2x1xf32, #tpu.memory_space<vmem>>, %arg23: memref<16x32xf32, #tpu.memory_space<vmem>>) attributes {dimension_semantics = [], scalar_prefetch = 0 : i64, scratch_operands = 0 : i64, tpu.core_type = #tpu.core_type<tc>} {
    %c0 = arith.constant 0 : index
    %c0_0 = arith.constant 0 : index
    %0 = vector.load %arg0[%c0, %c0_0] : memref<16x16xf32, #tpu.memory_space<vmem>>, vector<16x16xf32>
    %c0_1 = arith.constant 0 : index
    %c0_2 = arith.constant 0 : index
    %1 = vector.load %arg1[%c0_1, %c0_2] : memref<16x4xf32, #tpu.memory_space<vmem>>, vector<16x4xf32>
    %cst = arith.constant 1.000000e+00 : f32
    %2 = vector.broadcast %cst : f32 to vector<16x4xf32>
    %3 = arith.subf %2, %1 : vector<16x4xf32>
    %c0_3 = arith.constant 0 : index
    %c0_4 = arith.constant 0 : index
    %4 = vector.load %arg4[%c0_3, %c0_4] : memref<16x32xf32, #tpu.memory_space<vmem>>, vector<16x32xf32>
    %cst_5 = arith.constant dense<0.000000e+00> : vector<16x32xf32>
    %5 = tpu.matmul %0, %4, %cst_5 {dimension_numbers = #tpu.dot_dimension_numbers<[1], [0], [0], [1], [0, 0, 1, 1], [], []>} : vector<16x16xf32>, vector<16x32xf32>, vector<16x32xf32> -> vector<16x32xf32>
    %c0_6 = arith.constant 0 : index
    %c0_7 = arith.constant 0 : index
    %6 = vector.load %arg5[%c0_6, %c0_7] : memref<1x32xf32, #tpu.memory_space<vmem>>, vector<1x32xf32>
    %7 = vector.broadcast %6 : vector<1x32xf32> to vector<16x32xf32>
    %8 = arith.addf %5, %7 : vector<16x32xf32>
    %9 = arith.mulf %3, %3 : vector<16x4xf32>
    %c0_8 = arith.constant 0 : index
    %c0_9 = arith.constant 0 : index
    %10 = vector.load %arg6[%c0_8, %c0_9] : memref<4x32xf32, #tpu.memory_space<vmem>>, vector<4x32xf32>
    %cst_10 = arith.constant dense<0.000000e+00> : vector<16x32xf32>
    %11 = tpu.matmul %9, %10, %cst_10 {dimension_numbers = #tpu.dot_dimension_numbers<[1], [0], [0], [1], [0, 0, 1, 1], [], []>} : vector<16x4xf32>, vector<4x32xf32>, vector<16x32xf32> -> vector<16x32xf32>
    %12 = arith.addf %8, %11 : vector<16x32xf32>
    %c0_11 = arith.constant 0 : index
    %c0_12 = arith.constant 0 : index
    %13 = vector.load %arg7[%c0_11, %c0_12] : memref<4x32xf32, #tpu.memory_space<vmem>>, vector<4x32xf32>
    %cst_13 = arith.constant dense<0.000000e+00> : vector<16x32xf32>
    %14 = tpu.matmul %3, %13, %cst_13 {dimension_numbers = #tpu.dot_dimension_numbers<[1], [0], [0], [1], [0, 0, 1, 1], [], []>} : vector<16x4xf32>, vector<4x32xf32>, vector<16x32xf32> -> vector<16x32xf32>
    %15 = arith.addf %12, %14 : vector<16x32xf32>
    %c0_14 = arith.constant 0 : index
    %c0_15 = arith.constant 0 : index
    %16 = vector.load %arg8[%c0_14, %c0_15] : memref<1x32xf32, #tpu.memory_space<vmem>>, vector<1x32xf32>
    %17 = vector.broadcast %16 : vector<1x32xf32> to vector<16x32xf32>
    %18 = arith.addf %15, %17 : vector<16x32xf32>
    %c0_16 = arith.constant 0 : index
    %c0_17 = arith.constant 0 : index
    %19 = vector.load %arg2[%c0_16, %c0_17] : memref<128x4xf32, #tpu.memory_space<vmem>>, vector<128x4xf32>
    %cst_18 = arith.constant 1.000000e+00 : f32
    %20 = vector.broadcast %cst_18 : f32 to vector<128x4xf32>
    %21 = arith.subf %20, %19 : vector<128x4xf32>
    %22 = arith.mulf %21, %21 : vector<128x4xf32>
    %c0_19 = arith.constant 0 : index
    %c0_20 = arith.constant 0 : index
    %23 = vector.load %arg9[%c0_19, %c0_20] : memref<4x32xf32, #tpu.memory_space<vmem>>, vector<4x32xf32>
    %cst_21 = arith.constant dense<0.000000e+00> : vector<128x32xf32>
    %24 = tpu.matmul %22, %23, %cst_21 {dimension_numbers = #tpu.dot_dimension_numbers<[1], [0], [0], [1], [0, 0, 1, 1], [], []>} : vector<128x4xf32>, vector<4x32xf32>, vector<128x32xf32> -> vector<128x32xf32>
    %c0_22 = arith.constant 0 : index
    %c0_23 = arith.constant 0 : index
    %25 = vector.load %arg10[%c0_22, %c0_23] : memref<4x32xf32, #tpu.memory_space<vmem>>, vector<4x32xf32>
    %cst_24 = arith.constant dense<0.000000e+00> : vector<128x32xf32>
    %26 = tpu.matmul %21, %25, %cst_24 {dimension_numbers = #tpu.dot_dimension_numbers<[1], [0], [0], [1], [0, 0, 1, 1], [], []>} : vector<128x4xf32>, vector<4x32xf32>, vector<128x32xf32> -> vector<128x32xf32>
    %27 = arith.addf %24, %26 : vector<128x32xf32>
    %c0_25 = arith.constant 0 : index
    %c0_26 = arith.constant 0 : index
    %28 = vector.load %arg11[%c0_25, %c0_26] : memref<1x32xf32, #tpu.memory_space<vmem>>, vector<1x32xf32>
    %29 = vector.broadcast %28 : vector<1x32xf32> to vector<128x32xf32>
    %30 = arith.addf %27, %29 : vector<128x32xf32>
    %c0_27 = arith.constant 0 : index
    %c0_28 = arith.constant 0 : index
    %c0_29 = arith.constant 0 : index
    %31 = vector.load %arg3[%c0_27, %c0_28, %c0_29] : memref<2x8x1xf32, #tpu.memory_space<vmem>>, vector<2x8x1xf32>
    %32 = vector.shape_cast %31 : vector<2x8x1xf32> to vector<2x1x8x1xf32>
    %33 = vector.shape_cast %31 : vector<2x8x1xf32> to vector<2x8x1x1xf32>
    %34 = vector.broadcast %33 : vector<2x8x1x1xf32> to vector<2x8x8x1xf32>
    %35 = vector.broadcast %32 : vector<2x1x8x1xf32> to vector<2x8x8x1xf32>
    %36 = arith.mulf %34, %35 : vector<2x8x8x1xf32>
    %cst_30 = arith.constant 0.000000e+00 : f32
    %37 = vector.broadcast %cst_30 : f32 to vector<2x8x8x1xf32>
    %38 = arith.cmpf ogt, %36, %37 : vector<2x8x8x1xf32>
    %39 = arith.extui %38 : vector<2x8x8x1xi1> to vector<2x8x8x1xi32>
    %40 = arith.sitofp %39 : vector<2x8x8x1xi32> to vector<2x8x8x1xf32>
    %c0_31 = arith.constant 0 : index
    %c5 = arith.constant 5 : index
    %c0_32 = arith.constant 0 : index
    %c0_33 = arith.constant 0 : index
    %41 = vector.load %arg14[%c0_31, %c5, %c0_32, %c0_33] : memref<2x6x1x32xf32, #tpu.memory_space<vmem>>, vector<1x1x1x32xf32>
    %42 = vector.shape_cast %41 : vector<1x1x1x32xf32> to vector<1x32xf32>
    %c0_34 = arith.constant 0 : index
    %c5_35 = arith.constant 5 : index
    %c0_36 = arith.constant 0 : index
    %c0_37 = arith.constant 0 : index
    %43 = vector.load %arg15[%c0_34, %c5_35, %c0_36, %c0_37] : memref<2x6x1x32xf32, #tpu.memory_space<vmem>>, vector<1x1x1x32xf32>
    %44 = vector.shape_cast %43 : vector<1x1x1x32xf32> to vector<1x32xf32>
    %cst_38 = arith.constant dense<0.000000e+00> : vector<16xf32>
    %45 = vector.multi_reduction <add>, %18, %cst_38 [1] : vector<16x32xf32> to vector<16xf32>
    %46 = vector.shape_cast %45 : vector<16xf32> to vector<16x1xf32>
    %cst_39 = arith.constant 3.200000e+01 : f32
    %47 = vector.broadcast %cst_39 : f32 to vector<16x1xf32>
    %48 = arith.divf %46, %47 : vector<16x1xf32>
    %49 = vector.broadcast %48 : vector<16x1xf32> to vector<16x32xf32>
    %50 = arith.subf %18, %49 : vector<16x32xf32>
    %51 = arith.mulf %50, %50 : vector<16x32xf32>
    %cst_40 = arith.constant dense<0.000000e+00> : vector<16xf32>
    %52 = vector.multi_reduction <add>, %51, %cst_40 [1] : vector<16x32xf32> to vector<16xf32>
    %53 = vector.shape_cast %52 : vector<16xf32> to vector<16x1xf32>
    %cst_41 = arith.constant 3.200000e+01 : f32
    %54 = vector.broadcast %cst_41 : f32 to vector<16x1xf32>
    %55 = arith.divf %53, %54 : vector<16x1xf32>
    %56 = vector.broadcast %48 : vector<16x1xf32> to vector<16x32xf32>
    %57 = arith.subf %18, %56 : vector<16x32xf32>
    %cst_42 = arith.constant 9.99999974E-6 : f32
    %58 = vector.broadcast %cst_42 : f32 to vector<16x1xf32>
    %59 = arith.addf %55, %58 : vector<16x1xf32>
    %60 = math.rsqrt %59 : vector<16x1xf32>
    %61 = vector.broadcast %60 : vector<16x1xf32> to vector<16x32xf32>
    %62 = arith.mulf %57, %61 : vector<16x32xf32>
    %63 = vector.broadcast %42 : vector<1x32xf32> to vector<16x32xf32>
    %64 = arith.mulf %62, %63 : vector<16x32xf32>
    %65 = vector.broadcast %44 : vector<1x32xf32> to vector<16x32xf32>
    %66 = arith.addf %64, %65 : vector<16x32xf32>
    %67 = arith.truncf %66 : vector<16x32xf32> to vector<16x32xbf16>
    %c0_43 = arith.constant 0 : index
    %c0_44 = arith.constant 0 : index
    %c0_45 = arith.constant 0 : index
    %c0_46 = arith.constant 0 : index
    %68 = vector.load %arg12[%c0_43, %c0_44, %c0_45, %c0_46] : memref<2x11x32x32xbf16, #tpu.memory_space<vmem>>, vector<1x1x32x32xbf16>
    %69 = vector.shape_cast %68 : vector<1x1x32x32xbf16> to vector<32x32xbf16>
    %cst_47 = arith.constant dense<0.000000e+00> : vector<16x32xf32>
    %70 = tpu.matmul %67, %69, %cst_47 {dimension_numbers = #tpu.dot_dimension_numbers<[1], [0], [0], [1], [0, 0, 1, 1], [], []>} : vector<16x32xbf16>, vector<32x32xbf16>, vector<16x32xf32> -> vector<16x32xf32>
    %c0_48 = arith.constant 0 : index
    %c0_49 = arith.constant 0 : index
    %c0_50 = arith.constant 0 : index
    %c0_51 = arith.constant 0 : index
    %71 = vector.load %arg13[%c0_48, %c0_49, %c0_50, %c0_51] : memref<2x11x1x32xf32, #tpu.memory_space<vmem>>, vector<1x1x1x32xf32>
    %72 = vector.shape_cast %71 : vector<1x1x1x32xf32> to vector<1x32xf32>
    %73 = vector.broadcast %72 : vector<1x32xf32> to vector<16x32xf32>
    %74 = arith.addf %70, %73 : vector<16x32xf32>
    %c0_52 = arith.constant 0 : index
    %c0_53 = arith.constant 0 : index
    %c0_54 = arith.constant 0 : index
    %c0_55 = arith.constant 0 : index
    %75 = vector.load %arg14[%c0_52, %c0_53, %c0_54, %c0_55] : memref<2x6x1x32xf32, #tpu.memory_space<vmem>>, vector<1x1x1x32xf32>
    %76 = vector.shape_cast %75 : vector<1x1x1x32xf32> to vector<1x32xf32>
    %c0_56 = arith.constant 0 : index
    %c0_57 = arith.constant 0 : index
    %c0_58 = arith.constant 0 : index
    %c0_59 = arith.constant 0 : index
    %77 = vector.load %arg15[%c0_56, %c0_57, %c0_58, %c0_59] : memref<2x6x1x32xf32, #tpu.memory_space<vmem>>, vector<1x1x1x32xf32>
    %78 = vector.shape_cast %77 : vector<1x1x1x32xf32> to vector<1x32xf32>
    %cst_60 = arith.constant dense<0.000000e+00> : vector<16xf32>
    %79 = vector.multi_reduction <add>, %74, %cst_60 [1] : vector<16x32xf32> to vector<16xf32>
    %80 = vector.shape_cast %79 : vector<16xf32> to vector<16x1xf32>
    %cst_61 = arith.constant 3.200000e+01 : f32
    %81 = vector.broadcast %cst_61 : f32 to vector<16x1xf32>
    %82 = arith.divf %80, %81 : vector<16x1xf32>
    %83 = vector.broadcast %82 : vector<16x1xf32> to vector<16x32xf32>
    %84 = arith.subf %74, %83 : vector<16x32xf32>
    %85 = arith.mulf %84, %84 : vector<16x32xf32>
    %cst_62 = arith.constant dense<0.000000e+00> : vector<16xf32>
    %86 = vector.multi_reduction <add>, %85, %cst_62 [1] : vector<16x32xf32> to vector<16xf32>
    %87 = vector.shape_cast %86 : vector<16xf32> to vector<16x1xf32>
    %cst_63 = arith.constant 3.200000e+01 : f32
    %88 = vector.broadcast %cst_63 : f32 to vector<16x1xf32>
    %89 = arith.divf %87, %88 : vector<16x1xf32>
    %90 = vector.broadcast %82 : vector<16x1xf32> to vector<16x32xf32>
    %91 = arith.subf %74, %90 : vector<16x32xf32>
    %cst_64 = arith.constant 9.99999974E-6 : f32
    %92 = vector.broadcast %cst_64 : f32 to vector<16x1xf32>
    %93 = arith.addf %89, %92 : vector<16x1xf32>
    %94 = math.rsqrt %93 : vector<16x1xf32>
    %95 = vector.broadcast %94 : vector<16x1xf32> to vector<16x32xf32>
    %96 = arith.mulf %91, %95 : vector<16x32xf32>
    %97 = vector.broadcast %76 : vector<1x32xf32> to vector<16x32xf32>
    %98 = arith.mulf %96, %97 : vector<16x32xf32>
    %99 = vector.broadcast %78 : vector<1x32xf32> to vector<16x32xf32>
    %100 = arith.addf %98, %99 : vector<16x32xf32>
    %cst_65 = arith.constant 2.000000e+01 : f32
    %101 = vector.broadcast %cst_65 : f32 to vector<16x32xf32>
    %102 = arith.minimumf %100, %101 : vector<16x32xf32>
    %103 = math.exp %102 : vector<16x32xf32>
    %cst_66 = arith.constant 2.000000e+00 : f32
    %104 = vector.broadcast %cst_66 : f32 to vector<16x32xf32>
    %105 = arith.addf %103, %104 : vector<16x32xf32>
    %106 = arith.mulf %103, %105 : vector<16x32xf32>
    %107 = arith.mulf %100, %106 : vector<16x32xf32>
    %cst_67 = arith.constant 2.000000e+00 : f32
    %108 = vector.broadcast %cst_67 : f32 to vector<16x32xf32>
    %109 = arith.addf %106, %108 : vector<16x32xf32>
    %110 = tpu.reciprocal %109 {approx = true} : vector<16x32xf32> -> vector<16x32xf32>
    %111 = arith.mulf %107, %110 : vector<16x32xf32>
    %112 = arith.truncf %66 : vector<16x32xf32> to vector<16x32xbf16>
    %c0_68 = arith.constant 0 : index
    %c1 = arith.constant 1 : index
    %c0_69 = arith.constant 0 : index
    %c0_70 = arith.constant 0 : index
    %113 = vector.load %arg12[%c0_68, %c1, %c0_69, %c0_70] : memref<2x11x32x32xbf16, #tpu.memory_space<vmem>>, vector<1x1x32x32xbf16>
    %114 = vector.shape_cast %113 : vector<1x1x32x32xbf16> to vector<32x32xbf16>
    %cst_71 = arith.constant dense<0.000000e+00> : vector<16x32xf32>
    %115 = tpu.matmul %112, %114, %cst_71 {dimension_numbers = #tpu.dot_dimension_numbers<[1], [0], [0], [1], [0, 0, 1, 1], [], []>} : vector<16x32xbf16>, vector<32x32xbf16>, vector<16x32xf32> -> vector<16x32xf32>
    %c0_72 = arith.constant 0 : index
    %c1_73 = arith.constant 1 : index
    %c0_74 = arith.constant 0 : index
    %c0_75 = arith.constant 0 : index
    %116 = vector.load %arg13[%c0_72, %c1_73, %c0_74, %c0_75] : memref<2x11x1x32xf32, #tpu.memory_space<vmem>>, vector<1x1x1x32xf32>
    %117 = vector.shape_cast %116 : vector<1x1x1x32xf32> to vector<1x32xf32>
    %118 = vector.broadcast %117 : vector<1x32xf32> to vector<16x32xf32>
    %119 = arith.addf %115, %118 : vector<16x32xf32>
    %c0_76 = arith.constant 0 : index
    %c1_77 = arith.constant 1 : index
    %c0_78 = arith.constant 0 : index
    %c0_79 = arith.constant 0 : index
    %120 = vector.load %arg14[%c0_76, %c1_77, %c0_78, %c0_79] : memref<2x6x1x32xf32, #tpu.memory_space<vmem>>, vector<1x1x1x32xf32>
    %121 = vector.shape_cast %120 : vector<1x1x1x32xf32> to vector<1x32xf32>
    %c0_80 = arith.constant 0 : index
    %c1_81 = arith.constant 1 : index
    %c0_82 = arith.constant 0 : index
    %c0_83 = arith.constant 0 : index
    %122 = vector.load %arg15[%c0_80, %c1_81, %c0_82, %c0_83] : memref<2x6x1x32xf32, #tpu.memory_space<vmem>>, vector<1x1x1x32xf32>
    %123 = vector.shape_cast %122 : vector<1x1x1x32xf32> to vector<1x32xf32>
    %cst_84 = arith.constant dense<0.000000e+00> : vector<16xf32>
    %124 = vector.multi_reduction <add>, %119, %cst_84 [1] : vector<16x32xf32> to vector<16xf32>
    %125 = vector.shape_cast %124 : vector<16xf32> to vector<16x1xf32>
    %cst_85 = arith.constant 3.200000e+01 : f32
    %126 = vector.broadcast %cst_85 : f32 to vector<16x1xf32>
    %127 = arith.divf %125, %126 : vector<16x1xf32>
    %128 = vector.broadcast %127 : vector<16x1xf32> to vector<16x32xf32>
    %129 = arith.subf %119, %128 : vector<16x32xf32>
    %130 = arith.mulf %129, %129 : vector<16x32xf32>
    %cst_86 = arith.constant dense<0.000000e+00> : vector<16xf32>
    %131 = vector.multi_reduction <add>, %130, %cst_86 [1] : vector<16x32xf32> to vector<16xf32>
    %132 = vector.shape_cast %131 : vector<16xf32> to vector<16x1xf32>
    %cst_87 = arith.constant 3.200000e+01 : f32
    %133 = vector.broadcast %cst_87 : f32 to vector<16x1xf32>
    %134 = arith.divf %132, %133 : vector<16x1xf32>
    %135 = vector.broadcast %127 : vector<16x1xf32> to vector<16x32xf32>
    %136 = arith.subf %119, %135 : vector<16x32xf32>
    %cst_88 = arith.constant 9.99999974E-6 : f32
    %137 = vector.broadcast %cst_88 : f32 to vector<16x1xf32>
    %138 = arith.addf %134, %137 : vector<16x1xf32>
    %139 = math.rsqrt %138 : vector<16x1xf32>
    %140 = vector.broadcast %139 : vector<16x1xf32> to vector<16x32xf32>
    %141 = arith.mulf %136, %140 : vector<16x32xf32>
    %142 = vector.broadcast %121 : vector<1x32xf32> to vector<16x32xf32>
    %143 = arith.mulf %141, %142 : vector<16x32xf32>
    %144 = vector.broadcast %123 : vector<1x32xf32> to vector<16x32xf32>
    %145 = arith.addf %143, %144 : vector<16x32xf32>
    %cst_89 = arith.constant 2.000000e+01 : f32
    %146 = vector.broadcast %cst_89 : f32 to vector<16x32xf32>
    %147 = arith.minimumf %145, %146 : vector<16x32xf32>
    %148 = math.exp %147 : vector<16x32xf32>
    %cst_90 = arith.constant 2.000000e+00 : f32
    %149 = vector.broadcast %cst_90 : f32 to vector<16x32xf32>
    %150 = arith.addf %148, %149 : vector<16x32xf32>
    %151 = arith.mulf %148, %150 : vector<16x32xf32>
    %152 = arith.mulf %145, %151 : vector<16x32xf32>
    %cst_91 = arith.constant 2.000000e+00 : f32
    %153 = vector.broadcast %cst_91 : f32 to vector<16x32xf32>
    %154 = arith.addf %151, %153 : vector<16x32xf32>
    %155 = tpu.reciprocal %154 {approx = true} : vector<16x32xf32> -> vector<16x32xf32>
    %156 = arith.mulf %152, %155 : vector<16x32xf32>
    %157 = arith.truncf %66 : vector<16x32xf32> to vector<16x32xbf16>
    %c0_92 = arith.constant 0 : index
    %c2 = arith.constant 2 : index
    %c0_93 = arith.constant 0 : index
    %c0_94 = arith.constant 0 : index
    %158 = vector.load %arg12[%c0_92, %c2, %c0_93, %c0_94] : memref<2x11x32x32xbf16, #tpu.memory_space<vmem>>, vector<1x1x32x32xbf16>
    %159 = vector.shape_cast %158 : vector<1x1x32x32xbf16> to vector<32x32xbf16>
    %cst_95 = arith.constant dense<0.000000e+00> : vector<16x32xf32>
    %160 = tpu.matmul %157, %159, %cst_95 {dimension_numbers = #tpu.dot_dimension_numbers<[1], [0], [0], [1], [0, 0, 1, 1], [], []>} : vector<16x32xbf16>, vector<32x32xbf16>, vector<16x32xf32> -> vector<16x32xf32>
    %c0_96 = arith.constant 0 : index
    %c2_97 = arith.constant 2 : index
    %c0_98 = arith.constant 0 : index
    %c0_99 = arith.constant 0 : index
    %161 = vector.load %arg13[%c0_96, %c2_97, %c0_98, %c0_99] : memref<2x11x1x32xf32, #tpu.memory_space<vmem>>, vector<1x1x1x32xf32>
    %162 = vector.shape_cast %161 : vector<1x1x1x32xf32> to vector<1x32xf32>
    %163 = vector.broadcast %162 : vector<1x32xf32> to vector<16x32xf32>
    %164 = arith.addf %160, %163 : vector<16x32xf32>
    %165 = vector.shape_cast %111 : vector<16x32xf32> to vector<2x8x32xf32>
    %166 = vector.shape_cast %156 : vector<16x32xf32> to vector<2x8x32xf32>
    %167 = vector.shape_cast %164 : vector<16x32xf32> to vector<2x8x32xf32>
    %168 = vector.shape_cast %166 : vector<2x8x32xf32> to vector<2x1x8x32xf32>
    %169 = vector.shape_cast %165 : vector<2x8x32xf32> to vector<2x8x1x32xf32>
    %170 = vector.broadcast %168 : vector<2x1x8x32xf32> to vector<2x8x8x32xf32>
    %171 = vector.broadcast %169 : vector<2x8x1x32xf32> to vector<2x8x8x32xf32>
    %172 = arith.subf %170, %171 : vector<2x8x8x32xf32>
    %173 = vector.shape_cast %172 : vector<2x8x8x32xf32> to vector<128x32xf32>
    %174 = arith.truncf %30 : vector<128x32xf32> to vector<128x32xbf16>
    %c0_100 = arith.constant 0 : index
    %c3 = arith.constant 3 : index
    %c0_101 = arith.constant 0 : index
    %c0_102 = arith.constant 0 : index
    %175 = vector.load %arg12[%c0_100, %c3, %c0_101, %c0_102] : memref<2x11x32x32xbf16, #tpu.memory_space<vmem>>, vector<1x1x32x32xbf16>
    %176 = vector.shape_cast %175 : vector<1x1x32x32xbf16> to vector<32x32xbf16>
    %cst_103 = arith.constant dense<0.000000e+00> : vector<128x32xf32>
    %177 = tpu.matmul %174, %176, %cst_103 {dimension_numbers = #tpu.dot_dimension_numbers<[1], [0], [0], [1], [0, 0, 1, 1], [], []>} : vector<128x32xbf16>, vector<32x32xbf16>, vector<128x32xf32> -> vector<128x32xf32>
    %c0_104 = arith.constant 0 : index
    %c3_105 = arith.constant 3 : index
    %c0_106 = arith.constant 0 : index
    %c0_107 = arith.constant 0 : index
    %178 = vector.load %arg13[%c0_104, %c3_105, %c0_106, %c0_107] : memref<2x11x1x32xf32, #tpu.memory_space<vmem>>, vector<1x1x1x32xf32>
    %179 = vector.shape_cast %178 : vector<1x1x1x32xf32> to vector<1x32xf32>
    %180 = vector.broadcast %179 : vector<1x32xf32> to vector<128x32xf32>
    %181 = arith.addf %177, %180 : vector<128x32xf32>
    %c0_108 = arith.constant 0 : index
    %c2_109 = arith.constant 2 : index
    %c0_110 = arith.constant 0 : index
    %c0_111 = arith.constant 0 : index
    %182 = vector.load %arg14[%c0_108, %c2_109, %c0_110, %c0_111] : memref<2x6x1x32xf32, #tpu.memory_space<vmem>>, vector<1x1x1x32xf32>
    %183 = vector.shape_cast %182 : vector<1x1x1x32xf32> to vector<1x32xf32>
    %c0_112 = arith.constant 0 : index
    %c2_113 = arith.constant 2 : index
    %c0_114 = arith.constant 0 : index
    %c0_115 = arith.constant 0 : index
    %184 = vector.load %arg15[%c0_112, %c2_113, %c0_114, %c0_115] : memref<2x6x1x32xf32, #tpu.memory_space<vmem>>, vector<1x1x1x32xf32>
    %185 = vector.shape_cast %184 : vector<1x1x1x32xf32> to vector<1x32xf32>
    %cst_116 = arith.constant dense<0.000000e+00> : vector<128xf32>
    %186 = vector.multi_reduction <add>, %181, %cst_116 [1] : vector<128x32xf32> to vector<128xf32>
    %187 = vector.shape_cast %186 : vector<128xf32> to vector<128x1xf32>
    %cst_117 = arith.constant 3.200000e+01 : f32
    %188 = vector.broadcast %cst_117 : f32 to vector<128x1xf32>
    %189 = arith.divf %187, %188 : vector<128x1xf32>
    %190 = vector.broadcast %189 : vector<128x1xf32> to vector<128x32xf32>
    %191 = arith.subf %181, %190 : vector<128x32xf32>
    %192 = arith.mulf %191, %191 : vector<128x32xf32>
    %cst_118 = arith.constant dense<0.000000e+00> : vector<128xf32>
    %193 = vector.multi_reduction <add>, %192, %cst_118 [1] : vector<128x32xf32> to vector<128xf32>
    %194 = vector.shape_cast %193 : vector<128xf32> to vector<128x1xf32>
    %cst_119 = arith.constant 3.200000e+01 : f32
    %195 = vector.broadcast %cst_119 : f32 to vector<128x1xf32>
    %196 = arith.divf %194, %195 : vector<128x1xf32>
    %197 = vector.broadcast %189 : vector<128x1xf32> to vector<128x32xf32>
    %198 = arith.subf %181, %197 : vector<128x32xf32>
    %cst_120 = arith.constant 9.99999974E-6 : f32
    %199 = vector.broadcast %cst_120 : f32 to vector<128x1xf32>
    %200 = arith.addf %196, %199 : vector<128x1xf32>
    %201 = math.rsqrt %200 : vector<128x1xf32>
    %202 = vector.broadcast %201 : vector<128x1xf32> to vector<128x32xf32>
    %203 = arith.mulf %198, %202 : vector<128x32xf32>
    %204 = vector.broadcast %183 : vector<1x32xf32> to vector<128x32xf32>
    %205 = arith.mulf %203, %204 : vector<128x32xf32>
    %206 = vector.broadcast %185 : vector<1x32xf32> to vector<128x32xf32>
    %207 = arith.addf %205, %206 : vector<128x32xf32>
    %cst_121 = arith.constant 2.000000e+01 : f32
    %208 = vector.broadcast %cst_121 : f32 to vector<128x32xf32>
    %209 = arith.minimumf %207, %208 : vector<128x32xf32>
    %210 = math.exp %209 : vector<128x32xf32>
    %cst_122 = arith.constant 2.000000e+00 : f32
    %211 = vector.broadcast %cst_122 : f32 to vector<128x32xf32>
    %212 = arith.addf %210, %211 : vector<128x32xf32>
    %213 = arith.mulf %210, %212 : vector<128x32xf32>
    %214 = arith.mulf %207, %213 : vector<128x32xf32>
    %cst_123 = arith.constant 2.000000e+00 : f32
    %215 = vector.broadcast %cst_123 : f32 to vector<128x32xf32>
    %216 = arith.addf %213, %215 : vector<128x32xf32>
    %217 = tpu.reciprocal %216 {approx = true} : vector<128x32xf32> -> vector<128x32xf32>
    %218 = arith.mulf %214, %217 : vector<128x32xf32>
    %219 = arith.truncf %218 : vector<128x32xf32> to vector<128x32xbf16>
    %c0_124 = arith.constant 0 : index
    %c4 = arith.constant 4 : index
    %c0_125 = arith.constant 0 : index
    %c0_126 = arith.constant 0 : index
    %220 = vector.load %arg12[%c0_124, %c4, %c0_125, %c0_126] : memref<2x11x32x32xbf16, #tpu.memory_space<vmem>>, vector<1x1x32x32xbf16>
    %221 = vector.shape_cast %220 : vector<1x1x32x32xbf16> to vector<32x32xbf16>
    %cst_127 = arith.constant dense<0.000000e+00> : vector<128x32xf32>
    %222 = tpu.matmul %219, %221, %cst_127 {dimension_numbers = #tpu.dot_dimension_numbers<[1], [0], [0], [1], [0, 0, 1, 1], [], []>} : vector<128x32xbf16>, vector<32x32xbf16>, vector<128x32xf32> -> vector<128x32xf32>
    %c0_128 = arith.constant 0 : index
    %c4_129 = arith.constant 4 : index
    %c0_130 = arith.constant 0 : index
    %c0_131 = arith.constant 0 : index
    %223 = vector.load %arg13[%c0_128, %c4_129, %c0_130, %c0_131] : memref<2x11x1x32xf32, #tpu.memory_space<vmem>>, vector<1x1x1x32xf32>
    %224 = vector.shape_cast %223 : vector<1x1x1x32xf32> to vector<1x32xf32>
    %225 = vector.broadcast %224 : vector<1x32xf32> to vector<128x32xf32>
    %226 = arith.addf %222, %225 : vector<128x32xf32>
    %227 = arith.truncf %30 : vector<128x32xf32> to vector<128x32xbf16>
    %c0_132 = arith.constant 0 : index
    %c5_133 = arith.constant 5 : index
    %c0_134 = arith.constant 0 : index
    %c0_135 = arith.constant 0 : index
    %228 = vector.load %arg12[%c0_132, %c5_133, %c0_134, %c0_135] : memref<2x11x32x32xbf16, #tpu.memory_space<vmem>>, vector<1x1x32x32xbf16>
    %229 = vector.shape_cast %228 : vector<1x1x32x32xbf16> to vector<32x32xbf16>
    %cst_136 = arith.constant dense<0.000000e+00> : vector<128x32xf32>
    %230 = tpu.matmul %227, %229, %cst_136 {dimension_numbers = #tpu.dot_dimension_numbers<[1], [0], [0], [1], [0, 0, 1, 1], [], []>} : vector<128x32xbf16>, vector<32x32xbf16>, vector<128x32xf32> -> vector<128x32xf32>
    %c0_137 = arith.constant 0 : index
    %c5_138 = arith.constant 5 : index
    %c0_139 = arith.constant 0 : index
    %c0_140 = arith.constant 0 : index
    %231 = vector.load %arg13[%c0_137, %c5_138, %c0_139, %c0_140] : memref<2x11x1x32xf32, #tpu.memory_space<vmem>>, vector<1x1x1x32xf32>
    %232 = vector.shape_cast %231 : vector<1x1x1x32xf32> to vector<1x32xf32>
    %233 = vector.broadcast %232 : vector<1x32xf32> to vector<128x32xf32>
    %234 = arith.addf %230, %233 : vector<128x32xf32>
    %c0_141 = arith.constant 0 : index
    %c3_142 = arith.constant 3 : index
    %c0_143 = arith.constant 0 : index
    %c0_144 = arith.constant 0 : index
    %235 = vector.load %arg14[%c0_141, %c3_142, %c0_143, %c0_144] : memref<2x6x1x32xf32, #tpu.memory_space<vmem>>, vector<1x1x1x32xf32>
    %236 = vector.shape_cast %235 : vector<1x1x1x32xf32> to vector<1x32xf32>
    %c0_145 = arith.constant 0 : index
    %c3_146 = arith.constant 3 : index
    %c0_147 = arith.constant 0 : index
    %c0_148 = arith.constant 0 : index
    %237 = vector.load %arg15[%c0_145, %c3_146, %c0_147, %c0_148] : memref<2x6x1x32xf32, #tpu.memory_space<vmem>>, vector<1x1x1x32xf32>
    %238 = vector.shape_cast %237 : vector<1x1x1x32xf32> to vector<1x32xf32>
    %cst_149 = arith.constant dense<0.000000e+00> : vector<128xf32>
    %239 = vector.multi_reduction <add>, %234, %cst_149 [1] : vector<128x32xf32> to vector<128xf32>
    %240 = vector.shape_cast %239 : vector<128xf32> to vector<128x1xf32>
    %cst_150 = arith.constant 3.200000e+01 : f32
    %241 = vector.broadcast %cst_150 : f32 to vector<128x1xf32>
    %242 = arith.divf %240, %241 : vector<128x1xf32>
    %243 = vector.broadcast %242 : vector<128x1xf32> to vector<128x32xf32>
    %244 = arith.subf %234, %243 : vector<128x32xf32>
    %245 = arith.mulf %244, %244 : vector<128x32xf32>
    %cst_151 = arith.constant dense<0.000000e+00> : vector<128xf32>
    %246 = vector.multi_reduction <add>, %245, %cst_151 [1] : vector<128x32xf32> to vector<128xf32>
    %247 = vector.shape_cast %246 : vector<128xf32> to vector<128x1xf32>
    %cst_152 = arith.constant 3.200000e+01 : f32
    %248 = vector.broadcast %cst_152 : f32 to vector<128x1xf32>
    %249 = arith.divf %247, %248 : vector<128x1xf32>
    %250 = vector.broadcast %242 : vector<128x1xf32> to vector<128x32xf32>
    %251 = arith.subf %234, %250 : vector<128x32xf32>
    %cst_153 = arith.constant 9.99999974E-6 : f32
    %252 = vector.broadcast %cst_153 : f32 to vector<128x1xf32>
    %253 = arith.addf %249, %252 : vector<128x1xf32>
    %254 = math.rsqrt %253 : vector<128x1xf32>
    %255 = vector.broadcast %254 : vector<128x1xf32> to vector<128x32xf32>
    %256 = arith.mulf %251, %255 : vector<128x32xf32>
    %257 = vector.broadcast %236 : vector<1x32xf32> to vector<128x32xf32>
    %258 = arith.mulf %256, %257 : vector<128x32xf32>
    %259 = vector.broadcast %238 : vector<1x32xf32> to vector<128x32xf32>
    %260 = arith.addf %258, %259 : vector<128x32xf32>
    %cst_154 = arith.constant 2.000000e+01 : f32
    %261 = vector.broadcast %cst_154 : f32 to vector<128x32xf32>
    %262 = arith.minimumf %260, %261 : vector<128x32xf32>
    %263 = math.exp %262 : vector<128x32xf32>
    %cst_155 = arith.constant 2.000000e+00 : f32
    %264 = vector.broadcast %cst_155 : f32 to vector<128x32xf32>
    %265 = arith.addf %263, %264 : vector<128x32xf32>
    %266 = arith.mulf %263, %265 : vector<128x32xf32>
    %267 = arith.mulf %260, %266 : vector<128x32xf32>
    %cst_156 = arith.constant 2.000000e+00 : f32
    %268 = vector.broadcast %cst_156 : f32 to vector<128x32xf32>
    %269 = arith.addf %266, %268 : vector<128x32xf32>
    %270 = tpu.reciprocal %269 {approx = true} : vector<128x32xf32> -> vector<128x32xf32>
    %271 = arith.mulf %267, %270 : vector<128x32xf32>
    %272 = arith.truncf %271 : vector<128x32xf32> to vector<128x32xbf16>
    %c0_157 = arith.constant 0 : index
    %c6 = arith.constant 6 : index
    %c0_158 = arith.constant 0 : index
    %c0_159 = arith.constant 0 : index
    %273 = vector.load %arg12[%c0_157, %c6, %c0_158, %c0_159] : memref<2x11x32x32xbf16, #tpu.memory_space<vmem>>, vector<1x1x32x32xbf16>
    %274 = vector.shape_cast %273 : vector<1x1x32x32xbf16> to vector<32x32xbf16>
    %cst_160 = arith.constant dense<0.000000e+00> : vector<128x32xf32>
    %275 = tpu.matmul %272, %274, %cst_160 {dimension_numbers = #tpu.dot_dimension_numbers<[1], [0], [0], [1], [0, 0, 1, 1], [], []>} : vector<128x32xbf16>, vector<32x32xbf16>, vector<128x32xf32> -> vector<128x32xf32>
    %c0_161 = arith.constant 0 : index
    %c6_162 = arith.constant 6 : index
    %c0_163 = arith.constant 0 : index
    %c0_164 = arith.constant 0 : index
    %276 = vector.load %arg13[%c0_161, %c6_162, %c0_163, %c0_164] : memref<2x11x1x32xf32, #tpu.memory_space<vmem>>, vector<1x1x1x32xf32>
    %277 = vector.shape_cast %276 : vector<1x1x1x32xf32> to vector<1x32xf32>
    %278 = vector.broadcast %277 : vector<1x32xf32> to vector<128x32xf32>
    %279 = arith.addf %275, %278 : vector<128x32xf32>
    %280 = arith.mulf %173, %226 : vector<128x32xf32>
    %281 = arith.addf %280, %279 : vector<128x32xf32>
    %282 = arith.truncf %281 : vector<128x32xf32> to vector<128x32xbf16>
    %c0_165 = arith.constant 0 : index
    %c7 = arith.constant 7 : index
    %c0_166 = arith.constant 0 : index
    %c0_167 = arith.constant 0 : index
    %283 = vector.load %arg12[%c0_165, %c7, %c0_166, %c0_167] : memref<2x11x32x32xbf16, #tpu.memory_space<vmem>>, vector<1x1x32x32xbf16>
    %284 = vector.shape_cast %283 : vector<1x1x32x32xbf16> to vector<32x32xbf16>
    %cst_168 = arith.constant dense<0.000000e+00> : vector<128x32xf32>
    %285 = tpu.matmul %282, %284, %cst_168 {dimension_numbers = #tpu.dot_dimension_numbers<[1], [0], [0], [1], [0, 0, 1, 1], [], []>} : vector<128x32xbf16>, vector<32x32xbf16>, vector<128x32xf32> -> vector<128x32xf32>
    %c0_169 = arith.constant 0 : index
    %c7_170 = arith.constant 7 : index
    %c0_171 = arith.constant 0 : index
    %c0_172 = arith.constant 0 : index
    %286 = vector.load %arg13[%c0_169, %c7_170, %c0_171, %c0_172] : memref<2x11x1x32xf32, #tpu.memory_space<vmem>>, vector<1x1x1x32xf32>
    %287 = vector.shape_cast %286 : vector<1x1x1x32xf32> to vector<1x32xf32>
    %288 = vector.broadcast %287 : vector<1x32xf32> to vector<128x32xf32>
    %289 = arith.addf %285, %288 : vector<128x32xf32>
    %c0_173 = arith.constant 0 : index
    %c4_174 = arith.constant 4 : index
    %c0_175 = arith.constant 0 : index
    %c0_176 = arith.constant 0 : index
    %290 = vector.load %arg14[%c0_173, %c4_174, %c0_175, %c0_176] : memref<2x6x1x32xf32, #tpu.memory_space<vmem>>, vector<1x1x1x32xf32>
    %291 = vector.shape_cast %290 : vector<1x1x1x32xf32> to vector<1x32xf32>
    %c0_177 = arith.constant 0 : index
    %c4_178 = arith.constant 4 : index
    %c0_179 = arith.constant 0 : index
    %c0_180 = arith.constant 0 : index
    %292 = vector.load %arg15[%c0_177, %c4_178, %c0_179, %c0_180] : memref<2x6x1x32xf32, #tpu.memory_space<vmem>>, vector<1x1x1x32xf32>
    %293 = vector.shape_cast %292 : vector<1x1x1x32xf32> to vector<1x32xf32>
    %cst_181 = arith.constant dense<0.000000e+00> : vector<128xf32>
    %294 = vector.multi_reduction <add>, %289, %cst_181 [1] : vector<128x32xf32> to vector<128xf32>
    %295 = vector.shape_cast %294 : vector<128xf32> to vector<128x1xf32>
    %cst_182 = arith.constant 3.200000e+01 : f32
    %296 = vector.broadcast %cst_182 : f32 to vector<128x1xf32>
    %297 = arith.divf %295, %296 : vector<128x1xf32>
    %298 = vector.broadcast %297 : vector<128x1xf32> to vector<128x32xf32>
    %299 = arith.subf %289, %298 : vector<128x32xf32>
    %300 = arith.mulf %299, %299 : vector<128x32xf32>
    %cst_183 = arith.constant dense<0.000000e+00> : vector<128xf32>
    %301 = vector.multi_reduction <add>, %300, %cst_183 [1] : vector<128x32xf32> to vector<128xf32>
    %302 = vector.shape_cast %301 : vector<128xf32> to vector<128x1xf32>
    %cst_184 = arith.constant 3.200000e+01 : f32
    %303 = vector.broadcast %cst_184 : f32 to vector<128x1xf32>
    %304 = arith.divf %302, %303 : vector<128x1xf32>
    %305 = vector.broadcast %297 : vector<128x1xf32> to vector<128x32xf32>
    %306 = arith.subf %289, %305 : vector<128x32xf32>
    %cst_185 = arith.constant 9.99999974E-6 : f32
    %307 = vector.broadcast %cst_185 : f32 to vector<128x1xf32>
    %308 = arith.addf %304, %307 : vector<128x1xf32>
    %309 = math.rsqrt %308 : vector<128x1xf32>
    %310 = vector.broadcast %309 : vector<128x1xf32> to vector<128x32xf32>
    %311 = arith.mulf %306, %310 : vector<128x32xf32>
    %312 = vector.broadcast %291 : vector<1x32xf32> to vector<128x32xf32>
    %313 = arith.mulf %311, %312 : vector<128x32xf32>
    %314 = vector.broadcast %293 : vector<1x32xf32> to vector<128x32xf32>
    %315 = arith.addf %313, %314 : vector<128x32xf32>
    %cst_186 = arith.constant 2.000000e+01 : f32
    %316 = vector.broadcast %cst_186 : f32 to vector<128x32xf32>
    %317 = arith.minimumf %315, %316 : vector<128x32xf32>
    %318 = math.exp %317 : vector<128x32xf32>
    %cst_187 = arith.constant 2.000000e+00 : f32
    %319 = vector.broadcast %cst_187 : f32 to vector<128x32xf32>
    %320 = arith.addf %318, %319 : vector<128x32xf32>
    %321 = arith.mulf %318, %320 : vector<128x32xf32>
    %322 = arith.mulf %315, %321 : vector<128x32xf32>
    %cst_188 = arith.constant 2.000000e+00 : f32
    %323 = vector.broadcast %cst_188 : f32 to vector<128x32xf32>
    %324 = arith.addf %321, %323 : vector<128x32xf32>
    %325 = tpu.reciprocal %324 {approx = true} : vector<128x32xf32> -> vector<128x32xf32>
    %326 = arith.mulf %322, %325 : vector<128x32xf32>
    %327 = arith.truncf %326 : vector<128x32xf32> to vector<128x32xbf16>
    %c0_189 = arith.constant 0 : index
    %c8 = arith.constant 8 : index
    %c0_190 = arith.constant 0 : index
    %c0_191 = arith.constant 0 : index
    %328 = vector.load %arg12[%c0_189, %c8, %c0_190, %c0_191] : memref<2x11x32x32xbf16, #tpu.memory_space<vmem>>, vector<1x1x32x32xbf16>
    %329 = vector.shape_cast %328 : vector<1x1x32x32xbf16> to vector<32x32xbf16>
    %cst_192 = arith.constant dense<0.000000e+00> : vector<128x32xf32>
    %330 = tpu.matmul %327, %329, %cst_192 {dimension_numbers = #tpu.dot_dimension_numbers<[1], [0], [0], [1], [0, 0, 1, 1], [], []>} : vector<128x32xbf16>, vector<32x32xbf16>, vector<128x32xf32> -> vector<128x32xf32>
    %c0_193 = arith.constant 0 : index
    %c8_194 = arith.constant 8 : index
    %c0_195 = arith.constant 0 : index
    %c0_196 = arith.constant 0 : index
    %331 = vector.load %arg13[%c0_193, %c8_194, %c0_195, %c0_196] : memref<2x11x1x32xf32, #tpu.memory_space<vmem>>, vector<1x1x1x32xf32>
    %332 = vector.shape_cast %331 : vector<1x1x1x32xf32> to vector<1x32xf32>
    %333 = vector.broadcast %332 : vector<1x32xf32> to vector<128x32xf32>
    %334 = arith.addf %330, %333 : vector<128x32xf32>
    %335 = vector.shape_cast %334 : vector<128x32xf32> to vector<2x8x8x32xf32>
    %cst_197 = arith.constant dense<0xFF800000> : vector<2x8x32xf32>
    %336 = vector.multi_reduction <maximumf>, %335, %cst_197 [2] : vector<2x8x8x32xf32> to vector<2x8x32xf32>
    %337 = vector.shape_cast %336 : vector<2x8x32xf32> to vector<2x8x1x32xf32>
    %338 = vector.broadcast %337 : vector<2x8x1x32xf32> to vector<2x8x8x32xf32>
    %339 = arith.subf %335, %338 : vector<2x8x8x32xf32>
    %340 = math.exp %339 : vector<2x8x8x32xf32>
    %341 = vector.broadcast %32 : vector<2x1x8x1xf32> to vector<2x8x8x32xf32>
    %342 = arith.mulf %340, %341 : vector<2x8x8x32xf32>
    %cst_198 = arith.constant dense<0.000000e+00> : vector<2x8x32xf32>
    %343 = vector.multi_reduction <add>, %342, %cst_198 [2] : vector<2x8x8x32xf32> to vector<2x8x32xf32>
    %344 = vector.shape_cast %343 : vector<2x8x32xf32> to vector<2x8x1x32xf32>
    %345 = tpu.reciprocal %344 {approx = true} : vector<2x8x1x32xf32> -> vector<2x8x1x32xf32>
    %346 = vector.broadcast %345 : vector<2x8x1x32xf32> to vector<2x8x8x32xf32>
    %347 = arith.mulf %342, %346 : vector<2x8x8x32xf32>
    %348 = vector.broadcast %40 : vector<2x8x8x1xf32> to vector<2x8x8x32xf32>
    %349 = arith.mulf %347, %348 : vector<2x8x8x32xf32>
    %350 = vector.shape_cast %167 : vector<2x8x32xf32> to vector<2x1x8x32xf32>
    %351 = vector.broadcast %350 : vector<2x1x8x32xf32> to vector<2x8x8x32xf32>
    %352 = arith.mulf %349, %351 : vector<2x8x8x32xf32>
    %cst_199 = arith.constant dense<0.000000e+00> : vector<2x8x32xf32>
    %353 = vector.multi_reduction <add>, %352, %cst_199 [2] : vector<2x8x8x32xf32> to vector<2x8x32xf32>
    %354 = vector.shape_cast %353 : vector<2x8x32xf32> to vector<16x32xf32>
    %355 = arith.truncf %354 : vector<16x32xf32> to vector<16x32xbf16>
    %c0_200 = arith.constant 0 : index
    %c9 = arith.constant 9 : index
    %c0_201 = arith.constant 0 : index
    %c0_202 = arith.constant 0 : index
    %356 = vector.load %arg12[%c0_200, %c9, %c0_201, %c0_202] : memref<2x11x32x32xbf16, #tpu.memory_space<vmem>>, vector<1x1x32x32xbf16>
    %357 = vector.shape_cast %356 : vector<1x1x32x32xbf16> to vector<32x32xbf16>
    %cst_203 = arith.constant dense<0.000000e+00> : vector<16x32xf32>
    %358 = tpu.matmul %355, %357, %cst_203 {dimension_numbers = #tpu.dot_dimension_numbers<[1], [0], [0], [1], [0, 0, 1, 1], [], []>} : vector<16x32xbf16>, vector<32x32xbf16>, vector<16x32xf32> -> vector<16x32xf32>
    %c0_204 = arith.constant 0 : index
    %c9_205 = arith.constant 9 : index
    %c0_206 = arith.constant 0 : index
    %c0_207 = arith.constant 0 : index
    %359 = vector.load %arg13[%c0_204, %c9_205, %c0_206, %c0_207] : memref<2x11x1x32xf32, #tpu.memory_space<vmem>>, vector<1x1x1x32xf32>
    %360 = vector.shape_cast %359 : vector<1x1x1x32xf32> to vector<1x32xf32>
    %361 = vector.broadcast %360 : vector<1x32xf32> to vector<16x32xf32>
    %362 = arith.addf %358, %361 : vector<16x32xf32>
    %363 = arith.addf %18, %362 : vector<16x32xf32>
    %c0_208 = arith.constant 0 : index
    %c5_209 = arith.constant 5 : index
    %c0_210 = arith.constant 0 : index
    %c0_211 = arith.constant 0 : index
    %364 = vector.load %arg14[%c0_208, %c5_209, %c0_210, %c0_211] : memref<2x6x1x32xf32, #tpu.memory_space<vmem>>, vector<1x1x1x32xf32>
    %365 = vector.shape_cast %364 : vector<1x1x1x32xf32> to vector<1x32xf32>
    %c0_212 = arith.constant 0 : index
    %c5_213 = arith.constant 5 : index
    %c0_214 = arith.constant 0 : index
    %c0_215 = arith.constant 0 : index
    %366 = vector.load %arg15[%c0_212, %c5_213, %c0_214, %c0_215] : memref<2x6x1x32xf32, #tpu.memory_space<vmem>>, vector<1x1x1x32xf32>
    %367 = vector.shape_cast %366 : vector<1x1x1x32xf32> to vector<1x32xf32>
    %cst_216 = arith.constant dense<0.000000e+00> : vector<16xf32>
    %368 = vector.multi_reduction <add>, %363, %cst_216 [1] : vector<16x32xf32> to vector<16xf32>
    %369 = vector.shape_cast %368 : vector<16xf32> to vector<16x1xf32>
    %cst_217 = arith.constant 3.200000e+01 : f32
    %370 = vector.broadcast %cst_217 : f32 to vector<16x1xf32>
    %371 = arith.divf %369, %370 : vector<16x1xf32>
    %372 = vector.broadcast %371 : vector<16x1xf32> to vector<16x32xf32>
    %373 = arith.subf %363, %372 : vector<16x32xf32>
    %374 = arith.mulf %373, %373 : vector<16x32xf32>
    %cst_218 = arith.constant dense<0.000000e+00> : vector<16xf32>
    %375 = vector.multi_reduction <add>, %374, %cst_218 [1] : vector<16x32xf32> to vector<16xf32>
    %376 = vector.shape_cast %375 : vector<16xf32> to vector<16x1xf32>
    %cst_219 = arith.constant 3.200000e+01 : f32
    %377 = vector.broadcast %cst_219 : f32 to vector<16x1xf32>
    %378 = arith.divf %376, %377 : vector<16x1xf32>
    %379 = vector.broadcast %371 : vector<16x1xf32> to vector<16x32xf32>
    %380 = arith.subf %363, %379 : vector<16x32xf32>
    %cst_220 = arith.constant 9.99999974E-6 : f32
    %381 = vector.broadcast %cst_220 : f32 to vector<16x1xf32>
    %382 = arith.addf %378, %381 : vector<16x1xf32>
    %383 = math.rsqrt %382 : vector<16x1xf32>
    %384 = vector.broadcast %383 : vector<16x1xf32> to vector<16x32xf32>
    %385 = arith.mulf %380, %384 : vector<16x32xf32>
    %386 = vector.broadcast %365 : vector<1x32xf32> to vector<16x32xf32>
    %387 = arith.mulf %385, %386 : vector<16x32xf32>
    %388 = vector.broadcast %367 : vector<1x32xf32> to vector<16x32xf32>
    %389 = arith.addf %387, %388 : vector<16x32xf32>
    %390 = arith.truncf %389 : vector<16x32xf32> to vector<16x32xbf16>
    %c0_221 = arith.constant 0 : index
    %c10 = arith.constant 10 : index
    %c0_222 = arith.constant 0 : index
    %c0_223 = arith.constant 0 : index
    %391 = vector.load %arg12[%c0_221, %c10, %c0_222, %c0_223] : memref<2x11x32x32xbf16, #tpu.memory_space<vmem>>, vector<1x1x32x32xbf16>
    %392 = vector.shape_cast %391 : vector<1x1x32x32xbf16> to vector<32x32xbf16>
    %cst_224 = arith.constant dense<0.000000e+00> : vector<16x32xf32>
    %393 = tpu.matmul %390, %392, %cst_224 {dimension_numbers = #tpu.dot_dimension_numbers<[1], [0], [0], [1], [0, 0, 1, 1], [], []>} : vector<16x32xbf16>, vector<32x32xbf16>, vector<16x32xf32> -> vector<16x32xf32>
    %c0_225 = arith.constant 0 : index
    %c10_226 = arith.constant 10 : index
    %c0_227 = arith.constant 0 : index
    %c0_228 = arith.constant 0 : index
    %394 = vector.load %arg13[%c0_225, %c10_226, %c0_227, %c0_228] : memref<2x11x1x32xf32, #tpu.memory_space<vmem>>, vector<1x1x1x32xf32>
    %395 = vector.shape_cast %394 : vector<1x1x1x32xf32> to vector<1x32xf32>
    %396 = vector.broadcast %395 : vector<1x32xf32> to vector<16x32xf32>
    %397 = arith.addf %393, %396 : vector<16x32xf32>
    %cst_229 = arith.constant 2.000000e+01 : f32
    %398 = vector.broadcast %cst_229 : f32 to vector<16x32xf32>
    %399 = arith.minimumf %397, %398 : vector<16x32xf32>
    %400 = math.exp %399 : vector<16x32xf32>
    %cst_230 = arith.constant 2.000000e+00 : f32
    %401 = vector.broadcast %cst_230 : f32 to vector<16x32xf32>
    %402 = arith.addf %400, %401 : vector<16x32xf32>
    %403 = arith.mulf %400, %402 : vector<16x32xf32>
    %404 = arith.mulf %397, %403 : vector<16x32xf32>
    %cst_231 = arith.constant 2.000000e+00 : f32
    %405 = vector.broadcast %cst_231 : f32 to vector<16x32xf32>
    %406 = arith.addf %403, %405 : vector<16x32xf32>
    %407 = tpu.reciprocal %406 {approx = true} : vector<16x32xf32> -> vector<16x32xf32>
    %408 = arith.mulf %404, %407 : vector<16x32xf32>
    %409 = arith.addf %363, %408 : vector<16x32xf32>
    %c0_232 = arith.constant 0 : index
    %c5_233 = arith.constant 5 : index
    %c0_234 = arith.constant 0 : index
    %c0_235 = arith.constant 0 : index
    %410 = vector.load %arg14[%c0_232, %c5_233, %c0_234, %c0_235] : memref<2x6x1x32xf32, #tpu.memory_space<vmem>>, vector<1x1x1x32xf32>
    %411 = vector.shape_cast %410 : vector<1x1x1x32xf32> to vector<1x32xf32>
    %c0_236 = arith.constant 0 : index
    %c5_237 = arith.constant 5 : index
    %c0_238 = arith.constant 0 : index
    %c0_239 = arith.constant 0 : index
    %412 = vector.load %arg15[%c0_236, %c5_237, %c0_238, %c0_239] : memref<2x6x1x32xf32, #tpu.memory_space<vmem>>, vector<1x1x1x32xf32>
    %413 = vector.shape_cast %412 : vector<1x1x1x32xf32> to vector<1x32xf32>
    %cst_240 = arith.constant dense<0.000000e+00> : vector<16xf32>
    %414 = vector.multi_reduction <add>, %409, %cst_240 [1] : vector<16x32xf32> to vector<16xf32>
    %415 = vector.shape_cast %414 : vector<16xf32> to vector<16x1xf32>
    %cst_241 = arith.constant 3.200000e+01 : f32
    %416 = vector.broadcast %cst_241 : f32 to vector<16x1xf32>
    %417 = arith.divf %415, %416 : vector<16x1xf32>
    %418 = vector.broadcast %417 : vector<16x1xf32> to vector<16x32xf32>
    %419 = arith.subf %409, %418 : vector<16x32xf32>
    %420 = arith.mulf %419, %419 : vector<16x32xf32>
    %cst_242 = arith.constant dense<0.000000e+00> : vector<16xf32>
    %421 = vector.multi_reduction <add>, %420, %cst_242 [1] : vector<16x32xf32> to vector<16xf32>
    %422 = vector.shape_cast %421 : vector<16xf32> to vector<16x1xf32>
    %cst_243 = arith.constant 3.200000e+01 : f32
    %423 = vector.broadcast %cst_243 : f32 to vector<16x1xf32>
    %424 = arith.divf %422, %423 : vector<16x1xf32>
    %425 = vector.broadcast %417 : vector<16x1xf32> to vector<16x32xf32>
    %426 = arith.subf %409, %425 : vector<16x32xf32>
    %cst_244 = arith.constant 9.99999974E-6 : f32
    %427 = vector.broadcast %cst_244 : f32 to vector<16x1xf32>
    %428 = arith.addf %424, %427 : vector<16x1xf32>
    %429 = math.rsqrt %428 : vector<16x1xf32>
    %430 = vector.broadcast %429 : vector<16x1xf32> to vector<16x32xf32>
    %431 = arith.mulf %426, %430 : vector<16x32xf32>
    %432 = vector.broadcast %411 : vector<1x32xf32> to vector<16x32xf32>
    %433 = arith.mulf %431, %432 : vector<16x32xf32>
    %434 = vector.broadcast %413 : vector<1x32xf32> to vector<16x32xf32>
    %435 = arith.addf %433, %434 : vector<16x32xf32>
    %c1_245 = arith.constant 1 : index
    %c5_246 = arith.constant 5 : index
    %c0_247 = arith.constant 0 : index
    %c0_248 = arith.constant 0 : index
    %436 = vector.load %arg14[%c1_245, %c5_246, %c0_247, %c0_248] : memref<2x6x1x32xf32, #tpu.memory_space<vmem>>, vector<1x1x1x32xf32>
    %437 = vector.shape_cast %436 : vector<1x1x1x32xf32> to vector<1x32xf32>
    %c1_249 = arith.constant 1 : index
    %c5_250 = arith.constant 5 : index
    %c0_251 = arith.constant 0 : index
    %c0_252 = arith.constant 0 : index
    %438 = vector.load %arg15[%c1_249, %c5_250, %c0_251, %c0_252] : memref<2x6x1x32xf32, #tpu.memory_space<vmem>>, vector<1x1x1x32xf32>
    %439 = vector.shape_cast %438 : vector<1x1x1x32xf32> to vector<1x32xf32>
    %cst_253 = arith.constant dense<0.000000e+00> : vector<16xf32>
    %440 = vector.multi_reduction <add>, %435, %cst_253 [1] : vector<16x32xf32> to vector<16xf32>
    %441 = vector.shape_cast %440 : vector<16xf32> to vector<16x1xf32>
    %cst_254 = arith.constant 3.200000e+01 : f32
    %442 = vector.broadcast %cst_254 : f32 to vector<16x1xf32>
    %443 = arith.divf %441, %442 : vector<16x1xf32>
    %444 = vector.broadcast %443 : vector<16x1xf32> to vector<16x32xf32>
    %445 = arith.subf %435, %444 : vector<16x32xf32>
    %446 = arith.mulf %445, %445 : vector<16x32xf32>
    %cst_255 = arith.constant dense<0.000000e+00> : vector<16xf32>
    %447 = vector.multi_reduction <add>, %446, %cst_255 [1] : vector<16x32xf32> to vector<16xf32>
    %448 = vector.shape_cast %447 : vector<16xf32> to vector<16x1xf32>
    %cst_256 = arith.constant 3.200000e+01 : f32
    %449 = vector.broadcast %cst_256 : f32 to vector<16x1xf32>
    %450 = arith.divf %448, %449 : vector<16x1xf32>
    %451 = vector.broadcast %443 : vector<16x1xf32> to vector<16x32xf32>
    %452 = arith.subf %435, %451 : vector<16x32xf32>
    %cst_257 = arith.constant 9.99999974E-6 : f32
    %453 = vector.broadcast %cst_257 : f32 to vector<16x1xf32>
    %454 = arith.addf %450, %453 : vector<16x1xf32>
    %455 = math.rsqrt %454 : vector<16x1xf32>
    %456 = vector.broadcast %455 : vector<16x1xf32> to vector<16x32xf32>
    %457 = arith.mulf %452, %456 : vector<16x32xf32>
    %458 = vector.broadcast %437 : vector<1x32xf32> to vector<16x32xf32>
    %459 = arith.mulf %457, %458 : vector<16x32xf32>
    %460 = vector.broadcast %439 : vector<1x32xf32> to vector<16x32xf32>
    %461 = arith.addf %459, %460 : vector<16x32xf32>
    %462 = arith.truncf %461 : vector<16x32xf32> to vector<16x32xbf16>
    %c1_258 = arith.constant 1 : index
    %c0_259 = arith.constant 0 : index
    %c0_260 = arith.constant 0 : index
    %c0_261 = arith.constant 0 : index
    %463 = vector.load %arg12[%c1_258, %c0_259, %c0_260, %c0_261] : memref<2x11x32x32xbf16, #tpu.memory_space<vmem>>, vector<1x1x32x32xbf16>
    %464 = vector.shape_cast %463 : vector<1x1x32x32xbf16> to vector<32x32xbf16>
    %cst_262 = arith.constant dense<0.000000e+00> : vector<16x32xf32>
    %465 = tpu.matmul %462, %464, %cst_262 {dimension_numbers = #tpu.dot_dimension_numbers<[1], [0], [0], [1], [0, 0, 1, 1], [], []>} : vector<16x32xbf16>, vector<32x32xbf16>, vector<16x32xf32> -> vector<16x32xf32>
    %c1_263 = arith.constant 1 : index
    %c0_264 = arith.constant 0 : index
    %c0_265 = arith.constant 0 : index
    %c0_266 = arith.constant 0 : index
    %466 = vector.load %arg13[%c1_263, %c0_264, %c0_265, %c0_266] : memref<2x11x1x32xf32, #tpu.memory_space<vmem>>, vector<1x1x1x32xf32>
    %467 = vector.shape_cast %466 : vector<1x1x1x32xf32> to vector<1x32xf32>
    %468 = vector.broadcast %467 : vector<1x32xf32> to vector<16x32xf32>
    %469 = arith.addf %465, %468 : vector<16x32xf32>
    %c1_267 = arith.constant 1 : index
    %c0_268 = arith.constant 0 : index
    %c0_269 = arith.constant 0 : index
    %c0_270 = arith.constant 0 : index
    %470 = vector.load %arg14[%c1_267, %c0_268, %c0_269, %c0_270] : memref<2x6x1x32xf32, #tpu.memory_space<vmem>>, vector<1x1x1x32xf32>
    %471 = vector.shape_cast %470 : vector<1x1x1x32xf32> to vector<1x32xf32>
    %c1_271 = arith.constant 1 : index
    %c0_272 = arith.constant 0 : index
    %c0_273 = arith.constant 0 : index
    %c0_274 = arith.constant 0 : index
    %472 = vector.load %arg15[%c1_271, %c0_272, %c0_273, %c0_274] : memref<2x6x1x32xf32, #tpu.memory_space<vmem>>, vector<1x1x1x32xf32>
    %473 = vector.shape_cast %472 : vector<1x1x1x32xf32> to vector<1x32xf32>
    %cst_275 = arith.constant dense<0.000000e+00> : vector<16xf32>
    %474 = vector.multi_reduction <add>, %469, %cst_275 [1] : vector<16x32xf32> to vector<16xf32>
    %475 = vector.shape_cast %474 : vector<16xf32> to vector<16x1xf32>
    %cst_276 = arith.constant 3.200000e+01 : f32
    %476 = vector.broadcast %cst_276 : f32 to vector<16x1xf32>
    %477 = arith.divf %475, %476 : vector<16x1xf32>
    %478 = vector.broadcast %477 : vector<16x1xf32> to vector<16x32xf32>
    %479 = arith.subf %469, %478 : vector<16x32xf32>
    %480 = arith.mulf %479, %479 : vector<16x32xf32>
    %cst_277 = arith.constant dense<0.000000e+00> : vector<16xf32>
    %481 = vector.multi_reduction <add>, %480, %cst_277 [1] : vector<16x32xf32> to vector<16xf32>
    %482 = vector.shape_cast %481 : vector<16xf32> to vector<16x1xf32>
    %cst_278 = arith.constant 3.200000e+01 : f32
    %483 = vector.broadcast %cst_278 : f32 to vector<16x1xf32>
    %484 = arith.divf %482, %483 : vector<16x1xf32>
    %485 = vector.broadcast %477 : vector<16x1xf32> to vector<16x32xf32>
    %486 = arith.subf %469, %485 : vector<16x32xf32>
    %cst_279 = arith.constant 9.99999974E-6 : f32
    %487 = vector.broadcast %cst_279 : f32 to vector<16x1xf32>
    %488 = arith.addf %484, %487 : vector<16x1xf32>
    %489 = math.rsqrt %488 : vector<16x1xf32>
    %490 = vector.broadcast %489 : vector<16x1xf32> to vector<16x32xf32>
    %491 = arith.mulf %486, %490 : vector<16x32xf32>
    %492 = vector.broadcast %471 : vector<1x32xf32> to vector<16x32xf32>
    %493 = arith.mulf %491, %492 : vector<16x32xf32>
    %494 = vector.broadcast %473 : vector<1x32xf32> to vector<16x32xf32>
    %495 = arith.addf %493, %494 : vector<16x32xf32>
    %cst_280 = arith.constant 2.000000e+01 : f32
    %496 = vector.broadcast %cst_280 : f32 to vector<16x32xf32>
    %497 = arith.minimumf %495, %496 : vector<16x32xf32>
    %498 = math.exp %497 : vector<16x32xf32>
    %cst_281 = arith.constant 2.000000e+00 : f32
    %499 = vector.broadcast %cst_281 : f32 to vector<16x32xf32>
    %500 = arith.addf %498, %499 : vector<16x32xf32>
    %501 = arith.mulf %498, %500 : vector<16x32xf32>
    %502 = arith.mulf %495, %501 : vector<16x32xf32>
    %cst_282 = arith.constant 2.000000e+00 : f32
    %503 = vector.broadcast %cst_282 : f32 to vector<16x32xf32>
    %504 = arith.addf %501, %503 : vector<16x32xf32>
    %505 = tpu.reciprocal %504 {approx = true} : vector<16x32xf32> -> vector<16x32xf32>
    %506 = arith.mulf %502, %505 : vector<16x32xf32>
    %507 = arith.truncf %461 : vector<16x32xf32> to vector<16x32xbf16>
    %c1_283 = arith.constant 1 : index
    %c1_284 = arith.constant 1 : index
    %c0_285 = arith.constant 0 : index
    %c0_286 = arith.constant 0 : index
    %508 = vector.load %arg12[%c1_283, %c1_284, %c0_285, %c0_286] : memref<2x11x32x32xbf16, #tpu.memory_space<vmem>>, vector<1x1x32x32xbf16>
    %509 = vector.shape_cast %508 : vector<1x1x32x32xbf16> to vector<32x32xbf16>
    %cst_287 = arith.constant dense<0.000000e+00> : vector<16x32xf32>
    %510 = tpu.matmul %507, %509, %cst_287 {dimension_numbers = #tpu.dot_dimension_numbers<[1], [0], [0], [1], [0, 0, 1, 1], [], []>} : vector<16x32xbf16>, vector<32x32xbf16>, vector<16x32xf32> -> vector<16x32xf32>
    %c1_288 = arith.constant 1 : index
    %c1_289 = arith.constant 1 : index
    %c0_290 = arith.constant 0 : index
    %c0_291 = arith.constant 0 : index
    %511 = vector.load %arg13[%c1_288, %c1_289, %c0_290, %c0_291] : memref<2x11x1x32xf32, #tpu.memory_space<vmem>>, vector<1x1x1x32xf32>
    %512 = vector.shape_cast %511 : vector<1x1x1x32xf32> to vector<1x32xf32>
    %513 = vector.broadcast %512 : vector<1x32xf32> to vector<16x32xf32>
    %514 = arith.addf %510, %513 : vector<16x32xf32>
    %c1_292 = arith.constant 1 : index
    %c1_293 = arith.constant 1 : index
    %c0_294 = arith.constant 0 : index
    %c0_295 = arith.constant 0 : index
    %515 = vector.load %arg14[%c1_292, %c1_293, %c0_294, %c0_295] : memref<2x6x1x32xf32, #tpu.memory_space<vmem>>, vector<1x1x1x32xf32>
    %516 = vector.shape_cast %515 : vector<1x1x1x32xf32> to vector<1x32xf32>
    %c1_296 = arith.constant 1 : index
    %c1_297 = arith.constant 1 : index
    %c0_298 = arith.constant 0 : index
    %c0_299 = arith.constant 0 : index
    %517 = vector.load %arg15[%c1_296, %c1_297, %c0_298, %c0_299] : memref<2x6x1x32xf32, #tpu.memory_space<vmem>>, vector<1x1x1x32xf32>
    %518 = vector.shape_cast %517 : vector<1x1x1x32xf32> to vector<1x32xf32>
    %cst_300 = arith.constant dense<0.000000e+00> : vector<16xf32>
    %519 = vector.multi_reduction <add>, %514, %cst_300 [1] : vector<16x32xf32> to vector<16xf32>
    %520 = vector.shape_cast %519 : vector<16xf32> to vector<16x1xf32>
    %cst_301 = arith.constant 3.200000e+01 : f32
    %521 = vector.broadcast %cst_301 : f32 to vector<16x1xf32>
    %522 = arith.divf %520, %521 : vector<16x1xf32>
    %523 = vector.broadcast %522 : vector<16x1xf32> to vector<16x32xf32>
    %524 = arith.subf %514, %523 : vector<16x32xf32>
    %525 = arith.mulf %524, %524 : vector<16x32xf32>
    %cst_302 = arith.constant dense<0.000000e+00> : vector<16xf32>
    %526 = vector.multi_reduction <add>, %525, %cst_302 [1] : vector<16x32xf32> to vector<16xf32>
    %527 = vector.shape_cast %526 : vector<16xf32> to vector<16x1xf32>
    %cst_303 = arith.constant 3.200000e+01 : f32
    %528 = vector.broadcast %cst_303 : f32 to vector<16x1xf32>
    %529 = arith.divf %527, %528 : vector<16x1xf32>
    %530 = vector.broadcast %522 : vector<16x1xf32> to vector<16x32xf32>
    %531 = arith.subf %514, %530 : vector<16x32xf32>
    %cst_304 = arith.constant 9.99999974E-6 : f32
    %532 = vector.broadcast %cst_304 : f32 to vector<16x1xf32>
    %533 = arith.addf %529, %532 : vector<16x1xf32>
    %534 = math.rsqrt %533 : vector<16x1xf32>
    %535 = vector.broadcast %534 : vector<16x1xf32> to vector<16x32xf32>
    %536 = arith.mulf %531, %535 : vector<16x32xf32>
    %537 = vector.broadcast %516 : vector<1x32xf32> to vector<16x32xf32>
    %538 = arith.mulf %536, %537 : vector<16x32xf32>
    %539 = vector.broadcast %518 : vector<1x32xf32> to vector<16x32xf32>
    %540 = arith.addf %538, %539 : vector<16x32xf32>
    %cst_305 = arith.constant 2.000000e+01 : f32
    %541 = vector.broadcast %cst_305 : f32 to vector<16x32xf32>
    %542 = arith.minimumf %540, %541 : vector<16x32xf32>
    %543 = math.exp %542 : vector<16x32xf32>
    %cst_306 = arith.constant 2.000000e+00 : f32
    %544 = vector.broadcast %cst_306 : f32 to vector<16x32xf32>
    %545 = arith.addf %543, %544 : vector<16x32xf32>
    %546 = arith.mulf %543, %545 : vector<16x32xf32>
    %547 = arith.mulf %540, %546 : vector<16x32xf32>
    %cst_307 = arith.constant 2.000000e+00 : f32
    %548 = vector.broadcast %cst_307 : f32 to vector<16x32xf32>
    %549 = arith.addf %546, %548 : vector<16x32xf32>
    %550 = tpu.reciprocal %549 {approx = true} : vector<16x32xf32> -> vector<16x32xf32>
    %551 = arith.mulf %547, %550 : vector<16x32xf32>
    %552 = arith.truncf %461 : vector<16x32xf32> to vector<16x32xbf16>
    %c1_308 = arith.constant 1 : index
    %c2_309 = arith.constant 2 : index
    %c0_310 = arith.constant 0 : index
    %c0_311 = arith.constant 0 : index
    %553 = vector.load %arg12[%c1_308, %c2_309, %c0_310, %c0_311] : memref<2x11x32x32xbf16, #tpu.memory_space<vmem>>, vector<1x1x32x32xbf16>
    %554 = vector.shape_cast %553 : vector<1x1x32x32xbf16> to vector<32x32xbf16>
    %cst_312 = arith.constant dense<0.000000e+00> : vector<16x32xf32>
    %555 = tpu.matmul %552, %554, %cst_312 {dimension_numbers = #tpu.dot_dimension_numbers<[1], [0], [0], [1], [0, 0, 1, 1], [], []>} : vector<16x32xbf16>, vector<32x32xbf16>, vector<16x32xf32> -> vector<16x32xf32>
    %c1_313 = arith.constant 1 : index
    %c2_314 = arith.constant 2 : index
    %c0_315 = arith.constant 0 : index
    %c0_316 = arith.constant 0 : index
    %556 = vector.load %arg13[%c1_313, %c2_314, %c0_315, %c0_316] : memref<2x11x1x32xf32, #tpu.memory_space<vmem>>, vector<1x1x1x32xf32>
    %557 = vector.shape_cast %556 : vector<1x1x1x32xf32> to vector<1x32xf32>
    %558 = vector.broadcast %557 : vector<1x32xf32> to vector<16x32xf32>
    %559 = arith.addf %555, %558 : vector<16x32xf32>
    %560 = vector.shape_cast %506 : vector<16x32xf32> to vector<2x8x32xf32>
    %561 = vector.shape_cast %551 : vector<16x32xf32> to vector<2x8x32xf32>
    %562 = vector.shape_cast %559 : vector<16x32xf32> to vector<2x8x32xf32>
    %563 = vector.shape_cast %561 : vector<2x8x32xf32> to vector<2x1x8x32xf32>
    %564 = vector.shape_cast %560 : vector<2x8x32xf32> to vector<2x8x1x32xf32>
    %565 = vector.broadcast %563 : vector<2x1x8x32xf32> to vector<2x8x8x32xf32>
    %566 = vector.broadcast %564 : vector<2x8x1x32xf32> to vector<2x8x8x32xf32>
    %567 = arith.subf %565, %566 : vector<2x8x8x32xf32>
    %568 = vector.shape_cast %567 : vector<2x8x8x32xf32> to vector<128x32xf32>
    %569 = arith.truncf %281 : vector<128x32xf32> to vector<128x32xbf16>
    %c1_317 = arith.constant 1 : index
    %c3_318 = arith.constant 3 : index
    %c0_319 = arith.constant 0 : index
    %c0_320 = arith.constant 0 : index
    %570 = vector.load %arg12[%c1_317, %c3_318, %c0_319, %c0_320] : memref<2x11x32x32xbf16, #tpu.memory_space<vmem>>, vector<1x1x32x32xbf16>
    %571 = vector.shape_cast %570 : vector<1x1x32x32xbf16> to vector<32x32xbf16>
    %cst_321 = arith.constant dense<0.000000e+00> : vector<128x32xf32>
    %572 = tpu.matmul %569, %571, %cst_321 {dimension_numbers = #tpu.dot_dimension_numbers<[1], [0], [0], [1], [0, 0, 1, 1], [], []>} : vector<128x32xbf16>, vector<32x32xbf16>, vector<128x32xf32> -> vector<128x32xf32>
    %c1_322 = arith.constant 1 : index
    %c3_323 = arith.constant 3 : index
    %c0_324 = arith.constant 0 : index
    %c0_325 = arith.constant 0 : index
    %573 = vector.load %arg13[%c1_322, %c3_323, %c0_324, %c0_325] : memref<2x11x1x32xf32, #tpu.memory_space<vmem>>, vector<1x1x1x32xf32>
    %574 = vector.shape_cast %573 : vector<1x1x1x32xf32> to vector<1x32xf32>
    %575 = vector.broadcast %574 : vector<1x32xf32> to vector<128x32xf32>
    %576 = arith.addf %572, %575 : vector<128x32xf32>
    %c1_326 = arith.constant 1 : index
    %c2_327 = arith.constant 2 : index
    %c0_328 = arith.constant 0 : index
    %c0_329 = arith.constant 0 : index
    %577 = vector.load %arg14[%c1_326, %c2_327, %c0_328, %c0_329] : memref<2x6x1x32xf32, #tpu.memory_space<vmem>>, vector<1x1x1x32xf32>
    %578 = vector.shape_cast %577 : vector<1x1x1x32xf32> to vector<1x32xf32>
    %c1_330 = arith.constant 1 : index
    %c2_331 = arith.constant 2 : index
    %c0_332 = arith.constant 0 : index
    %c0_333 = arith.constant 0 : index
    %579 = vector.load %arg15[%c1_330, %c2_331, %c0_332, %c0_333] : memref<2x6x1x32xf32, #tpu.memory_space<vmem>>, vector<1x1x1x32xf32>
    %580 = vector.shape_cast %579 : vector<1x1x1x32xf32> to vector<1x32xf32>
    %cst_334 = arith.constant dense<0.000000e+00> : vector<128xf32>
    %581 = vector.multi_reduction <add>, %576, %cst_334 [1] : vector<128x32xf32> to vector<128xf32>
    %582 = vector.shape_cast %581 : vector<128xf32> to vector<128x1xf32>
    %cst_335 = arith.constant 3.200000e+01 : f32
    %583 = vector.broadcast %cst_335 : f32 to vector<128x1xf32>
    %584 = arith.divf %582, %583 : vector<128x1xf32>
    %585 = vector.broadcast %584 : vector<128x1xf32> to vector<128x32xf32>
    %586 = arith.subf %576, %585 : vector<128x32xf32>
    %587 = arith.mulf %586, %586 : vector<128x32xf32>
    %cst_336 = arith.constant dense<0.000000e+00> : vector<128xf32>
    %588 = vector.multi_reduction <add>, %587, %cst_336 [1] : vector<128x32xf32> to vector<128xf32>
    %589 = vector.shape_cast %588 : vector<128xf32> to vector<128x1xf32>
    %cst_337 = arith.constant 3.200000e+01 : f32
    %590 = vector.broadcast %cst_337 : f32 to vector<128x1xf32>
    %591 = arith.divf %589, %590 : vector<128x1xf32>
    %592 = vector.broadcast %584 : vector<128x1xf32> to vector<128x32xf32>
    %593 = arith.subf %576, %592 : vector<128x32xf32>
    %cst_338 = arith.constant 9.99999974E-6 : f32
    %594 = vector.broadcast %cst_338 : f32 to vector<128x1xf32>
    %595 = arith.addf %591, %594 : vector<128x1xf32>
    %596 = math.rsqrt %595 : vector<128x1xf32>
    %597 = vector.broadcast %596 : vector<128x1xf32> to vector<128x32xf32>
    %598 = arith.mulf %593, %597 : vector<128x32xf32>
    %599 = vector.broadcast %578 : vector<1x32xf32> to vector<128x32xf32>
    %600 = arith.mulf %598, %599 : vector<128x32xf32>
    %601 = vector.broadcast %580 : vector<1x32xf32> to vector<128x32xf32>
    %602 = arith.addf %600, %601 : vector<128x32xf32>
    %cst_339 = arith.constant 2.000000e+01 : f32
    %603 = vector.broadcast %cst_339 : f32 to vector<128x32xf32>
    %604 = arith.minimumf %602, %603 : vector<128x32xf32>
    %605 = math.exp %604 : vector<128x32xf32>
    %cst_340 = arith.constant 2.000000e+00 : f32
    %606 = vector.broadcast %cst_340 : f32 to vector<128x32xf32>
    %607 = arith.addf %605, %606 : vector<128x32xf32>
    %608 = arith.mulf %605, %607 : vector<128x32xf32>
    %609 = arith.mulf %602, %608 : vector<128x32xf32>
    %cst_341 = arith.constant 2.000000e+00 : f32
    %610 = vector.broadcast %cst_341 : f32 to vector<128x32xf32>
    %611 = arith.addf %608, %610 : vector<128x32xf32>
    %612 = tpu.reciprocal %611 {approx = true} : vector<128x32xf32> -> vector<128x32xf32>
    %613 = arith.mulf %609, %612 : vector<128x32xf32>
    %614 = arith.truncf %613 : vector<128x32xf32> to vector<128x32xbf16>
    %c1_342 = arith.constant 1 : index
    %c4_343 = arith.constant 4 : index
    %c0_344 = arith.constant 0 : index
    %c0_345 = arith.constant 0 : index
    %615 = vector.load %arg12[%c1_342, %c4_343, %c0_344, %c0_345] : memref<2x11x32x32xbf16, #tpu.memory_space<vmem>>, vector<1x1x32x32xbf16>
    %616 = vector.shape_cast %615 : vector<1x1x32x32xbf16> to vector<32x32xbf16>
    %cst_346 = arith.constant dense<0.000000e+00> : vector<128x32xf32>
    %617 = tpu.matmul %614, %616, %cst_346 {dimension_numbers = #tpu.dot_dimension_numbers<[1], [0], [0], [1], [0, 0, 1, 1], [], []>} : vector<128x32xbf16>, vector<32x32xbf16>, vector<128x32xf32> -> vector<128x32xf32>
    %c1_347 = arith.constant 1 : index
    %c4_348 = arith.constant 4 : index
    %c0_349 = arith.constant 0 : index
    %c0_350 = arith.constant 0 : index
    %618 = vector.load %arg13[%c1_347, %c4_348, %c0_349, %c0_350] : memref<2x11x1x32xf32, #tpu.memory_space<vmem>>, vector<1x1x1x32xf32>
    %619 = vector.shape_cast %618 : vector<1x1x1x32xf32> to vector<1x32xf32>
    %620 = vector.broadcast %619 : vector<1x32xf32> to vector<128x32xf32>
    %621 = arith.addf %617, %620 : vector<128x32xf32>
    %622 = arith.truncf %281 : vector<128x32xf32> to vector<128x32xbf16>
    %c1_351 = arith.constant 1 : index
    %c5_352 = arith.constant 5 : index
    %c0_353 = arith.constant 0 : index
    %c0_354 = arith.constant 0 : index
    %623 = vector.load %arg12[%c1_351, %c5_352, %c0_353, %c0_354] : memref<2x11x32x32xbf16, #tpu.memory_space<vmem>>, vector<1x1x32x32xbf16>
    %624 = vector.shape_cast %623 : vector<1x1x32x32xbf16> to vector<32x32xbf16>
    %cst_355 = arith.constant dense<0.000000e+00> : vector<128x32xf32>
    %625 = tpu.matmul %622, %624, %cst_355 {dimension_numbers = #tpu.dot_dimension_numbers<[1], [0], [0], [1], [0, 0, 1, 1], [], []>} : vector<128x32xbf16>, vector<32x32xbf16>, vector<128x32xf32> -> vector<128x32xf32>
    %c1_356 = arith.constant 1 : index
    %c5_357 = arith.constant 5 : index
    %c0_358 = arith.constant 0 : index
    %c0_359 = arith.constant 0 : index
    %626 = vector.load %arg13[%c1_356, %c5_357, %c0_358, %c0_359] : memref<2x11x1x32xf32, #tpu.memory_space<vmem>>, vector<1x1x1x32xf32>
    %627 = vector.shape_cast %626 : vector<1x1x1x32xf32> to vector<1x32xf32>
    %628 = vector.broadcast %627 : vector<1x32xf32> to vector<128x32xf32>
    %629 = arith.addf %625, %628 : vector<128x32xf32>
    %c1_360 = arith.constant 1 : index
    %c3_361 = arith.constant 3 : index
    %c0_362 = arith.constant 0 : index
    %c0_363 = arith.constant 0 : index
    %630 = vector.load %arg14[%c1_360, %c3_361, %c0_362, %c0_363] : memref<2x6x1x32xf32, #tpu.memory_space<vmem>>, vector<1x1x1x32xf32>
    %631 = vector.shape_cast %630 : vector<1x1x1x32xf32> to vector<1x32xf32>
    %c1_364 = arith.constant 1 : index
    %c3_365 = arith.constant 3 : index
    %c0_366 = arith.constant 0 : index
    %c0_367 = arith.constant 0 : index
    %632 = vector.load %arg15[%c1_364, %c3_365, %c0_366, %c0_367] : memref<2x6x1x32xf32, #tpu.memory_space<vmem>>, vector<1x1x1x32xf32>
    %633 = vector.shape_cast %632 : vector<1x1x1x32xf32> to vector<1x32xf32>
    %cst_368 = arith.constant dense<0.000000e+00> : vector<128xf32>
    %634 = vector.multi_reduction <add>, %629, %cst_368 [1] : vector<128x32xf32> to vector<128xf32>
    %635 = vector.shape_cast %634 : vector<128xf32> to vector<128x1xf32>
    %cst_369 = arith.constant 3.200000e+01 : f32
    %636 = vector.broadcast %cst_369 : f32 to vector<128x1xf32>
    %637 = arith.divf %635, %636 : vector<128x1xf32>
    %638 = vector.broadcast %637 : vector<128x1xf32> to vector<128x32xf32>
    %639 = arith.subf %629, %638 : vector<128x32xf32>
    %640 = arith.mulf %639, %639 : vector<128x32xf32>
    %cst_370 = arith.constant dense<0.000000e+00> : vector<128xf32>
    %641 = vector.multi_reduction <add>, %640, %cst_370 [1] : vector<128x32xf32> to vector<128xf32>
    %642 = vector.shape_cast %641 : vector<128xf32> to vector<128x1xf32>
    %cst_371 = arith.constant 3.200000e+01 : f32
    %643 = vector.broadcast %cst_371 : f32 to vector<128x1xf32>
    %644 = arith.divf %642, %643 : vector<128x1xf32>
    %645 = vector.broadcast %637 : vector<128x1xf32> to vector<128x32xf32>
    %646 = arith.subf %629, %645 : vector<128x32xf32>
    %cst_372 = arith.constant 9.99999974E-6 : f32
    %647 = vector.broadcast %cst_372 : f32 to vector<128x1xf32>
    %648 = arith.addf %644, %647 : vector<128x1xf32>
    %649 = math.rsqrt %648 : vector<128x1xf32>
    %650 = vector.broadcast %649 : vector<128x1xf32> to vector<128x32xf32>
    %651 = arith.mulf %646, %650 : vector<128x32xf32>
    %652 = vector.broadcast %631 : vector<1x32xf32> to vector<128x32xf32>
    %653 = arith.mulf %651, %652 : vector<128x32xf32>
    %654 = vector.broadcast %633 : vector<1x32xf32> to vector<128x32xf32>
    %655 = arith.addf %653, %654 : vector<128x32xf32>
    %cst_373 = arith.constant 2.000000e+01 : f32
    %656 = vector.broadcast %cst_373 : f32 to vector<128x32xf32>
    %657 = arith.minimumf %655, %656 : vector<128x32xf32>
    %658 = math.exp %657 : vector<128x32xf32>
    %cst_374 = arith.constant 2.000000e+00 : f32
    %659 = vector.broadcast %cst_374 : f32 to vector<128x32xf32>
    %660 = arith.addf %658, %659 : vector<128x32xf32>
    %661 = arith.mulf %658, %660 : vector<128x32xf32>
    %662 = arith.mulf %655, %661 : vector<128x32xf32>
    %cst_375 = arith.constant 2.000000e+00 : f32
    %663 = vector.broadcast %cst_375 : f32 to vector<128x32xf32>
    %664 = arith.addf %661, %663 : vector<128x32xf32>
    %665 = tpu.reciprocal %664 {approx = true} : vector<128x32xf32> -> vector<128x32xf32>
    %666 = arith.mulf %662, %665 : vector<128x32xf32>
    %667 = arith.truncf %666 : vector<128x32xf32> to vector<128x32xbf16>
    %c1_376 = arith.constant 1 : index
    %c6_377 = arith.constant 6 : index
    %c0_378 = arith.constant 0 : index
    %c0_379 = arith.constant 0 : index
    %668 = vector.load %arg12[%c1_376, %c6_377, %c0_378, %c0_379] : memref<2x11x32x32xbf16, #tpu.memory_space<vmem>>, vector<1x1x32x32xbf16>
    %669 = vector.shape_cast %668 : vector<1x1x32x32xbf16> to vector<32x32xbf16>
    %cst_380 = arith.constant dense<0.000000e+00> : vector<128x32xf32>
    %670 = tpu.matmul %667, %669, %cst_380 {dimension_numbers = #tpu.dot_dimension_numbers<[1], [0], [0], [1], [0, 0, 1, 1], [], []>} : vector<128x32xbf16>, vector<32x32xbf16>, vector<128x32xf32> -> vector<128x32xf32>
    %c1_381 = arith.constant 1 : index
    %c6_382 = arith.constant 6 : index
    %c0_383 = arith.constant 0 : index
    %c0_384 = arith.constant 0 : index
    %671 = vector.load %arg13[%c1_381, %c6_382, %c0_383, %c0_384] : memref<2x11x1x32xf32, #tpu.memory_space<vmem>>, vector<1x1x1x32xf32>
    %672 = vector.shape_cast %671 : vector<1x1x1x32xf32> to vector<1x32xf32>
    %673 = vector.broadcast %672 : vector<1x32xf32> to vector<128x32xf32>
    %674 = arith.addf %670, %673 : vector<128x32xf32>
    %675 = arith.mulf %568, %621 : vector<128x32xf32>
    %676 = arith.addf %675, %674 : vector<128x32xf32>
    %677 = arith.truncf %676 : vector<128x32xf32> to vector<128x32xbf16>
    %c1_385 = arith.constant 1 : index
    %c7_386 = arith.constant 7 : index
    %c0_387 = arith.constant 0 : index
    %c0_388 = arith.constant 0 : index
    %678 = vector.load %arg12[%c1_385, %c7_386, %c0_387, %c0_388] : memref<2x11x32x32xbf16, #tpu.memory_space<vmem>>, vector<1x1x32x32xbf16>
    %679 = vector.shape_cast %678 : vector<1x1x32x32xbf16> to vector<32x32xbf16>
    %cst_389 = arith.constant dense<0.000000e+00> : vector<128x32xf32>
    %680 = tpu.matmul %677, %679, %cst_389 {dimension_numbers = #tpu.dot_dimension_numbers<[1], [0], [0], [1], [0, 0, 1, 1], [], []>} : vector<128x32xbf16>, vector<32x32xbf16>, vector<128x32xf32> -> vector<128x32xf32>
    %c1_390 = arith.constant 1 : index
    %c7_391 = arith.constant 7 : index
    %c0_392 = arith.constant 0 : index
    %c0_393 = arith.constant 0 : index
    %681 = vector.load %arg13[%c1_390, %c7_391, %c0_392, %c0_393] : memref<2x11x1x32xf32, #tpu.memory_space<vmem>>, vector<1x1x1x32xf32>
    %682 = vector.shape_cast %681 : vector<1x1x1x32xf32> to vector<1x32xf32>
    %683 = vector.broadcast %682 : vector<1x32xf32> to vector<128x32xf32>
    %684 = arith.addf %680, %683 : vector<128x32xf32>
    %c1_394 = arith.constant 1 : index
    %c4_395 = arith.constant 4 : index
    %c0_396 = arith.constant 0 : index
    %c0_397 = arith.constant 0 : index
    %685 = vector.load %arg14[%c1_394, %c4_395, %c0_396, %c0_397] : memref<2x6x1x32xf32, #tpu.memory_space<vmem>>, vector<1x1x1x32xf32>
    %686 = vector.shape_cast %685 : vector<1x1x1x32xf32> to vector<1x32xf32>
    %c1_398 = arith.constant 1 : index
    %c4_399 = arith.constant 4 : index
    %c0_400 = arith.constant 0 : index
    %c0_401 = arith.constant 0 : index
    %687 = vector.load %arg15[%c1_398, %c4_399, %c0_400, %c0_401] : memref<2x6x1x32xf32, #tpu.memory_space<vmem>>, vector<1x1x1x32xf32>
    %688 = vector.shape_cast %687 : vector<1x1x1x32xf32> to vector<1x32xf32>
    %cst_402 = arith.constant dense<0.000000e+00> : vector<128xf32>
    %689 = vector.multi_reduction <add>, %684, %cst_402 [1] : vector<128x32xf32> to vector<128xf32>
    %690 = vector.shape_cast %689 : vector<128xf32> to vector<128x1xf32>
    %cst_403 = arith.constant 3.200000e+01 : f32
    %691 = vector.broadcast %cst_403 : f32 to vector<128x1xf32>
    %692 = arith.divf %690, %691 : vector<128x1xf32>
    %693 = vector.broadcast %692 : vector<128x1xf32> to vector<128x32xf32>
    %694 = arith.subf %684, %693 : vector<128x32xf32>
    %695 = arith.mulf %694, %694 : vector<128x32xf32>
    %cst_404 = arith.constant dense<0.000000e+00> : vector<128xf32>
    %696 = vector.multi_reduction <add>, %695, %cst_404 [1] : vector<128x32xf32> to vector<128xf32>
    %697 = vector.shape_cast %696 : vector<128xf32> to vector<128x1xf32>
    %cst_405 = arith.constant 3.200000e+01 : f32
    %698 = vector.broadcast %cst_405 : f32 to vector<128x1xf32>
    %699 = arith.divf %697, %698 : vector<128x1xf32>
    %700 = vector.broadcast %692 : vector<128x1xf32> to vector<128x32xf32>
    %701 = arith.subf %684, %700 : vector<128x32xf32>
    %cst_406 = arith.constant 9.99999974E-6 : f32
    %702 = vector.broadcast %cst_406 : f32 to vector<128x1xf32>
    %703 = arith.addf %699, %702 : vector<128x1xf32>
    %704 = math.rsqrt %703 : vector<128x1xf32>
    %705 = vector.broadcast %704 : vector<128x1xf32> to vector<128x32xf32>
    %706 = arith.mulf %701, %705 : vector<128x32xf32>
    %707 = vector.broadcast %686 : vector<1x32xf32> to vector<128x32xf32>
    %708 = arith.mulf %706, %707 : vector<128x32xf32>
    %709 = vector.broadcast %688 : vector<1x32xf32> to vector<128x32xf32>
    %710 = arith.addf %708, %709 : vector<128x32xf32>
    %cst_407 = arith.constant 2.000000e+01 : f32
    %711 = vector.broadcast %cst_407 : f32 to vector<128x32xf32>
    %712 = arith.minimumf %710, %711 : vector<128x32xf32>
    %713 = math.exp %712 : vector<128x32xf32>
    %cst_408 = arith.constant 2.000000e+00 : f32
    %714 = vector.broadcast %cst_408 : f32 to vector<128x32xf32>
    %715 = arith.addf %713, %714 : vector<128x32xf32>
    %716 = arith.mulf %713, %715 : vector<128x32xf32>
    %717 = arith.mulf %710, %716 : vector<128x32xf32>
    %cst_409 = arith.constant 2.000000e+00 : f32
    %718 = vector.broadcast %cst_409 : f32 to vector<128x32xf32>
    %719 = arith.addf %716, %718 : vector<128x32xf32>
    %720 = tpu.reciprocal %719 {approx = true} : vector<128x32xf32> -> vector<128x32xf32>
    %721 = arith.mulf %717, %720 : vector<128x32xf32>
    %722 = arith.truncf %721 : vector<128x32xf32> to vector<128x32xbf16>
    %c1_410 = arith.constant 1 : index
    %c8_411 = arith.constant 8 : index
    %c0_412 = arith.constant 0 : index
    %c0_413 = arith.constant 0 : index
    %723 = vector.load %arg12[%c1_410, %c8_411, %c0_412, %c0_413] : memref<2x11x32x32xbf16, #tpu.memory_space<vmem>>, vector<1x1x32x32xbf16>
    %724 = vector.shape_cast %723 : vector<1x1x32x32xbf16> to vector<32x32xbf16>
    %cst_414 = arith.constant dense<0.000000e+00> : vector<128x32xf32>
    %725 = tpu.matmul %722, %724, %cst_414 {dimension_numbers = #tpu.dot_dimension_numbers<[1], [0], [0], [1], [0, 0, 1, 1], [], []>} : vector<128x32xbf16>, vector<32x32xbf16>, vector<128x32xf32> -> vector<128x32xf32>
    %c1_415 = arith.constant 1 : index
    %c8_416 = arith.constant 8 : index
    %c0_417 = arith.constant 0 : index
    %c0_418 = arith.constant 0 : index
    %726 = vector.load %arg13[%c1_415, %c8_416, %c0_417, %c0_418] : memref<2x11x1x32xf32, #tpu.memory_space<vmem>>, vector<1x1x1x32xf32>
    %727 = vector.shape_cast %726 : vector<1x1x1x32xf32> to vector<1x32xf32>
    %728 = vector.broadcast %727 : vector<1x32xf32> to vector<128x32xf32>
    %729 = arith.addf %725, %728 : vector<128x32xf32>
    %730 = vector.shape_cast %729 : vector<128x32xf32> to vector<2x8x8x32xf32>
    %cst_419 = arith.constant dense<0xFF800000> : vector<2x8x32xf32>
    %731 = vector.multi_reduction <maximumf>, %730, %cst_419 [2] : vector<2x8x8x32xf32> to vector<2x8x32xf32>
    %732 = vector.shape_cast %731 : vector<2x8x32xf32> to vector<2x8x1x32xf32>
    %733 = vector.broadcast %732 : vector<2x8x1x32xf32> to vector<2x8x8x32xf32>
    %734 = arith.subf %730, %733 : vector<2x8x8x32xf32>
    %735 = math.exp %734 : vector<2x8x8x32xf32>
    %736 = vector.broadcast %32 : vector<2x1x8x1xf32> to vector<2x8x8x32xf32>
    %737 = arith.mulf %735, %736 : vector<2x8x8x32xf32>
    %cst_420 = arith.constant dense<0.000000e+00> : vector<2x8x32xf32>
    %738 = vector.multi_reduction <add>, %737, %cst_420 [2] : vector<2x8x8x32xf32> to vector<2x8x32xf32>
    %739 = vector.shape_cast %738 : vector<2x8x32xf32> to vector<2x8x1x32xf32>
    %740 = tpu.reciprocal %739 {approx = true} : vector<2x8x1x32xf32> -> vector<2x8x1x32xf32>
    %741 = vector.broadcast %740 : vector<2x8x1x32xf32> to vector<2x8x8x32xf32>
    %742 = arith.mulf %737, %741 : vector<2x8x8x32xf32>
    %743 = vector.broadcast %40 : vector<2x8x8x1xf32> to vector<2x8x8x32xf32>
    %744 = arith.mulf %742, %743 : vector<2x8x8x32xf32>
    %745 = vector.shape_cast %562 : vector<2x8x32xf32> to vector<2x1x8x32xf32>
    %746 = vector.broadcast %745 : vector<2x1x8x32xf32> to vector<2x8x8x32xf32>
    %747 = arith.mulf %744, %746 : vector<2x8x8x32xf32>
    %cst_421 = arith.constant dense<0.000000e+00> : vector<2x8x32xf32>
    %748 = vector.multi_reduction <add>, %747, %cst_421 [2] : vector<2x8x8x32xf32> to vector<2x8x32xf32>
    %749 = vector.shape_cast %748 : vector<2x8x32xf32> to vector<16x32xf32>
    %750 = arith.truncf %749 : vector<16x32xf32> to vector<16x32xbf16>
    %c1_422 = arith.constant 1 : index
    %c9_423 = arith.constant 9 : index
    %c0_424 = arith.constant 0 : index
    %c0_425 = arith.constant 0 : index
    %751 = vector.load %arg12[%c1_422, %c9_423, %c0_424, %c0_425] : memref<2x11x32x32xbf16, #tpu.memory_space<vmem>>, vector<1x1x32x32xbf16>
    %752 = vector.shape_cast %751 : vector<1x1x32x32xbf16> to vector<32x32xbf16>
    %cst_426 = arith.constant dense<0.000000e+00> : vector<16x32xf32>
    %753 = tpu.matmul %750, %752, %cst_426 {dimension_numbers = #tpu.dot_dimension_numbers<[1], [0], [0], [1], [0, 0, 1, 1], [], []>} : vector<16x32xbf16>, vector<32x32xbf16>, vector<16x32xf32> -> vector<16x32xf32>
    %c1_427 = arith.constant 1 : index
    %c9_428 = arith.constant 9 : index
    %c0_429 = arith.constant 0 : index
    %c0_430 = arith.constant 0 : index
    %754 = vector.load %arg13[%c1_427, %c9_428, %c0_429, %c0_430] : memref<2x11x1x32xf32, #tpu.memory_space<vmem>>, vector<1x1x1x32xf32>
    %755 = vector.shape_cast %754 : vector<1x1x1x32xf32> to vector<1x32xf32>
    %756 = vector.broadcast %755 : vector<1x32xf32> to vector<16x32xf32>
    %757 = arith.addf %753, %756 : vector<16x32xf32>
    %758 = arith.addf %435, %757 : vector<16x32xf32>
    %c1_431 = arith.constant 1 : index
    %c5_432 = arith.constant 5 : index
    %c0_433 = arith.constant 0 : index
    %c0_434 = arith.constant 0 : index
    %759 = vector.load %arg14[%c1_431, %c5_432, %c0_433, %c0_434] : memref<2x6x1x32xf32, #tpu.memory_space<vmem>>, vector<1x1x1x32xf32>
    %760 = vector.shape_cast %759 : vector<1x1x1x32xf32> to vector<1x32xf32>
    %c1_435 = arith.constant 1 : index
    %c5_436 = arith.constant 5 : index
    %c0_437 = arith.constant 0 : index
    %c0_438 = arith.constant 0 : index
    %761 = vector.load %arg15[%c1_435, %c5_436, %c0_437, %c0_438] : memref<2x6x1x32xf32, #tpu.memory_space<vmem>>, vector<1x1x1x32xf32>
    %762 = vector.shape_cast %761 : vector<1x1x1x32xf32> to vector<1x32xf32>
    %cst_439 = arith.constant dense<0.000000e+00> : vector<16xf32>
    %763 = vector.multi_reduction <add>, %758, %cst_439 [1] : vector<16x32xf32> to vector<16xf32>
    %764 = vector.shape_cast %763 : vector<16xf32> to vector<16x1xf32>
    %cst_440 = arith.constant 3.200000e+01 : f32
    %765 = vector.broadcast %cst_440 : f32 to vector<16x1xf32>
    %766 = arith.divf %764, %765 : vector<16x1xf32>
    %767 = vector.broadcast %766 : vector<16x1xf32> to vector<16x32xf32>
    %768 = arith.subf %758, %767 : vector<16x32xf32>
    %769 = arith.mulf %768, %768 : vector<16x32xf32>
    %cst_441 = arith.constant dense<0.000000e+00> : vector<16xf32>
    %770 = vector.multi_reduction <add>, %769, %cst_441 [1] : vector<16x32xf32> to vector<16xf32>
    %771 = vector.shape_cast %770 : vector<16xf32> to vector<16x1xf32>
    %cst_442 = arith.constant 3.200000e+01 : f32
    %772 = vector.broadcast %cst_442 : f32 to vector<16x1xf32>
    %773 = arith.divf %771, %772 : vector<16x1xf32>
    %774 = vector.broadcast %766 : vector<16x1xf32> to vector<16x32xf32>
    %775 = arith.subf %758, %774 : vector<16x32xf32>
    %cst_443 = arith.constant 9.99999974E-6 : f32
    %776 = vector.broadcast %cst_443 : f32 to vector<16x1xf32>
    %777 = arith.addf %773, %776 : vector<16x1xf32>
    %778 = math.rsqrt %777 : vector<16x1xf32>
    %779 = vector.broadcast %778 : vector<16x1xf32> to vector<16x32xf32>
    %780 = arith.mulf %775, %779 : vector<16x32xf32>
    %781 = vector.broadcast %760 : vector<1x32xf32> to vector<16x32xf32>
    %782 = arith.mulf %780, %781 : vector<16x32xf32>
    %783 = vector.broadcast %762 : vector<1x32xf32> to vector<16x32xf32>
    %784 = arith.addf %782, %783 : vector<16x32xf32>
    %785 = arith.truncf %784 : vector<16x32xf32> to vector<16x32xbf16>
    %c1_444 = arith.constant 1 : index
    %c10_445 = arith.constant 10 : index
    %c0_446 = arith.constant 0 : index
    %c0_447 = arith.constant 0 : index
    %786 = vector.load %arg12[%c1_444, %c10_445, %c0_446, %c0_447] : memref<2x11x32x32xbf16, #tpu.memory_space<vmem>>, vector<1x1x32x32xbf16>
    %787 = vector.shape_cast %786 : vector<1x1x32x32xbf16> to vector<32x32xbf16>
    %cst_448 = arith.constant dense<0.000000e+00> : vector<16x32xf32>
    %788 = tpu.matmul %785, %787, %cst_448 {dimension_numbers = #tpu.dot_dimension_numbers<[1], [0], [0], [1], [0, 0, 1, 1], [], []>} : vector<16x32xbf16>, vector<32x32xbf16>, vector<16x32xf32> -> vector<16x32xf32>
    %c1_449 = arith.constant 1 : index
    %c10_450 = arith.constant 10 : index
    %c0_451 = arith.constant 0 : index
    %c0_452 = arith.constant 0 : index
    %789 = vector.load %arg13[%c1_449, %c10_450, %c0_451, %c0_452] : memref<2x11x1x32xf32, #tpu.memory_space<vmem>>, vector<1x1x1x32xf32>
    %790 = vector.shape_cast %789 : vector<1x1x1x32xf32> to vector<1x32xf32>
    %791 = vector.broadcast %790 : vector<1x32xf32> to vector<16x32xf32>
    %792 = arith.addf %788, %791 : vector<16x32xf32>
    %cst_453 = arith.constant 2.000000e+01 : f32
    %793 = vector.broadcast %cst_453 : f32 to vector<16x32xf32>
    %794 = arith.minimumf %792, %793 : vector<16x32xf32>
    %795 = math.exp %794 : vector<16x32xf32>
    %cst_454 = arith.constant 2.000000e+00 : f32
    %796 = vector.broadcast %cst_454 : f32 to vector<16x32xf32>
    %797 = arith.addf %795, %796 : vector<16x32xf32>
    %798 = arith.mulf %795, %797 : vector<16x32xf32>
    %799 = arith.mulf %792, %798 : vector<16x32xf32>
    %cst_455 = arith.constant 2.000000e+00 : f32
    %800 = vector.broadcast %cst_455 : f32 to vector<16x32xf32>
    %801 = arith.addf %798, %800 : vector<16x32xf32>
    %802 = tpu.reciprocal %801 {approx = true} : vector<16x32xf32> -> vector<16x32xf32>
    %803 = arith.mulf %799, %802 : vector<16x32xf32>
    %804 = arith.addf %758, %803 : vector<16x32xf32>
    %c1_456 = arith.constant 1 : index
    %c5_457 = arith.constant 5 : index
    %c0_458 = arith.constant 0 : index
    %c0_459 = arith.constant 0 : index
    %805 = vector.load %arg14[%c1_456, %c5_457, %c0_458, %c0_459] : memref<2x6x1x32xf32, #tpu.memory_space<vmem>>, vector<1x1x1x32xf32>
    %806 = vector.shape_cast %805 : vector<1x1x1x32xf32> to vector<1x32xf32>
    %c1_460 = arith.constant 1 : index
    %c5_461 = arith.constant 5 : index
    %c0_462 = arith.constant 0 : index
    %c0_463 = arith.constant 0 : index
    %807 = vector.load %arg15[%c1_460, %c5_461, %c0_462, %c0_463] : memref<2x6x1x32xf32, #tpu.memory_space<vmem>>, vector<1x1x1x32xf32>
    %808 = vector.shape_cast %807 : vector<1x1x1x32xf32> to vector<1x32xf32>
    %cst_464 = arith.constant dense<0.000000e+00> : vector<16xf32>
    %809 = vector.multi_reduction <add>, %804, %cst_464 [1] : vector<16x32xf32> to vector<16xf32>
    %810 = vector.shape_cast %809 : vector<16xf32> to vector<16x1xf32>
    %cst_465 = arith.constant 3.200000e+01 : f32
    %811 = vector.broadcast %cst_465 : f32 to vector<16x1xf32>
    %812 = arith.divf %810, %811 : vector<16x1xf32>
    %813 = vector.broadcast %812 : vector<16x1xf32> to vector<16x32xf32>
    %814 = arith.subf %804, %813 : vector<16x32xf32>
    %815 = arith.mulf %814, %814 : vector<16x32xf32>
    %cst_466 = arith.constant dense<0.000000e+00> : vector<16xf32>
    %816 = vector.multi_reduction <add>, %815, %cst_466 [1] : vector<16x32xf32> to vector<16xf32>
    %817 = vector.shape_cast %816 : vector<16xf32> to vector<16x1xf32>
    %cst_467 = arith.constant 3.200000e+01 : f32
    %818 = vector.broadcast %cst_467 : f32 to vector<16x1xf32>
    %819 = arith.divf %817, %818 : vector<16x1xf32>
    %820 = vector.broadcast %812 : vector<16x1xf32> to vector<16x32xf32>
    %821 = arith.subf %804, %820 : vector<16x32xf32>
    %cst_468 = arith.constant 9.99999974E-6 : f32
    %822 = vector.broadcast %cst_468 : f32 to vector<16x1xf32>
    %823 = arith.addf %819, %822 : vector<16x1xf32>
    %824 = math.rsqrt %823 : vector<16x1xf32>
    %825 = vector.broadcast %824 : vector<16x1xf32> to vector<16x32xf32>
    %826 = arith.mulf %821, %825 : vector<16x32xf32>
    %827 = vector.broadcast %806 : vector<1x32xf32> to vector<16x32xf32>
    %828 = arith.mulf %826, %827 : vector<16x32xf32>
    %829 = vector.broadcast %808 : vector<1x32xf32> to vector<16x32xf32>
    %830 = arith.addf %828, %829 : vector<16x32xf32>
    %c0_469 = arith.constant 0 : index
    %c0_470 = arith.constant 0 : index
    %831 = vector.load %arg23[%c0_469, %c0_470] : memref<16x32xf32, #tpu.memory_space<vmem>>, vector<16x32xf32>
    tpu.vector_store %arg23[%c0_469, %c0_470], %830 {strides = array<i32>} : memref<16x32xf32, #tpu.memory_space<vmem>>, vector<16x32xf32>,
    %832 = arith.addf %830, %18 : vector<16x32xf32>
    %833 = vector.shape_cast %832 : vector<16x32xf32> to vector<2x8x32xf32>
    %834 = vector.broadcast %31 : vector<2x8x1xf32> to vector<2x8x32xf32>
    %835 = arith.mulf %834, %833 : vector<2x8x32xf32>
    %cst_471 = arith.constant dense<0.000000e+00> : vector<2x32xf32>
    %836 = vector.multi_reduction <add>, %835, %cst_471 [1] : vector<2x8x32xf32> to vector<2x32xf32>
    %c0_472 = arith.constant 0 : index
    %c0_473 = arith.constant 0 : index
    %837 = vector.load %arg16[%c0_472, %c0_473] : memref<1x32xf32, #tpu.memory_space<vmem>>, vector<1x32xf32>
    %c0_474 = arith.constant 0 : index
    %c0_475 = arith.constant 0 : index
    %838 = vector.load %arg17[%c0_474, %c0_475] : memref<1x32xf32, #tpu.memory_space<vmem>>, vector<1x32xf32>
    %cst_476 = arith.constant dense<0.000000e+00> : vector<2xf32>
    %839 = vector.multi_reduction <add>, %836, %cst_476 [1] : vector<2x32xf32> to vector<2xf32>
    %840 = vector.shape_cast %839 : vector<2xf32> to vector<2x1xf32>
    %cst_477 = arith.constant 3.200000e+01 : f32
    %841 = vector.broadcast %cst_477 : f32 to vector<2x1xf32>
    %842 = arith.divf %840, %841 : vector<2x1xf32>
    %843 = vector.broadcast %842 : vector<2x1xf32> to vector<2x32xf32>
    %844 = arith.subf %836, %843 : vector<2x32xf32>
    %845 = arith.mulf %844, %844 : vector<2x32xf32>
    %cst_478 = arith.constant dense<0.000000e+00> : vector<2xf32>
    %846 = vector.multi_reduction <add>, %845, %cst_478 [1] : vector<2x32xf32> to vector<2xf32>
    %847 = vector.shape_cast %846 : vector<2xf32> to vector<2x1xf32>
    %cst_479 = arith.constant 3.200000e+01 : f32
    %848 = vector.broadcast %cst_479 : f32 to vector<2x1xf32>
    %849 = arith.divf %847, %848 : vector<2x1xf32>
    %850 = vector.broadcast %842 : vector<2x1xf32> to vector<2x32xf32>
    %851 = arith.subf %836, %850 : vector<2x32xf32>
    %cst_480 = arith.constant 9.99999974E-6 : f32
    %852 = vector.broadcast %cst_480 : f32 to vector<2x1xf32>
    %853 = arith.addf %849, %852 : vector<2x1xf32>
    %854 = math.rsqrt %853 : vector<2x1xf32>
    %855 = vector.broadcast %854 : vector<2x1xf32> to vector<2x32xf32>
    %856 = arith.mulf %851, %855 : vector<2x32xf32>
    %857 = vector.broadcast %837 : vector<1x32xf32> to vector<2x32xf32>
    %858 = arith.mulf %856, %857 : vector<2x32xf32>
    %859 = vector.broadcast %838 : vector<1x32xf32> to vector<2x32xf32>
    %860 = arith.addf %858, %859 : vector<2x32xf32>
    %c0_481 = arith.constant 0 : index
    %c0_482 = arith.constant 0 : index
    %c0_483 = arith.constant 0 : index
    %861 = vector.load %arg18[%c0_481, %c0_482, %c0_483] : memref<2x32x32xf32, #tpu.memory_space<vmem>>, vector<1x32x32xf32>
    %862 = vector.shape_cast %861 : vector<1x32x32xf32> to vector<32x32xf32>
    %cst_484 = arith.constant dense<0.000000e+00> : vector<2x32xf32>
    %863 = tpu.matmul %860, %862, %cst_484 {dimension_numbers = #tpu.dot_dimension_numbers<[1], [0], [0], [1], [0, 0, 1, 1], [], []>} : vector<2x32xf32>, vector<32x32xf32>, vector<2x32xf32> -> vector<2x32xf32>
    %c0_485 = arith.constant 0 : index
    %c0_486 = arith.constant 0 : index
    %c0_487 = arith.constant 0 : index
    %864 = vector.load %arg19[%c0_485, %c0_486, %c0_487] : memref<2x1x32xf32, #tpu.memory_space<vmem>>, vector<1x1x32xf32>
    %865 = vector.shape_cast %864 : vector<1x1x32xf32> to vector<1x32xf32>
    %866 = vector.broadcast %865 : vector<1x32xf32> to vector<2x32xf32>
    %867 = arith.addf %863, %866 : vector<2x32xf32>
    %c1_488 = arith.constant 1 : index
    %c0_489 = arith.constant 0 : index
    %c0_490 = arith.constant 0 : index
    %868 = vector.load %arg18[%c1_488, %c0_489, %c0_490] : memref<2x32x32xf32, #tpu.memory_space<vmem>>, vector<1x32x32xf32>
    %869 = vector.shape_cast %868 : vector<1x32x32xf32> to vector<32x32xf32>
    %cst_491 = arith.constant dense<0.000000e+00> : vector<2x32xf32>
    %870 = tpu.matmul %867, %869, %cst_491 {dimension_numbers = #tpu.dot_dimension_numbers<[1], [0], [0], [1], [0, 0, 1, 1], [], []>} : vector<2x32xf32>, vector<32x32xf32>, vector<2x32xf32> -> vector<2x32xf32>
    %c1_492 = arith.constant 1 : index
    %c0_493 = arith.constant 0 : index
    %c0_494 = arith.constant 0 : index
    %871 = vector.load %arg19[%c1_492, %c0_493, %c0_494] : memref<2x1x32xf32, #tpu.memory_space<vmem>>, vector<1x1x32xf32>
    %872 = vector.shape_cast %871 : vector<1x1x32xf32> to vector<1x32xf32>
    %873 = vector.broadcast %872 : vector<1x32xf32> to vector<2x32xf32>
    %874 = arith.addf %870, %873 : vector<2x32xf32>
    %cst_495 = arith.constant 2.000000e+01 : f32
    %875 = vector.broadcast %cst_495 : f32 to vector<2x32xf32>
    %876 = arith.minimumf %874, %875 : vector<2x32xf32>
    %877 = math.exp %876 : vector<2x32xf32>
    %cst_496 = arith.constant 2.000000e+00 : f32
    %878 = vector.broadcast %cst_496 : f32 to vector<2x32xf32>
    %879 = arith.addf %877, %878 : vector<2x32xf32>
    %880 = arith.mulf %877, %879 : vector<2x32xf32>
    %881 = arith.mulf %874, %880 : vector<2x32xf32>
    %cst_497 = arith.constant 2.000000e+00 : f32
    %882 = vector.broadcast %cst_497 : f32 to vector<2x32xf32>
    %883 = arith.addf %880, %882 : vector<2x32xf32>
    %884 = tpu.reciprocal %883 {approx = true} : vector<2x32xf32> -> vector<2x32xf32>
    %885 = arith.mulf %881, %884 : vector<2x32xf32>
    %c0_498 = arith.constant 0 : index
    %c0_499 = arith.constant 0 : index
    %886 = vector.load %arg20[%c0_498, %c0_499] : memref<32x1xf32, #tpu.memory_space<vmem>>, vector<32x1xf32>
    %cst_500 = arith.constant dense<0.000000e+00> : vector<2x1xf32>
    %887 = tpu.matmul %885, %886, %cst_500 {dimension_numbers = #tpu.dot_dimension_numbers<[1], [0], [0], [1], [0, 0, 1, 1], [], []>} : vector<2x32xf32>, vector<32x1xf32>, vector<2x1xf32> -> vector<2x1xf32>
    %c0_501 = arith.constant 0 : index
    %c0_502 = arith.constant 0 : index
    %888 = vector.load %arg21[%c0_501, %c0_502] : memref<1x1xf32, #tpu.memory_space<vmem>>, vector<1x1xf32>
    %889 = vector.broadcast %888 : vector<1x1xf32> to vector<2x1xf32>
    %890 = arith.addf %887, %889 : vector<2x1xf32>
    %c0_503 = arith.constant 0 : index
    %c0_504 = arith.constant 0 : index
    %891 = vector.load %arg22[%c0_503, %c0_504] : memref<2x1xf32, #tpu.memory_space<vmem>>, vector<2x1xf32>
    tpu.vector_store %arg22[%c0_503, %c0_504], %890 {strides = array<i32>} : memref<2x1xf32, #tpu.memory_space<vmem>>, vector<2x1xf32>,
    return
  }
}

</mosaic_0001>

<bundles_post_ra>
// kernel: pst_v2_forward.1
= control target key start
LH: loop header
LB: loop body
LE: loop exit
PB: predicated region body
PF: predicated region fallthrough
CT: control target
= control target key end

     0   :  { %s14229_s0 = inlined_call_operand.vmem [shape: f32[16,16], index: 0, kind: input, shape index: {}]   ;;  %s14230_s1 = inlined_call_operand.vmem [shape: f32[16,4], index: 1, kind: input, shape index: {}]   ;;  %s14231_s2 = inlined_call_operand.vmem [shape: f32[128,4], index: 2, kind: input, shape index: {}]   ;;  %s14232_s3 = inlined_call_operand.vmem [shape: f32[2,8,1], index: 3, kind: input, shape index: {}]   ;;  %s14233_s4 = inlined_call_operand.vmem [shape: f32[16,32], index: 4, kind: input, shape index: {}]   ;;  %s14234_s5 = inlined_call_operand.vmem [shape: f32[1,32], index: 5, kind: input, shape index: {}]   ;;  %s14235_s6 = inlined_call_operand.vmem [shape: f32[4,32], index: 6, kind: input, shape index: {}]   ;;  %s14236_s7 = inlined_call_operand.vmem [shape: f32[4,32], index: 7, kind: input, shape index: {}]   ;;  %s14237_s8 = inlined_call_operand.vmem [shape: f32[1,32], index: 8, kind: input, shape index: {}]   ;;  %s14238_s9 = inlined_call_operand.vmem [shape: f32[4,32], index: 9, kind: input, shape index: {}]   ;;  %s14239_s10 = inlined_call_operand.vmem [shape: f32[4,32], index: 10, kind: input, shape index: {}]   ;;  %s14240_s11 = inlined_call_operand.vmem [shape: f32[1,32], index: 11, kind: input, shape index: {}]   ;;  %s14241_s12 = inlined_call_operand.hbm [shape: bf16[2,11,32,32], index: 12, kind: input, shape index: {}]   ;;  %s14242_s13 = inlined_call_operand.vmem [shape: f32[2,11,1,32], index: 13, kind: input, shape index: {}]   ;;  %s14243_s14 = inlined_call_operand.vmem [shape: f32[2,6,1,32], index: 14, kind: input, shape index: {}]   ;;  %s14244_s15 = inlined_call_operand.vmem [shape: f32[2,6,1,32], index: 15, kind: input, shape index: {}]   ;;  %s14245_s16 = inlined_call_operand.vmem [shape: f32[1,32], index: 16, kind: input, shape index: {}]   ;;  %s14246_s17 = inlined_call_operand.vmem [shape: f32[1,32], index: 17, kind: input, shape index: {}]   ;;  %s14247_s18 = inlined_call_operand.vmem [shape: f32[2,32,32], index: 18, kind: input, shape index: {}]   ;;  %s14248_s19 = inlined_call_operand.vmem [shape: f32[2,1,32], index: 19, kind: input, shape index: {}]   ;;  %s14249_s20 = inlined_call_operand.vmem [shape: f32[32,1], index: 20, kind: input, shape index: {}]   ;;  %s14250_s21 = inlined_call_operand.<no memory space> [shape: f32[1,1], index: 21, kind: input, shape index: {}]   ;;  %s14251_s22 = inlined_call_operand.vmem [shape: f32[2,1], index: 22, kind: output, shape index: {0}]   ;;  %s14252_s23 = inlined_call_operand.hbm [shape: f32[16,32], index: 23, kind: output, shape index: {1}]  }
   0x1   :  { %14307 = sst [smem:[#allocation34_spill]] %s14229_s0  ;;  %v29_v0 = vstv %s14250_s21 }
   0x2   :  { %14308 = sst [smem:[#allocation35_spill]] %s14230_s1  ;;  %30 = vst [vmem:[#allocation2] sm:$0x1] %v29_v0 }
   0x3   :  { %14309 = sst [smem:[#allocation36_spill]] %s14231_s2 }
   0x4   :  { %14310 = sst [smem:[#allocation37_spill]] %s14232_s3 }
   0x5   :  { %14311 = sst [smem:[#allocation38_spill]] %s14233_s4 }
   0x6   :  { %14312 = sst [smem:[#allocation39_spill]] %s14234_s5 }
   0x7   :  { %14313 = sst [smem:[#allocation40_spill]] %s14235_s6 }
   0x8   :  { %14314 = sst [smem:[#allocation41_spill]] %s14236_s7 }
   0x9   :  { %31 = vsyncpa [#allocation4], 0 }
   0xa   :  { %32 = vsyncpa [#allocation5], 0  ;;  %s10333_s24 = smov [#allocation3]   ;;  %s10285_s26 = scalar_lea.hbm %s14241_s12, 5632 }
   0xb   :  { %s62_s25 = sshll.u32 %s10333_s24, 4  ;;  %p10286_p0 = scmp.ne.s32.totalorder %s14241_s12, %s10285_s26  ;;  %s63_s25 = int_to_ptr.vmem [resolvable:$true] %s62_s25 }
   0xc   :  { %p10289_p1 = scmp.lt.u32.totalorder %s10285_s26, %s14241_s12 }
   0xe   :  { %p10291_p2 = pnand %p10289_p1, %p10286_p0 }
  0x10   :  { %10294 = shalt.err (!%p10291_p2)
}
  0x11   :  { %s10295_s21 = scalar_lea.vmem %s63_s25, 5632  ;;  %p10300_p4 = scmp.lt.s32.totalorder %s63_s25, %s63_s25 }
  0x12   :  { %p10296_p3 = scmp.ne.s32.totalorder %s63_s25, %s10295_s21  ;;  %p10301_p5 = scmp.lt.s32.totalorder %s10295_s21, %s10295_s21 }
  0x14   :  { %p10302_p6 = por %p10301_p5, %p10300_p4 }
  0x16   :  { %p10303_p7 = pnand %p10302_p6, %p10296_p3 }
  0x18   :  { %10306 = shalt.err (!%p10303_p7)
}
  0x19   :  { %s10334_s28 = smov 64   ;;  %s10335_s29 = smov 4  }
  0x1a   :  { %68 = dma.hbm_to_vmem [thread:$0]  %s14241_s12, 5632, %s63_s25, [#allocation4], %s10334_s28, %s10334_s28, %s10335_s29  }
  0x1b   :  { %10329 = dma.done.wait [#allocation4], 5632  }
  0x1c   :  { %10330 = vsyncadd [#allocation4], 4294961664  ;;  %vm106_vm0 = vcmask 130048   ;;  %s14315_s24 = sld [smem:[#allocation38_spill]]  ;;  %s14316_s6 = sld [smem:[#allocation34_spill]]  ;;  %vm198_vm1 = vcmask 1043456  }
  0x1d   :  { %s14317_s25 = sld [smem:[#allocation35_spill]]  ;;  %s14318_s28 = sld [smem:[#allocation40_spill]]  ;;  %vm191_vm2 = vcmask 31744   ;;  %v424_v14 = vld [vmem:[%s14239_s10] sm:$0xf]  ;;  %vm1090_vm3 = vcmask 261120  }
  0x1e   :  { %s14319_s5 = sld [smem:[#allocation41_spill]]  ;;  %s14320_s27 = sld [smem:[#allocation36_spill]]  ;;  %8935 = vmatprep.subr.msk.mxu1 %vm198_vm1, %v424_v14  ;;  %v423_v27 = vld [vmem:[%s14238_s9] sm:$0xf]  ;;  %vm10337_vm4 = vmmov 0  }
  0x1f   :  { %8936 = vmatpush3.msk.msra.mxu1 %vm198_vm1, %v424_v14  ;;  %s14321_s2 = sld [smem:[#allocation39_spill]]  ;;  %s14335_s26 = sld [smem:[#allocation37_spill]] }
  0x20   :  { %8961 = vmatprep.subr.msk.mxu1 %vm198_vm1, %v423_v27 }
  0x22   :  { %v97_v1 = vld [vmem:[%s14315_s24] sm:$0xff]  ;;  %v98_v2 = vld [vmem:[%s14315_s24 + $0x8] sm:$0xff] }
  0x23   :  { %v91_v3 = vld [vmem:[%s14316_s6] sm:$0xff]  ;;  %v9340_v4 = vpack.c.bf16 %v98_v2, %v97_v1  ;;  %v94_v8 = vld [vmem:[%s14317_s25 + $0x8] sm:$0xff] }
  0x24   :  { %8922 = vmatprep.mubr.msk.f32.mxu0 %vm106_vm0, %v91_v3  ;;  %v93_v5 = vld [vmem:[%s14317_s25] sm:$0xff]  ;;  %v92_v9 = vld [vmem:[%s14316_s6 + $0x8] sm:$0xff]  ;;  %v96_v10 = vsub.f32 1.0, %v94_v8  ;;  %v377_v19 = vld [vmem:[%s14320_s27 + $0x10] sm:$0xff] }
  0x25   :  { %v190_v6 = vld [vmem:[%s14318_s28] sm:$0xf]  ;;  %v95_v7 = vsub.f32 1.0, %v93_v5  ;;  %9341 = vmatprep.subr.bf16.mxu0 %v9340_v4  ;;  %v376_v16 = vld [vmem:[%s14320_s27 + $0x8] sm:$0xff]  ;;  %v378_v20 = vld [vmem:[%s14320_s27 + $0x18] sm:$0xff]  ;;  %v393_v21 = vsub.f32 1.0, %v377_v19 }
  0x26   :  { %9343 = vmatpush3.bf16.msra.mxu0 %v9340_v4  ;;  %v279_v12 = vld [vmem:[%s14319_s5] sm:$0xf]  ;;  %v189_v13 = vmul.f32 %v96_v10, %v96_v10  ;;  %v392_v18 = vsub.f32 1.0, %v376_v16  ;;  %v394_v23 = vsub.f32 1.0, %v378_v20  ;;  %v380_v25 = vld [vmem:[%s14320_s27 + $0x28] sm:$0xff]  ;;  %v381_v26 = vld [vmem:[%s14320_s27 + $0x30] sm:$0xff] }
  0x27   :  { %v188_v11 = vmul.f32 %v95_v7, %v95_v7  ;;  %8925 = vmatprep.subr.msk.mxu0 %vm198_vm1, %v190_v6  ;;  %v375_v15 = vld [vmem:[%s14320_s27] sm:$0xff]  ;;  %v396_v28 = vsub.f32 1.0, %v380_v25  ;;  %v397_v29 = vsub.f32 1.0, %v381_v26  ;;  %v382_v30 = vld [vmem:[%s14320_s27 + $0x38] sm:$0xff]  ;;  %v384_v34 = vld [vmem:[%s14320_s27 + $0x48] sm:$0xff]  ;;  %v409_v50 = vmul.f32 %v393_v21, %v393_v21 }
  0x28   :  { %v391_v17 = vsub.f32 1.0, %v375_v15  ;;  %v379_v22 = vld [vmem:[%s14320_s27 + $0x20] sm:$0xff]  ;;  %v398_v32 = vsub.f32 1.0, %v382_v30  ;;  %v385_v35 = vld [vmem:[%s14320_s27 + $0x50] sm:$0xff]  ;;  %v400_v36 = vsub.f32 1.0, %v384_v34  ;;  %v386_v38 = vld [vmem:[%s14320_s27 + $0x58] sm:$0xff]  ;;  %v408_v49 = vmul.f32 %v392_v18, %v392_v18 }
  0x29   :  { %8923 = vmatmul.mubr.msk.f32.vlgmr.msra.gmra.mrb[0].mxu0 %vm106_vm0, %v92_v9  ;;  %v395_v24 = vsub.f32 1.0, %v379_v22  ;;  %v383_v31 = vld [vmem:[%s14320_s27 + $0x40] sm:$0xff]  ;;  %v401_v37 = vsub.f32 1.0, %v385_v35  ;;  %v402_v40 = vsub.f32 1.0, %v386_v38  ;;  %v388_v42 = vld [vmem:[%s14320_s27 + $0x68] sm:$0xff]  ;;  %v389_v43 = vld [vmem:[%s14320_s27 + $0x70] sm:$0xff]  ;;  %v410_v51 = vmul.f32 %v394_v23, %v394_v23 }
  0x2a   :  { %8926 = vmatpush3.msk.msra.mxu0 %vm198_vm1, %v190_v6  ;;  %8927 = vmatprep.mubr.msk.f32.mxu0 %vm191_vm2, %v188_v11  ;;  %v399_v33 = vsub.f32 1.0, %v383_v31  ;;  %v387_v39 = vld [vmem:[%s14320_s27 + $0x60] sm:$0xff]  ;;  %v404_v44 = vsub.f32 1.0, %v388_v42  ;;  %v405_v45 = vsub.f32 1.0, %v389_v43  ;;  %v390_v46 = vld [vmem:[%s14320_s27 + $0x78] sm:$0xff]  ;;  %v407_v48 = vmul.f32 %v391_v17, %v391_v17 }
  0x2b   :  { %8930 = vmatprep.subr.msk.mxu0 %vm198_vm1, %v279_v12  ;;  %8937 = vmatprep.mubr.msk.f32.mxu1 %vm191_vm2, %v391_v17  ;;  %v403_v41 = vsub.f32 1.0, %v387_v39  ;;  %v406_v47 = vsub.f32 1.0, %v390_v46  ;;  %v411_v52 = vmul.f32 %v395_v24, %v395_v24  ;;  %v412_v53 = vmul.f32 %v396_v28, %v396_v28  ;;  %v8396_v0 = vld [vmem:[%s14321_s2] ss:$0 sm:$0xff]  ;;  %v9437_v35 = vld [vmem:[#allocation3] sm:$0xff]  }
  0x2c   :  { %8938 = vmatmul.mubr.msk.f32.vlgmr.msra.gmra.mrb[0].mxu1 %vm191_vm2, %v392_v18  ;;  %v413_v54 = vmul.f32 %v397_v29, %v397_v29  ;;  %v414_v55 = vmul.f32 %v398_v32, %v398_v32  ;;  %v415_v56 = vmul.f32 %v399_v33, %v399_v33  ;;  %v416_v57 = vmul.f32 %v400_v36, %v400_v36  ;;  %v8405_v2 = vld [vmem:[%s14237_s8] ss:$0 sm:$0xff] }
  0x2d   :  { %8940 = vmatprep.mubr.msk.f32.mxu1 %vm191_vm2, %v393_v21  ;;  %8962 = vmatpush3.msk.msra.mxu1 %vm198_vm1, %v423_v27  ;;  %v417_v58 = vmul.f32 %v401_v37, %v401_v37  ;;  %v418_v59 = vmul.f32 %v402_v40, %v402_v40  ;;  %v419_v60 = vmul.f32 %v403_v41, %v403_v41  ;;  %v8440_v21 = vld [vmem:[%s14240_s11] ss:$0 sm:$0xff] }
  0x2e   :  { %v420_v61 = vmul.f32 %v404_v44, %v404_v44  ;;  %v421_v62 = vmul.f32 %v405_v45, %v405_v45  ;;  %v422_v63 = vmul.f32 %v406_v47, %v406_v47 }
  0x30   :  { %8941 = vmatmul.mubr.msk.f32.gmra.mrb[2].mxu1 %vm191_vm2, %v394_v23 }
  0x31   :  { %8928 = vmatmul.mubr.msk.f32.vlgmr.msra.gmra.mrb[0].mxu0 %vm191_vm2, %v189_v13  ;;  %8943 = vmatprep.mubr.msk.f32.mxu1 %vm191_vm2, %v395_v24 }
  0x32   :  { %8931 = vmatpush3.msk.msra.mxu0 %vm198_vm1, %v279_v12  ;;  %8932 = vmatprep.mubr.msk.f32.mxu0 %vm191_vm2, %v95_v7 }
  0x34   :  { %8944 = vmatmul.mubr.msk.f32.gmra.mrb[4].mxu1 %vm191_vm2, %v396_v28 }
  0x35   :  { %8946 = vmatprep.mubr.msk.f32.mxu1 %vm191_vm2, %v397_v29 }
  0x38   :  { %8947 = vmatmul.mubr.msk.f32.gmra.mrb[6].mxu1 %vm191_vm2, %v398_v32 }
  0x39   :  { %8933 = vmatmul.mubr.msk.f32.vlgmr.msra.gmra.mrb[0].mxu0 %vm191_vm2, %v96_v10  ;;  %8949 = vmatprep.mubr.msk.f32.mxu1 %vm191_vm2, %v399_v33 }
  0x3c   :  { %8950 = vmatmul.mubr.msk.f32.gmra.mrb[8].mxu1 %vm191_vm2, %v400_v36  ;;  %v14258_v36 = vmov 0.0  }
  0x3d   :  { %8952 = vmatprep.mubr.msk.f32.mxu1 %vm191_vm2, %v401_v37  ;;  %8987 = vmatprep.subr.bf16.mxu0 %v14258_v36 }
  0x3e   :  { %8988 = vmatpush3.bf16.msra.mxu0 %v9437_v35  ;;  %8991 = vmatprep.mubr.msk.bf16.mxu0 %vm10337_vm4, %v14258_v36 }
  0x3f   :  { %8989 = vmatprep.subr.bf16.mxu0 %v14258_v36 }
  0x40   :  { %8953 = vmatmul.mubr.msk.f32.gmra.mrb[10].mxu1 %vm191_vm2, %v402_v40 }
  0x41   :  { %8955 = vmatprep.mubr.msk.f32.mxu1 %vm191_vm2, %v403_v41  ;;  %v9438_v41 = vld [vmem:[#allocation3 + $0x8] sm:$0xff]  }
  0x42   :  { %8990 = vmatpush3.bf16.msra.mxu0 %v9438_v41 }
  0x43   :  { %8995 = vmatprep.subr.bf16.mxu0 %v14258_v36 }
  0x44   :  { %8956 = vmatmul.mubr.msk.f32.gmra.mrb[12].mxu1 %vm191_vm2, %v404_v44 }
  0x45   :  { %8958 = vmatprep.mubr.msk.f32.mxu1 %vm191_vm2, %v405_v45 }
  0x48   :  { %8959 = vmatmul.mubr.msk.f32.gmra.mrb[14].mxu1 %vm191_vm2, %v406_v47 }
  0x49   :  { %8963 = vmatprep.mubr.msk.f32.mxu1 %vm191_vm2, %v407_v48 }
  0x4c   :  { %8964 = vmatmul.mubr.msk.f32.vlgmr.msra.gmra.mrb[0].mxu1 %vm191_vm2, %v408_v49 }
  0x4d   :  { %8966 = vmatprep.mubr.msk.f32.mxu1 %vm191_vm2, %v409_v50 }
  0x50   :  { %8967 = vmatmul.mubr.msk.f32.gmra.mrb[2].mxu1 %vm191_vm2, %v410_v51 }
  0x51   :  { %8969 = vmatprep.mubr.msk.f32.mxu1 %vm191_vm2, %v411_v52 }
  0x54   :  { %8970 = vmatmul.mubr.msk.f32.gmra.mrb[4].mxu1 %vm191_vm2, %v412_v53 }
  0x55   :  { %8972 = vmatprep.mubr.msk.f32.mxu1 %vm191_vm2, %v413_v54 }
  0x58   :  { %8973 = vmatmul.mubr.msk.f32.gmra.mrb[6].mxu1 %vm191_vm2, %v414_v55 }
  0x59   :  { %8975 = vmatprep.mubr.msk.f32.mxu1 %vm191_vm2, %v415_v56 }
  0x5c   :  { %8976 = vmatmul.mubr.msk.f32.gmra.mrb[8].mxu1 %vm191_vm2, %v416_v57 }
  0x5d   :  { %8978 = vmatprep.mubr.msk.f32.mxu1 %vm191_vm2, %v417_v58 }
  0x60   :  { %8979 = vmatmul.mubr.msk.f32.gmra.mrb[10].mxu1 %vm191_vm2, %v418_v59 }
  0x61   :  { %8981 = vmatprep.mubr.msk.f32.mxu1 %vm191_vm2, %v419_v60 }
  0x64   :  { %8982 = vmatmul.mubr.msk.f32.gmra.mrb[12].mxu1 %vm191_vm2, %v420_v61 }
  0x65   :  { %8984 = vmatprep.mubr.msk.f32.mxu1 %vm191_vm2, %v421_v62 }
  0x68   :  { %8985 = vmatmul.mubr.msk.f32.gmra.mrb[14].mxu1 %vm191_vm2, %v422_v63 }
 0x10c   :  { %v8934_v1 = vpop.f32.mrb[0].mxu0 }
 0x10d   :  { %v355_v3 = vpop.f32.mrb[1].mxu0  ;;  %v9362_v4 = vadd.f32 %v8934_v1, %v8396_v0 }
 0x10e   :  { %v9363_v5 = vadd.f32 %v8396_v0, %v355_v3 }
 0x10f   :  { %v10611_v7 = vadd.f32 %v9362_v4, %v8405_v2 }
 0x110   :  { %v10609_v6 = vadd.f32 %v9363_v5, %v8405_v2 }
 0x111   :  { %14323 = vst [vmem:[#allocation10_spill] sm:$0xff] %v10611_v7  ;;  %v1094_v9 = vsel %vm1090_vm3, %v10611_v7, 0.0 }
 0x112   :  { %14322 = vst [vmem:[#allocation9_spill] sm:$0xff] %v10609_v6  ;;  %v1091_v8 = vsel %vm1090_vm3, %v10609_v6, 0.0 }
 0x113   :  { %1092 = vadd.xlane.f32.xlu0 %v1091_v8 }
 0x117   :  { %1095 = vadd.xlane.f32.xlu0 %v1094_v9 }
 0x11f   :  { %v8965_v20 = vpop.f32.mrb[0].mxu1 }
 0x120   :  { %v738_v22 = vpop.f32.mrb[1].mxu1  ;;  %v825_v23 = vadd.f32 %v8965_v20, %v8440_v21  ;;  %v9439_v20 = vld [vmem:[#allocation3 + $0x10] sm:$0xff]  }
 0x121   :  { %v824_v24 = vadd.f32 %v8440_v21, %v738_v22  ;;  %v9442_v22 = vld [vmem:[#allocation3 + $0x28] sm:$0xff]  }
 0x123   :  { %v10632_v25 = vpack.c.bf16 %v825_v23, %v824_v24  ;;  %v8968_v26 = vpop.f32.mrb[2].mxu1  ;;  %v9443_v23 = vld [vmem:[#allocation3 + $0x30] sm:$0xff]   ;;  %v9444_v24 = vld [vmem:[#allocation3 + $0x38] sm:$0xff]  }
 0x124   :  { %v748_v27 = vpop.f32.mrb[3].mxu1  ;;  %v827_v28 = vadd.f32 %v8968_v26, %v8440_v21  ;;  %v9445_v26 = vld [vmem:[#allocation3 + $0x50] sm:$0xff]  }
 0x125   :  { %v826_v29 = vadd.f32 %v8440_v21, %v748_v27  ;;  %v9446_v27 = vld [vmem:[#allocation3 + $0x58] sm:$0xff]  }
 0x127   :  { %v10634_v30 = vpack.c.bf16 %v827_v28, %v826_v29  ;;  %v8971_v31 = vpop.f32.mrb[4].mxu1 }
 0x128   :  { %v758_v32 = vpop.f32.mrb[5].mxu1  ;;  %v829_v33 = vadd.f32 %v8971_v31, %v8440_v21 }
 0x129   :  { %v828_v34 = vadd.f32 %v8440_v21, %v758_v32 }
 0x12b   :  { %v10637_v37 = vpack.c.bf16 %v829_v33, %v828_v34  ;;  %v8974_v38 = vpop.f32.mrb[6].mxu1 }
 0x12c   :  { %v831_v39 = vadd.f32 %v8974_v38, %v8440_v21  ;;  %v768_v40 = vpop.f32.mrb[7].mxu1 }
 0x12d   :  { %v830_v42 = vadd.f32 %v8440_v21, %v768_v40  ;;  %v8482_v40 = vld [vmem:[%s14242_s13 + $0x3] ss:$0 sm:$0xff] }
 0x12f   :  { %v8977_v43 = vpop.f32.mrb[8].mxu1  ;;  %v10642_v46 = vpack.c.bf16 %v831_v39, %v830_v42 }
 0x130   :  { %v833_v44 = vadd.f32 %v8977_v43, %v8440_v21  ;;  %v778_v45 = vpop.f32.mrb[9].mxu1 }
 0x131   :  { %v832_v47 = vadd.f32 %v8440_v21, %v778_v45 }
 0x133   :  { %v10645_v48 = vpack.c.bf16 %v833_v44, %v832_v47  ;;  %v8980_v49 = vpop.f32.mrb[10].mxu1 }
 0x134   :  { %v835_v50 = vadd.f32 %v8980_v49, %v8440_v21  ;;  %v788_v51 = vpop.f32.mrb[11].mxu1 }
 0x135   :  { %v834_v52 = vadd.f32 %v8440_v21, %v788_v51 }
 0x137   :  { %v10647_v53 = vpack.c.bf16 %v835_v50, %v834_v52  ;;  %v8983_v54 = vpop.f32.mrb[12].mxu1 }
 0x138   :  { %v837_v55 = vadd.f32 %v8983_v54, %v8440_v21  ;;  %v798_v56 = vpop.f32.mrb[13].mxu1 }
 0x139   :  { %v836_v57 = vadd.f32 %v8440_v21, %v798_v56 }
 0x13b   :  { %v10649_v58 = vpack.c.bf16 %v837_v55, %v836_v57  ;;  %v8986_v59 = vpop.f32.mrb[14].mxu1 }
 0x13c   :  { %v839_v60 = vadd.f32 %v8986_v59, %v8440_v21  ;;  %v808_v61 = vpop.f32.mrb[15].mxu1 }
 0x13d   :  { %v838_v62 = vadd.f32 %v8440_v21, %v808_v61 }
 0x13f   :  { %v10651_v63 = vpack.c.bf16 %v839_v60, %v838_v62 }
 0x1a0   :  { %v1093_v10 = vpop.xlane.xlu0 %1092 }
 0x1a1   :  { %v1098_v11 = vmul.f32 0.03125, %v1093_v10  ;;  %v8459_v10 = vld [vmem:[%s14243_s14 + $0x5] ss:$0 sm:$0xff] }
 0x1a3   :  { %v10618_v12 = vsub.f32 %v10609_v6, %v1098_v11 }
 0x1a4   :  { %v1096_v13 = vpop.xlane.xlu0 %1095 }
 0x1a5   :  { %v1099_v14 = vmul.f32 0.03125, %v1096_v13  ;;  %v1102_v15 = vmul.f32 %v10618_v12, %v10618_v12 }
 0x1a7   :  { %v10623_v16 = vsub.f32 %v10611_v7, %v1099_v14  ;;  %v1104_v17 = vsel %vm1090_vm3, %v1102_v15, 0.0  ;;  %v8460_v15 = vld [vmem:[%s14244_s15 + $0x5] ss:$0 sm:$0xff] }
 0x1a8   :  { %1105 = vadd.xlane.f32.xlu1 %v1104_v17 }
 0x1a9   :  { %v1103_v18 = vmul.f32 %v10623_v16, %v10623_v16 }
 0x1ab   :  { %v1107_v19 = vsel %vm1090_vm3, %v1103_v18, 0.0 }
 0x1ac   :  { %1108 = vadd.xlane.f32.xlu1 %v1107_v19 }
 0x235   :  { %v1106_v0 = vpop.xlane.xlu1 %1105 }
 0x236   :  { %v1110_v1 = vmul.f32 0.03125, %v1106_v0 }
 0x238   :  { %v1112_v2 = vadd.f32 1e-05, %v1110_v1 }
 0x239   :  { %v1109_v3 = vpop.xlane.xlu1 %1108 }
 0x23a   :  { %9483 = vrsqrt.f32 %v1112_v2  ;;  %v1111_v4 = vmul.f32 0.03125, %v1109_v3 }
 0x23c   :  { %v1113_v5 = vadd.f32 1e-05, %v1111_v4 }
 0x23e   :  { %9485 = vrsqrt.f32 %v1113_v5 }
 0x244   :  { %v9484_v8 = vpop.eup %9483 }
 0x245   :  { %v1116_v9 = vmul.f32 %v9484_v8, %v10618_v12  ;;  %v9440_v12 = vld [vmem:[#allocation3 + $0x18] sm:$0xff]  }
 0x247   :  { %v1124_v13 = vmul.f32 %v8459_v10, %v1116_v9 }
 0x248   :  { %v9486_v11 = vpop.eup %9485 }
 0x249   :  { %v1117_v14 = vmul.f32 %v9486_v11, %v10623_v16  ;;  %v1132_v18 = vadd.f32 %v8460_v15, %v1124_v13  ;;  %v9441_v16 = vld [vmem:[#allocation3 + $0x20] sm:$0xff]  }
 0x24b   :  { %v1125_v17 = vmul.f32 %v8459_v10, %v1117_v14 }
 0x24d   :  { %v1133_v19 = vadd.f32 %v8460_v15, %v1125_v17 }
 0x24f   :  { %v1134_v21 = vpack.c.bf16 %v1133_v19, %v1132_v18 }
 0x251   :  { %8992 = vmatmul.mubr.msk.bf16.vlgmr.msra.gmra.mrb[4].mxu0 %vm1090_vm3, %v1134_v21 }
 0x252   :  { %8996 = vmatpush3.bf16.msra.mxu0 %v9439_v20  ;;  %8999 = vmatprep.mubr.msk.bf16.mxu0 %vm10337_vm4, %v14258_v36 }
 0x253   :  { %8997 = vmatprep.subr.bf16.mxu0 %v14258_v36 }
 0x256   :  { %8998 = vmatpush3.bf16.msra.mxu0 %v9440_v12 }
 0x257   :  { %9003 = vmatprep.subr.bf16.mxu0 %v14258_v36 }
 0x259   :  { %9000 = vmatmul.mubr.msk.bf16.vlgmr.msra.gmra.mrb[8].mxu0 %vm1090_vm3, %v1134_v21 }
 0x25a   :  { %9004 = vmatpush3.bf16.msra.mxu0 %v9441_v16  ;;  %9007 = vmatprep.mubr.msk.bf16.mxu0 %vm10337_vm4, %v14258_v36 }
 0x25b   :  { %9005 = vmatprep.subr.bf16.mxu0 %v14258_v36 }
 0x25e   :  { %9006 = vmatpush3.bf16.msra.mxu0 %v9442_v22 }
 0x25f   :  { %9011 = vmatprep.subr.bf16.mxu0 %v9443_v23 }
 0x261   :  { %9008 = vmatmul.mubr.msk.bf16.vlgmr.msra.gmra.mrb[12].mxu0 %vm1090_vm3, %v1134_v21 }
 0x262   :  { %9012 = vmatpush3.bf16.msra.mxu0 %v9443_v23  ;;  %9015 = vmatprep.mubr.msk.bf16.mxu0 %vm1090_vm3, %v10632_v25 }
 0x263   :  { %9013 = vmatprep.subr.bf16.mxu0 %v9444_v24 }
 0x266   :  { %9014 = vmatpush3.bf16.msra.mxu0 %v9444_v24 }
 0x267   :  { %9051 = vmatprep.subr.bf16.mxu0 %v9445_v26 }
 0x269   :  { %9016 = vmatmul.mubr.msk.bf16.vlgmr.msra.gmra.mrb[16].mxu0 %vm1090_vm3, %v10634_v30 }
 0x26a   :  { %9019 = vmatprep.mubr.msk.bf16.mxu0 %vm1090_vm3, %v10637_v37  ;;  %9052 = vmatpush3.bf16.msra.mxu0 %v9445_v26  ;;  %v8510_v26 = vld [vmem:[%s14242_s13 + $0x5] ss:$0 sm:$0xff] }
 0x26b   :  { %9053 = vmatprep.subr.bf16.mxu0 %v9446_v27 }
 0x26e   :  { %9054 = vmatpush3.bf16.msra.mxu0 %v9446_v27 }
 0x271   :  { %9020 = vmatmul.mubr.msk.bf16.gmra.mrb[20].mxu0 %vm1090_vm3, %v10642_v46 }
 0x272   :  { %9023 = vmatprep.mubr.msk.bf16.mxu0 %vm1090_vm3, %v10645_v48 }
 0x279   :  { %9024 = vmatmul.mubr.msk.bf16.gmra.mrb[24].mxu0 %vm1090_vm3, %v10647_v53 }
 0x27a   :  { %9027 = vmatprep.mubr.msk.bf16.mxu0 %vm1090_vm3, %v10649_v58 }
 0x281   :  { %9028 = vmatmul.mubr.msk.bf16.gmra.mrb[28].mxu0 %vm1090_vm3, %v10651_v63 }
 0x282   :  { %9055 = vmatprep.mubr.msk.bf16.mxu0 %vm1090_vm3, %v10632_v25 }
 0x289   :  { %9056 = vmatmul.mubr.msk.bf16.vlgmr.msra.gmra.mrb[32].mxu0 %vm1090_vm3, %v10634_v30 }
 0x28a   :  { %9059 = vmatprep.mubr.msk.bf16.mxu0 %vm1090_vm3, %v10637_v37 }
 0x291   :  { %9060 = vmatmul.mubr.msk.bf16.gmra.mrb[36].mxu0 %vm1090_vm3, %v10642_v46 }
 0x292   :  { %9063 = vmatprep.mubr.msk.bf16.mxu0 %vm1090_vm3, %v10645_v48 }
 0x299   :  { %9064 = vmatmul.mubr.msk.bf16.gmra.mrb[40].mxu0 %vm1090_vm3, %v10647_v53 }
 0x29a   :  { %9067 = vmatprep.mubr.msk.bf16.mxu0 %vm1090_vm3, %v10649_v58 }
 0x2a1   :  { %9068 = vmatmul.mubr.msk.bf16.gmra.mrb[44].mxu0 %vm1090_vm3, %v10651_v63 }
 0x324   :  { %v10703_v25 = vpop.f32.mrb[4].mxu0 }
 0x325   :  { %v8993_v28 = vpop.f32.mrb[5].mxu0 }
 0x326   :  { %v10705_v29 = vpop.f32.mrb[6].mxu0 }
 0x327   :  { %v8994_v30 = vpop.f32.mrb[7].mxu0 }
 0x32c   :  { %v10707_v31 = vpop.f32.mrb[8].mxu0 }
 0x32d   :  { %v9001_v32 = vpop.f32.mrb[9].mxu0 }
 0x32e   :  { %v10709_v33 = vpop.f32.mrb[10].mxu0 }
 0x32f   :  { %v9002_v34 = vpop.f32.mrb[11].mxu0 }
 0x334   :  { %v10711_v35 = vpop.f32.mrb[12].mxu0 }
 0x335   :  { %14324 = vst [vmem:[#allocation11_spill] sm:$0xff] %v10711_v35  ;;  %v9009_v37 = vpop.f32.mrb[13].mxu0 }
 0x336   :  { %v10713_v38 = vpop.f32.mrb[14].mxu0 }
 0x337   :  { %14325 = vst [vmem:[#allocation12_spill] sm:$0xff] %v10713_v38  ;;  %v9010_v39 = vpop.f32.mrb[15].mxu0 }
 0x33c   :  { %v9017_v41 = vpop.f32.mrb[16].mxu0 }
 0x33d   :  { %v1747_v42 = vpop.f32.mrb[17].mxu0  ;;  %v10720_v46 = vadd.f32 %v9017_v41, %v8482_v40 }
 0x33e   :  { %v10718_v43 = vadd.f32 %v8482_v40, %v1747_v42  ;;  %v9018_v44 = vpop.f32.mrb[18].mxu0 }
 0x33f   :  { %v1750_v45 = vpop.f32.mrb[19].mxu0  ;;  %v10726_v49 = vadd.f32 %v9018_v44, %v8482_v40  ;;  %v1820_v52 = vsel %vm1090_vm3, %v10720_v46, 0.0 }
 0x340   :  { %v10722_v47 = vadd.f32 %v8482_v40, %v1750_v45  ;;  %v1814_v48 = vsel %vm1090_vm3, %v10718_v43, 0.0 }
 0x341   :  { %1815 = vadd.xlane.f32.xlu0 %v1814_v48  ;;  %v1823_v56 = vsel %vm1090_vm3, %v10726_v49, 0.0 }
 0x342   :  { %v1817_v50 = vsel %vm1090_vm3, %v10722_v47, 0.0 }
 0x343   :  { %1818 = vadd.xlane.f32.xlu1 %v1817_v50 }
 0x344   :  { %v9021_v51 = vpop.f32.mrb[20].mxu0 }
 0x345   :  { %v1763_v53 = vpop.f32.mrb[21].mxu0  ;;  %1821 = vadd.xlane.f32.xlu0 %v1820_v52  ;;  %v10736_v58 = vadd.f32 %v9021_v51, %v8482_v40 }
 0x346   :  { %v10732_v54 = vadd.f32 %v8482_v40, %v1763_v53  ;;  %v9022_v55 = vpop.f32.mrb[22].mxu0 }
 0x347   :  { %v1766_v57 = vpop.f32.mrb[23].mxu0  ;;  %1824 = vadd.xlane.f32.xlu1 %v1823_v56  ;;  %v10742_v61 = vadd.f32 %v9022_v55, %v8482_v40  ;;  %v1832_v0 = vsel %vm1090_vm3, %v10736_v58, 0.0 }
 0x348   :  { %v10738_v59 = vadd.f32 %v8482_v40, %v1766_v57  ;;  %v1826_v60 = vsel %vm1090_vm3, %v10732_v54, 0.0 }
 0x349   :  { %1827 = vadd.xlane.f32.xlu0 %v1826_v60  ;;  %v1835_v4 = vsel %vm1090_vm3, %v10742_v61, 0.0 }
 0x34a   :  { %v1829_v62 = vsel %vm1090_vm3, %v10738_v59, 0.0 }
 0x34b   :  { %1830 = vadd.xlane.f32.xlu1 %v1829_v62 }
 0x34c   :  { %v9025_v63 = vpop.f32.mrb[24].mxu0 }
 0x34d   :  { %v1779_v1 = vpop.f32.mrb[25].mxu0  ;;  %1833 = vadd.xlane.f32.xlu0 %v1832_v0  ;;  %v10752_v8 = vadd.f32 %v9025_v63, %v8482_v40 }
 0x34e   :  { %v10748_v2 = vadd.f32 %v8482_v40, %v1779_v1  ;;  %v9026_v3 = vpop.f32.mrb[26].mxu0 }
 0x34f   :  { %v1782_v5 = vpop.f32.mrb[27].mxu0  ;;  %1836 = vadd.xlane.f32.xlu1 %v1835_v4  ;;  %v10758_v11 = vadd.f32 %v9026_v3, %v8482_v40  ;;  %v1844_v15 = vsel %vm1090_vm3, %v10752_v8, 0.0 }
 0x350   :  { %v10754_v9 = vadd.f32 %v8482_v40, %v1782_v5  ;;  %v1838_v10 = vsel %vm1090_vm3, %v10748_v2, 0.0 }
 0x351   :  { %1839 = vadd.xlane.f32.xlu0 %v1838_v10  ;;  %v1847_v20 = vsel %vm1090_vm3, %v10758_v11, 0.0 }
 0x352   :  { %v1841_v13 = vsel %vm1090_vm3, %v10754_v9, 0.0 }
 0x353   :  { %1842 = vadd.xlane.f32.xlu1 %v1841_v13 }
 0x354   :  { %v9029_v14 = vpop.f32.mrb[28].mxu0 }
 0x355   :  { %v1795_v17 = vpop.f32.mrb[29].mxu0  ;;  %1845 = vadd.xlane.f32.xlu0 %v1844_v15  ;;  %v10768_v12 = vadd.f32 %v9029_v14, %v8482_v40 }
 0x356   :  { %v10764_v18 = vadd.f32 %v8482_v40, %v1795_v17  ;;  %v9030_v19 = vpop.f32.mrb[30].mxu0 }
 0x357   :  { %v1798_v21 = vpop.f32.mrb[31].mxu0  ;;  %1848 = vadd.xlane.f32.xlu1 %v1847_v20  ;;  %v10774_v23 = vadd.f32 %v9030_v19, %v8482_v40  ;;  %v1856_v28 = vsel %vm1090_vm3, %v10768_v12, 0.0 }
 0x358   :  { %v10770_v16 = vadd.f32 %v8482_v40, %v1798_v21  ;;  %v1850_v22 = vsel %vm1090_vm3, %v10764_v18, 0.0 }
 0x359   :  { %1851 = vadd.xlane.f32.xlu0 %v1850_v22  ;;  %v1859_v37 = vsel %vm1090_vm3, %v10774_v23, 0.0 }
 0x35a   :  { %v1853_v24 = vsel %vm1090_vm3, %v10770_v16, 0.0 }
 0x35b   :  { %1854 = vadd.xlane.f32.xlu1 %v1853_v24 }
 0x35c   :  { %v9057_v27 = vpop.f32.mrb[32].mxu0 }
 0x35d   :  { %v2423_v30 = vpop.f32.mrb[33].mxu0  ;;  %1857 = vadd.xlane.f32.xlu0 %v1856_v28  ;;  %v10787_v40 = vadd.f32 %v9057_v27, %v8510_v26 }
 0x35e   :  { %v10783_v32 = vadd.f32 %v8510_v26, %v2423_v30  ;;  %v9058_v34 = vpop.f32.mrb[34].mxu0 }
 0x35f   :  { %v2426_v39 = vpop.f32.mrb[35].mxu0  ;;  %1860 = vadd.xlane.f32.xlu1 %v1859_v37  ;;  %v10793_v44 = vadd.f32 %v9058_v34, %v8510_v26  ;;  %v2496_v50 = vsel %vm1090_vm3, %v10787_v40, 0.0 }
 0x360   :  { %v10789_v41 = vadd.f32 %v8510_v26, %v2426_v39  ;;  %v2490_v42 = vsel %vm1090_vm3, %v10783_v32, 0.0 }
 0x361   :  { %2491 = vadd.xlane.f32.xlu0 %v2490_v42  ;;  %v2499_v55 = vsel %vm1090_vm3, %v10793_v44, 0.0 }
 0x362   :  { %v2493_v45 = vsel %vm1090_vm3, %v10789_v41, 0.0 }
 0x363   :  { %2494 = vadd.xlane.f32.xlu1 %v2493_v45 }
 0x364   :  { %v9061_v48 = vpop.f32.mrb[36].mxu0 }
 0x365   :  { %v2439_v51 = vpop.f32.mrb[37].mxu0  ;;  %2497 = vadd.xlane.f32.xlu0 %v2496_v50  ;;  %v10803_v57 = vadd.f32 %v9061_v48, %v8510_v26 }
 0x366   :  { %v10799_v52 = vadd.f32 %v8510_v26, %v2439_v51  ;;  %v9062_v53 = vpop.f32.mrb[38].mxu0 }
 0x367   :  { %v2442_v56 = vpop.f32.mrb[39].mxu0  ;;  %2500 = vadd.xlane.f32.xlu1 %v2499_v55  ;;  %v10809_v63 = vadd.f32 %v9062_v53, %v8510_v26  ;;  %v2508_v3 = vsel %vm1090_vm3, %v10803_v57, 0.0 }
 0x368   :  { %v10805_v60 = vadd.f32 %v8510_v26, %v2442_v56  ;;  %v2502_v62 = vsel %vm1090_vm3, %v10799_v52, 0.0 }
 0x369   :  { %2503 = vadd.xlane.f32.xlu0 %v2502_v62  ;;  %v2511_v13 = vsel %vm1090_vm3, %v10809_v63, 0.0 }
 0x36a   :  { %v2505_v0 = vsel %vm1090_vm3, %v10805_v60, 0.0 }
 0x36b   :  { %2506 = vadd.xlane.f32.xlu1 %v2505_v0 }
 0x36c   :  { %v9065_v1 = vpop.f32.mrb[40].mxu0 }
 0x36d   :  { %v2455_v4 = vpop.f32.mrb[41].mxu0  ;;  %2509 = vadd.xlane.f32.xlu0 %v2508_v3  ;;  %v10819_v15 = vadd.f32 %v9065_v1, %v8510_v26 }
 0x36e   :  { %v10815_v5 = vadd.f32 %v8510_v26, %v2455_v4  ;;  %v9066_v10 = vpop.f32.mrb[42].mxu0 }
 0x36f   :  { %v2458_v14 = vpop.f32.mrb[43].mxu0  ;;  %2512 = vadd.xlane.f32.xlu1 %v2511_v13  ;;  %v10825_v20 = vadd.f32 %v9066_v10, %v8510_v26  ;;  %v2520_v24 = vsel %vm1090_vm3, %v10819_v15, 0.0 }
 0x370   :  { %v10821_v17 = vadd.f32 %v8510_v26, %v2458_v14  ;;  %v2514_v19 = vsel %vm1090_vm3, %v10815_v5, 0.0 }
 0x371   :  { %2515 = vadd.xlane.f32.xlu0 %v2514_v19  ;;  %v2523_v34 = vsel %vm1090_vm3, %v10825_v20, 0.0 }
 0x372   :  { %v2517_v21 = vsel %vm1090_vm3, %v10821_v17, 0.0 }
 0x373   :  { %2518 = vadd.xlane.f32.xlu1 %v2517_v21 }
 0x374   :  { %v9069_v22 = vpop.f32.mrb[44].mxu0 }
 0x375   :  { %v2471_v27 = vpop.f32.mrb[45].mxu0  ;;  %2521 = vadd.xlane.f32.xlu0 %v2520_v24  ;;  %v10835_v39 = vadd.f32 %v9069_v22, %v8510_v26 }
 0x376   :  { %v10831_v28 = vadd.f32 %v8510_v26, %v2471_v27  ;;  %v9070_v30 = vpop.f32.mrb[46].mxu0 }
 0x377   :  { %v2474_v37 = vpop.f32.mrb[47].mxu0  ;;  %2524 = vadd.xlane.f32.xlu1 %v2523_v34  ;;  %v10841_v48 = vadd.f32 %v9070_v30, %v8510_v26  ;;  %v2532_v51 = vsel %vm1090_vm3, %v10835_v39, 0.0 }
 0x378   :  { %v10837_v42 = vadd.f32 %v8510_v26, %v2474_v37  ;;  %v2526_v45 = vsel %vm1090_vm3, %v10831_v28, 0.0 }
 0x379   :  { %2527 = vadd.xlane.f32.xlu0 %v2526_v45  ;;  %v2535_v53 = vsel %vm1090_vm3, %v10841_v48, 0.0 }
 0x37a   :  { %v2529_v50 = vsel %vm1090_vm3, %v10837_v42, 0.0 }
 0x37b   :  { %2530 = vadd.xlane.f32.xlu1 %v2529_v50 }
 0x37d   :  { %2533 = vadd.xlane.f32.xlu0 %v2532_v51 }
 0x37f   :  { %2536 = vadd.xlane.f32.xlu1 %v2535_v53 }
 0x3ce   :  { %v1816_v55 = vpop.xlane.xlu0 %1815 }
 0x3cf   :  { %v1862_v56 = vmul.f32 0.03125, %v1816_v55 }
 0x3d0   :  { %v1819_v62 = vpop.xlane.xlu1 %1818 }
 0x3d1   :  { %v10850_v0 = vsub.f32 %v10718_v43, %v1862_v56  ;;  %v1863_v26 = vmul.f32 0.03125, %v1819_v62 }
 0x3d2   :  { %v1822_v1 = vpop.xlane.xlu0 %1821 }
 0x3d3   :  { %v10853_v3 = vsub.f32 %v10722_v47, %v1863_v26  ;;  %v1864_v4 = vmul.f32 0.03125, %v1822_v1  ;;  %v1894_v10 = vmul.f32 %v10850_v0, %v10850_v0 }
 0x3d4   :  { %v1825_v13 = vpop.xlane.xlu1 %1824 }
 0x3d5   :  { %v10858_v14 = vsub.f32 %v10720_v46, %v1864_v4  ;;  %v1865_v19 = vmul.f32 0.03125, %v1825_v13  ;;  %v1910_v21 = vsel %vm1090_vm3, %v1894_v10, 0.0  ;;  %v1895_v43 = vmul.f32 %v10853_v3, %v10853_v3 }
 0x3d6   :  { %1911 = vadd.xlane.f32.xlu0 %v1910_v21  ;;  %v1828_v22 = vpop.xlane.xlu0 %1827 }
 0x3d7   :  { %v10864_v24 = vsub.f32 %v10726_v49, %v1865_v19  ;;  %v1866_v47 = vmul.f32 0.03125, %v1828_v22  ;;  %v1913_v27 = vsel %vm1090_vm3, %v1895_v43, 0.0  ;;  %v1896_v30 = vmul.f32 %v10858_v14, %v10858_v14 }
 0x3d8   :  { %1914 = vadd.xlane.f32.xlu1 %v1913_v27  ;;  %v1831_v46 = vpop.xlane.xlu1 %1830 }
 0x3d9   :  { %v10870_v34 = vsub.f32 %v10732_v54, %v1866_v47  ;;  %v1867_v37 = vmul.f32 0.03125, %v1831_v46  ;;  %v1916_v45 = vsel %vm1090_vm3, %v1896_v30, 0.0  ;;  %v1897_v50 = vmul.f32 %v10864_v24, %v10864_v24 }
 0x3da   :  { %1917 = vadd.xlane.f32.xlu0 %v1916_v45  ;;  %v1834_v49 = vpop.xlane.xlu0 %1833 }
 0x3db   :  { %v10876_v51 = vsub.f32 %v10738_v59, %v1867_v37  ;;  %v1868_v53 = vmul.f32 0.03125, %v1834_v49  ;;  %v1919_v55 = vsel %vm1090_vm3, %v1897_v50, 0.0  ;;  %v1898_v56 = vmul.f32 %v10870_v34, %v10870_v34 }
 0x3dc   :  { %1920 = vadd.xlane.f32.xlu1 %v1919_v55  ;;  %v1837_v54 = vpop.xlane.xlu1 %1836 }
 0x3dd   :  { %v10882_v62 = vsub.f32 %v10736_v58, %v1868_v53  ;;  %v1869_v26 = vmul.f32 0.03125, %v1837_v54  ;;  %v1922_v1 = vsel %vm1090_vm3, %v1898_v56, 0.0  ;;  %v1899_v4 = vmul.f32 %v10876_v51, %v10876_v51 }
 0x3de   :  { %1923 = vadd.xlane.f32.xlu0 %v1922_v1  ;;  %v1840_v59 = vpop.xlane.xlu0 %1839 }
 0x3df   :  { %v10888_v10 = vsub.f32 %v10742_v61, %v1869_v26  ;;  %v1870_v13 = vmul.f32 0.03125, %v1840_v59  ;;  %v1925_v19 = vsel %vm1090_vm3, %v1899_v4, 0.0  ;;  %v1900_v21 = vmul.f32 %v10882_v62, %v10882_v62 }
 0x3e0   :  { %1926 = vadd.xlane.f32.xlu1 %v1925_v19  ;;  %v1843_v58 = vpop.xlane.xlu1 %1842 }
 0x3e1   :  { %v10894_v43 = vsub.f32 %v10748_v2, %v1870_v13  ;;  %v1871_v22 = vmul.f32 0.03125, %v1843_v58  ;;  %v1928_v47 = vsel %vm1090_vm3, %v1900_v21, 0.0  ;;  %v1901_v27 = vmul.f32 %v10888_v10, %v10888_v10 }
 0x3e2   :  { %1929 = vadd.xlane.f32.xlu0 %v1928_v47  ;;  %v1846_v61 = vpop.xlane.xlu0 %1845 }
 0x3e3   :  { %v10900_v30 = vsub.f32 %v10754_v9, %v1871_v22  ;;  %v1872_v46 = vmul.f32 0.03125, %v1846_v61  ;;  %v1931_v37 = vsel %vm1090_vm3, %v1901_v27, 0.0  ;;  %v1902_v45 = vmul.f32 %v10894_v43, %v10894_v43 }
 0x3e4   :  { %1932 = vadd.xlane.f32.xlu1 %v1931_v37  ;;  %v1849_v2 = vpop.xlane.xlu1 %1848 }
 0x3e5   :  { %v10906_v50 = vsub.f32 %v10752_v8, %v1872_v46  ;;  %v1873_v49 = vmul.f32 0.03125, %v1849_v2  ;;  %v1934_v53 = vsel %vm1090_vm3, %v1902_v45, 0.0  ;;  %v1903_v55 = vmul.f32 %v10900_v30, %v10900_v30 }
 0x3e6   :  { %1935 = vadd.xlane.f32.xlu0 %v1934_v53  ;;  %v1852_v9 = vpop.xlane.xlu0 %1851 }
 0x3e7   :  { %v10912_v56 = vsub.f32 %v10758_v11, %v1873_v49  ;;  %v1874_v54 = vmul.f32 0.03125, %v1852_v9  ;;  %v1937_v26 = vsel %vm1090_vm3, %v1903_v55, 0.0  ;;  %v1904_v1 = vmul.f32 %v10906_v50, %v10906_v50 }
 0x3e8   :  { %1938 = vadd.xlane.f32.xlu1 %v1937_v26  ;;  %v1855_v8 = vpop.xlane.xlu1 %1854 }
 0x3e9   :  { %v10918_v4 = vsub.f32 %v10764_v18, %v1874_v54  ;;  %v1875_v59 = vmul.f32 0.03125, %v1855_v8  ;;  %v1940_v13 = vsel %vm1090_vm3, %v1904_v1, 0.0  ;;  %v1905_v19 = vmul.f32 %v10912_v56, %v10912_v56 }
 0x3ea   :  { %1941 = vadd.xlane.f32.xlu0 %v1940_v13  ;;  %v1858_v11 = vpop.xlane.xlu0 %1857 }
 0x3eb   :  { %v10924_v21 = vsub.f32 %v10770_v16, %v1875_v59  ;;  %v1876_v58 = vmul.f32 0.03125, %v1858_v11  ;;  %v1943_v22 = vsel %vm1090_vm3, %v1905_v19, 0.0  ;;  %v1906_v47 = vmul.f32 %v10918_v4, %v10918_v4 }
 0x3ec   :  { %1944 = vadd.xlane.f32.xlu1 %v1943_v22  ;;  %v1861_v18 = vpop.xlane.xlu1 %1860 }
 0x3ed   :  { %v10930_v27 = vsub.f32 %v10768_v12, %v1876_v58  ;;  %v1877_v61 = vmul.f32 0.03125, %v1861_v18  ;;  %v1946_v46 = vsel %vm1090_vm3, %v1906_v47, 0.0  ;;  %v1907_v37 = vmul.f32 %v10924_v21, %v10924_v21 }
 0x3ee   :  { %1947 = vadd.xlane.f32.xlu0 %v1946_v46  ;;  %v2492_v16 = vpop.xlane.xlu0 %2491 }
 0x3ef   :  { %v10936_v45 = vsub.f32 %v10774_v23, %v1877_v61  ;;  %v2538_v2 = vmul.f32 0.03125, %v2492_v16  ;;  %v1949_v49 = vsel %vm1090_vm3, %v1907_v37, 0.0  ;;  %v1908_v53 = vmul.f32 %v10930_v27, %v10930_v27 }
 0x3f0   :  { %1950 = vadd.xlane.f32.xlu1 %v1949_v49  ;;  %v2495_v12 = vpop.xlane.xlu1 %2494 }
 0x3f1   :  { %v10942_v55 = vsub.f32 %v10783_v32, %v2538_v2  ;;  %v2539_v9 = vmul.f32 0.03125, %v2495_v12  ;;  %v1952_v54 = vsel %vm1090_vm3, %v1908_v53, 0.0  ;;  %v1909_v26 = vmul.f32 %v10936_v45, %v10936_v45 }
 0x3f2   :  { %1953 = vadd.xlane.f32.xlu0 %v1952_v54  ;;  %v2498_v23 = vpop.xlane.xlu0 %2497 }
 0x3f3   :  { %v10948_v1 = vsub.f32 %v10789_v41, %v2539_v9  ;;  %v2540_v8 = vmul.f32 0.03125, %v2498_v23  ;;  %v1955_v59 = vsel %vm1090_vm3, %v1909_v26, 0.0  ;;  %v2570_v13 = vmul.f32 %v10942_v55, %v10942_v55 }
 0x3f4   :  { %1956 = vadd.xlane.f32.xlu1 %v1955_v59  ;;  %v2501_v32 = vpop.xlane.xlu1 %2500 }
 0x3f5   :  { %v10954_v19 = vsub.f32 %v10787_v40, %v2540_v8  ;;  %v2541_v11 = vmul.f32 0.03125, %v2501_v32  ;;  %v2586_v58 = vsel %vm1090_vm3, %v2570_v13, 0.0  ;;  %v2571_v22 = vmul.f32 %v10948_v1, %v10948_v1 }
 0x3f6   :  { %2587 = vadd.xlane.f32.xlu0 %v2586_v58  ;;  %v2504_v41 = vpop.xlane.xlu0 %2503 }
 0x3f7   :  { %v10960_v47 = vsub.f32 %v10793_v44, %v2541_v11  ;;  %v2542_v18 = vmul.f32 0.03125, %v2504_v41  ;;  %v2589_v61 = vsel %vm1090_vm3, %v2571_v22, 0.0  ;;  %v2572_v46 = vmul.f32 %v10954_v19, %v10954_v19 }
 0x3f8   :  { %2590 = vadd.xlane.f32.xlu1 %v2589_v61  ;;  %v2507_v40 = vpop.xlane.xlu1 %2506 }
 0x3f9   :  { %v10966_v37 = vsub.f32 %v10799_v52, %v2542_v18  ;;  %v2543_v16 = vmul.f32 0.03125, %v2507_v40  ;;  %v2592_v2 = vsel %vm1090_vm3, %v2572_v46, 0.0  ;;  %v2573_v49 = vmul.f32 %v10960_v47, %v10960_v47 }
 0x3fa   :  { %2593 = vadd.xlane.f32.xlu0 %v2592_v2  ;;  %v2510_v44 = vpop.xlane.xlu0 %2509 }
 0x3fb   :  { %v10972_v53 = vsub.f32 %v10805_v60, %v2543_v16  ;;  %v2544_v12 = vmul.f32 0.03125, %v2510_v44  ;;  %v2595_v9 = vsel %vm1090_vm3, %v2573_v49, 0.0  ;;  %v2574_v54 = vmul.f32 %v10966_v37, %v10966_v37 }
 0x3fc   :  { %2596 = vadd.xlane.f32.xlu1 %v2595_v9  ;;  %v2513_v52 = vpop.xlane.xlu1 %2512 }
 0x3fd   :  { %v10978_v26 = vsub.f32 %v10803_v57, %v2544_v12  ;;  %v2545_v23 = vmul.f32 0.03125, %v2513_v52  ;;  %v2598_v8 = vsel %vm1090_vm3, %v2574_v54, 0.0  ;;  %v2575_v59 = vmul.f32 %v10972_v53, %v10972_v53 }
 0x3fe   :  { %2599 = vadd.xlane.f32.xlu0 %v2598_v8  ;;  %v2516_v60 = vpop.xlane.xlu0 %2515 }
 0x3ff   :  { %v10984_v13 = vsub.f32 %v10809_v63, %v2545_v23  ;;  %v2546_v32 = vmul.f32 0.03125, %v2516_v60  ;;  %v2601_v11 = vsel %vm1090_vm3, %v2575_v59, 0.0  ;;  %v2576_v58 = vmul.f32 %v10978_v26, %v10978_v26 }
 0x400   :  { %2602 = vadd.xlane.f32.xlu1 %v2601_v11  ;;  %v2519_v57 = vpop.xlane.xlu1 %2518 }
 0x401   :  { %v10990_v22 = vsub.f32 %v10815_v5, %v2546_v32  ;;  %v2547_v41 = vmul.f32 0.03125, %v2519_v57  ;;  %v2604_v18 = vsel %vm1090_vm3, %v2576_v58, 0.0  ;;  %v2577_v61 = vmul.f32 %v10984_v13, %v10984_v13 }
 0x402   :  { %2605 = vadd.xlane.f32.xlu0 %v2604_v18  ;;  %v2522_v63 = vpop.xlane.xlu0 %2521 }
 0x403   :  { %v10996_v46 = vsub.f32 %v10821_v17, %v2547_v41  ;;  %v2548_v40 = vmul.f32 0.03125, %v2522_v63  ;;  %v2607_v16 = vsel %vm1090_vm3, %v2577_v61, 0.0  ;;  %v2578_v2 = vmul.f32 %v10990_v22, %v10990_v22 }
 0x404   :  { %2608 = vadd.xlane.f32.xlu1 %v2607_v16  ;;  %v2525_v5 = vpop.xlane.xlu1 %2524 }
 0x405   :  { %v11002_v49 = vsub.f32 %v10819_v15, %v2548_v40  ;;  %v2549_v44 = vmul.f32 0.03125, %v2525_v5  ;;  %v2610_v12 = vsel %vm1090_vm3, %v2578_v2, 0.0  ;;  %v2579_v9 = vmul.f32 %v10996_v46, %v10996_v46 }
 0x406   :  { %2611 = vadd.xlane.f32.xlu0 %v2610_v12  ;;  %v2528_v17 = vpop.xlane.xlu0 %2527 }
 0x407   :  { %v11008_v54 = vsub.f32 %v10825_v20, %v2549_v44  ;;  %v2550_v52 = vmul.f32 0.03125, %v2528_v17  ;;  %v2613_v23 = vsel %vm1090_vm3, %v2579_v9, 0.0  ;;  %v2580_v8 = vmul.f32 %v11002_v49, %v11002_v49  ;;  %v8468_v44 = vld [vmem:[%s14242_s13 + $0x1] ss:$0 sm:$0xff] }
 0x408   :  { %2614 = vadd.xlane.f32.xlu1 %v2613_v23  ;;  %v2531_v15 = vpop.xlane.xlu1 %2530  ;;  %v9447_v23 = vld [vmem:[#allocation3 + $0x40] sm:$0xff]  }
 0x409   :  { %v11014_v59 = vsub.f32 %v10831_v28, %v2550_v52  ;;  %v2551_v60 = vmul.f32 0.03125, %v2531_v15  ;;  %v2616_v32 = vsel %vm1090_vm3, %v2580_v8, 0.0  ;;  %v2581_v11 = vmul.f32 %v11008_v54, %v11008_v54  ;;  %9031 = vmatprep.subr.bf16.mxu1 %v9447_v23 }
 0x40a   :  { %2617 = vadd.xlane.f32.xlu0 %v2616_v32  ;;  %v2534_v20 = vpop.xlane.xlu0 %2533  ;;  %v11059_v15 = vadd.f32 %v8468_v44, %v10709_v33  ;;  %9032 = vmatpush3.bf16.msra.mxu1 %v9447_v23  ;;  %v9448_v32 = vld [vmem:[#allocation3 + $0x48] sm:$0xff]  }
 0x40b   :  { %v11020_v58 = vsub.f32 %v10837_v42, %v2551_v60  ;;  %v2552_v57 = vmul.f32 0.03125, %v2534_v20  ;;  %v2619_v41 = vsel %vm1090_vm3, %v2581_v11, 0.0  ;;  %v2582_v18 = vmul.f32 %v11014_v59, %v11014_v59  ;;  %v8461_v42 = vld [vmem:[%s14242_s13] ss:$0 sm:$0xff]  ;;  %9033 = vmatprep.subr.bf16.mxu1 %v9448_v32  ;;  %v11067_v11 = vld [vmem:[#allocation3 + $0x60] sm:$0xff]  }
 0x40c   :  { %2620 = vadd.xlane.f32.xlu1 %v2619_v41  ;;  %v2537_v28 = vpop.xlane.xlu1 %2536  ;;  %v11044_v12 = vadd.f32 %v8461_v42, %v10703_v25  ;;  %v11054_v8 = vadd.f32 %v8461_v42, %v10705_v29  ;;  %v1337_v29 = vsel %vm1090_vm3, %v11059_v15, 0.0 }
 0x40d   :  { %v11026_v61 = vsub.f32 %v10835_v39, %v2552_v57  ;;  %v2553_v63 = vmul.f32 0.03125, %v2537_v28  ;;  %v2622_v40 = vsel %vm1090_vm3, %v2582_v18, 0.0  ;;  %v2583_v16 = vmul.f32 %v11020_v58, %v11020_v58 }
 0x40e   :  { %2623 = vadd.xlane.f32.xlu0 %v2622_v40  ;;  %v1204_v25 = vsel %vm1090_vm3, %v11044_v12, 0.0  ;;  %9034 = vmatpush3.bf16.msra.mxu1 %v9448_v32 }
 0x40f   :  { %v11035_v2 = vsub.f32 %v10841_v48, %v2553_v63  ;;  %v2625_v5 = vsel %vm1090_vm3, %v2583_v16, 0.0  ;;  %v2584_v39 = vmul.f32 %v11026_v61, %v11026_v61  ;;  %v11050_v48 = vadd.f32 %v8468_v44, %v10707_v31  ;;  %9071 = vmatprep.subr.bf16.mxu1 %v11067_v11 }
 0x410   :  { %2626 = vadd.xlane.f32.xlu1 %v2625_v5  ;;  %v1207_v31 = vsel %vm1090_vm3, %v11054_v8, 0.0 }
 0x411   :  { %14326 = vst [vmem:[#allocation13_spill] sm:$0xff] %v11035_v2  ;;  %v2628_v9 = vsel %vm1090_vm3, %v2584_v39, 0.0  ;;  %v2585_v17 = vmul.f32 %v11035_v2, %v11035_v2  ;;  %v1334_v60 = vsel %vm1090_vm3, %v11050_v48, 0.0 }
 0x412   :  { %2629 = vadd.xlane.f32.xlu0 %v2628_v9 }
 0x413   :  { %v2631_v52 = vsel %vm1090_vm3, %v2585_v17, 0.0 }
 0x414   :  { %2632 = vadd.xlane.f32.xlu1 %v2631_v52 }
 0x416   :  { %1205 = vadd.xlane.f32.xlu0 %v1204_v25 }
 0x418   :  { %1335 = vadd.xlane.f32.xlu1 %v1334_v60 }
 0x41a   :  { %1208 = vadd.xlane.f32.xlu0 %v1207_v31 }
 0x41c   :  { %1338 = vadd.xlane.f32.xlu1 %v1337_v29 }
 0x463   :  { %v1912_v33 = vpop.xlane.xlu0 %1911 }
 0x464   :  { %v1958_v20 = vmul.f32 0.03125, %v1912_v33  ;;  %v11073_v33 = vld [vmem:[%s14243_s14 + $0x2] ss:$0 sm:$0xff] }
 0x465   :  { %v1915_v57 = vpop.xlane.xlu1 %1914 }
 0x466   :  { %v1974_v41 = vadd.f32 1e-05, %v1958_v20  ;;  %v1959_v18 = vmul.f32 0.03125, %v1915_v57 }
 0x467   :  { %v1918_v28 = vpop.xlane.xlu0 %1917 }
 0x468   :  { %9487 = vrsqrt.f32 %v1974_v41  ;;  %v1975_v63 = vadd.f32 1e-05, %v1959_v18  ;;  %v1960_v40 = vmul.f32 0.03125, %v1918_v28 }
 0x469   :  { %v1921_v16 = vpop.xlane.xlu1 %1920 }
 0x46a   :  { %9489 = vrsqrt.f32 %v1975_v63  ;;  %v1976_v42 = vadd.f32 1e-05, %v1960_v40  ;;  %v1961_v5 = vmul.f32 0.03125, %v1921_v16  ;;  %v11079_v63 = vld [vmem:[%s14244_s15 + $0x2] ss:$0 sm:$0xff] }
 0x46b   :  { %v1924_v39 = vpop.xlane.xlu0 %1923 }
 0x46c   :  { %9491 = vrsqrt.f32 %v1976_v42  ;;  %v1977_v44 = vadd.f32 1e-05, %v1961_v5  ;;  %v1962_v9 = vmul.f32 0.03125, %v1924_v39 }
 0x46d   :  { %v1927_v17 = vpop.xlane.xlu1 %1926 }
 0x46e   :  { %9493 = vrsqrt.f32 %v1977_v44  ;;  %v1978_v52 = vadd.f32 1e-05, %v1962_v9  ;;  %v1963_v23 = vmul.f32 0.03125, %v1927_v17 }
 0x46f   :  { %v1930_v25 = vpop.xlane.xlu0 %1929 }
 0x470   :  { %9495 = vrsqrt.f32 %v1978_v52  ;;  %v1979_v60 = vadd.f32 1e-05, %v1963_v23  ;;  %v1964_v31 = vmul.f32 0.03125, %v1930_v25 }
 0x471   :  { %v1933_v29 = vpop.xlane.xlu1 %1932 }
 0x472   :  { %v9488_v32 = vpop.eup %9487  ;;  %9497 = vrsqrt.f32 %v1979_v60  ;;  %v1980_v20 = vadd.f32 1e-05, %v1964_v31  ;;  %v1965_v57 = vmul.f32 0.03125, %v1933_v29 }
 0x473   :  { %v2006_v41 = vmul.f32 %v9488_v32, %v10850_v0  ;;  %v1936_v18 = vpop.xlane.xlu0 %1935 }
 0x474   :  { %v9490_v28 = vpop.eup %9489  ;;  %9499 = vrsqrt.f32 %v1980_v20  ;;  %v1981_v40 = vadd.f32 1e-05, %v1965_v57  ;;  %v1966_v16 = vmul.f32 0.03125, %v1936_v18 }
 0x475   :  { %v2007_v42 = vmul.f32 %v9490_v28, %v10853_v3  ;;  %v1939_v5 = vpop.xlane.xlu1 %1938  ;;  %v2028_v39 = vmul.f32 %v11073_v33, %v2006_v41 }
 0x476   :  { %v9492_v44 = vpop.eup %9491  ;;  %9501 = vrsqrt.f32 %v1981_v40  ;;  %v1982_v9 = vadd.f32 1e-05, %v1966_v16  ;;  %v1967_v17 = vmul.f32 0.03125, %v1939_v5 }
 0x477   :  { %v2008_v0 = vmul.f32 %v9492_v44, %v10858_v14  ;;  %v1942_v52 = vpop.xlane.xlu0 %1941  ;;  %v2029_v23 = vmul.f32 %v11073_v33, %v2007_v42  ;;  %v11086_v25 = vadd.f32 %v11079_v63, %v2028_v39 }
 0x478   :  { %v9494_v60 = vpop.eup %9493  ;;  %9503 = vrsqrt.f32 %v1982_v9  ;;  %v1983_v31 = vadd.f32 1e-05, %v1967_v17  ;;  %v1968_v29 = vmul.f32 0.03125, %v1942_v52 }
 0x479   :  { %v2030_v3 = vmul.f32 %v11073_v33, %v2008_v0  ;;  %v2009_v32 = vmul.f32 %v9494_v60, %v10864_v24  ;;  %v1945_v20 = vpop.xlane.xlu1 %1944  ;;  %v11091_v57 = vadd.f32 %v11079_v63, %v2029_v23  ;;  %v2066_v14 = vmin.f32 %v11086_v25, 20.0 }
 0x47a   :  { %v9496_v41 = vpop.eup %9495  ;;  %9505 = vrsqrt.f32 %v1983_v31  ;;  %v1984_v18 = vadd.f32 1e-05, %v1968_v29  ;;  %v1969_v28 = vmul.f32 0.03125, %v1945_v20 }
 0x47b   :  { %v11095_v40 = vadd.f32 %v11079_v63, %v2030_v3  ;;  %v2031_v16 = vmul.f32 %v11073_v33, %v2009_v32  ;;  %v2010_v42 = vmul.f32 %v9496_v41, %v10870_v34  ;;  %v1948_v5 = vpop.xlane.xlu0 %1947  ;;  %v2067_v24 = vmin.f32 %v11091_v57, 20.0 }
 0x47c   :  { %v9498_v39 = vpop.eup %9497  ;;  %9507 = vrsqrt.f32 %v1984_v18  ;;  %v1985_v44 = vadd.f32 1e-05, %v1969_v28  ;;  %v1970_v9 = vmul.f32 0.03125, %v1948_v5  ;;  %v2082_v17 = vmul.f32 1.442695, %v2066_v14 }
 0x47d   :  { %v2068_v0 = vmin.f32 %v11095_v40, 20.0  ;;  %v11102_v52 = vadd.f32 %v11079_v63, %v2031_v16  ;;  %v2011_v23 = vmul.f32 %v9498_v39, %v10876_v51  ;;  %v1951_v60 = vpop.xlane.xlu1 %1950  ;;  %v2084_v31 = vmul.f32 1.442695, %v2067_v24 }
 0x47e   :  { %v9500_v29 = vpop.eup %9499  ;;  %9509 = vrsqrt.f32 %v1985_v44  ;;  %v1986_v34 = vadd.f32 1e-05, %v1970_v9  ;;  %v1971_v3 = vmul.f32 0.03125, %v1951_v60  ;;  %v2032_v32 = vmul.f32 %v11073_v33, %v2010_v42 }
 0x47f   :  { %v2086_v20 = vmul.f32 1.442695, %v2068_v0  ;;  %v2069_v41 = vmin.f32 %v11102_v52, 20.0  ;;  %v2012_v14 = vmul.f32 %v9500_v29, %v10882_v62  ;;  %v1954_v18 = vpop.xlane.xlu0 %1953  ;;  %9511 = vpow2.f32 %v2082_v17 }
 0x480   :  { %v9502_v28 = vpop.eup %9501  ;;  %9513 = vrsqrt.f32 %v1986_v34  ;;  %v1987_v16 = vadd.f32 1e-05, %v1971_v3  ;;  %v1972_v5 = vmul.f32 0.03125, %v1954_v18  ;;  %v2033_v51 = vmul.f32 %v11073_v33, %v2011_v23 }
 0x481   :  { %9515 = vpow2.f32 %v2086_v20  ;;  %v2088_v24 = vmul.f32 1.442695, %v2069_v41  ;;  %v2013_v39 = vmul.f32 %v9502_v28, %v10888_v10  ;;  %v1957_v44 = vpop.xlane.xlu1 %1956  ;;  %v11111_v42 = vadd.f32 %v11079_v63, %v2032_v32 }
 0x482   :  { %v9504_v9 = vpop.eup %9503  ;;  %9517 = vrsqrt.f32 %v1987_v16  ;;  %v1973_v0 = vmul.f32 0.03125, %v1957_v44  ;;  %v11114_v62 = vadd.f32 %v11079_v63, %v2033_v51  ;;  %v2034_v23 = vmul.f32 %v11073_v33, %v2012_v14 }
 0x483   :  { %9519 = vpow2.f32 %v2088_v24  ;;  %v2588_v17 = vpop.xlane.xlu0 %2587  ;;  %v2070_v60 = vmin.f32 %v11111_v42, 20.0  ;;  %v1988_v34 = vadd.f32 1e-05, %v1972_v5  ;;  %v2035_v41 = vmul.f32 %v11073_v33, %v2013_v39 }
 0x484   :  { %v9506_v29 = vpop.eup %9505  ;;  %v2634_v3 = vmul.f32 0.03125, %v2588_v17  ;;  %v2071_v10 = vmin.f32 %v11114_v62, 20.0  ;;  %9521 = vpow2.f32 %v2084_v31  ;;  %v1989_v28 = vadd.f32 1e-05, %v1973_v0 }
 0x485   :  { %v2591_v20 = vpop.xlane.xlu1 %2590  ;;  %v2090_v32 = vmul.f32 1.442695, %v2070_v60  ;;  %v11121_v36 = vadd.f32 %v11079_v63, %v2034_v23  ;;  %v11124_v14 = vadd.f32 %v11079_v63, %v2035_v41  ;;  %v2014_v60 = vmul.f32 %v9504_v9, %v10894_v43 }
 0x486   :  { %v9508_v18 = vpop.eup %9507  ;;  %v2635_v16 = vmul.f32 0.03125, %v2591_v20  ;;  %v2092_v51 = vmul.f32 1.442695, %v2071_v10  ;;  %v2650_v24 = vadd.f32 1e-05, %v2634_v3  ;;  %v2015_v10 = vmul.f32 %v9506_v29, %v10900_v30 }
 0x487   :  { %v2594_v44 = vpop.xlane.xlu0 %2593  ;;  %9523 = vpow2.f32 %v2090_v32  ;;  %14327 = vst [vmem:[#allocation14_spill] sm:$0xff] %v11124_v14  ;;  %v2072_v0 = vmin.f32 %v11121_v36, 20.0  ;;  %v11130_v41 = vmul.f32 %v9508_v18, %v10906_v50  ;;  %v2073_v43 = vmin.f32 %v11124_v14, 20.0 }
 0x488   :  { %v9510_v5 = vpop.eup %9509  ;;  %9525 = vrsqrt.f32 %v1988_v34  ;;  %v2636_v17 = vmul.f32 0.03125, %v2594_v44  ;;  %v2651_v39 = vadd.f32 1e-05, %v2635_v16  ;;  %v2036_v50 = vmul.f32 %v11073_v33, %v2014_v60 }
 0x489   :  { %v9512_v31 = vpop.eup %9511  ;;  %v2597_v7 = vpop.xlane.xlu1 %2596  ;;  %9527 = vpow2.f32 %v2092_v51  ;;  %v11134_v30 = vmul.f32 %v9510_v5, %v10912_v56  ;;  %v2094_v29 = vmul.f32 1.442695, %v2072_v0  ;;  %v11140_v14 = vmul.f32 1.442695, %v2073_v43 }
 0x48a   :  { %v9514_v3 = vpop.eup %9513  ;;  %9529 = vrsqrt.f32 %v1989_v28  ;;  %v2652_v23 = vadd.f32 1e-05, %v2636_v17  ;;  %v2637_v20 = vmul.f32 0.03125, %v2597_v7  ;;  %v2114_v44 = vadd.f32 2.0, %v9512_v31 }
 0x48b   :  { %v9516_v32 = vpop.eup %9515  ;;  %9531 = vrsqrt.f32 %v2650_v24  ;;  %v2600_v34 = vpop.xlane.xlu0 %2599  ;;  %v11138_v35 = vmul.f32 %v9514_v3, %v10918_v4  ;;  %v11146_v60 = vmul.f32 %v11073_v33, %v2015_v10 }
 0x48c   :  { %v9518_v9 = vpop.eup %9517  ;;  %v2116_v16 = vadd.f32 2.0, %v9516_v32  ;;  %9533 = vrsqrt.f32 %v2652_v23  ;;  %v2653_v51 = vadd.f32 1e-05, %v2637_v20  ;;  %v2638_v6 = vmul.f32 0.03125, %v2600_v34 }
 0x48d   :  { %v9520_v38 = vpop.eup %9519  ;;  %9535 = vrsqrt.f32 %v2651_v39  ;;  %v2603_v7 = vpop.xlane.xlu1 %2602  ;;  %v2130_v34 = vmul.f32 %v9512_v31, %v2114_v44  ;;  %v11143_v39 = vmul.f32 %v9518_v9, %v10924_v21  ;;  %v11149_v44 = vadd.f32 %v11079_v63, %v2036_v50 }
 0x48e   :  { %v2132_v18 = vmul.f32 %v9516_v32, %v2116_v16  ;;  %v2117_v28 = vadd.f32 2.0, %v9520_v38  ;;  %9537 = vrsqrt.f32 %v2653_v51  ;;  %v2654_v24 = vadd.f32 1e-05, %v2638_v6  ;;  %v9522_v17 = vpop.eup %9521 }
 0x48f   :  { %v2639_v23 = vmul.f32 0.03125, %v2603_v7  ;;  %v2606_v20 = vpop.xlane.xlu0 %2605  ;;  %v2115_v51 = vadd.f32 2.0, %v9522_v17  ;;  %9539 = vpow2.f32 %v2094_v29  ;;  %v2162_v10 = vadd.f32 2.0, %v2130_v34 }
 0x490   :  { %v2164_v56 = vadd.f32 2.0, %v2132_v18  ;;  %v2133_v5 = vmul.f32 %v9520_v38, %v2117_v28  ;;  %v2640_v6 = vmul.f32 0.03125, %v2606_v20  ;;  %9541 = vrsqrt.f32 %v2654_v24 }
 0x491   :  { %v9524_v0 = vpop.eup %9523  ;;  %v2655_v32 = vadd.f32 1e-05, %v2639_v23  ;;  %v2609_v16 = vpop.xlane.xlu1 %2608  ;;  %v11151_v9 = vmul.f32 %v9522_v17, %v2115_v51  ;;  %v11157_v50 = vmul.f32 %v2130_v34, %v11086_v25  ;;  %v11167_v25 = vld [vmem:[%s14243_s14 + $0x3] ss:$0 sm:$0xff] }
 0x492   :  { %v9526_v4 = vpop.eup %9525  ;;  %v2165_v3 = vadd.f32 2.0, %v2133_v5  ;;  %v2641_v31 = vmul.f32 0.03125, %v2609_v16  ;;  %9543 = vrcp.f32 %v2164_v56  ;;  %v2656_v21 = vadd.f32 1e-05, %v2640_v6 }
 0x493   :  { %v9528_v38 = vpop.eup %9527  ;;  %v2612_v43 = vpop.xlane.xlu0 %2611  ;;  %v2118_v20 = vadd.f32 2.0, %v9524_v0  ;;  %v11154_v2 = vmul.f32 %v9526_v4, %v10930_v27  ;;  %v2163_v56 = vadd.f32 2.0, %v11151_v9 }
 0x494   :  { %v9530_v7 = vpop.eup %9529  ;;  %9545 = vrcp.f32 %v2165_v3  ;;  %v2657_v28 = vadd.f32 1e-05, %v2641_v31  ;;  %v2642_v23 = vmul.f32 0.03125, %v2612_v43  ;;  %v2119_v51 = vadd.f32 2.0, %v9528_v38 }
 0x495   :  { %v9532_v29 = vpop.eup %9531  ;;  %9547 = vrsqrt.f32 %v2655_v32  ;;  %v2615_v24 = vpop.xlane.xlu1 %2614  ;;  %v11161_v31 = vmul.f32 %v2132_v18, %v11095_v40  ;;  %v2134_v32 = vmul.f32 %v9524_v0, %v2118_v20  ;;  %v2149_v0 = vmul.f32 %v2133_v5, %v11102_v52 }
 0x496   :  { %v9534_v6 = vpop.eup %9533  ;;  %9549 = vrsqrt.f32 %v2656_v21  ;;  %v2658_v17 = vadd.f32 1e-05, %v2642_v23  ;;  %v2643_v16 = vmul.f32 0.03125, %v2615_v24  ;;  %v2135_v23 = vmul.f32 %v9528_v38, %v2119_v51 }
 0x497   :  { %v9536_v3 = vpop.eup %9535  ;;  %v2684_v43 = vmul.f32 %v9534_v6, %v10954_v19  ;;  %v2618_v27 = vpop.xlane.xlu0 %2617  ;;  %9551 = vrcp.f32 %v2162_v10  ;;  %v11170_v24 = vmul.f32 %v9530_v7, %v10936_v45  ;;  %v11178_v10 = vld [vmem:[%s14244_s15 + $0x3] ss:$0 sm:$0xff] }
 0x498   :  { %v9538_v4 = vpop.eup %9537  ;;  %9553 = vrsqrt.f32 %v2657_v28  ;;  %v2659_v34 = vadd.f32 1e-05, %v2643_v16  ;;  %v2644_v21 = vmul.f32 0.03125, %v2618_v27  ;;  %v2167_v16 = vadd.f32 2.0, %v2135_v23 }
 0x499   :  { %v2706_v40 = vmul.f32 %v11167_v25, %v2684_v43  ;;  %v2685_v19 = vmul.f32 %v9538_v4, %v10960_v47  ;;  %v2621_v18 = vpop.xlane.xlu1 %2620  ;;  %9555 = vrcp.f32 %v2163_v56  ;;  %v11180_v38 = vpop.eup %9539  ;;  %v2166_v56 = vadd.f32 2.0, %v2134_v32 }
 0x49a   :  { %9557 = vrsqrt.f32 %v2658_v17  ;;  %v2660_v28 = vadd.f32 1e-05, %v2644_v21  ;;  %v2645_v20 = vmul.f32 0.03125, %v2621_v18  ;;  %v9542_v6 = vpop.eup %9541  ;;  %v11187_v17 = vmul.f32 %v9532_v29, %v10942_v55 }
 0x49b   :  { %v11183_v45 = vadd.f32 %v11178_v10, %v2706_v40  ;;  %v2707_v7 = vmul.f32 %v11167_v25, %v2685_v19  ;;  %9559 = vrsqrt.f32 %v2659_v34  ;;  %v2624_v47 = vpop.xlane.xlu0 %2623  ;;  %v11194_v34 = vmul.f32 %v9536_v3, %v10948_v1 }
 0x49c   :  { %9561 = vrsqrt.f32 %v2660_v28  ;;  %v2661_v52 = vadd.f32 1e-05, %v2645_v20  ;;  %v2646_v5 = vmul.f32 0.03125, %v2624_v47  ;;  %v9544_v51 = vpop.eup %9543  ;;  %v2147_v55 = vmul.f32 %v11151_v9, %v11091_v57 }
 0x49d   :  { %v2744_v43 = vmin.f32 %v11183_v45, 20.0  ;;  %v11191_v27 = vadd.f32 %v11178_v10, %v2707_v7  ;;  %v2627_v4 = vpop.xlane.xlu1 %2626  ;;  %9563 = vrcp.f32 %v2166_v56  ;;  %v11201_v1 = vadd.f32 %v11079_v63, %v11146_v60 }
 0x49e   :  { %v9546_v21 = vpop.eup %9545  ;;  %9565 = vrsqrt.f32 %v2661_v52  ;;  %v2662_v40 = vadd.f32 1e-05, %v2646_v5  ;;  %v2647_v19 = vmul.f32 0.03125, %v2627_v4  ;;  %v2150_v4 = vmul.f32 %v2134_v32, %v11111_v42 }
 0x49f   :  { %14328 = vst [vmem:[#allocation15_spill] sm:$0xff] %v11191_v27  ;;  %v9548_v18 = vpop.eup %9547  ;;  %v2762_v28 = vmul.f32 1.442695, %v2744_v43  ;;  %v2745_v20 = vmin.f32 %v11191_v27, 20.0  ;;  %v2630_v29 = vpop.xlane.xlu0 %2629  ;;  %9567 = vrcp.f32 %v2167_v16  ;;  %v2197_v43 = vmul.f32 %v9546_v21, %v2149_v0 }
 0x4a0   :  { %v9550_v7 = vpop.eup %9549  ;;  %9569 = vrsqrt.f32 %v2662_v40  ;;  %v2663_v47 = vadd.f32 1e-05, %v2647_v19  ;;  %v2648_v56 = vmul.f32 0.03125, %v2630_v29  ;;  %v11205_v57 = vmul.f32 %v9542_v6, %v10966_v37 }
 0x4a1   :  { %v9552_v3 = vpop.eup %9551  ;;  %9571 = vpow2.f32 %v2762_v28  ;;  %v2764_v52 = vmul.f32 1.442695, %v2745_v20  ;;  %v2633_v5 = vpop.xlane.xlu1 %2632  ;;  %v2196_v9 = vmul.f32 %v9544_v51, %v11161_v31  ;;  %v2151_v16 = vmul.f32 %v2135_v23, %v11114_v62 }
 0x4a2   :  { %v9554_v27 = vpop.eup %9553  ;;  %9573 = vrsqrt.f32 %v2663_v47  ;;  %v11210_v60 = vmul.f32 %v9548_v18, %v10972_v53  ;;  %v2664_v19 = vadd.f32 1e-05, %v2648_v56  ;;  %v2074_v0 = vmin.f32 %v11149_v44, 20.0 }
 0x4a3   :  { %v9556_v40 = vpop.eup %9555  ;;  %9575 = vpow2.f32 %v2764_v52  ;;  %v1206_v28 = vpop.xlane.xlu0 %1205  ;;  %v2194_v42 = vmul.f32 %v9552_v3, %v11157_v50  ;;  %v2649_v37 = vmul.f32 0.03125, %v2633_v5  ;;  %v2211_v29 = vpack.c.bf16 %v2197_v43, %v2196_v9  ;;  %v9450_v5 = vld [vmem:[#allocation3 + $0x68] sm:$0xff]  }
 0x4a4   :  { %v9558_v21 = vpop.eup %9557  ;;  %v2195_v32 = vmul.f32 %v9556_v40, %v2147_v55  ;;  %v1210_v6 = vmul.f32 0.03125, %v1206_v28  ;;  %9577 = vpow2.f32 %v11140_v14  ;;  %v2120_v62 = vadd.f32 2.0, %v11180_v38 }
 0x4a5   :  { %v9560_v20 = vpop.eup %9559  ;;  %v1336_v31 = vpop.xlane.xlu1 %1335  ;;  %v2075_v53 = vmin.f32 %v11201_v1, 20.0  ;;  %v11218_v51 = vmul.f32 %v9550_v7, %v10978_v26  ;;  %v11224_v56 = vmul.f32 %v9554_v27, %v10984_v13  ;;  %v11227_v3 = vmul.f32 %v9558_v21, %v10990_v22 }
 0x4a6   :  { %v9562_v23 = vpop.eup %9561  ;;  %v2210_v18 = vpack.c.bf16 %v2195_v32, %v2194_v42  ;;  %v11221_v47 = vsub.f32 %v11044_v12, %v1210_v6  ;;  %v1340_v50 = vmul.f32 0.03125, %v1336_v31  ;;  %9579 = vrsqrt.f32 %v2664_v19 }
 0x4a7   :  { %v9564_v55 = vpop.eup %9563  ;;  %v1209_v14 = vpop.xlane.xlu0 %1208  ;;  %v2098_v52 = vmul.f32 1.442695, %v2074_v0  ;;  %v2665_v26 = vadd.f32 1e-05, %v2649_v37  ;;  %v2136_v40 = vmul.f32 %v11180_v38, %v2120_v62  ;;  %v2100_v19 = vmul.f32 1.442695, %v2075_v53 }
 0x4a8   :  { %v9566_v43 = vpop.eup %9565  ;;  %9035 = vmatprep.mubr.msk.bf16.mxu1 %vm1090_vm3, %v2210_v18  ;;  %v11231_v7 = vsub.f32 %v11050_v48, %v1340_v50  ;;  %v1211_v12 = vmul.f32 0.03125, %v1209_v14  ;;  %v1214_v9 = vmul.f32 %v11221_v47, %v11221_v47  ;;  %v2198_v22 = vmul.f32 %v9564_v55, %v2150_v4 }
 0x4a9   :  { %v9568_v13 = vpop.eup %9567  ;;  %9036 = vmatmul.mubr.msk.bf16.vlgmr.msra.gmra.mrb[16].mxu1 %vm1090_vm3, %v2211_v29  ;;  %v1339_v27 = vpop.xlane.xlu1 %1338  ;;  %v2038_v28 = vmul.f32 %v11073_v33, %v11130_v41  ;;  %v11245_v4 = vmul.f32 %v9560_v20, %v10996_v46  ;;  %9581 = vpow2.f32 %v2098_v52  ;;  %v2039_v41 = vmul.f32 %v11073_v33, %v11134_v30 }
 0x4aa   :  { %v9570_v0 = vpop.eup %9569  ;;  %9072 = vmatpush3.bf16.msra.mxu1 %v11067_v11  ;;  %v2199_v48 = vmul.f32 %v9568_v13, %v2151_v16  ;;  %v11241_v21 = vsub.f32 %v11054_v8, %v1211_v12  ;;  %v1341_v42 = vmul.f32 0.03125, %v1339_v27  ;;  %v1216_v32 = vsel %vm1090_vm3, %v1214_v9, 0.0 }
 0x4ab   :  { %v9572_v37 = vpop.eup %9571  ;;  %1217 = vadd.xlane.f32.xlu0 %v1216_v32  ;;  %v1344_v38 = vmul.f32 %v11231_v7, %v11231_v7  ;;  %9073 = vmatprep.subr.bf16.mxu1 %v9450_v5  ;;  %9583 = vpow2.f32 %v2100_v19  ;;  %v11258_v31 = vadd.f32 %v11079_v63, %v2038_v28  ;;  %v2168_v30 = vadd.f32 2.0, %v2136_v40 }
 0x4ac   :  { %v9574_v11 = vpop.eup %9573  ;;  %v2792_v16 = vadd.f32 2.0, %v9572_v37  ;;  %v2212_v8 = vpack.c.bf16 %v2199_v48, %v2198_v22  ;;  %v11252_v6 = vsub.f32 %v11059_v15, %v1341_v42  ;;  %9585 = vrsqrt.f32 %v2665_v26 }
 0x4ad   :  { %v9576_v29 = vpop.eup %9575  ;;  %v1346_v46 = vsel %vm1090_vm3, %v1344_v38, 0.0  ;;  %v1215_v20 = vmul.f32 %v11241_v21, %v11241_v21  ;;  %v11264_v53 = vadd.f32 %v11079_v63, %v2039_v41  ;;  %v11267_v50 = vmul.f32 %v9562_v23, %v11002_v49 }
 0x4ae   :  { %v2793_v62 = vadd.f32 2.0, %v9576_v29  ;;  %9039 = vmatprep.mubr.msk.bf16.mxu1 %vm1090_vm3, %v2212_v8  ;;  %1347 = vadd.xlane.f32.xlu1 %v1346_v46  ;;  %v1345_v15 = vmul.f32 %v11252_v6, %v11252_v6  ;;  %v9578_v18 = vpop.eup %9577  ;;  %v2076_v14 = vmin.f32 %v11258_v31, 20.0  ;;  %v2040_v52 = vmul.f32 %v11073_v33, %v11138_v35 }
 0x4af   :  { %v1219_v55 = vsel %vm1090_vm3, %v1215_v20, 0.0  ;;  %9074 = vmatpush3.bf16.msra.mxu1 %v9450_v5  ;;  %v2808_v26 = vmul.f32 %v9572_v37, %v2792_v16  ;;  %v2121_v9 = vadd.f32 2.0, %v9578_v18  ;;  %v11276_v13 = vmul.f32 %v2136_v40, %v11121_v36 }
 0x4b0   :  { %v11273_v12 = vmul.f32 %v9576_v29, %v2793_v62  ;;  %1220 = vadd.xlane.f32.xlu0 %v1219_v55  ;;  %v9580_v22 = vpop.eup %9579  ;;  %v11279_v49 = vmul.f32 %v9566_v43, %v11008_v54  ;;  %v1349_v23 = vsel %vm1090_vm3, %v1345_v15, 0.0  ;;  %v2077_v27 = vmin.f32 %v11264_v53, 20.0 }
 0x4b1   :  { %v2102_v5 = vmul.f32 1.442695, %v2076_v14  ;;  %v11284_v19 = vmul.f32 %v9570_v0, %v11014_v59  ;;  %v11287_v35 = vmul.f32 %v9574_v11, %v11020_v58  ;;  %v2137_v28 = vmul.f32 %v9578_v18, %v2121_v9 }
 0x4b2   :  { %9587 = vrcp.f32 %v2168_v30  ;;  %1350 = vadd.xlane.f32.xlu1 %v1349_v23  ;;  %v2104_v36 = vmul.f32 1.442695, %v2077_v27  ;;  %v2041_v54 = vmul.f32 %v11073_v33, %v11143_v39  ;;  %v11292_v43 = vadd.f32 %v11079_v63, %v2040_v52  ;;  %v14329_v27 = vld [vmem:[#allocation13_spill] sm:$0xff] }
 0x4b3   :  { %9589 = vpow2.f32 %v2102_v5  ;;  %v11295_v40 = vmul.f32 %v2808_v26, %v11183_v45  ;;  %v2841_v59 = vadd.f32 2.0, %v11273_v12  ;;  %v11299_v0 = vmul.f32 %v9580_v22, %v11026_v61  ;;  %v9582_v48 = vpop.eup %9581 }
 0x4b4   :  { %v2169_v58 = vadd.f32 2.0, %v2137_v28  ;;  %9591 = vpow2.f32 %v2104_v36  ;;  %v11302_v42 = vadd.f32 %v11079_v63, %v2041_v54  ;;  %v2078_v32 = vmin.f32 %v11292_v43, 20.0 }
 0x4b5   :  { %v2042_v39 = vmul.f32 %v11073_v33, %v11154_v2  ;;  %v9584_v37 = vpop.eup %9583  ;;  %v2122_v45 = vadd.f32 2.0, %v9582_v48  ;;  %v2043_v38 = vmul.f32 %v11073_v33, %v11170_v24  ;;  %v2704_v61 = vmul.f32 %v11167_v25, %v11187_v17 }
 0x4b6   :  { %9593 = vrcp.f32 %v2169_v58  ;;  %v9586_v41 = vpop.eup %9585  ;;  %v2123_v11 = vadd.f32 2.0, %v9584_v37  ;;  %v2079_v16 = vmin.f32 %v11302_v42, 20.0  ;;  %v2106_v8 = vmul.f32 1.442695, %v2078_v32  ;;  %v14330_v32 = vld [vmem:[#allocation14_spill] sm:$0xff] }
 0x4b7   :  { %v11313_v29 = vadd.f32 %v11079_v63, %v2042_v39  ;;  %v2138_v46 = vmul.f32 %v9582_v48, %v2122_v45  ;;  %v11316_v2 = vadd.f32 %v11079_v63, %v2043_v38  ;;  %v2705_v20 = vmul.f32 %v11167_v25, %v11194_v34 }
 0x4b8   :  { %v11321_v33 = vadd.f32 %v11178_v10, %v2704_v61  ;;  %v2139_v24 = vmul.f32 %v9584_v37, %v2123_v11  ;;  %9595 = vpow2.f32 %v2106_v8  ;;  %v2108_v17 = vmul.f32 1.442695, %v2079_v16 }
 0x4b9   :  { %v2080_v62 = vmin.f32 %v11313_v29, 20.0  ;;  %9597 = vrcp.f32 %v2841_v59  ;;  %v2170_v30 = vadd.f32 2.0, %v2138_v46  ;;  %v2081_v15 = vmin.f32 %v11316_v2, 20.0 }
 0x4ba   :  { %v11326_v18 = vadd.f32 %v11178_v10, %v2705_v20  ;;  %v2840_v63 = vadd.f32 2.0, %v2808_v26  ;;  %v2171_v55 = vadd.f32 2.0, %v2139_v24  ;;  %9599 = vpow2.f32 %v2108_v17 }
 0x4bb   :  { %v2110_v14 = vmul.f32 1.442695, %v2080_v62  ;;  %9601 = vrcp.f32 %v2170_v30  ;;  %v2112_v52 = vmul.f32 1.442695, %v2081_v15  ;;  %v2742_v9 = vmin.f32 %v11321_v33, 20.0 }
 0x4bc   :  { %v9588_v34 = vpop.eup %9587  ;;  %v2743_v22 = vmin.f32 %v11326_v18, 20.0  ;;  %v11331_v5 = vmul.f32 %v9586_v41, %v14329_v27  ;;  %9603 = vrcp.f32 %v2171_v55  ;;  %v2708_v36 = vmul.f32 %v11167_v25, %v11205_v57 }
 0x4bd   :  { %v9590_v23 = vpop.eup %9589  ;;  %v2709_v26 = vmul.f32 %v11167_v25, %v11210_v60  ;;  %9605 = vpow2.f32 %v2110_v14  ;;  %v2758_v59 = vmul.f32 1.442695, %v2742_v9  ;;  %v2153_v39 = vmul.f32 %v2137_v28, %v14330_v32 }
 0x4be   :  { %v2124_v54 = vadd.f32 2.0, %v9590_v23  ;;  %v2760_v58 = vmul.f32 1.442695, %v2743_v22  ;;  %v9592_v48 = vpop.eup %9591  ;;  %9607 = vpow2.f32 %v2112_v52  ;;  %v11339_v37 = vadd.f32 %v11178_v10, %v2708_v36 }
 0x4bf   :  { %v11342_v45 = vadd.f32 %v11178_v10, %v2709_v26  ;;  %v2125_v61 = vadd.f32 2.0, %v9592_v48  ;;  %9609 = vpow2.f32 %v2758_v59  ;;  %v2710_v60 = vmul.f32 %v11167_v25, %v11218_v51 }
 0x4c0   :  { %v9594_v38 = vpop.eup %9593  ;;  %v11344_v57 = vmul.f32 %v9590_v23, %v2124_v54  ;;  %v2200_v41 = vmul.f32 %v9588_v34, %v11276_v13  ;;  %9611 = vpow2.f32 %v2760_v58  ;;  %v2746_v28 = vmin.f32 %v11339_v37, 20.0 }
 0x4c1   :  { %v2201_v11 = vmul.f32 %v9594_v38, %v2153_v39  ;;  %9613 = vrcp.f32 %v2840_v63  ;;  %v11350_v16 = vmul.f32 %v9592_v48, %v2125_v61  ;;  %v2747_v20 = vmin.f32 %v11342_v45, 20.0 }
 0x4c2   :  { %v2172_v8 = vadd.f32 2.0, %v11344_v57  ;;  %v9596_v17 = vpop.eup %9595  ;;  %v2766_v30 = vmul.f32 1.442695, %v2746_v28  ;;  %v2711_v15 = vmul.f32 %v11167_v25, %v11224_v56  ;;  %v11357_v51 = vadd.f32 %v11178_v10, %v2710_v60 }
 0x4c3   :  { %v2213_v62 = vpack.c.bf16 %v2201_v11, %v2200_v41  ;;  %v9598_v13 = vpop.eup %9597  ;;  %v2154_v55 = vmul.f32 %v2138_v46, %v11149_v44  ;;  %v2173_v63 = vadd.f32 2.0, %v11350_v16  ;;  %v2126_v14 = vadd.f32 2.0, %v9596_v17  ;;  %v14331_v41 = vld [vmem:[#allocation15_spill] sm:$0xff] }
 0x4c4   :  { %9615 = vrcp.f32 %v2172_v8  ;;  %v9600_v34 = vpop.eup %9599  ;;  %v2768_v52 = vmul.f32 1.442695, %v2747_v20  ;;  %v11363_v9 = vadd.f32 %v11178_v10, %v2711_v15  ;;  %v2748_v56 = vmin.f32 %v11357_v51, 20.0 }
 0x4c5   :  { %9040 = vmatmul.mubr.msk.bf16.gmra.mrb[20].mxu1 %vm1090_vm3, %v2213_v62  ;;  %9617 = vpow2.f32 %v2766_v30  ;;  %v9602_v22 = vpop.eup %9601  ;;  %v2155_v23 = vmul.f32 %v2139_v24, %v11201_v1  ;;  %v2127_v27 = vadd.f32 2.0, %v9600_v34  ;;  %v2142_v44 = vmul.f32 %v9596_v17, %v2126_v14 }
 0x4c6   :  { %9619 = vrcp.f32 %v2173_v63  ;;  %v9604_v46 = vpop.eup %9603  ;;  %v2749_v36 = vmin.f32 %v11363_v9, 20.0  ;;  %v2770_v26 = vmul.f32 1.442695, %v2748_v56  ;;  %v2712_v54 = vmul.f32 %v11167_v25, %v11227_v3 }
 0x4c7   :  { %9621 = vpow2.f32 %v2768_v52  ;;  %v9606_v59 = vpop.eup %9605  ;;  %v2202_v58 = vmul.f32 %v9602_v22, %v2154_v55  ;;  %v2203_v48 = vmul.f32 %v9604_v46, %v2155_v23  ;;  %v11370_v32 = vmul.f32 %v9600_v34, %v2127_v27 }
 0x4c8   :  { %v2174_v39 = vadd.f32 2.0, %v2142_v44  ;;  %v9608_v38 = vpop.eup %9607  ;;  %v2128_v61 = vadd.f32 2.0, %v9606_v59  ;;  %9623 = vpow2.f32 %v2770_v26  ;;  %v2772_v1 = vmul.f32 1.442695, %v2749_v36 }
 0x4c9   :  { %v2713_v24 = vmul.f32 %v11167_v25, %v11245_v4  ;;  %v9610_v60 = vpop.eup %9609  ;;  %v2825_v11 = vmul.f32 %v11273_v12, %v14331_v41  ;;  %v2214_v28 = vpack.c.bf16 %v2203_v48, %v2202_v58  ;;  %v2175_v3 = vadd.f32 2.0, %v11370_v32 }
 0x4ca   :  { %9625 = vrcp.f32 %v2174_v39  ;;  %v9612_v8 = vpop.eup %9611  ;;  %v2129_v20 = vadd.f32 2.0, %v9608_v38  ;;  %v2144_v17 = vmul.f32 %v9606_v59, %v2128_v61  ;;  %v2790_v62 = vadd.f32 2.0, %v9610_v60 }
 0x4cb   :  { %9627 = vpow2.f32 %v2772_v1  ;;  %v11377_v30 = vpop.eup %9613  ;;  %9043 = vmatprep.mubr.msk.bf16.mxu1 %vm1090_vm3, %v2214_v28  ;;  %v2791_v15 = vadd.f32 2.0, %v9612_v8  ;;  %v11381_v4 = vadd.f32 %v11178_v10, %v2712_v54  ;;  %v11384_v12 = vadd.f32 %v11178_v10, %v2713_v24 }
 0x4cc   :  { %9629 = vrcp.f32 %v2175_v3  ;;  %v2145_v55 = vmul.f32 %v9608_v38, %v2129_v20  ;;  %v2176_v63 = vadd.f32 2.0, %v2144_v17  ;;  %v2806_v14 = vmul.f32 %v9610_v60, %v2790_v62 }
 0x4cd   :  { %v11386_v34 = vmul.f32 %v9598_v13, %v2825_v11  ;;  %v2156_v56 = vmul.f32 %v11344_v57, %v11258_v31  ;;  %v2807_v22 = vmul.f32 %v9612_v8, %v2791_v15  ;;  %v2750_v23 = vmin.f32 %v11381_v4, 20.0 }
 0x4ce   :  { %v9616_v52 = vpop.eup %9615  ;;  %v2751_v27 = vmin.f32 %v11384_v12, 20.0  ;;  %v2157_v36 = vmul.f32 %v11350_v16, %v11264_v53  ;;  %v2177_v26 = vadd.f32 2.0, %v2145_v55  ;;  %9631 = vrcp.f32 %v2176_v63 }
 0x4cf   :  { %v9618_v46 = vpop.eup %9617  ;;  %v2714_v54 = vmul.f32 %v11167_v25, %v11267_v50  ;;  %v2204_v59 = vmul.f32 %v9616_v52, %v2156_v56  ;;  %v2158_v58 = vmul.f32 %v2142_v44, %v11292_v43  ;;  %v2838_v48 = vadd.f32 2.0, %v2806_v14 }
 0x4d0   :  { %v9620_v13 = vpop.eup %9619  ;;  %v2839_v31 = vadd.f32 2.0, %v2807_v22  ;;  %9633 = vrcp.f32 %v2177_v26  ;;  %v2794_v38 = vadd.f32 2.0, %v9618_v46  ;;  %v2774_v61 = vmul.f32 1.442695, %v2750_v23 }
 0x4d1   :  { %v9622_v57 = vpop.eup %9621  ;;  %v2205_v39 = vmul.f32 %v9620_v13, %v2157_v36  ;;  %9635 = vrcp.f32 %v2838_v48  ;;  %v2776_v24 = vmul.f32 1.442695, %v2751_v27  ;;  %v2715_v53 = vmul.f32 %v11167_v25, %v11279_v49 }
 0x4d2   :  { %v2795_v1 = vadd.f32 2.0, %v9622_v57  ;;  %v9624_v16 = vpop.eup %9623  ;;  %9637 = vrcp.f32 %v2839_v31  ;;  %v2810_v50 = vmul.f32 %v9618_v46, %v2794_v38  ;;  %v11400_v41 = vadd.f32 %v11178_v10, %v2714_v54 }
 0x4d3   :  { %v2215_v60 = vpack.c.bf16 %v2205_v39, %v2204_v59  ;;  %v2796_v11 = vadd.f32 2.0, %v9624_v16  ;;  %9639 = vpow2.f32 %v2774_v61  ;;  %v11405_v28 = vadd.f32 %v11178_v10, %v2715_v53 }
 0x4d4   :  { %v9626_v43 = vpop.eup %9625  ;;  %v11402_v44 = vmul.f32 %v9622_v57, %v2795_v1  ;;  %v2159_v49 = vmul.f32 %v11370_v32, %v11302_v42  ;;  %v2160_v8 = vmul.f32 %v2144_v17, %v11313_v29  ;;  %v2842_v20 = vadd.f32 2.0, %v2810_v50 }
 0x4d5   :  { %v9628_v3 = vpop.eup %9627  ;;  %9044 = vmatmul.mubr.msk.bf16.gmra.mrb[24].mxu1 %vm1090_vm3, %v2215_v60  ;;  %9641 = vpow2.f32 %v2776_v24  ;;  %v2206_v15 = vmul.f32 %v9626_v43, %v2158_v58  ;;  %v11412_v56 = vmul.f32 %v9624_v16, %v2796_v11  ;;  %v2752_v27 = vmin.f32 %v11400_v41, 20.0 }
 0x4d6   :  { %v9630_v62 = vpop.eup %9629  ;;  %v2843_v63 = vadd.f32 2.0, %v11402_v44  ;;  %v2797_v52 = vadd.f32 2.0, %v9628_v3  ;;  %9643 = vrcp.f32 %v2842_v20  ;;  %v2753_v46 = vmin.f32 %v11405_v28, 20.0 }
 0x4d7   :  { %v2207_v23 = vmul.f32 %v9630_v62, %v2159_v49  ;;  %v2161_v36 = vmul.f32 %v2145_v55, %v11316_v2  ;;  %v2844_v29 = vadd.f32 2.0, %v11412_v56  ;;  %v2778_v26 = vmul.f32 1.442695, %v2752_v27 }
 0x4d8   :  { %9645 = vrcp.f32 %v2843_v63  ;;  %v11417_v42 = vmul.f32 %v9628_v3, %v2797_v52  ;;  %v9632_v32 = vpop.eup %9631  ;;  %v2780_v54 = vmul.f32 1.442695, %v2753_v46  ;;  %v2716_v13 = vmul.f32 %v11167_v25, %v11284_v19 }
 0x4d9   :  { %v2216_v17 = vpack.c.bf16 %v2207_v23, %v2206_v15  ;;  %v2822_v59 = vmul.f32 %v2806_v14, %v11321_v33  ;;  %v2823_v58 = vmul.f32 %v2807_v22, %v11326_v18  ;;  %9647 = vrcp.f32 %v2844_v29 }
 0x4da   :  { %v2845_v48 = vadd.f32 2.0, %v11417_v42  ;;  %v9634_v2 = vpop.eup %9633  ;;  %9649 = vpow2.f32 %v2778_v26  ;;  %v2717_v55 = vmul.f32 %v11167_v25, %v11287_v35  ;;  %v11429_v31 = vadd.f32 %v11178_v10, %v2716_v13 }
 0x4db   :  { %9047 = vmatprep.mubr.msk.bf16.mxu1 %vm1090_vm3, %v2216_v17  ;;  %v2718_v19 = vmul.f32 %v11167_v25, %v11299_v0  ;;  %v9636_v57 = vpop.eup %9635  ;;  %v2208_v33 = vmul.f32 %v9632_v32, %v2160_v8  ;;  %v2209_v14 = vmul.f32 %v9634_v2, %v2161_v36  ;;  %v2719_v18 = vmul.f32 %v11167_v25, %v11331_v5 }
 0x4dc   :  { %9651 = vrcp.f32 %v2845_v48  ;;  %v9638_v22 = vpop.eup %9637  ;;  %v2870_v39 = vmul.f32 %v9636_v57, %v2822_v59  ;;  %v11436_v38 = vadd.f32 %v11178_v10, %v2717_v55  ;;  %v2754_v35 = vmin.f32 %v11429_v31, 20.0 }
 0x4dd   :  { %9653 = vpow2.f32 %v2780_v54  ;;  %v9640_v61 = vpop.eup %9639  ;;  %v2217_v1 = vpack.c.bf16 %v2209_v14, %v2208_v33  ;;  %v2871_v24 = vmul.f32 %v9638_v22, %v2823_v58  ;;  %v11440_v0 = vadd.f32 %v11178_v10, %v2718_v19 }
 0x4de   :  { %v11443_v53 = vadd.f32 %v11178_v10, %v2719_v18  ;;  %v2826_v25 = vmul.f32 %v2810_v50, %v11339_v37  ;;  %v2798_v5 = vadd.f32 2.0, %v9640_v61  ;;  %v2755_v60 = vmin.f32 %v11436_v38, 20.0 }
 0x4df   :  { %v9642_v16 = vpop.eup %9641  ;;  %v2782_v43 = vmul.f32 1.442695, %v2754_v35  ;;  %9048 = vmatmul.mubr.msk.bf16.gmra.mrb[28].mxu1 %vm1090_vm3, %v2217_v1  ;;  %v2886_v11 = vpack.c.bf16 %v2871_v24, %v2870_v39  ;;  %v2756_v49 = vmin.f32 %v11440_v0, 20.0  ;;  %v2827_v10 = vmul.f32 %v11402_v44, %v11342_v45 }
 0x4e0   :  { %v2799_v3 = vadd.f32 2.0, %v9642_v16  ;;  %v2757_v8 = vmin.f32 %v11443_v53, 20.0  ;;  %v9644_v20 = vpop.eup %9643  ;;  %v2814_v62 = vmul.f32 %v9640_v61, %v2798_v5  ;;  %v2784_v15 = vmul.f32 1.442695, %v2755_v60 }
 0x4e1   :  { %9655 = vpow2.f32 %v2782_v43  ;;  %9075 = vmatprep.mubr.msk.bf16.mxu1 %vm1090_vm3, %v2886_v11  ;;  %v2872_v50 = vmul.f32 %v11377_v30, %v11295_v40  ;;  %v2874_v63 = vmul.f32 %v9644_v20, %v2826_v25  ;;  %v2786_v23 = vmul.f32 1.442695, %v2756_v49 }
 0x4e2   :  { %v9646_v37 = vpop.eup %9645  ;;  %v2815_v52 = vmul.f32 %v9642_v16, %v2799_v3  ;;  %v2846_v46 = vadd.f32 2.0, %v2814_v62  ;;  %9657 = vpow2.f32 %v2784_v15  ;;  %v2788_v36 = vmul.f32 1.442695, %v2757_v8 }
 0x4e3   :  { %v2875_v27 = vmul.f32 %v9646_v37, %v2827_v10  ;;  %v9648_v29 = vpop.eup %9647  ;;  %v2887_v32 = vpack.c.bf16 %v11386_v34, %v2872_v50  ;;  %9659 = vpow2.f32 %v2786_v23  ;;  %v2829_v54 = vmul.f32 %v11417_v42, %v11363_v9 }
 0x4e4   :  { %v2847_v45 = vadd.f32 2.0, %v2815_v52  ;;  %v9650_v44 = vpop.eup %9649  ;;  %9661 = vrcp.f32 %v2846_v46  ;;  %v2828_v13 = vmul.f32 %v11412_v56, %v11357_v51  ;;  %v2830_v51 = vmul.f32 %v2814_v62, %v11381_v4 }
 0x4e5   :  { %v2888_v17 = vpack.c.bf16 %v2875_v27, %v2874_v63  ;;  %v2800_v40 = vadd.f32 2.0, %v9650_v44  ;;  %v2831_v56 = vmul.f32 %v2815_v52, %v11384_v12 }
 0x4e6   :  { %v9652_v26 = vpop.eup %9651  ;;  %9663 = vrcp.f32 %v2847_v45  ;;  %v2876_v48 = vmul.f32 %v9648_v29, %v2828_v13 }
 0x4e7   :  { %v9654_v30 = vpop.eup %9653  ;;  %9665 = vpow2.f32 %v2788_v36  ;;  %9076 = vmatmul.mubr.msk.bf16.vlgmr.msra.gmra.mrb[32].mxu1 %vm1090_vm3, %v2887_v32  ;;  %v2877_v59 = vmul.f32 %v9652_v26, %v2829_v54  ;;  %v2816_v58 = vmul.f32 %v9650_v44, %v2800_v40  ;;  %v14332_v54 = vmov 0.0  }
 0x4e8   :  { %v2801_v34 = vadd.f32 2.0, %v9654_v30  ;;  %9079 = vmatprep.mubr.msk.bf16.mxu1 %vm1090_vm3, %v2888_v17 }
 0x4e9   :  { %v2848_v55 = vadd.f32 2.0, %v2816_v58  ;;  %v2889_v57 = vpack.c.bf16 %v2877_v59, %v2876_v48  ;;  %v2832_v20 = vmul.f32 %v2816_v58, %v11400_v41  ;;  %v8465_v48 = vld [vmem:[%s14243_s14] ss:$0 sm:$0xff] }
 0x4ea   :  { %v2817_v2 = vmul.f32 %v9654_v30, %v2801_v34 }
 0x4eb   :  { %v9656_v19 = vpop.eup %9655  ;;  %9667 = vrcp.f32 %v2848_v55 }
 0x4ec   :  { %v2849_v9 = vadd.f32 2.0, %v2817_v2  ;;  %v2802_v42 = vadd.f32 2.0, %v9656_v19  ;;  %v9658_v33 = vpop.eup %9657  ;;  %v2833_v10 = vmul.f32 %v2817_v2, %v11405_v28 }
 0x4ed   :  { %v9660_v14 = vpop.eup %9659  ;;  %v2803_v18 = vadd.f32 2.0, %v9658_v33 }
 0x4ee   :  { %9669 = vrcp.f32 %v2849_v9  ;;  %v2818_v22 = vmul.f32 %v9656_v19, %v2802_v42  ;;  %v9662_v39 = vpop.eup %9661  ;;  %v2804_v35 = vadd.f32 2.0, %v9660_v14 }
 0x4ef   :  { %9080 = vmatmul.mubr.msk.bf16.gmra.mrb[36].mxu1 %vm1090_vm3, %v2889_v57  ;;  %v2819_v1 = vmul.f32 %v9658_v33, %v2803_v18  ;;  %v2878_v25 = vmul.f32 %v9662_v39, %v2830_v51  ;;  %v8466_v57 = vld [vmem:[%s14244_s15] ss:$0 sm:$0xff] }
 0x4f0   :  { %v9664_v61 = vpop.eup %9663  ;;  %v2850_v24 = vadd.f32 2.0, %v2818_v22  ;;  %v2820_v60 = vmul.f32 %v9660_v14, %v2804_v35  ;;  %v2834_v52 = vmul.f32 %v2818_v22, %v11429_v31  ;;  %v9451_v31 = vld [vmem:[#allocation3 + $0x70] sm:$0xff]  }
 0x4f1   :  { %v9666_v16 = vpop.eup %9665  ;;  %v2879_v5 = vmul.f32 %v9664_v61, %v2831_v56  ;;  %v2851_v43 = vadd.f32 2.0, %v2819_v1  ;;  %v2835_v23 = vmul.f32 %v2819_v1, %v11436_v38  ;;  %9091 = vmatprep.subr.bf16.mxu0 %v9451_v31  ;;  %v9452_v38 = vld [vmem:[#allocation3 + $0x78] sm:$0xff]   ;;  %v8474_v56 = vld [vmem:[%s14243_s14 + $0x1] ss:$0 sm:$0xff] }
 0x4f2   :  { %9671 = vrcp.f32 %v2850_v24  ;;  %v2805_v11 = vadd.f32 2.0, %v9666_v16  ;;  %v2852_v49 = vadd.f32 2.0, %v2820_v60  ;;  %v2836_v41 = vmul.f32 %v2820_v60, %v11440_v0  ;;  %9092 = vmatpush3.bf16.msra.mxu0 %v9451_v31 }
 0x4f3   :  { %v2890_v3 = vpack.c.bf16 %v2879_v5, %v2878_v25  ;;  %9673 = vrcp.f32 %v2851_v43  ;;  %9093 = vmatprep.subr.bf16.mxu0 %v9452_v38 }
 0x4f4   :  { %v2821_v8 = vmul.f32 %v9666_v16, %v2805_v11  ;;  %9675 = vrcp.f32 %v2852_v49 }
 0x4f5   :  { %9083 = vmatprep.mubr.msk.bf16.mxu1 %vm1090_vm3, %v2890_v3  ;;  %v9668_v4 = vpop.eup %9667 }
 0x4f6   :  { %v2853_v12 = vadd.f32 2.0, %v2821_v8  ;;  %v2880_v15 = vmul.f32 %v9668_v4, %v2832_v20  ;;  %v2837_v28 = vmul.f32 %v2821_v8, %v11443_v53  ;;  %9094 = vmatpush3.bf16.msra.mxu0 %v9452_v38 }
 0x4f7   :  { %9131 = vmatprep.subr.bf16.mxu0 %v14332_v54 }
 0x4f8   :  { %v9670_v62 = vpop.eup %9669  ;;  %9677 = vrcp.f32 %v2853_v12 }
 0x4f9   :  { %v2881_v37 = vmul.f32 %v9670_v62, %v2833_v10 }
 0x4fb   :  { %v2891_v50 = vpack.c.bf16 %v2881_v37, %v2880_v15 }
 0x4fc   :  { %v9672_v63 = vpop.eup %9671 }
 0x4fd   :  { %9084 = vmatmul.mubr.msk.bf16.gmra.mrb[40].mxu1 %vm1090_vm3, %v2891_v50  ;;  %v9674_v27 = vpop.eup %9673  ;;  %v2882_v46 = vmul.f32 %v9672_v63, %v2834_v52 }
 0x4fe   :  { %v2883_v36 = vmul.f32 %v9674_v27, %v2835_v23  ;;  %v9676_v29 = vpop.eup %9675  ;;  %v10338_v23 = vmov 1966171168  }
 0x4ff   :  { %v2884_v44 = vmul.f32 %v9676_v29, %v2836_v41  ;;  %v846_v27 = vunpack.c.l.s4 %v10338_v23 }
 0x500   :  { %v2892_v32 = vpack.c.bf16 %v2883_v36, %v2882_v46  ;;  %v848_v46 = vlaneseq }
 0x502   :  { %v9678_v45 = vpop.eup %9677  ;;  %9087 = vmatprep.mubr.msk.bf16.mxu1 %vm1090_vm3, %v2892_v32 }
 0x503   :  { %v2885_v17 = vmul.f32 %v9678_v45, %v2837_v28  ;;  %v847_v45 = vunpack.c.0.s8 %v846_v27 }
 0x505   :  { %v2893_v26 = vpack.c.bf16 %v2885_v17, %v2884_v44 }
 0x507   :  { %9088 = vmatmul.mubr.msk.bf16.gmra.mrb[44].mxu1 %vm1090_vm3, %v2893_v26 }
 0x538   :  { %v1218_v40 = vpop.xlane.xlu0 %1217 }
 0x539   :  { %v1222_v0 = vmul.f32 0.03125, %v1218_v40 }
 0x53b   :  { %v1224_v30 = vadd.f32 1e-05, %v1222_v0  ;;  %v1348_v53 = vpop.xlane.xlu1 %1347 }
 0x53c   :  { %v1352_v59 = vmul.f32 0.03125, %v1348_v53 }
 0x53d   :  { %9679 = vrsqrt.f32 %v1224_v30  ;;  %v1221_v34 = vpop.xlane.xlu0 %1220 }
 0x53e   :  { %v1223_v2 = vmul.f32 0.03125, %v1221_v34  ;;  %v1354_v55 = vadd.f32 1e-05, %v1352_v59 }
 0x53f   :  { %v1351_v22 = vpop.xlane.xlu1 %1350 }
 0x540   :  { %v1225_v9 = vadd.f32 1e-05, %v1223_v2  ;;  %9681 = vrsqrt.f32 %v1354_v55  ;;  %v1353_v61 = vmul.f32 0.03125, %v1351_v22 }
 0x542   :  { %9683 = vrsqrt.f32 %v1225_v9  ;;  %v1355_v5 = vadd.f32 1e-05, %v1353_v61 }
 0x547   :  { %v9680_v13 = vpop.eup %9679 }
 0x548   :  { %v1228_v58 = vmul.f32 %v9680_v13, %v11221_v47 }
 0x54a   :  { %v1236_v19 = vmul.f32 %v8465_v48, %v1228_v58  ;;  %v9682_v18 = vpop.eup %9681 }
 0x54b   :  { %v1358_v39 = vmul.f32 %v9682_v18, %v11231_v7  ;;  %v8475_v7 = vld [vmem:[%s14244_s15 + $0x1] ss:$0 sm:$0xff] }
 0x54c   :  { %v1244_v42 = vadd.f32 %v8466_v57, %v1236_v19  ;;  %v9684_v47 = vpop.eup %9683 }
 0x54d   :  { %v1229_v24 = vmul.f32 %v9684_v47, %v11241_v21  ;;  %v1366_v25 = vmul.f32 %v8474_v56, %v1358_v39 }
 0x54e   :  { %v1246_v33 = vmin.f32 %v1244_v42, 20.0 }
 0x54f   :  { %v1237_v60 = vmul.f32 %v8465_v48, %v1229_v24  ;;  %v1374_v43 = vadd.f32 %v8475_v7, %v1366_v25 }
 0x550   :  { %v1248_v14 = vmul.f32 1.442695, %v1246_v33 }
 0x551   :  { %v11499_v3 = vadd.f32 %v8466_v57, %v1237_v60  ;;  %v1376_v49 = vmin.f32 %v1374_v43, 20.0  ;;  %v11538_v60 = vld [vmem:[%s14242_s13 + $0x4] ss:$0 sm:$0xff] }
 0x552   :  { %9685 = vpow2.f32 %v1248_v14 }
 0x553   :  { %9687 = vrsqrt.f32 %v1355_v5  ;;  %v1247_v4 = vmin.f32 %v11499_v3, 20.0  ;;  %v1378_v12 = vmul.f32 1.442695, %v1376_v49 }
 0x555   :  { %v1250_v20 = vmul.f32 1.442695, %v1247_v4  ;;  %9689 = vpow2.f32 %v1378_v12 }
 0x557   :  { %9691 = vpow2.f32 %v1250_v20 }
 0x55c   :  { %v9686_v11 = vpop.eup %9685 }
 0x55d   :  { %v1252_v8 = vadd.f32 2.0, %v9686_v11  ;;  %v9688_v10 = vpop.eup %9687 }
 0x55e   :  { %v1359_v15 = vmul.f32 %v9688_v10, %v11252_v6  ;;  %v849_v6 = vshrl.u32 %v848_v46, 7  ;;  %v11562_v46 = vld [vmem:[%s14242_s13 + $0x6] ss:$0 sm:$0xff] }
 0x55f   :  { %v1254_v21 = vmul.f32 %v9686_v11, %v1252_v8  ;;  %v9690_v52 = vpop.eup %9689 }
 0x560   :  { %v1367_v37 = vmul.f32 %v8474_v56, %v1359_v15  ;;  %v1382_v28 = vadd.f32 2.0, %v9690_v52  ;;  %v11514_v40 = vsub.s32 %v847_v45, %v849_v6  ;;  %v11528_v22 = vsub.s32 0, %v849_v6 }
 0x561   :  { %v1258_v62 = vadd.f32 2.0, %v1254_v21  ;;  %v9692_v41 = vpop.eup %9691  ;;  %v1256_v26 = vmul.f32 %v1254_v21, %v1244_v42 }
 0x562   :  { %v11509_v29 = vadd.f32 %v8475_v7, %v1367_v37  ;;  %v1253_v31 = vadd.f32 2.0, %v9692_v41  ;;  %v1384_v38 = vmul.f32 %v9690_v52, %v1382_v28  ;;  %14333 = vst [vmem:[#allocation13_spill] sm:$0xff] %v11514_v40  ;;  %14334 = vst [vmem:[#allocation14_spill] sm:$0xff] %v11528_v22 }
 0x563   :  { %9693 = vrcp.f32 %v1258_v62 }
 0x564   :  { %v1377_v17 = vmin.f32 %v11509_v29, 20.0  ;;  %v1255_v53 = vmul.f32 %v9692_v41, %v1253_v31  ;;  %v1388_v13 = vadd.f32 2.0, %v1384_v38  ;;  %v1386_v61 = vmul.f32 %v1384_v38, %v1374_v43 }
 0x566   :  { %v1380_v30 = vmul.f32 1.442695, %v1377_v17  ;;  %v1259_v34 = vadd.f32 2.0, %v1255_v53  ;;  %v1257_v20 = vmul.f32 %v1255_v53, %v11499_v3 }
 0x568   :  { %9695 = vpow2.f32 %v1380_v30 }
 0x569   :  { %9697 = vrcp.f32 %v1388_v13 }
 0x56a   :  { %9699 = vrcp.f32 %v1259_v34 }
 0x56d   :  { %v9694_v44 = vpop.eup %9693 }
 0x56e   :  { %v1262_v0 = vmul.f32 %v9694_v44, %v1256_v26 }
 0x570   :  { %v1469_v59 = vrot.slane %v1262_v0, %v11514_v40  ;;  %v1462_v9 = vcombine.high %v1262_v0, %v1262_v0 }
 0x572   :  { %v1477_v2 = vcombine.high %v1469_v59, %v1469_v59  ;;  %v1485_v57 = vrot.slane %v1469_v59, %v11514_v40  ;;  %v1476_v14 = vrot.slane %v1462_v9, %v11514_v40  ;;  %v9696_v18 = vpop.eup %9695 }
 0x573   :  { %v9698_v39 = vpop.eup %9697  ;;  %v1383_v24 = vadd.f32 2.0, %v9696_v18 }
 0x574   :  { %v1499_v42 = vrot.slane %v1477_v2, %v11514_v40  ;;  %v1507_v33 = vcombine.high %v1485_v57, %v1485_v57  ;;  %v1478_v7 = vcombine.high %v1476_v14, %v1476_v14  ;;  %v9700_v49 = vpop.eup %9699  ;;  %v11542_v8 = vmul.f32 %v9698_v39, %v1386_v61 }
 0x575   :  { %v1492_v43 = vrot.slane %v1476_v14, %v11514_v40  ;;  %v1563_v21 = vrot.slane %v1485_v57, %v11528_v22  ;;  %v11550_v10 = vmul.f32 %v9696_v18, %v1383_v24  ;;  %v1263_v27 = vmul.f32 %v9700_v49, %v1257_v20 }
 0x576   :  { %v1509_v47 = vcombine.high %v1499_v42, %v1499_v42  ;;  %v1571_v25 = vrot.slane %v1507_v33, %v11528_v22  ;;  %v1506_v37 = vrot.slane %v1478_v7, %v11514_v40  ;;  %v1567_v23 = vrot.slane %v1499_v42, %v11528_v22 }
 0x577   :  { %v1508_v28 = vcombine.high %v1492_v43, %v1492_v43  ;;  %v1389_v6 = vadd.f32 2.0, %v11550_v10  ;;  %v1518_v30 = vrot.slane %v1263_v27, %v11514_v40  ;;  %v1579_v9 = vrot.slane %v1492_v43, %v11528_v22 }
 0x578   :  { %v1575_v4 = vrot.slane %v1509_v47, %v11528_v22  ;;  %v1642_v62 = vsub.f32 %v11542_v8, %v1571_v25  ;;  %v1510_v17 = vcombine.high %v1506_v37, %v1506_v37  ;;  %v1641_v0 = vsub.f32 %v11542_v8, %v1567_v23 }
 0x579   :  { %v1587_v59 = vrot.slane %v1508_v28, %v11528_v22  ;;  %9701 = vrcp.f32 %v1389_v6  ;;  %v1583_v61 = vrot.slane %v1506_v37, %v11528_v22  ;;  %v1526_v24 = vcombine.high %v1518_v30, %v1518_v30 }
 0x57a   :  { %v1643_v3 = vsub.f32 %v11542_v8, %v1575_v4  ;;  %v1591_v18 = vrot.slane %v1510_v17, %v11528_v22  ;;  %v1534_v4 = vrot.slane %v1518_v30, %v11514_v40  ;;  %v1511_v20 = vcombine.high %v1263_v27, %v1263_v27 }
 0x57b   :  { %v1646_v7 = vsub.f32 %v11542_v8, %v1587_v59 }
 0x57c   :  { %v11484_v51 = vpop.f32.mrb[16].mxu1  ;;  %v1647_v37 = vsub.f32 %v11542_v8, %v1591_v18  ;;  %v1556_v27 = vcombine.high %v1534_v4, %v1534_v4 }
 0x57d   :  { %v11489_v35 = vpop.f32.mrb[17].mxu1  ;;  %v2310_v15 = vadd.f32 %v11484_v51, %v11538_v60  ;;  %v1640_v51 = vsub.f32 %v11542_v8, %v1563_v21 }
 0x57e   :  { %v11491_v1 = vpop.f32.mrb[18].mxu1  ;;  %v2302_v52 = vadd.f32 %v11538_v60, %v11489_v35 }
 0x57f   :  { %v11494_v16 = vpop.f32.mrb[19].mxu1  ;;  %v2313_v41 = vadd.f32 %v11491_v1, %v11538_v60  ;;  %v3042_v44 = vmul.f32 %v2310_v15, %v1642_v62 }
 0x580   :  { %v2305_v45 = vadd.f32 %v11538_v60, %v11494_v16  ;;  %v3040_v38 = vmul.f32 %v2302_v52, %v1640_v51 }
 0x581   :  { %v3043_v13 = vmul.f32 %v2313_v41, %v1643_v3  ;;  %v1645_v3 = vsub.f32 %v11542_v8, %v1583_v61  ;;  %v1548_v41 = vrot.slane %v1526_v24, %v11514_v40 }
 0x582   :  { %v3041_v57 = vmul.f32 %v2305_v45, %v1641_v0 }
 0x583   :  { %v9702_v30 = vpop.eup %9701 }
 0x598   :  { %v11503_v50 = vpop.f32.mrb[20].mxu1 }
 0x599   :  { %v11505_v63 = vpop.f32.mrb[21].mxu1  ;;  %v2326_v14 = vadd.f32 %v11503_v50, %v11538_v60  ;;  %v1644_v50 = vsub.f32 %v11542_v8, %v1579_v9  ;;  %v1525_v8 = vrot.slane %v1511_v20, %v11514_v40 }
 0x59a   :  { %v11507_v36 = vpop.f32.mrb[22].mxu1  ;;  %v2318_v39 = vadd.f32 %v11538_v60, %v11505_v63 }
 0x59b   :  { %v11511_v32 = vpop.f32.mrb[23].mxu1  ;;  %v2329_v49 = vadd.f32 %v11507_v36, %v11538_v60  ;;  %v3046_v15 = vmul.f32 %v2326_v14, %v1646_v7  ;;  %v1527_v59 = vcombine.high %v1525_v8, %v1525_v8 }
 0x59c   :  { %v2321_v21 = vadd.f32 %v11538_v60, %v11511_v32  ;;  %v3044_v36 = vmul.f32 %v2318_v39, %v1644_v50 }
 0x59d   :  { %v3047_v32 = vmul.f32 %v2329_v49, %v1647_v37 }
 0x5a8   :  { %v11517_v58 = vpop.f32.mrb[24].mxu1 }
 0x5a9   :  { %v11519_v48 = vpop.f32.mrb[25].mxu1 }
 0x5aa   :  { %v11521_v55 = vpop.f32.mrb[26].mxu1 }
 0x5ab   :  { %v11523_v19 = vpop.f32.mrb[27].mxu1  ;;  %v2345_v14 = vadd.f32 %v11521_v55, %v11538_v60 }
 0x5b2   :  { %v11530_v56 = vpop.f32.mrb[28].mxu1 }
 0x5b3   :  { %v11533_v5 = vpop.f32.mrb[29].mxu1 }
 0x5b4   :  { %v11540_v11 = vpop.f32.mrb[30].mxu1 }
 0x5b5   :  { %v11546_v12 = vpop.f32.mrb[31].mxu1 }
 0x5ba   :  { %v9077_v35 = vpop.f32.mrb[32].mxu1 }
 0x5bb   :  { %v2986_v26 = vadd.f32 %v9077_v35, %v11562_v46  ;;  %v2977_v31 = vpop.f32.mrb[33].mxu1 }
 0x5bc   :  { %v2978_v1 = vadd.f32 %v11562_v46, %v2977_v31  ;;  %v9078_v53 = vpop.f32.mrb[34].mxu1 }
 0x5bd   :  { %v3058_v16 = vadd.f32 %v3042_v44, %v2986_v26  ;;  %v2989_v34 = vadd.f32 %v9078_v53, %v11562_v46  ;;  %v2980_v2 = vpop.f32.mrb[35].mxu1  ;;  %v3045_v44 = vmul.f32 %v2321_v21, %v1645_v3  ;;  %v1387_v53 = vmul.f32 %v11550_v10, %v11509_v29 }
 0x5be   :  { %v3056_v42 = vadd.f32 %v3040_v38, %v2978_v1  ;;  %v2981_v33 = vadd.f32 %v11562_v46, %v2980_v2  ;;  %v1558_v38 = vcombine.high %v1548_v41, %v1548_v41  ;;  %v2334_v29 = vadd.f32 %v11538_v60, %v11519_v48 }
 0x5bf   :  { %v3059_v47 = vadd.f32 %v3043_v13, %v2989_v34  ;;  %v1603_v13 = vrot.slane %v1556_v27, %v11528_v22  ;;  %v1595_v34 = vrot.slane %v1534_v4, %v11528_v22  ;;  %v1393_v2 = vmul.f32 %v9702_v30, %v1387_v53 }
 0x5c0   :  { %v3057_v25 = vadd.f32 %v3041_v57, %v2981_v33  ;;  %v2342_v57 = vadd.f32 %v11517_v58, %v11538_v60  ;;  %v1607_v9 = vrot.slane %v1558_v38, %v11528_v22  ;;  %v1599_v10 = vrot.slane %v1548_v41, %v11528_v22 }
 0x5c1   :  { %v11589_v43 = vpack.c.bf16 %v3059_v47, %v3058_v16  ;;  %v1650_v33 = vsub.f32 %v1393_v2, %v1603_v13  ;;  %v1555_v58 = vrot.slane %v1527_v59, %v11514_v40  ;;  %v1648_v18 = vsub.f32 %v1393_v2, %v1595_v34 }
 0x5c2   :  { %v11594_v63 = vpack.c.bf16 %v3057_v25, %v3056_v42  ;;  %v9081_v62 = vpop.f32.mrb[36].mxu1  ;;  %v1541_v42 = vrot.slane %v1525_v8, %v11514_v40  ;;  %v2337_v47 = vadd.f32 %v11538_v60, %v11523_v19  ;;  %v1651_v24 = vsub.f32 %v1393_v2, %v1607_v9 }
 0x5c3   :  { %v3002_v52 = vadd.f32 %v9081_v62, %v11562_v46  ;;  %v2993_v23 = vpop.f32.mrb[37].mxu1  ;;  %v3050_v61 = vmul.f32 %v2342_v57, %v1650_v33  ;;  %v3048_v49 = vmul.f32 %v2334_v29, %v1648_v18  ;;  %v1649_v4 = vsub.f32 %v1393_v2, %v1599_v10 }
 0x5c4   :  { %v2994_v28 = vadd.f32 %v11562_v46, %v2993_v23  ;;  %v9082_v51 = vpop.f32.mrb[38].mxu1  ;;  %9095 = vmatprep.mubr.msk.bf16.mxu0 %vm1090_vm3, %v11594_v63  ;;  %v1557_v25 = vcombine.high %v1541_v42, %v1541_v42  ;;  %v3051_v20 = vmul.f32 %v2345_v14, %v1651_v24  ;;  %v1559_v55 = vcombine.high %v1555_v58, %v1555_v58 }
 0x5c5   :  { %v3062_v45 = vadd.f32 %v3046_v15, %v3002_v52  ;;  %v3005_v35 = vadd.f32 %v9082_v51, %v11562_v46  ;;  %v2996_v6 = vpop.f32.mrb[39].mxu1  ;;  %9096 = vmatmul.mubr.msk.bf16.vlgmr.msra.gmra.mrb[48].mxu0 %vm1090_vm3, %v11589_v43  ;;  %v3049_v52 = vmul.f32 %v2337_v47, %v1649_v4  ;;  %v1611_v41 = vrot.slane %v1541_v42, %v11528_v22 }
 0x5c6   :  { %v3060_v17 = vadd.f32 %v3044_v36, %v2994_v28  ;;  %v2997_v26 = vadd.f32 %v11562_v46, %v2996_v6  ;;  %v1619_v36 = vrot.slane %v1557_v25, %v11528_v22  ;;  %v2358_v51 = vadd.f32 %v11530_v56, %v11538_v60 }
 0x5c7   :  { %v3063_v31 = vadd.f32 %v3047_v32, %v3005_v35  ;;  %v1623_v32 = vrot.slane %v1559_v55, %v11528_v22  ;;  %v1615_v35 = vrot.slane %v1555_v58, %v11528_v22  ;;  %v2361_v8 = vadd.f32 %v11540_v11, %v11538_v60 }
 0x5c8   :  { %v3061_v0 = vadd.f32 %v3045_v44, %v2997_v26  ;;  %v1654_v44 = vsub.f32 %v1393_v2, %v1619_v36  ;;  %v2353_v26 = vadd.f32 %v11538_v60, %v11546_v12 }
 0x5c9   :  { %v11608_v1 = vpack.c.bf16 %v3063_v31, %v3062_v45  ;;  %v2350_v45 = vadd.f32 %v11538_v60, %v11533_v5  ;;  %v1655_v38 = vsub.f32 %v1393_v2, %v1623_v32  ;;  %v1653_v53 = vsub.f32 %v1393_v2, %v1615_v35 }
 0x5ca   :  { %v11613_v16 = vpack.c.bf16 %v3061_v0, %v3060_v17  ;;  %v1652_v17 = vsub.f32 %v1393_v2, %v1611_v41  ;;  %v3054_v31 = vmul.f32 %v2358_v51, %v1654_v44  ;;  %v8538_v2 = vld [vmem:[%s14242_s13 + $0x7] ss:$0 sm:$0xff] }
 0x5cb   :  { %v3055_v59 = vmul.f32 %v2361_v8, %v1655_v38  ;;  %v3053_v57 = vmul.f32 %v2353_v26, %v1653_v53 }
 0x5cc   :  { %9099 = vmatprep.mubr.msk.bf16.mxu0 %vm1090_vm3, %v11613_v16  ;;  %v3052_v30 = vmul.f32 %v2350_v45, %v1652_v17 }
 0x5cd   :  { %9100 = vmatmul.mubr.msk.bf16.gmra.mrb[52].mxu0 %vm1090_vm3, %v11608_v1 }
 0x5d0   :  { %v9085_v39 = vpop.f32.mrb[40].mxu1 }
 0x5d1   :  { %v3018_v48 = vadd.f32 %v9085_v39, %v11562_v46  ;;  %v3009_v7 = vpop.f32.mrb[41].mxu1 }
 0x5d2   :  { %v3010_v50 = vadd.f32 %v11562_v46, %v3009_v7  ;;  %v9086_v21 = vpop.f32.mrb[42].mxu1 }
 0x5d3   :  { %v3066_v62 = vadd.f32 %v3050_v61, %v3018_v48  ;;  %v3021_v15 = vadd.f32 %v9086_v21, %v11562_v46  ;;  %v3012_v37 = vpop.f32.mrb[43].mxu1 }
 0x5d4   :  { %v3064_v19 = vadd.f32 %v3048_v49, %v3010_v50  ;;  %v3013_v23 = vadd.f32 %v11562_v46, %v3012_v37 }
 0x5d5   :  { %v3067_v3 = vadd.f32 %v3051_v20, %v3021_v15 }
 0x5d6   :  { %v3065_v28 = vadd.f32 %v3049_v52, %v3013_v23 }
 0x5d7   :  { %v11641_v27 = vpack.c.bf16 %v3067_v3, %v3066_v62 }
 0x5d8   :  { %v11646_v6 = vpack.c.bf16 %v3065_v28, %v3064_v19 }
 0x5da   :  { %v9089_v56 = vpop.f32.mrb[44].mxu1  ;;  %9103 = vmatprep.mubr.msk.bf16.mxu0 %vm1090_vm3, %v11646_v6 }
 0x5db   :  { %v3034_v5 = vadd.f32 %v9089_v56, %v11562_v46  ;;  %v3025_v0 = vpop.f32.mrb[45].mxu1  ;;  %9104 = vmatmul.mubr.msk.bf16.gmra.mrb[56].mxu0 %vm1090_vm3, %v11641_v27 }
 0x5dc   :  { %v3026_v11 = vadd.f32 %v11562_v46, %v3025_v0  ;;  %v9090_v13 = vpop.f32.mrb[46].mxu1 }
 0x5dd   :  { %v3070_v34 = vadd.f32 %v3054_v31, %v3034_v5  ;;  %v3037_v60 = vadd.f32 %v9090_v13, %v11562_v46  ;;  %v3028_v12 = vpop.f32.mrb[47].mxu1 }
 0x5de   :  { %v3068_v9 = vadd.f32 %v3052_v30, %v3026_v11  ;;  %v3029_v42 = vadd.f32 %v11562_v46, %v3028_v12 }
 0x5df   :  { %v3071_v29 = vadd.f32 %v3055_v59, %v3037_v60 }
 0x5e0   :  { %v3069_v10 = vadd.f32 %v3053_v57, %v3029_v42 }
 0x5e1   :  { %v11660_v33 = vpack.c.bf16 %v3071_v29, %v3070_v34 }
 0x5e2   :  { %v11662_v14 = vpack.c.bf16 %v3069_v10, %v3068_v9 }
 0x5e4   :  { %9107 = vmatprep.mubr.msk.bf16.mxu0 %vm1090_vm3, %v11662_v14 }
 0x5e5   :  { %9108 = vmatmul.mubr.msk.bf16.gmra.mrb[60].mxu0 %vm1090_vm3, %v11660_v33 }
 0x5e6   :  { %9135 = vmatprep.mubr.msk.bf16.mxu0 %vm10337_vm4, %v14332_v54 }
 0x698   :  { %v9097_v46 = vpop.f32.mrb[48].mxu0 }
 0x699   :  { %v3163_v58 = vpop.f32.mrb[49].mxu0  ;;  %v11675_v61 = vadd.f32 %v9097_v46, %v8538_v2 }
 0x69a   :  { %v11673_v18 = vadd.f32 %v8538_v2, %v3163_v58  ;;  %v9098_v47 = vpop.f32.mrb[50].mxu0 }
 0x69b   :  { %v3166_v39 = vpop.f32.mrb[51].mxu0  ;;  %v11681_v48 = vadd.f32 %v9098_v47, %v8538_v2  ;;  %v3236_v4 = vsel %vm1090_vm3, %v11675_v61, 0.0 }
 0x69c   :  { %v11677_v24 = vadd.f32 %v8538_v2, %v3166_v39  ;;  %v3230_v25 = vsel %vm1090_vm3, %v11673_v18, 0.0 }
 0x69d   :  { %3231 = vadd.xlane.f32.xlu0 %v3230_v25  ;;  %v3239_v55 = vsel %vm1090_vm3, %v11681_v48, 0.0 }
 0x69e   :  { %v3233_v7 = vsel %vm1090_vm3, %v11677_v24, 0.0 }
 0x69f   :  { %3234 = vadd.xlane.f32.xlu1 %v3233_v7 }
 0x6a0   :  { %v9101_v49 = vpop.f32.mrb[52].mxu0 }
 0x6a1   :  { %3237 = vadd.xlane.f32.xlu0 %v3236_v4  ;;  %v3179_v50 = vpop.f32.mrb[53].mxu0  ;;  %v11691_v15 = vadd.f32 %v9101_v49, %v8538_v2 }
 0x6a2   :  { %v11687_v21 = vadd.f32 %v8538_v2, %v3179_v50  ;;  %v9102_v20 = vpop.f32.mrb[54].mxu0 }
 0x6a3   :  { %3240 = vadd.xlane.f32.xlu1 %v3239_v55  ;;  %v3182_v62 = vpop.f32.mrb[55].mxu0  ;;  %v11697_v19 = vadd.f32 %v9102_v20, %v8538_v2  ;;  %v3248_v36 = vsel %vm1090_vm3, %v11691_v15, 0.0 }
 0x6a4   :  { %v11693_v37 = vadd.f32 %v8538_v2, %v3182_v62  ;;  %v3242_v52 = vsel %vm1090_vm3, %v11687_v21, 0.0 }
 0x6a5   :  { %3243 = vadd.xlane.f32.xlu0 %v3242_v52  ;;  %v3251_v3 = vsel %vm1090_vm3, %v11697_v19, 0.0 }
 0x6a6   :  { %v3245_v23 = vsel %vm1090_vm3, %v11693_v37, 0.0 }
 0x6a7   :  { %3246 = vadd.xlane.f32.xlu1 %v3245_v23 }
 0x6a9   :  { %3249 = vadd.xlane.f32.xlu0 %v3248_v36 }
 0x6ab   :  { %3252 = vadd.xlane.f32.xlu1 %v3251_v3 }
 0x6ae   :  { %v9105_v41 = vpop.f32.mrb[56].mxu0 }
 0x6af   :  { %v3195_v28 = vpop.f32.mrb[57].mxu0  ;;  %v11707_v35 = vadd.f32 %v9105_v41, %v8538_v2 }
 0x6b0   :  { %v11705_v51 = vadd.f32 %v8538_v2, %v3195_v28  ;;  %v9106_v32 = vpop.f32.mrb[58].mxu0 }
 0x6b1   :  { %v3198_v45 = vpop.f32.mrb[59].mxu0  ;;  %v11713_v17 = vadd.f32 %v9106_v32, %v8538_v2  ;;  %v3260_v56 = vsel %vm1090_vm3, %v11707_v35, 0.0 }
 0x6b2   :  { %v11709_v44 = vadd.f32 %v8538_v2, %v3198_v45  ;;  %v3254_v8 = vsel %vm1090_vm3, %v11705_v51, 0.0 }
 0x6b3   :  { %3255 = vadd.xlane.f32.xlu0 %v3254_v8  ;;  %v3263_v38 = vsel %vm1090_vm3, %v11713_v17, 0.0 }
 0x6b4   :  { %v3257_v26 = vsel %vm1090_vm3, %v11709_v44, 0.0 }
 0x6b5   :  { %3258 = vadd.xlane.f32.xlu1 %v3257_v26 }
 0x6b7   :  { %3261 = vadd.xlane.f32.xlu0 %v3260_v56 }
 0x6b8   :  { %v9109_v31 = vpop.f32.mrb[60].mxu0 }
 0x6b9   :  { %v3211_v5 = vpop.f32.mrb[61].mxu0  ;;  %3264 = vadd.xlane.f32.xlu1 %v3263_v38  ;;  %v11723_v11 = vadd.f32 %v9109_v31, %v8538_v2 }
 0x6ba   :  { %v11721_v0 = vadd.f32 %v8538_v2, %v3211_v5  ;;  %v9110_v30 = vpop.f32.mrb[62].mxu0 }
 0x6bb   :  { %v3214_v53 = vpop.f32.mrb[63].mxu0  ;;  %v11729_v34 = vadd.f32 %v9110_v30, %v8538_v2  ;;  %v3272_v12 = vsel %vm1090_vm3, %v11723_v11, 0.0 }
 0x6bc   :  { %v11725_v13 = vadd.f32 %v8538_v2, %v3214_v53  ;;  %v3266_v59 = vsel %vm1090_vm3, %v11721_v0, 0.0 }
 0x6bd   :  { %3267 = vadd.xlane.f32.xlu0 %v3266_v59  ;;  %v3275_v57 = vsel %vm1090_vm3, %v11729_v34, 0.0 }
 0x6be   :  { %v3269_v60 = vsel %vm1090_vm3, %v11725_v13, 0.0 }
 0x6bf   :  { %3270 = vadd.xlane.f32.xlu1 %v3269_v60 }
 0x6c1   :  { %3273 = vadd.xlane.f32.xlu0 %v3272_v12 }
 0x6c3   :  { %3276 = vadd.xlane.f32.xlu1 %v3275_v57 }
 0x72a   :  { %v3232_v9 = vpop.xlane.xlu0 %3231 }
 0x72b   :  { %v3278_v42 = vmul.f32 0.03125, %v3232_v9 }
 0x72c   :  { %v3235_v29 = vpop.xlane.xlu1 %3234 }
 0x72d   :  { %v11738_v10 = vsub.f32 %v11673_v18, %v3278_v42  ;;  %v3279_v2 = vmul.f32 0.03125, %v3235_v29 }
 0x72e   :  { %v3238_v46 = vpop.xlane.xlu0 %3237 }
 0x72f   :  { %v11741_v58 = vsub.f32 %v11677_v24, %v3279_v2  ;;  %v3280_v47 = vmul.f32 0.03125, %v3238_v46  ;;  %v3310_v39 = vmul.f32 %v11738_v10, %v11738_v10 }
 0x730   :  { %v3241_v25 = vpop.xlane.xlu1 %3240 }
 0x731   :  { %v11746_v7 = vsub.f32 %v11675_v61, %v3280_v47  ;;  %v3281_v49 = vmul.f32 0.03125, %v3241_v25  ;;  %v3326_v4 = vsel %vm1090_vm3, %v3310_v39, 0.0  ;;  %v3311_v18 = vmul.f32 %v11741_v58, %v11741_v58 }
 0x732   :  { %3327 = vadd.xlane.f32.xlu0 %v3326_v4  ;;  %v3244_v50 = vpop.xlane.xlu0 %3243 }
 0x733   :  { %v11752_v20 = vsub.f32 %v11681_v48, %v3281_v49  ;;  %v3282_v24 = vmul.f32 0.03125, %v3244_v50  ;;  %v3329_v55 = vsel %vm1090_vm3, %v3311_v18, 0.0  ;;  %v3312_v62 = vmul.f32 %v11746_v7, %v11746_v7 }
 0x734   :  { %v3247_v52 = vpop.xlane.xlu1 %3246  ;;  %3330 = vadd.xlane.f32.xlu1 %v3329_v55 }
 0x735   :  { %v11758_v61 = vsub.f32 %v11687_v21, %v3282_v24  ;;  %v3283_v23 = vmul.f32 0.03125, %v3247_v52  ;;  %v3332_v36 = vsel %vm1090_vm3, %v3312_v62, 0.0  ;;  %v3313_v3 = vmul.f32 %v11752_v20, %v11752_v20 }
 0x736   :  { %3333 = vadd.xlane.f32.xlu0 %v3332_v36  ;;  %v3250_v48 = vpop.xlane.xlu0 %3249 }
 0x737   :  { %v11764_v41 = vsub.f32 %v11693_v37, %v3283_v23  ;;  %v3284_v28 = vmul.f32 0.03125, %v3250_v48  ;;  %v3335_v32 = vsel %vm1090_vm3, %v3313_v3, 0.0  ;;  %v3314_v45 = vmul.f32 %v11758_v61, %v11758_v61 }
 0x738   :  { %v3253_v8 = vpop.xlane.xlu1 %3252  ;;  %3336 = vadd.xlane.f32.xlu1 %v3335_v32 }
 0x739   :  { %v11770_v21 = vsub.f32 %v11691_v15, %v3284_v28  ;;  %v3285_v26 = vmul.f32 0.03125, %v3253_v8  ;;  %v3338_v56 = vsel %vm1090_vm3, %v3314_v45, 0.0  ;;  %v3315_v31 = vmul.f32 %v11764_v41, %v11764_v41 }
 0x73a   :  { %3339 = vadd.xlane.f32.xlu0 %v3338_v56 }
 0x73b   :  { %v11776_v37 = vsub.f32 %v11697_v19, %v3285_v26  ;;  %v3341_v38 = vsel %vm1090_vm3, %v3315_v31, 0.0  ;;  %v3316_v5 = vmul.f32 %v11770_v21, %v11770_v21 }
 0x73c   :  { %3342 = vadd.xlane.f32.xlu1 %v3341_v38 }
 0x73d   :  { %v3344_v30 = vsel %vm1090_vm3, %v3316_v5, 0.0  ;;  %v3317_v15 = vmul.f32 %v11776_v37, %v11776_v37  ;;  %v9453_v5 = vld [vmem:[#allocation3 + $0x80] sm:$0xff]  }
 0x73e   :  { %3345 = vadd.xlane.f32.xlu0 %v3344_v30  ;;  %v9454_v30 = vld [vmem:[#allocation3 + $0x88] sm:$0xff]   ;;  %9111 = vmatprep.subr.bf16.mxu1 %v9453_v5 }
 0x73f   :  { %v3347_v59 = vsel %vm1090_vm3, %v3317_v15, 0.0  ;;  %9112 = vmatpush3.bf16.msra.mxu1 %v9453_v5  ;;  %v11842_v15 = vld [vmem:[%s14335_s26] sm:$0xff] }
 0x740   :  { %v3256_v53 = vpop.xlane.xlu0 %3255  ;;  %3348 = vadd.xlane.f32.xlu1 %v3347_v59  ;;  %9113 = vmatprep.subr.bf16.mxu1 %v9454_v30  ;;  %v851_v59 = vrot.slane %v11842_v15, %v11514_v40 }
 0x741   :  { %v3286_v60 = vmul.f32 0.03125, %v3256_v53  ;;  %v10339_v53 = vmov 0  }
 0x742   :  { %v3259_v12 = vpop.xlane.xlu1 %3258  ;;  %9396 = vset.pattern.permute.xlu1 %v10339_v53  ;;  %9395 = vset.pattern.permute.xlu0 %v10339_v53 }
 0x743   :  { %v11786_v19 = vsub.f32 %v11705_v51, %v3286_v60  ;;  %v3287_v57 = vmul.f32 0.03125, %v3259_v12  ;;  %9114 = vmatpush3.bf16.msra.mxu1 %v9454_v30  ;;  %v844_v12 = vcombine.high %v11842_v15, %v11842_v15 }
 0x744   :  { %v3262_v9 = vpop.xlane.xlu0 %3261  ;;  %9155 = vmatprep.subr.bf16.mxu1 %v14332_v54 }
 0x745   :  { %v11789_v42 = vsub.f32 %v11709_v44, %v3287_v57  ;;  %v3288_v29 = vmul.f32 0.03125, %v3262_v9  ;;  %v3318_v2 = vmul.f32 %v11786_v19, %v11786_v19  ;;  %v859_v9 = vcombine.high %v851_v59, %v851_v59 }
 0x746   :  { %v3265_v46 = vpop.xlane.xlu1 %3264 }
 0x747   :  { %v11794_v47 = vsub.f32 %v11707_v35, %v3288_v29  ;;  %v3289_v39 = vmul.f32 0.03125, %v3265_v46  ;;  %v3350_v25 = vsel %vm1090_vm3, %v3318_v2, 0.0  ;;  %v3319_v51 = vmul.f32 %v11789_v42, %v11789_v42 }
 0x748   :  { %3351 = vadd.xlane.f32.xlu0 %v3350_v25  ;;  %v867_v29 = vrot.slane %v851_v59, %v11514_v40 }
 0x749   :  { %v11800_v49 = vsub.f32 %v11713_v17, %v3289_v39  ;;  %v3353_v44 = vsel %vm1090_vm3, %v3319_v51, 0.0  ;;  %v3320_v4 = vmul.f32 %v11794_v47, %v11794_v47  ;;  %v858_v39 = vrot.slane %v844_v12, %v11514_v40 }
 0x74a   :  { %v3268_v18 = vpop.xlane.xlu0 %3267  ;;  %3354 = vadd.xlane.f32.xlu1 %v3353_v44  ;;  %v881_v51 = vrot.slane %v859_v9, %v11514_v40  ;;  %v945_v44 = vrot.slane %v867_v29, %v11528_v22 }
 0x74b   :  { %v3290_v50 = vmul.f32 0.03125, %v3268_v18  ;;  %v3356_v35 = vsel %vm1090_vm3, %v3320_v4, 0.0  ;;  %v3321_v24 = vmul.f32 %v11800_v49, %v11800_v49 }
 0x74c   :  { %v3271_v55 = vpop.xlane.xlu1 %3270  ;;  %3357 = vadd.xlane.f32.xlu0 %v3356_v35 }
 0x74d   :  { %v11809_v62 = vsub.f32 %v11721_v0, %v3290_v50  ;;  %v3291_v17 = vmul.f32 0.03125, %v3271_v55  ;;  %v3359_v52 = vsel %vm1090_vm3, %v3321_v24, 0.0  ;;  %v889_v50 = vcombine.high %v867_v29, %v867_v29 }
 0x74e   :  { %v3274_v23 = vpop.xlane.xlu0 %3273  ;;  %3360 = vadd.xlane.f32.xlu1 %v3359_v52  ;;  %v874_v24 = vrot.slane %v858_v39, %v11514_v40  ;;  %v1022_v52 = vmul.f32 %v945_v44, %v11842_v15 }
 0x74f   :  { %v11813_v36 = vsub.f32 %v11725_v13, %v3291_v17  ;;  %v3292_v3 = vmul.f32 0.03125, %v3274_v23  ;;  %v3322_v48 = vmul.f32 %v11809_v62, %v11809_v62  ;;  %v949_v17 = vrot.slane %v881_v51, %v11528_v22 }
 0x750   :  { %v3277_v28 = vpop.xlane.xlu1 %3276  ;;  %vm1038_vm5 = vcmp.gt.f32.partialorder %v1022_v52, 0.0  ;;  %v961_v29 = vrot.slane %v874_v24, %v11528_v22  ;;  %v890_v44 = vcombine.high %v874_v24, %v874_v24 }
 0x751   :  { %v11818_v32 = vsub.f32 %v11723_v11, %v3292_v3  ;;  %v3293_v45 = vmul.f32 0.03125, %v3277_v28  ;;  %v3362_v0 = vsel %vm1090_vm3, %v3322_v48, 0.0  ;;  %v3323_v8 = vmul.f32 %v11813_v36, %v11813_v36 }
 0x752   :  { %3363 = vadd.xlane.f32.xlu0 %v3362_v0  ;;  %v953_v48 = vrot.slane %v889_v50, %v11528_v22  ;;  %v1026_v50 = vmul.f32 %v961_v29, %v11842_v15  ;;  %v969_v24 = vrot.slane %v890_v44, %v11528_v22 }
 0x753   :  { %v11824_v26 = vsub.f32 %v11729_v34, %v3293_v45  ;;  %v3365_v13 = vsel %vm1090_vm3, %v3323_v8, 0.0  ;;  %v3324_v56 = vmul.f32 %v11818_v32, %v11818_v32  ;;  %v11837_v34 = vld [vmem:[%s14335_s26 + $0x8] sm:$0xff]  ;;  %v891_v45 = vcombine.high %v881_v51, %v881_v51 }
 0x754   :  { %3366 = vadd.xlane.f32.xlu1 %v3365_v13  ;;  %v900_v60 = vrot.slane %v11837_v34, %v11514_v40  ;;  %v893_v57 = vcombine.high %v11837_v34, %v11837_v34  ;;  %v1023_v8 = vmul.f32 %v949_v17, %v11842_v15  ;;  %vm1042_vm13 = vcmp.gt.f32.partialorder %v1026_v50, 0.0 }
 0x755   :  { %v3368_v31 = vsel %vm1090_vm3, %v3324_v56, 0.0  ;;  %v3325_v11 = vmul.f32 %v11824_v26, %v11824_v26  ;;  %v8441_v56 = vsel %vm1038_vm5, 1.0, %v14332_v54  ;;  %v957_v5 = vrot.slane %v891_v45, %v11528_v22 }
 0x756   :  { %3369 = vadd.xlane.f32.xlu0 %v3368_v31  ;;  %v908_v2 = vcombine.high %v900_v60, %v900_v60  ;;  %v916_v46 = vrot.slane %v900_v60, %v11514_v40  ;;  %v907_v25 = vrot.slane %v893_v57, %v11514_v40  ;;  %vm1039_vm7 = vcmp.gt.f32.partialorder %v1023_v8, 0.0 }
 0x757   :  { %v3371_v38 = vsel %vm1090_vm3, %v3325_v11, 0.0  ;;  %v1024_v11 = vmul.f32 %v953_v48, %v11842_v15  ;;  %v8442_v53 = vsel %vm1039_vm7, 1.0, %v14332_v54  ;;  %v1025_v57 = vmul.f32 %v957_v5, %v11842_v15 }
 0x758   :  { %3372 = vadd.xlane.f32.xlu1 %v3371_v38  ;;  %v930_v4 = vrot.slane %v908_v2, %v11514_v40  ;;  %v977_v18 = vrot.slane %v916_v46, %v11528_v22  ;;  %v938_v35 = vcombine.high %v916_v46, %v916_v46  ;;  %v923_v55 = vrot.slane %v907_v25, %v11514_v40 }
 0x759   :  { %v9397_v60 = vpack.i.bf16 %v8442_v53, %v8441_v56  ;;  %vm1040_vm9 = vcmp.gt.f32.partialorder %v1024_v11, 0.0  ;;  %v860_v46 = vcombine.high %v858_v39, %v858_v39  ;;  %v909_v51 = vcombine.high %v907_v25, %v907_v25 }
 0x75a   :  { %v981_v23 = vrot.slane %v930_v4, %v11528_v22  ;;  %v1030_v3 = vmul.f32 %v977_v18, %v11837_v34  ;;  %v985_v28 = vrot.slane %v938_v35, %v11528_v22  ;;  %v940_v0 = vcombine.high %v930_v4, %v930_v4 }
 0x75b   :  { %v993_v2 = vrot.slane %v923_v55, %v11528_v22  ;;  %v8443_v4 = vsel %vm1040_vm9, 1.0, %v14332_v54  ;;  %vm1041_vm11 = vcmp.gt.f32.partialorder %v1025_v57, 0.0  ;;  %v888_v17 = vrot.slane %v860_v46, %v11514_v40 }
 0x75c   :  { %v1031_v13 = vmul.f32 %v981_v23, %v11837_v34  ;;  %vm1046_vm6 = vcmp.gt.f32.partialorder %v1030_v3, 0.0  ;;  %v1032_v38 = vmul.f32 %v985_v28, %v11837_v34  ;;  %v989_v30 = vrot.slane %v940_v0, %v11528_v22 }
 0x75d   :  { %v8449_v31 = vsel %vm1046_vm6, 1.0, %v14332_v54  ;;  %v1034_v35 = vmul.f32 %v993_v2, %v11837_v34  ;;  %v939_v52 = vcombine.high %v923_v55, %v923_v55  ;;  %v937_v23 = vrot.slane %v909_v51, %v11514_v40 }
 0x75e   :  { %vm1047_vm8 = vcmp.gt.f32.partialorder %v1031_v13, 0.0  ;;  %vm1048_vm10 = vcmp.gt.f32.partialorder %v1032_v38, 0.0  ;;  %v1033_v9 = vmul.f32 %v989_v30, %v11837_v34  ;;  %v8444_v39 = vsel %vm1041_vm11, 1.0, %v14332_v54 }
 0x75f   :  { %v8450_v59 = vsel %vm1047_vm8, 1.0, %v14332_v54  ;;  %v8451_v18 = vsel %vm1048_vm10, 1.0, %v14332_v54  ;;  %v965_v25 = vrot.slane %v888_v17, %v11528_v22  ;;  %v997_v28 = vrot.slane %v937_v23, %v11528_v22 }
 0x760   :  { %v9402_v12 = vpack.i.bf16 %v8450_v59, %v8449_v31  ;;  %vm1049_vm12 = vcmp.gt.f32.partialorder %v1033_v9, 0.0  ;;  %v9407_v3 = vpack.i.bf16 %v8451_v18, %v8443_v4  ;;  %v892_v45 = vcombine.high %v888_v17, %v888_v17 }
 0x761   :  { %v8452_v48 = vsel %vm1049_vm12, 1.0, %v14332_v54  ;;  %vm1050_vm14 = vcmp.gt.f32.partialorder %v1034_v35, 0.0  ;;  %v1027_v0 = vmul.f32 %v965_v25, %v11842_v15  ;;  %v1001_v55 = vrot.slane %v939_v52, %v11528_v22 }
 0x762   :  { %v941_v8 = vcombine.high %v937_v23, %v937_v23  ;;  %v1035_v13 = vmul.f32 %v997_v28, %v11837_v34  ;;  %v973_v56 = vrot.slane %v892_v45, %v11528_v22  ;;  %v9412_v31 = vpack.i.bf16 %v8452_v48, %v8444_v39 }
 0x763   :  { %v1028_v11 = vmul.f32 %v969_v24, %v11842_v15  ;;  %v8445_v5 = vsel %vm1042_vm13, 1.0, %v14332_v54  ;;  %v8453_v30 = vsel %vm1050_vm14, 1.0, %v14332_v54  ;;  %vm1043_vm15 = vcmp.gt.f32.partialorder %v1027_v0, 0.0 }
 0x764   :  { %v1005_v38 = vrot.slane %v941_v8, %v11528_v22  ;;  %v1029_v53 = vmul.f32 %v973_v56, %v11842_v15  ;;  %vm1051_vm0 = vcmp.gt.f32.partialorder %v1035_v13, 0.0  ;;  %v1036_v59 = vmul.f32 %v1001_v55, %v11837_v34 }
 0x765   :  { %v9417_v57 = vpack.i.bf16 %v8453_v30, %v8445_v5  ;;  %vm1044_vm2 = vcmp.gt.f32.partialorder %v1028_v11, 0.0  ;;  %v8446_v2 = vsel %vm1043_vm15, 1.0, %v14332_v54  ;;  %v8454_v46 = vsel %vm1051_vm0, 1.0, %v14332_v54  ;;  %v11915_v5 = vld [vmem:[%s14243_s14 + $0x4] ss:$0 sm:$0xff] }
 0x766   :  { %vm1045_vm1 = vcmp.gt.f32.partialorder %v1029_v53, 0.0  ;;  %vm1052_vm6 = vcmp.gt.f32.partialorder %v1036_v59, 0.0  ;;  %v9422_v50 = vpack.i.bf16 %v8454_v46, %v8446_v2  ;;  %v8447_v35 = vsel %vm1044_vm2, 1.0, %v14332_v54 }
 0x767   :  { %v8448_v9 = vsel %vm1045_vm1, 1.0, %v14332_v54  ;;  %v8455_v23 = vsel %vm1052_vm6, 1.0, %v14332_v54  ;;  %vm4393_vm7 = vcmask 1041409   ;;  %vm4395_vm8 = vcmask 1042434  }
 0x768   :  { %v9427_v48 = vpack.i.bf16 %v8455_v23, %v8447_v35  ;;  %vm4397_vm9 = vcmask 1043459   ;;  %vm4399_vm10 = vcmask 1044484   ;;  %vm4401_vm11 = vcmask 1045509  }
 0x769   :  { %3945 = vperm.xlu1 %9396, %v11837_v34   ;;  %vm4403_vm12 = vcmask 1046534   ;;  %vm4405_vm13 = vcmask 1047559   ;;  %vm8061_vm14 = vcmask 254976  }
 0x76c   :  { %3941 = vperm.xlu0 %9395, %v11842_v15  }
 0x76d   :  { %9398 = vperm.xlu1 %9396, %v9397_v60   ;;  %v1037_v60 = vmul.f32 %v1005_v38, %v11837_v34 }
 0x76f   :  { %vm1053_vm5 = vcmp.gt.f32.partialorder %v1037_v60, 0.0 }
 0x770   :  { %v8456_v15 = vsel %vm1053_vm5, 1.0, %v14332_v54 }
 0x771   :  { %9403 = vperm.xlu1 %9396, %v9402_v12   ;;  %v9432_v44 = vpack.i.bf16 %v8456_v15, %v8448_v9 }
 0x773   :  { %9433 = vperm.xlu0 %9395, %v9432_v44  }
 0x775   :  { %9408 = vperm.xlu1 %9396, %v9407_v3  }
 0x779   :  { %9413 = vperm.xlu1 %9396, %v9412_v31  }
 0x77d   :  { %9418 = vperm.xlu1 %9396, %v9417_v57  }
 0x781   :  { %9423 = vperm.xlu1 %9396, %v9422_v50  }
 0x785   :  { %9428 = vperm.xlu1 %9396, %v9427_v48  }
 0x7bf   :  { %v3328_v12 = vpop.xlane.xlu0 %3327 }
 0x7c0   :  { %v3374_v29 = vmul.f32 0.03125, %v3328_v12  ;;  %v11921_v12 = vld [vmem:[%s14244_s15 + $0x4] ss:$0 sm:$0xff] }
 0x7c1   :  { %v3331_v51 = vpop.xlane.xlu1 %3330 }
 0x7c2   :  { %v3390_v4 = vadd.f32 1e-05, %v3374_v29  ;;  %v3375_v34 = vmul.f32 0.03125, %v3331_v51 }
 0x7c3   :  { %v3334_v18 = vpop.xlane.xlu0 %3333 }
 0x7c4   :  { %9703 = vrsqrt.f32 %v3390_v4  ;;  %v3391_v17 = vadd.f32 1e-05, %v3375_v34  ;;  %v3376_v52 = vmul.f32 0.03125, %v3334_v18 }
 0x7c5   :  { %v3337_v3 = vpop.xlane.xlu1 %3336 }
 0x7c6   :  { %9705 = vrsqrt.f32 %v3391_v17  ;;  %v3392_v39 = vadd.f32 1e-05, %v3376_v52  ;;  %v3377_v25 = vmul.f32 0.03125, %v3337_v3 }
 0x7c7   :  { %v3340_v24 = vpop.xlane.xlu0 %3339 }
 0x7c8   :  { %9707 = vrsqrt.f32 %v3392_v39  ;;  %v3393_v28 = vadd.f32 1e-05, %v3377_v25  ;;  %v3378_v45 = vmul.f32 0.03125, %v3340_v24 }
 0x7c9   :  { %v3343_v0 = vpop.xlane.xlu1 %3342 }
 0x7ca   :  { %9709 = vrsqrt.f32 %v3393_v28  ;;  %v3394_v55 = vadd.f32 1e-05, %v3378_v45  ;;  %v3379_v8 = vmul.f32 0.03125, %v3343_v0 }
 0x7cb   :  { %v3346_v13 = vpop.xlane.xlu0 %3345 }
 0x7cc   :  { %9711 = vrsqrt.f32 %v3394_v55  ;;  %v3395_v56 = vadd.f32 1e-05, %v3379_v8  ;;  %v3380_v31 = vmul.f32 0.03125, %v3346_v13 }
 0x7cd   :  { %v3349_v11 = vpop.xlane.xlu1 %3348 }
 0x7ce   :  { %v9704_v38 = vpop.eup %9703  ;;  %9713 = vrsqrt.f32 %v3395_v56  ;;  %v3396_v30 = vadd.f32 1e-05, %v3380_v31  ;;  %v3381_v53 = vmul.f32 0.03125, %v3349_v11 }
 0x7cf   :  { %v3422_v59 = vmul.f32 %v9704_v38, %v11738_v10 }
 0x7d0   :  { %v9706_v60 = vpop.eup %9705  ;;  %9715 = vrsqrt.f32 %v3396_v30  ;;  %v3397_v57 = vadd.f32 1e-05, %v3381_v53 }
 0x7d1   :  { %v3423_v9 = vmul.f32 %v9706_v60, %v11741_v58  ;;  %v3444_v29 = vmul.f32 %v11915_v5, %v3422_v59 }
 0x7d2   :  { %v9708_v2 = vpop.eup %9707  ;;  %9717 = vrsqrt.f32 %v3397_v57 }
 0x7d3   :  { %v3424_v46 = vmul.f32 %v9708_v2, %v11746_v7  ;;  %v3445_v15 = vmul.f32 %v11915_v5, %v3423_v9  ;;  %v11928_v10 = vadd.f32 %v11921_v12, %v3444_v29 }
 0x7d4   :  { %v9710_v51 = vpop.eup %9709 }
 0x7d5   :  { %v3352_v44 = vpop.xlane.xlu0 %3351  ;;  %v3446_v4 = vmul.f32 %v11915_v5, %v3424_v46  ;;  %v3425_v34 = vmul.f32 %v9710_v51, %v11752_v20  ;;  %v11933_v58 = vadd.f32 %v11921_v12, %v3445_v15  ;;  %v3482_v17 = vmin.f32 %v11928_v10, 20.0 }
 0x7d6   :  { %v3382_v18 = vmul.f32 0.03125, %v3352_v44  ;;  %v9712_v50 = vpop.eup %9711 }
 0x7d7   :  { %v3355_v35 = vpop.xlane.xlu1 %3354  ;;  %v11937_v7 = vadd.f32 %v11921_v12, %v3446_v4  ;;  %v3447_v52 = vmul.f32 %v11915_v5, %v3425_v34  ;;  %v3426_v39 = vmul.f32 %v9712_v50, %v11758_v61  ;;  %v3483_v20 = vmin.f32 %v11933_v58, 20.0 }
 0x7d8   :  { %v3398_v23 = vadd.f32 1e-05, %v3382_v18  ;;  %v9714_v3 = vpop.eup %9713  ;;  %v3383_v25 = vmul.f32 0.03125, %v3355_v35  ;;  %v3498_v48 = vmul.f32 1.442695, %v3482_v17 }
 0x7d9   :  { %v3358_v24 = vpop.xlane.xlu0 %3357  ;;  %v3484_v28 = vmin.f32 %v11937_v7, 20.0  ;;  %v11944_v45 = vadd.f32 %v11921_v12, %v3447_v52  ;;  %v3427_v0 = vmul.f32 %v9714_v3, %v11764_v41  ;;  %v3500_v31 = vmul.f32 1.442695, %v3483_v20 }
 0x7da   :  { %9719 = vrsqrt.f32 %v3398_v23  ;;  %v9716_v55 = vpop.eup %9715  ;;  %v3399_v8 = vadd.f32 1e-05, %v3383_v25  ;;  %v3384_v13 = vmul.f32 0.03125, %v3358_v24  ;;  %v3448_v60 = vmul.f32 %v11915_v5, %v3426_v39 }
 0x7db   :  { %v3361_v56 = vpop.xlane.xlu1 %3360  ;;  %9721 = vpow2.f32 %v3498_v48  ;;  %v3502_v61 = vmul.f32 1.442695, %v3484_v28  ;;  %v3485_v11 = vmin.f32 %v11944_v45, 20.0  ;;  %v3428_v38 = vmul.f32 %v9716_v55, %v11770_v21 }
 0x7dc   :  { %v3385_v30 = vmul.f32 0.03125, %v3361_v56  ;;  %v9718_v53 = vpop.eup %9717  ;;  %9723 = vrsqrt.f32 %v3399_v8  ;;  %v3400_v59 = vadd.f32 1e-05, %v3384_v13  ;;  %v3449_v41 = vmul.f32 %v11915_v5, %v3427_v0 }
 0x7dd   :  { %9725 = vpow2.f32 %v3502_v61  ;;  %v3504_v57 = vmul.f32 1.442695, %v3485_v11  ;;  %v3429_v9 = vmul.f32 %v9718_v53, %v11776_v37  ;;  %v11953_v46 = vadd.f32 %v11921_v12, %v3448_v60 }
 0x7de   :  { %v3401_v29 = vadd.f32 1e-05, %v3385_v30  ;;  %9727 = vrsqrt.f32 %v3400_v59  ;;  %v11956_v21 = vadd.f32 %v11921_v12, %v3449_v41  ;;  %v3450_v15 = vmul.f32 %v11915_v5, %v3428_v38 }
 0x7df   :  { %v3364_v2 = vpop.xlane.xlu0 %3363  ;;  %9729 = vpow2.f32 %v3504_v57  ;;  %v3451_v44 = vmul.f32 %v11915_v5, %v3429_v9  ;;  %v3486_v34 = vmin.f32 %v11953_v46, 20.0 }
 0x7e0   :  { %v3386_v51 = vmul.f32 0.03125, %v3364_v2  ;;  %9731 = vrsqrt.f32 %v3401_v29  ;;  %v3487_v37 = vmin.f32 %v11956_v21, 20.0  ;;  %v11963_v18 = vadd.f32 %v11921_v12, %v3450_v15 }
 0x7e1   :  { %v3367_v4 = vpop.xlane.xlu1 %3366  ;;  %9733 = vpow2.f32 %v3500_v31  ;;  %v11966_v17 = vadd.f32 %v11921_v12, %v3451_v44  ;;  %v3506_v23 = vmul.f32 1.442695, %v3486_v34 }
 0x7e2   :  { %v3402_v50 = vadd.f32 1e-05, %v3386_v51  ;;  %v3387_v35 = vmul.f32 0.03125, %v3367_v4  ;;  %v3508_v3 = vmul.f32 1.442695, %v3487_v37  ;;  %v3488_v39 = vmin.f32 %v11963_v18, 20.0 }
 0x7e3   :  { %v3370_v52 = vpop.xlane.xlu0 %3369  ;;  %v3489_v48 = vmin.f32 %v11966_v17, 20.0 }
 0x7e4   :  { %v9720_v25 = vpop.eup %9719  ;;  %9735 = vrsqrt.f32 %v3402_v50  ;;  %v3403_v24 = vadd.f32 1e-05, %v3387_v35  ;;  %v3388_v20 = vmul.f32 0.03125, %v3370_v52  ;;  %v3510_v8 = vmul.f32 1.442695, %v3488_v39 }
 0x7e5   :  { %v9722_v28 = vpop.eup %9721  ;;  %v3430_v0 = vmul.f32 %v9720_v25, %v11786_v19  ;;  %v3373_v55 = vpop.xlane.xlu1 %3372  ;;  %9737 = vpow2.f32 %v3506_v23  ;;  %v3512_v11 = vmul.f32 1.442695, %v3489_v48 }
 0x7e6   :  { %9739 = vrsqrt.f32 %v3403_v24  ;;  %v3404_v13 = vadd.f32 1e-05, %v3388_v20  ;;  %v3389_v56 = vmul.f32 0.03125, %v3373_v55  ;;  %v3530_v31 = vadd.f32 2.0, %v9722_v28  ;;  %v9724_v61 = vpop.eup %9723 }
 0x7e7   :  { %9741 = vpow2.f32 %v3508_v3  ;;  %v3452_v38 = vmul.f32 %v11915_v5, %v3430_v0  ;;  %v9726_v30 = vpop.eup %9725  ;;  %v3431_v53 = vmul.f32 %v9724_v61, %v11789_v42 }
 0x7e8   :  { %9743 = vrsqrt.f32 %v3404_v13  ;;  %v3405_v59 = vadd.f32 1e-05, %v3389_v56  ;;  %v3546_v60 = vmul.f32 %v9722_v28, %v3530_v31  ;;  %v9728_v41 = vpop.eup %9727  ;;  %v3532_v19 = vadd.f32 2.0, %v9726_v30 }
 0x7e9   :  { %9745 = vpow2.f32 %v3510_v8  ;;  %v11974_v57 = vadd.f32 %v11921_v12, %v3452_v38  ;;  %v9730_v9 = vpop.eup %9729  ;;  %v3432_v29 = vmul.f32 %v9728_v41, %v11794_v47  ;;  %v3453_v42 = vmul.f32 %v11915_v5, %v3431_v53 }
 0x7ea   :  { %9747 = vrsqrt.f32 %v3405_v59  ;;  %v3578_v2 = vadd.f32 2.0, %v3546_v60  ;;  %v9732_v15 = vpop.eup %9731  ;;  %v3548_v51 = vmul.f32 %v9726_v30, %v3532_v19  ;;  %v3533_v44 = vadd.f32 2.0, %v9730_v9 }
 0x7eb   :  { %9749 = vpow2.f32 %v3512_v11  ;;  %v9734_v4 = vpop.eup %9733  ;;  %v3433_v34 = vmul.f32 %v9732_v15, %v11800_v49  ;;  %v3490_v37 = vmin.f32 %v11974_v57, 20.0  ;;  %v3454_v50 = vmul.f32 %v11915_v5, %v3432_v29 }
 0x7ec   :  { %v3580_v35 = vadd.f32 2.0, %v3548_v51  ;;  %v3549_v52 = vmul.f32 %v9730_v9, %v3533_v44  ;;  %v3531_v23 = vadd.f32 2.0, %v9734_v4  ;;  %9751 = vrcp.f32 %v3578_v2 }
 0x7ed   :  { %v11982_v3 = vadd.f32 %v11921_v12, %v3453_v42  ;;  %v3514_v39 = vmul.f32 1.442695, %v3490_v37  ;;  %v3455_v25 = vmul.f32 %v11915_v5, %v3433_v34  ;;  %v11986_v24 = vadd.f32 %v11921_v12, %v3454_v50 }
 0x7ee   :  { %v9736_v47 = vpop.eup %9735  ;;  %9753 = vrcp.f32 %v3580_v35  ;;  %v3581_v49 = vadd.f32 2.0, %v3549_v52  ;;  %v3547_v28 = vmul.f32 %v9734_v4, %v3531_v23  ;;  %v3562_v34 = vmul.f32 %v3546_v60, %v11928_v10 }
 0x7ef   :  { %v9738_v20 = vpop.eup %9737  ;;  %v3491_v55 = vmin.f32 %v11982_v3, 20.0  ;;  %9755 = vpow2.f32 %v3514_v39  ;;  %v11990_v13 = vadd.f32 %v11921_v12, %v3455_v25  ;;  %v3492_v56 = vmin.f32 %v11986_v24, 20.0 }
 0x7f0   :  { %v9740_v48 = vpop.eup %9739  ;;  %v3534_v0 = vadd.f32 2.0, %v9738_v20  ;;  %9757 = vrcp.f32 %v3581_v49  ;;  %v3434_v61 = vmul.f32 %v9736_v47, %v11809_v62  ;;  %v3579_v11 = vadd.f32 2.0, %v3547_v28 }
 0x7f1   :  { %v9742_v8 = vpop.eup %9741  ;;  %v3435_v59 = vmul.f32 %v9740_v48, %v11813_v36  ;;  %v3516_v41 = vmul.f32 1.442695, %v3491_v55  ;;  %v3493_v19 = vmin.f32 %v11990_v13, 20.0  ;;  %v3518_v9 = vmul.f32 1.442695, %v3492_v56 }
 0x7f2   :  { %v9744_v31 = vpop.eup %9743  ;;  %v3535_v38 = vadd.f32 2.0, %v9742_v8  ;;  %v11994_v30 = vmul.f32 %v9738_v20, %v3534_v0  ;;  %9759 = vrcp.f32 %v3579_v11  ;;  %v3564_v10 = vmul.f32 %v3548_v51, %v11937_v7 }
 0x7f3   :  { %v9746_v53 = vpop.eup %9745  ;;  %v3436_v2 = vmul.f32 %v9744_v31, %v11818_v32  ;;  %9761 = vpow2.f32 %v3516_v41  ;;  %v3520_v4 = vmul.f32 1.442695, %v3493_v19  ;;  %v3456_v32 = vmul.f32 %v11915_v5, %v3434_v61 }
 0x7f4   :  { %v9748_v29 = vpop.eup %9747  ;;  %v3551_v15 = vmul.f32 %v9742_v8, %v3535_v38  ;;  %v3582_v44 = vadd.f32 2.0, %v11994_v30  ;;  %v3536_v62 = vadd.f32 2.0, %v9746_v53  ;;  %v3457_v39 = vmul.f32 %v11915_v5, %v3435_v59 }
 0x7f5   :  { %v9750_v42 = vpop.eup %9749  ;;  %v3437_v35 = vmul.f32 %v9748_v29, %v11824_v26  ;;  %v3458_v25 = vmul.f32 %v11915_v5, %v3436_v2  ;;  %v12010_v49 = vadd.f32 %v11921_v12, %v3456_v32  ;;  %v3565_v48 = vmul.f32 %v3549_v52, %v11944_v45 }
 0x7f6   :  { %v3583_v37 = vadd.f32 2.0, %v3551_v15  ;;  %9763 = vrcp.f32 %v3582_v44  ;;  %v3537_v36 = vadd.f32 2.0, %v9750_v42  ;;  %v9752_v50 = vpop.eup %9751  ;;  %v12002_v23 = vmul.f32 %v9746_v53, %v3536_v62 }
 0x7f7   :  { %9765 = vpow2.f32 %v3518_v9  ;;  %v3563_v0 = vmul.f32 %v3547_v28, %v11933_v58  ;;  %v12015_v8 = vadd.f32 %v11921_v12, %v3457_v39  ;;  %v3494_v7 = vmin.f32 %v12010_v49, 20.0 }
 0x7f8   :  { %9767 = vrcp.f32 %v3583_v37  ;;  %v3553_v47 = vmul.f32 %v9750_v42, %v3537_v36  ;;  %v9754_v20 = vpop.eup %9753  ;;  %v3584_v60 = vadd.f32 2.0, %v12002_v23  ;;  %v3459_v51 = vmul.f32 %v11915_v5, %v3437_v35 }
 0x7f9   :  { %9769 = vpow2.f32 %v3520_v4  ;;  %v9756_v26 = vpop.eup %9755  ;;  %v3495_v11 = vmin.f32 %v12015_v8, 20.0  ;;  %v12021_v38 = vadd.f32 %v11921_v12, %v3458_v25  ;;  %v3612_v45 = vmul.f32 %v9754_v20, %v3564_v10 }
 0x7fa   :  { %v3585_v55 = vadd.f32 2.0, %v3553_v47  ;;  %v9758_v56 = vpop.eup %9757  ;;  %9771 = vrcp.f32 %v3584_v60  ;;  %v3538_v31 = vadd.f32 2.0, %v9756_v26  ;;  %v3522_v52 = vmul.f32 1.442695, %v3494_v7 }
 0x7fb   :  { %v3613_v61 = vmul.f32 %v9758_v56, %v3565_v48  ;;  %v12026_v28 = vadd.f32 %v11921_v12, %v3459_v51  ;;  %v3610_v59 = vmul.f32 %v9752_v50, %v3562_v34  ;;  %v3524_v41 = vmul.f32 1.442695, %v3495_v11 }
 0x7fc   :  { %9773 = vrcp.f32 %v3585_v55  ;;  %v12023_v58 = vmul.f32 %v9756_v26, %v3538_v31  ;;  %v9760_v53 = vpop.eup %9759  ;;  %v3496_v19 = vmin.f32 %v12021_v38, 20.0  ;;  %v3566_v34 = vmul.f32 %v11994_v30, %v11953_v46 }
 0x7fd   :  { %v9762_v5 = vpop.eup %9761  ;;  %v3611_v9 = vmul.f32 %v9760_v53, %v3563_v0  ;;  %v3627_v29 = vpack.c.bf16 %v3613_v61, %v3612_v45  ;;  %9775 = vpow2.f32 %v3522_v52  ;;  %v3497_v62 = vmin.f32 %v12026_v28, 20.0 }
 0x7fe   :  { %v3586_v2 = vadd.f32 2.0, %v12023_v58  ;;  %v3539_v42 = vadd.f32 2.0, %v9762_v5  ;;  %9777 = vpow2.f32 %v3524_v41  ;;  %v3526_v4 = vmul.f32 1.442695, %v3496_v19 }
 0x7ff   :  { %v3626_v12 = vpack.c.bf16 %v3611_v9, %v3610_v59  ;;  %v3567_v36 = vmul.f32 %v3551_v15, %v11956_v21  ;;  %v3528_v39 = vmul.f32 1.442695, %v3497_v62  ;;  %v3568_v21 = vmul.f32 %v12002_v23, %v11963_v18 }
 0x800   :  { %v9764_v44 = vpop.eup %9763  ;;  %v3555_v35 = vmul.f32 %v9762_v5, %v3539_v42  ;;  %9779 = vpow2.f32 %v3526_v4  ;;  %v3569_v30 = vmul.f32 %v3553_v47, %v11966_v17  ;;  %v3570_v5 = vmul.f32 %v12023_v58, %v11974_v57 }
 0x801   :  { %v9766_v37 = vpop.eup %9765  ;;  %9115 = vmatprep.mubr.msk.bf16.mxu1 %vm1090_vm3, %v3626_v12  ;;  %v3614_v20 = vmul.f32 %v9764_v44, %v3566_v34  ;;  %9781 = vrcp.f32 %v3586_v2 }
 0x802   :  { %v9768_v50 = vpop.eup %9767  ;;  %v3540_v32 = vadd.f32 2.0, %v9766_v37  ;;  %9116 = vmatmul.mubr.msk.bf16.vlgmr.msra.gmra.mrb[48].mxu1 %vm1090_vm3, %v3627_v29  ;;  %v3587_v60 = vadd.f32 2.0, %v3555_v35  ;;  %9783 = vpow2.f32 %v3528_v39  ;;  %v3571_v9 = vmul.f32 %v3555_v35, %v11982_v3 }
 0x803   :  { %v9770_v25 = vpop.eup %9769  ;;  %v3615_v10 = vmul.f32 %v9768_v50, %v3567_v36 }
 0x804   :  { %v3541_v26 = vadd.f32 2.0, %v9770_v25  ;;  %v3556_v48 = vmul.f32 %v9766_v37, %v3540_v32  ;;  %v9772_v0 = vpop.eup %9771  ;;  %9785 = vrcp.f32 %v3587_v60 }
 0x805   :  { %v3628_v46 = vpack.c.bf16 %v3615_v10, %v3614_v20  ;;  %v3616_v56 = vmul.f32 %v9772_v0, %v3568_v21 }
 0x806   :  { %v9774_v15 = vpop.eup %9773  ;;  %v3557_v55 = vmul.f32 %v9770_v25, %v3541_v26  ;;  %v3588_v7 = vadd.f32 2.0, %v3556_v48  ;;  %v3572_v50 = vmul.f32 %v3556_v48, %v11986_v24 }
 0x807   :  { %9119 = vmatprep.mubr.msk.bf16.mxu1 %vm1090_vm3, %v3628_v46  ;;  %v3617_v31 = vmul.f32 %v9774_v15, %v3569_v30  ;;  %v9776_v61 = vpop.eup %9775 }
 0x808   :  { %v3589_v51 = vadd.f32 2.0, %v3557_v55  ;;  %9787 = vrcp.f32 %v3588_v7  ;;  %v9778_v45 = vpop.eup %9777  ;;  %v3542_v52 = vadd.f32 2.0, %v9776_v61  ;;  %v3573_v32 = vmul.f32 %v3557_v55, %v11990_v13 }
 0x809   :  { %v3629_v11 = vpack.c.bf16 %v3617_v31, %v3616_v56  ;;  %v3543_v53 = vadd.f32 2.0, %v9778_v45  ;;  %v8477_v31 = vld [vmem:[%s14242_s13 + $0x2] ss:$0 sm:$0xff] }
 0x80a   :  { %9789 = vrcp.f32 %v3589_v51  ;;  %v9780_v18 = vpop.eup %9779  ;;  %v3558_v17 = vmul.f32 %v9776_v61, %v3542_v52 }
 0x80b   :  { %9120 = vmatmul.mubr.msk.bf16.gmra.mrb[52].mxu1 %vm1090_vm3, %v3629_v11  ;;  %v3559_v23 = vmul.f32 %v9778_v45, %v3543_v53  ;;  %v3544_v47 = vadd.f32 2.0, %v9780_v18  ;;  %v9782_v59 = vpop.eup %9781  ;;  %v14341_v53 = vld [vmem:[#allocation11_spill] sm:$0xff] }
 0x80c   :  { %v3590_v41 = vadd.f32 2.0, %v3558_v17  ;;  %v9784_v19 = vpop.eup %9783  ;;  %v3618_v62 = vmul.f32 %v9782_v59, %v3570_v5  ;;  %v3574_v20 = vmul.f32 %v3558_v17, %v12010_v49  ;;  %v12056_v49 = vpop.permute.xlu1 %3945  ;;  %v14342_v17 = vld [vmem:[#allocation12_spill] sm:$0xff] }
 0x80d   :  { %v3591_v29 = vadd.f32 2.0, %v3559_v23  ;;  %v3560_v2 = vmul.f32 %v9780_v18, %v3544_v47  ;;  %v3545_v42 = vadd.f32 2.0, %v9784_v19  ;;  %v3575_v10 = vmul.f32 %v3559_v23, %v12015_v8  ;;  %14336 = vst [vmem:[#allocation15_spill] sm:$0xff] %v12056_v49 }
 0x80e   :  { %v9786_v44 = vpop.eup %9785  ;;  %9791 = vrcp.f32 %v3590_v41  ;;  %v12081_v18 = vadd.f32 %v8477_v31, %v14341_v53  ;;  %v12084_v23 = vadd.f32 %v8477_v31, %v14342_v17 }
 0x80f   :  { %v3619_v4 = vmul.f32 %v9786_v44, %v3571_v9  ;;  %9793 = vrcp.f32 %v3591_v29  ;;  %v3592_v37 = vadd.f32 2.0, %v3560_v2  ;;  %v3561_v12 = vmul.f32 %v9784_v19, %v3545_v42 }
 0x810   :  { %v3576_v0 = vmul.f32 %v3560_v2, %v12021_v38  ;;  %v12058_v8 = vpop.permute.xlu1 %9398 }
 0x811   :  { %v3630_v36 = vpack.c.bf16 %v3619_v4, %v3618_v62  ;;  %v3593_v57 = vadd.f32 2.0, %v3561_v12  ;;  %9795 = vrcp.f32 %v3592_v37  ;;  %v3577_v46 = vmul.f32 %v3561_v12, %v12026_v28  ;;  %14337 = vst [vmem:[#allocation16_spill] sm:$0xff] %v12058_v8  ;;  %v12067_v28 = vld [vmem:[%s14242_s13 + $0x8] ss:$0 sm:$0xff] }
 0x812   :  { %v9788_v34 = vpop.eup %9787  ;;  %v14271_v42 = vunpack.i.l.bf16 %v12058_v8 }
 0x813   :  { %9123 = vmatprep.mubr.msk.bf16.mxu1 %vm1090_vm3, %v3630_v36  ;;  %v3620_v3 = vmul.f32 %v9788_v34, %v3572_v50  ;;  %9797 = vrcp.f32 %v3593_v57 }
 0x814   :  { %v9790_v39 = vpop.eup %9789  ;;  %v12060_v56 = vpop.permute.xlu1 %9403 }
 0x815   :  { %v3621_v58 = vmul.f32 %v9790_v39, %v3573_v32  ;;  %14338 = vst [vmem:[#allocation17_spill] sm:$0xff] %v12060_v56 }
 0x817   :  { %v3631_v35 = vpack.c.bf16 %v3621_v58, %v3620_v3 }
 0x818   :  { %v9792_v25 = vpop.eup %9791  ;;  %v12062_v38 = vpop.permute.xlu1 %9408 }
 0x819   :  { %9124 = vmatmul.mubr.msk.bf16.gmra.mrb[56].mxu1 %vm1090_vm3, %v3631_v35  ;;  %v9794_v60 = vpop.eup %9793  ;;  %v3622_v24 = vmul.f32 %v9792_v25, %v3574_v20  ;;  %14339 = vst [vmem:[#allocation18_spill] sm:$0xff] %v12062_v38 }
 0x81a   :  { %v3623_v26 = vmul.f32 %v9794_v60, %v3575_v10 }
 0x81b   :  { %v9796_v13 = vpop.eup %9795 }
 0x81c   :  { %v3632_v48 = vpack.c.bf16 %v3623_v26, %v3622_v24  ;;  %v3624_v30 = vmul.f32 %v9796_v13, %v3576_v0  ;;  %v12078_v52 = vpop.permute.xlu1 %9413 }
 0x81d   :  { %v9798_v21 = vpop.eup %9797  ;;  %14340 = vst [vmem:[#allocation19_spill] sm:$0xff] %v12078_v52 }
 0x81e   :  { %9127 = vmatprep.mubr.msk.bf16.mxu1 %vm1090_vm3, %v3632_v48  ;;  %v3625_v15 = vmul.f32 %v9798_v21, %v3577_v46 }
 0x820   :  { %v3633_v55 = vpack.c.bf16 %v3625_v15, %v3624_v30  ;;  %v12108_v20 = vpop.permute.xlu1 %9418 }
 0x821   :  { %14343 = vst [vmem:[#allocation11_spill] sm:$0xff] %v12108_v20 }
 0x822   :  { %9128 = vmatmul.mubr.msk.bf16.gmra.mrb[60].mxu1 %vm1090_vm3, %v3633_v55 }
 0x823   :  { %9159 = vmatprep.mubr.msk.bf16.mxu1 %vm10337_vm4, %v14332_v54 }
 0x8d5   :  { %v9117_v7 = vpop.f32.mrb[48].mxu1 }
 0x8d6   :  { %v12073_v51 = vadd.f32 %v9117_v7, %v12067_v28  ;;  %v3717_v61 = vpop.f32.mrb[49].mxu1 }
 0x8d7   :  { %v12076_v11 = vadd.f32 %v12067_v28, %v3717_v61  ;;  %v9118_v45 = vpop.f32.mrb[50].mxu1 }
 0x8d8   :  { %v3794_v47 = vsel %vm1090_vm3, %v12073_v51, -inf  ;;  %v12089_v59 = vadd.f32 %v9118_v45, %v12067_v28  ;;  %v3720_v41 = vpop.f32.mrb[51].mxu1 }
 0x8d9   :  { %v3795_v19 = vrot.slane %v3794_v47, 4  ;;  %v3780_v5 = vsel %vm1090_vm3, %v12076_v11, -inf  ;;  %v12094_v9 = vadd.f32 %v12067_v28, %v3720_v41 }
 0x8da   :  { %v3781_v2 = vrot.slane %v3780_v5, 4  ;;  %v3801_v44 = vsel %vm1090_vm3, %v12089_v59, -inf }
 0x8db   :  { %v3796_v4 = vmax.f32 %v3794_v47, %v3795_v19  ;;  %v3802_v37 = vrot.slane %v3801_v44, 4  ;;  %v3787_v12 = vsel %vm1090_vm3, %v12094_v9, -inf }
 0x8dc   :  { %v3782_v36 = vmax.f32 %v3780_v5, %v3781_v2  ;;  %v3788_v50 = vrot.slane %v3787_v12, 4 }
 0x8dd   :  { %v3797_v57 = vrot.slane %v3796_v4, 2  ;;  %v3803_v3 = vmax.f32 %v3801_v44, %v3802_v37 }
 0x8de   :  { %v9121_v58 = vpop.f32.mrb[52].mxu1  ;;  %v3783_v10 = vrot.slane %v3782_v36, 2  ;;  %v3789_v60 = vmax.f32 %v3787_v12, %v3788_v50 }
 0x8df   :  { %v12111_v24 = vadd.f32 %v9121_v58, %v12067_v28  ;;  %v3733_v26 = vpop.f32.mrb[53].mxu1  ;;  %v3798_v48 = vmax.f32 %v3796_v4, %v3797_v57  ;;  %v3804_v0 = vrot.slane %v3803_v3, 2 }
 0x8e0   :  { %v12115_v46 = vadd.f32 %v12067_v28, %v3733_v26  ;;  %v9122_v21 = vpop.f32.mrb[54].mxu1  ;;  %v3784_v15 = vmax.f32 %v3782_v36, %v3783_v10  ;;  %v3790_v55 = vrot.slane %v3789_v60, 2 }
 0x8e1   :  { %v3822_v31 = vsel %vm1090_vm3, %v12111_v24, -inf  ;;  %v12121_v7 = vadd.f32 %v9122_v21, %v12067_v28  ;;  %v3736_v61 = vpop.f32.mrb[55].mxu1  ;;  %v3799_v45 = vrot.slane %v3798_v48, 1  ;;  %v3805_v53 = vmax.f32 %v3803_v3, %v3804_v0 }
 0x8e2   :  { %v3823_v17 = vrot.slane %v3822_v31, 4  ;;  %v3808_v47 = vsel %vm1090_vm3, %v12115_v46, -inf  ;;  %v3785_v41 = vrot.slane %v3784_v15, 1  ;;  %v3791_v19 = vmax.f32 %v3789_v60, %v3790_v55 }
 0x8e3   :  { %v3809_v5 = vrot.slane %v3808_v47, 4  ;;  %v3829_v2 = vsel %vm1090_vm3, %v12121_v7, -inf  ;;  %v3800_v44 = vmax.f32 %v3798_v48, %v3799_v45  ;;  %v3806_v4 = vrot.slane %v3805_v53, 1 }
 0x8e4   :  { %v3824_v37 = vmax.f32 %v3822_v31, %v3823_v17  ;;  %v3830_v12 = vrot.slane %v3829_v2, 4  ;;  %v3786_v36 = vmax.f32 %v3784_v15, %v3785_v41  ;;  %v3792_v50 = vrot.slane %v3791_v19, 1 }
 0x8e5   :  { %v3810_v57 = vmax.f32 %v3808_v47, %v3809_v5  ;;  %v12128_v58 = vadd.f32 %v12067_v28, %v3736_v61  ;;  %v3894_v3 = vsub.f32 %v12073_v51, %v3800_v44  ;;  %v3807_v10 = vmax.f32 %v3805_v53, %v3806_v4  ;;  %v12136_v53 = vpop.permute.xlu1 %9423 }
 0x8e6   :  { %v3825_v26 = vrot.slane %v3824_v37, 2  ;;  %v3831_v0 = vmax.f32 %v3829_v2, %v3830_v12  ;;  %v3892_v60 = vsub.f32 %v12076_v11, %v3786_v36  ;;  %v3793_v21 = vmax.f32 %v3791_v19, %v3792_v50  ;;  %14344 = vst [vmem:[#allocation12_spill] sm:$0xff] %v12136_v53 }
 0x8e7   :  { %v3811_v55 = vrot.slane %v3810_v57, 2  ;;  %v3815_v48 = vsel %vm1090_vm3, %v12128_v58, -inf  ;;  %v3912_v31 = vmul.f32 1.442695, %v3894_v3  ;;  %v3895_v15 = vsub.f32 %v12089_v59, %v3807_v10 }
 0x8e8   :  { %v3826_v45 = vmax.f32 %v3824_v37, %v3825_v26  ;;  %v3832_v17 = vrot.slane %v3831_v0, 2  ;;  %v3908_v47 = vmul.f32 1.442695, %v3892_v60  ;;  %v3893_v61 = vsub.f32 %v12094_v9, %v3793_v21 }
 0x8e9   :  { %v3812_v41 = vmax.f32 %v3810_v57, %v3811_v55  ;;  %v3816_v51 = vrot.slane %v3815_v48, 4  ;;  %9799 = vpow2.f32 %v3912_v31  ;;  %v3914_v59 = vmul.f32 1.442695, %v3895_v15 }
 0x8ea   :  { %v3827_v5 = vrot.slane %v3826_v45, 1  ;;  %v3833_v11 = vmax.f32 %v3831_v0, %v3832_v17  ;;  %9801 = vpow2.f32 %v3908_v47  ;;  %v3910_v2 = vmul.f32 1.442695, %v3893_v61 }
 0x8eb   :  { %v3813_v44 = vrot.slane %v3812_v41, 1  ;;  %v3817_v4 = vmax.f32 %v3815_v48, %v3816_v51 }
 0x8ec   :  { %v9125_v12 = vpop.f32.mrb[56].mxu1  ;;  %v3828_v37 = vmax.f32 %v3826_v45, %v3827_v5  ;;  %v3834_v36 = vrot.slane %v3833_v11, 1  ;;  %9803 = vpow2.f32 %v3910_v2 }
 0x8ed   :  { %v12140_v50 = vadd.f32 %v9125_v12, %v12067_v28  ;;  %v3749_v9 = vpop.f32.mrb[57].mxu1  ;;  %v3814_v57 = vmax.f32 %v3812_v41, %v3813_v44  ;;  %v3818_v3 = vrot.slane %v3817_v4, 2  ;;  %v9457_v44 = vld [vmem:[#allocation3 + $0x90] sm:$0xff]   ;;  %9805 = vpow2.f32 %v3914_v59 }
 0x8ee   :  { %v12143_v10 = vadd.f32 %v12067_v28, %v3749_v9  ;;  %v9126_v26 = vpop.f32.mrb[58].mxu1  ;;  %v3898_v0 = vsub.f32 %v12111_v24, %v3828_v37  ;;  %v3835_v60 = vmax.f32 %v3833_v11, %v3834_v36  ;;  %9132 = vmatpush3.bf16.msra.mxu0 %v9457_v44 }
 0x8ef   :  { %v3850_v21 = vsel %vm1090_vm3, %v12140_v50, -inf  ;;  %v12149_v55 = vadd.f32 %v9126_v26, %v12067_v28  ;;  %v3752_v48 = vpop.f32.mrb[59].mxu1  ;;  %v3896_v31 = vsub.f32 %v12115_v46, %v3814_v57  ;;  %v3819_v15 = vmax.f32 %v3817_v4, %v3818_v3  ;;  %v9458_v57 = vld [vmem:[#allocation3 + $0x98] sm:$0xff]   ;;  %9133 = vmatprep.subr.bf16.mxu0 %v14332_v54 }
 0x8f0   :  { %v3851_v45 = vrot.slane %v3850_v21, 4  ;;  %v3836_v17 = vsel %vm1090_vm3, %v12143_v10, -inf  ;;  %v3920_v47 = vmul.f32 1.442695, %v3898_v0  ;;  %v3899_v61 = vsub.f32 %v12121_v7, %v3835_v60  ;;  %v12160_v7 = vpop.permute.xlu0 %3941 }
 0x8f1   :  { %v3837_v41 = vrot.slane %v3836_v17, 4  ;;  %v3857_v24 = vsel %vm1090_vm3, %v12149_v55, -inf  ;;  %v3916_v51 = vmul.f32 1.442695, %v3896_v31  ;;  %v3820_v5 = vrot.slane %v3819_v15, 1  ;;  %14345 = vst [vmem:[#allocation20_spill] sm:$0xff] %v12160_v7 }
 0x8f2   :  { %v3852_v11 = vmax.f32 %v3850_v21, %v3851_v45  ;;  %v3858_v2 = vrot.slane %v3857_v24, 4  ;;  %v3922_v12 = vmul.f32 1.442695, %v3899_v61  ;;  %v12158_v4 = vadd.f32 %v12067_v28, %v3752_v48  ;;  %9134 = vmatpush3.bf16.msra.mxu0 %v9458_v57 }
 0x8f3   :  { %v3838_v46 = vmax.f32 %v3836_v17, %v3837_v41  ;;  %9807 = vpow2.f32 %v3920_v47  ;;  %v3821_v37 = vmax.f32 %v3819_v15, %v3820_v5  ;;  %v9800_v3 = vpop.eup %9799  ;;  %9139 = vmatprep.subr.bf16.mxu0 %v14332_v54 }
 0x8f4   :  { %v3853_v36 = vrot.slane %v3852_v11, 2  ;;  %v3859_v9 = vmax.f32 %v3857_v24, %v3858_v2  ;;  %9809 = vpow2.f32 %v3916_v51  ;;  %v3843_v0 = vsel %vm1090_vm3, %v12158_v4, -inf  ;;  %v9802_v60 = vpop.eup %9801 }
 0x8f5   :  { %v3839_v26 = vrot.slane %v3838_v46, 2  ;;  %v3897_v21 = vsub.f32 %v12128_v58, %v3821_v37  ;;  %v3844_v15 = vrot.slane %v3843_v0, 4  ;;  %9811 = vpow2.f32 %v3922_v12  ;;  %v9129_v2 = vpop.f32.mrb[60].mxu1 }
 0x8f6   :  { %v3854_v48 = vmax.f32 %v3852_v11, %v3853_v36  ;;  %v3860_v31 = vrot.slane %v3859_v9, 2  ;;  %v12168_v17 = vmul.f32 %v9802_v60, %v12160_v7  ;;  %v12171_v47 = vmul.f32 %v9800_v3, %v12160_v7  ;;  %v9804_v61 = vpop.eup %9803  ;;  %v3765_v11 = vpop.f32.mrb[61].mxu1 }
 0x8f7   :  { %v3840_v45 = vmax.f32 %v3838_v46, %v3839_v26  ;;  %v3918_v41 = vmul.f32 1.442695, %v3897_v21  ;;  %v3845_v5 = vmax.f32 %v3843_v0, %v3844_v15  ;;  %v12174_v58 = vadd.f32 %v9129_v2, %v12067_v28  ;;  %v9130_v3 = vpop.f32.mrb[62].mxu1 }
 0x8f8   :  { %v3855_v24 = vrot.slane %v3854_v48, 1  ;;  %v3861_v51 = vmax.f32 %v3859_v9, %v3860_v31  ;;  %v12177_v12 = vmul.f32 %v9804_v61, %v12160_v7  ;;  %v3964_v46 = vsel %vm1090_vm3, %v12168_v17, 0.0  ;;  %v3768_v21 = vpop.f32.mrb[63].mxu1 }
 0x8f9   :  { %v3841_v44 = vrot.slane %v3840_v45, 1  ;;  %9813 = vpow2.f32 %v3918_v41  ;;  %v3846_v9 = vrot.slane %v3845_v5, 2  ;;  %v3878_v57 = vsel %vm1090_vm3, %v12174_v58, -inf }
 0x8fa   :  { %v3856_v37 = vmax.f32 %v3854_v48, %v3855_v24  ;;  %v3862_v36 = vrot.slane %v3861_v51, 1  ;;  %v12185_v0 = vadd.f32 %v12067_v28, %v3765_v11  ;;  %v12188_v60 = vadd.f32 %v9130_v3, %v12067_v28  ;;  %v9806_v48 = vpop.eup %9805 }
 0x8fb   :  { %v3842_v26 = vmax.f32 %v3840_v45, %v3841_v44  ;;  %v3847_v61 = vmax.f32 %v3845_v5, %v3846_v9  ;;  %v3879_v41 = vrot.slane %v3878_v57, 4  ;;  %v12197_v44 = vadd.f32 %v12067_v28, %v3768_v21 }
 0x8fc   :  { %v3902_v31 = vsub.f32 %v12140_v50, %v3856_v37  ;;  %v3863_v15 = vmax.f32 %v3861_v51, %v3862_v36  ;;  %v3864_v45 = vsel %vm1090_vm3, %v12185_v0, -inf  ;;  %v3885_v2 = vsel %vm1090_vm3, %v12188_v60, -inf }
 0x8fd   :  { %v3900_v24 = vsub.f32 %v12143_v10, %v3842_v26  ;;  %v12199_v11 = vpop.eup %9807  ;;  %v3848_v51 = vrot.slane %v3847_v61, 1  ;;  %v3880_v5 = vmax.f32 %v3878_v57, %v3879_v41  ;;  %v3865_v10 = vrot.slane %v3864_v45, 4 }
 0x8fe   :  { %v3928_v3 = vmul.f32 1.442695, %v3902_v31  ;;  %v3903_v50 = vsub.f32 %v12149_v55, %v3863_v15  ;;  %v12202_v37 = vpop.eup %9809  ;;  %v3886_v9 = vrot.slane %v3885_v2, 4  ;;  %v3871_v26 = vsel %vm1090_vm3, %v12197_v44, -inf }
 0x8ff   :  { %v3924_v36 = vmul.f32 1.442695, %v3900_v24  ;;  %v3849_v59 = vmax.f32 %v3847_v61, %v3848_v51  ;;  %v3881_v28 = vrot.slane %v3880_v5, 2  ;;  %v12206_v21 = vpop.eup %9811  ;;  %v3866_v31 = vmax.f32 %v3864_v45, %v3865_v10 }
 0x900   :  { %9815 = vpow2.f32 %v3928_v3  ;;  %v3930_v19 = vmul.f32 1.442695, %v3903_v50  ;;  %v3887_v13 = vmax.f32 %v3885_v2, %v3886_v9  ;;  %v3872_v55 = vrot.slane %v3871_v26, 4 }
 0x901   :  { %9817 = vpow2.f32 %v3924_v36  ;;  %v3901_v57 = vsub.f32 %v12158_v4, %v3849_v59  ;;  %v3882_v15 = vmax.f32 %v3880_v5, %v3881_v28  ;;  %v3965_v41 = vrot.slane %v3964_v46, 4 }
 0x902   :  { %9819 = vpow2.f32 %v3930_v19  ;;  %v3867_v24 = vrot.slane %v3866_v31, 2  ;;  %v3888_v30 = vrot.slane %v3887_v13, 2  ;;  %v3873_v62 = vmax.f32 %v3871_v26, %v3872_v55 }
 0x903   :  { %v3971_v3 = vsel %vm1090_vm3, %v12177_v12, 0.0  ;;  %v12211_v50 = vpop.eup %9813  ;;  %v3926_v61 = vmul.f32 1.442695, %v3901_v57  ;;  %v3883_v51 = vrot.slane %v3882_v15, 1  ;;  %v3966_v35 = vadd.f32 %v3965_v41, %v3964_v46 }
 0x904   :  { %v3972_v36 = vrot.slane %v3971_v3, 4  ;;  %v3868_v45 = vmax.f32 %v3866_v31, %v3867_v24  ;;  %v3889_v2 = vmax.f32 %v3887_v13, %v3888_v30  ;;  %v3874_v10 = vrot.slane %v3873_v62, 2 }
 0x905   :  { %v3978_v19 = vsel %vm1090_vm3, %v12171_v47, 0.0  ;;  %9821 = vpow2.f32 %v3926_v61  ;;  %v3884_v4 = vmax.f32 %v3882_v15, %v3883_v51  ;;  %v3967_v59 = vrot.slane %v3966_v35, 2 }
 0x906   :  { %v3973_v5 = vadd.f32 %v3972_v36, %v3971_v3  ;;  %v3869_v9 = vrot.slane %v3868_v45, 1  ;;  %v3890_v26 = vrot.slane %v3889_v2, 1  ;;  %v3875_v28 = vmax.f32 %v3873_v62, %v3874_v10 }
 0x907   :  { %v3979_v55 = vrot.slane %v3978_v19, 4  ;;  %v3906_v25 = vsub.f32 %v12174_v58, %v3884_v4  ;;  %v3968_v57 = vadd.f32 %v3967_v59, %v3966_v35  ;;  %v12217_v46 = vmul.f32 %v9806_v48, %v12160_v7 }
 0x908   :  { %v3974_v32 = vrot.slane %v3973_v5, 2  ;;  %v3870_v13 = vmax.f32 %v3868_v45, %v3869_v9  ;;  %v3891_v30 = vmax.f32 %v3889_v2, %v3890_v26  ;;  %v3876_v31 = vrot.slane %v3875_v28, 1 }
 0x909   :  { %v3980_v41 = vadd.f32 %v3979_v55, %v3978_v19  ;;  %v3936_v61 = vmul.f32 1.442695, %v3906_v25  ;;  %v3969_v15 = vrot.slane %v3968_v57, 1  ;;  %v3985_v3 = vsel %vm1090_vm3, %v12217_v46, 0.0 }
 0x90a   :  { %v9816_v24 = vpop.eup %9815  ;;  %v3975_v51 = vadd.f32 %v3974_v32, %v3973_v5  ;;  %v3904_v36 = vsub.f32 %v12185_v0, %v3870_v13  ;;  %v3907_v35 = vsub.f32 %v12188_v60, %v3891_v30  ;;  %v3877_v58 = vmax.f32 %v3875_v28, %v3876_v31 }
 0x90b   :  { %v9818_v62 = vpop.eup %9817  ;;  %v12224_v48 = vmul.f32 %v9816_v24, %v12056_v49  ;;  %9823 = vpow2.f32 %v3936_v61  ;;  %v3970_v25 = vadd.f32 %v3969_v15, %v3968_v57  ;;  %v3981_v59 = vrot.slane %v3980_v41, 2 }
 0x90c   :  { %v9820_v45 = vpop.eup %9819  ;;  %v12227_v2 = vmul.f32 %v9818_v62, %v12056_v49  ;;  %v3976_v10 = vrot.slane %v3975_v51, 1  ;;  %v3932_v32 = vmul.f32 1.442695, %v3904_v36  ;;  %v3938_v19 = vmul.f32 1.442695, %v3907_v35 }
 0x90d   :  { %v3905_v4 = vsub.f32 %v12197_v44, %v3877_v58  ;;  %v4034_v5 = vsel %vm1090_vm3, %v12224_v48, 0.0  ;;  %9825 = vrcp.f32 %v3970_v25  ;;  %v3982_v28 = vadd.f32 %v3981_v59, %v3980_v41 }
 0x90e   :  { %v4020_v0 = vsel %vm1090_vm3, %v12227_v2, 0.0  ;;  %v3977_v60 = vadd.f32 %v3976_v10, %v3975_v51  ;;  %9827 = vpow2.f32 %v3932_v32  ;;  %v4035_v57 = vrot.slane %v4034_v5, 4 }
 0x90f   :  { %v3934_v9 = vmul.f32 1.442695, %v3905_v4  ;;  %v4021_v26 = vrot.slane %v4020_v0, 4  ;;  %v9822_v55 = vpop.eup %9821  ;;  %9829 = vpow2.f32 %v3938_v19  ;;  %v12235_v13 = vmul.f32 %v9820_v45, %v12056_v49 }
 0x910   :  { %v3986_v44 = vrot.slane %v3985_v3, 4  ;;  %v12238_v30 = vmul.f32 %v9822_v55, %v12056_v49  ;;  %v3983_v24 = vrot.slane %v3982_v28, 1  ;;  %v4036_v61 = vadd.f32 %v4035_v57, %v4034_v5 }
 0x911   :  { %9831 = vpow2.f32 %v3934_v9  ;;  %v4022_v31 = vadd.f32 %v4021_v26, %v4020_v0  ;;  %v4041_v51 = vsel %vm1090_vm3, %v12235_v13, 0.0  ;;  %v12246_v10 = vmul.f32 %v12202_v37, %v12160_v7 }
 0x912   :  { %9833 = vrcp.f32 %v3977_v60  ;;  %v3987_v15 = vadd.f32 %v3986_v44, %v3985_v3  ;;  %v4027_v62 = vsel %vm1090_vm3, %v12238_v30, 0.0  ;;  %v3984_v36 = vadd.f32 %v3983_v24, %v3982_v28 }
 0x913   :  { %v4023_v41 = vrot.slane %v4022_v31, 2  ;;  %v4042_v35 = vrot.slane %v4041_v51, 4  ;;  %v4028_v58 = vrot.slane %v4027_v62, 4  ;;  %v4037_v45 = vrot.slane %v4036_v61, 2 }
 0x914   :  { %v3988_v25 = vrot.slane %v3987_v15, 2  ;;  %9835 = vrcp.f32 %v3984_v36  ;;  %v12250_v3 = vmul.f32 %v12211_v50, %v12160_v7  ;;  %v3992_v5 = vsel %vm1090_vm3, %v12246_v10, 0.0 }
 0x915   :  { %v4024_v32 = vadd.f32 %v4023_v41, %v4022_v31  ;;  %v4043_v19 = vadd.f32 %v4042_v35, %v4041_v51  ;;  %v12252_v4 = vpop.eup %9823  ;;  %v4029_v59 = vadd.f32 %v4028_v58, %v4027_v62  ;;  %v4038_v0 = vadd.f32 %v4037_v45, %v4036_v61 }
 0x916   :  { %v3989_v60 = vadd.f32 %v3988_v25, %v3987_v15  ;;  %v3993_v28 = vrot.slane %v3992_v5, 4  ;;  %v3999_v37 = vsel %vm1090_vm3, %v12250_v3, 0.0 }
 0x917   :  { %v4025_v9 = vrot.slane %v4024_v32, 1  ;;  %v4044_v26 = vrot.slane %v4043_v19, 2  ;;  %v9826_v55 = vpop.eup %9825  ;;  %v4030_v57 = vrot.slane %v4029_v59, 2  ;;  %v4039_v44 = vrot.slane %v4038_v0, 1 }
 0x918   :  { %v3990_v31 = vrot.slane %v3989_v60, 1  ;;  %v4000_v50 = vrot.slane %v3999_v37, 4  ;;  %v9828_v24 = vpop.eup %9827  ;;  %v4092_v41 = vmul.f32 %v9826_v55, %v12168_v17  ;;  %v3994_v15 = vadd.f32 %v3993_v28, %v3992_v5 }
 0x919   :  { %v4026_v51 = vadd.f32 %v4025_v9, %v4024_v32  ;;  %v4045_v61 = vadd.f32 %v4044_v26, %v4043_v19  ;;  %v12259_v62 = vpop.eup %9829  ;;  %v4031_v36 = vadd.f32 %v4030_v57, %v4029_v59  ;;  %v4040_v35 = vadd.f32 %v4039_v44, %v4038_v0 }
 0x91a   :  { %v3991_v58 = vadd.f32 %v3990_v31, %v3989_v60  ;;  %v12262_v45 = vmul.f32 %v9828_v24, %v12056_v49  ;;  %v4188_v34 = vmul.f32 %v14271_v42, %v4092_v41  ;;  %v3995_v29 = vrot.slane %v3994_v15, 2 }
 0x91b   :  { %v9832_v25 = vpop.eup %9831  ;;  %9837 = vrcp.f32 %v4026_v51  ;;  %v4046_v39 = vrot.slane %v4045_v61, 1  ;;  %v4032_v9 = vrot.slane %v4031_v36, 1  ;;  %v4001_v55 = vadd.f32 %v4000_v50, %v3999_v37 }
 0x91c   :  { %v9834_v32 = vpop.eup %9833  ;;  %9839 = vrcp.f32 %v4040_v35  ;;  %v4048_v17 = vsel %vm1090_vm3, %v12262_v45, 0.0  ;;  %v12269_v19 = vmul.f32 %v9832_v25, %v12056_v49  ;;  %v4204_v0 = vmul.f32 %v4188_v34, %v12081_v18 }
 0x91d   :  { %v4093_v59 = vmul.f32 %v9834_v32, %v12177_v12  ;;  %v4047_v60 = vadd.f32 %v4046_v39, %v4045_v61  ;;  %9841 = vrcp.f32 %v3991_v58  ;;  %v4033_v5 = vadd.f32 %v4032_v9, %v4031_v36 }
 0x91e   :  { %v3996_v26 = vadd.f32 %v3995_v29, %v3994_v15  ;;  %v4049_v28 = vrot.slane %v4048_v17, 4  ;;  %v9836_v57 = vpop.eup %9835  ;;  %v14346_v44 = vunpack.i.h.bf16 %v12058_v8  ;;  %v4220_v24 = vsel %vm1090_vm3, %v4204_v0, 0.0 }
 0x91f   :  { %9843 = vrcp.f32 %v4047_v60  ;;  %v4055_v51 = vsel %vm1090_vm3, %v12269_v19, 0.0  ;;  %v4094_v12 = vmul.f32 %v9836_v57, %v12171_v47  ;;  %v4221_v34 = vrot.slane %v4220_v24, 4 }
 0x920   :  { %v4189_v31 = vmul.f32 %v14346_v44, %v4093_v59  ;;  %9845 = vrcp.f32 %v4033_v5  ;;  %v3997_v39 = vrot.slane %v3996_v26, 1  ;;  %v4050_v29 = vadd.f32 %v4049_v28, %v4048_v17 }
 0x921   :  { %v4002_v61 = vrot.slane %v4001_v55, 2  ;;  %v4056_v37 = vrot.slane %v4055_v51, 4  ;;  %v14347_v50 = vunpack.i.l.bf16 %v12062_v38  ;;  %v4222_v36 = vadd.f32 %v4221_v34, %v4220_v24 }
 0x922   :  { %v4205_v41 = vmul.f32 %v4189_v31, %v12081_v18  ;;  %v3998_v35 = vadd.f32 %v3997_v39, %v3996_v26  ;;  %v12284_v58 = vmul.f32 %v12199_v11, %v12160_v7  ;;  %v4051_v32 = vrot.slane %v4050_v29, 2 }
 0x923   :  { %v4190_v15 = vmul.f32 %v14347_v50, %v4094_v12  ;;  %v4003_v47 = vadd.f32 %v4002_v61, %v4001_v55  ;;  %v4057_v9 = vadd.f32 %v4056_v37, %v4055_v51  ;;  %v4223_v0 = vrot.slane %v4222_v36, 2 }
 0x924   :  { %v4227_v25 = vsel %vm1090_vm3, %v4205_v41, 0.0  ;;  %9847 = vrcp.f32 %v3998_v35  ;;  %v4052_v5 = vadd.f32 %v4051_v32, %v4050_v29  ;;  %v12290_v26 = vmul.f32 %v12252_v4, %v12056_v49 }
 0x925   :  { %v4206_v59 = vmul.f32 %v4190_v15, %v12081_v18  ;;  %v4228_v17 = vrot.slane %v4227_v25, 4  ;;  %v9838_v60 = vpop.eup %9837  ;;  %v4004_v28 = vrot.slane %v4003_v47, 1  ;;  %v4058_v57 = vrot.slane %v4057_v9, 2 }
 0x926   :  { %v9840_v11 = vpop.eup %9839  ;;  %v4100_v44 = vmul.f32 %v9838_v60, %v12227_v2  ;;  %v4224_v31 = vadd.f32 %v4223_v0, %v4222_v36  ;;  %v4053_v39 = vrot.slane %v4052_v5, 1  ;;  %v14348_v29 = vunpack.i.l.bf16 %v12060_v56 }
 0x927   :  { %v4229_v24 = vadd.f32 %v4228_v17, %v4227_v25  ;;  %v4234_v55 = vsel %vm1090_vm3, %v4206_v59, 0.0  ;;  %v9842_v51 = vpop.eup %9841  ;;  %v4102_v12 = vmul.f32 %v9840_v11, %v12224_v48  ;;  %v12295_v41 = vadd.f32 %v4004_v28, %v4003_v47 }
 0x928   :  { %v4235_v34 = vrot.slane %v4234_v55, 4  ;;  %v4196_v61 = vmul.f32 %v14348_v29, %v4100_v44  ;;  %v4225_v37 = vrot.slane %v4224_v31, 1  ;;  %v4095_v50 = vmul.f32 %v9842_v51, %v12217_v46 }
 0x929   :  { %v4230_v4 = vrot.slane %v4229_v24, 2  ;;  %v9844_v15 = vpop.eup %9843  ;;  %v14349_v2 = vunpack.i.h.bf16 %v12062_v38  ;;  %v4054_v25 = vadd.f32 %v4053_v39, %v4052_v5  ;;  %v12302_v32 = vadd.f32 %v4058_v57, %v4057_v9 }
 0x92a   :  { %v4236_v35 = vadd.f32 %v4235_v34, %v4234_v55  ;;  %v9846_v48 = vpop.eup %9845  ;;  %v4212_v47 = vmul.f32 %v4196_v61, %v12084_v23  ;;  %v4226_v59 = vadd.f32 %v4225_v37, %v4224_v31  ;;  %v4103_v17 = vmul.f32 %v9844_v15, %v12235_v13 }
 0x92b   :  { %v4198_v36 = vmul.f32 %v14349_v2, %v4102_v12  ;;  %v4231_v0 = vadd.f32 %v4230_v4, %v4229_v24  ;;  %v4101_v60 = vmul.f32 %v9846_v48, %v12238_v30  ;;  %v14350_v11 = vunpack.i.l.bf16 %v12078_v52 }
 0x92c   :  { %v4237_v28 = vrot.slane %v4236_v35, 2  ;;  %v4276_v55 = vsel %vm1090_vm3, %v4212_v47, 0.0  ;;  %v4332_v5 = vpack.c.bf16 %v4226_v59, %v4226_v59  ;;  %v14351_v57 = vunpack.i.h.bf16 %v12078_v52 }
 0x92d   :  { %v4214_v46 = vmul.f32 %v4198_v36, %v12084_v23  ;;  %v4191_v44 = vmul.f32 %v14350_v11, %v4095_v50  ;;  %v4232_v9 = vrot.slane %v4231_v0, 1  ;;  %v14352_v31 = vunpack.i.h.bf16 %v12060_v56 }
 0x92e   :  { %v4199_v51 = vmul.f32 %v14351_v57, %v4103_v17  ;;  %v4277_v13 = vrot.slane %v4276_v55, 4  ;;  %v4238_v12 = vadd.f32 %v4237_v28, %v4236_v35  ;;  %v9848_v34 = vpop.eup %9847  ;;  %v4377_v61 = vunpack.c.l.b16 %v4332_v5 }
 0x92f   :  { %v4197_v24 = vmul.f32 %v14352_v31, %v4101_v60  ;;  %v4290_v30 = vsel %vm1090_vm3, %v4214_v46, 0.0  ;;  %v4233_v39 = vadd.f32 %v4232_v9, %v4231_v0  ;;  %v4207_v37 = vmul.f32 %v4191_v44, %v12081_v18 }
 0x930   :  { %v4291_v29 = vrot.slane %v4290_v30, 4  ;;  %v4278_v50 = vadd.f32 %v4277_v13, %v4276_v55  ;;  %v4239_v15 = vrot.slane %v4238_v12, 1  ;;  %v4215_v2 = vmul.f32 %v4199_v51, %v12084_v23 }
 0x931   :  { %v4213_v4 = vmul.f32 %v4197_v24, %v12084_v23  ;;  %v4333_v48 = vpack.c.bf16 %v4233_v39, %v4233_v39  ;;  %v4241_v47 = vsel %vm1090_vm3, %v4207_v37, 0.0  ;;  %9849 = vrcp.f32 %v4054_v25 }
 0x932   :  { %v4292_v36 = vadd.f32 %v4291_v29, %v4290_v30  ;;  %v4279_v35 = vrot.slane %v4278_v50, 2  ;;  %v4240_v17 = vadd.f32 %v4239_v15, %v4238_v12  ;;  %v4242_v0 = vrot.slane %v4241_v47, 4 }
 0x933   :  { %v4283_v59 = vsel %vm1090_vm3, %v4213_v4, 0.0  ;;  %v4378_v28 = vunpack.c.l.b16 %v4333_v48  ;;  %v4297_v11 = vsel %vm1090_vm3, %v4215_v2, 0.0  ;;  %v4096_v25 = vmul.f32 %v9848_v34, %v12246_v10 }
 0x934   :  { %v4284_v60 = vrot.slane %v4283_v59, 4  ;;  %v4293_v46 = vrot.slane %v4292_v36, 2  ;;  %v4280_v44 = vadd.f32 %v4279_v35, %v4278_v50  ;;  %v4334_v55 = vpack.c.bf16 %v4240_v17, %v4240_v17 }
 0x935   :  { %v4243_v9 = vadd.f32 %v4242_v0, %v4241_v47  ;;  %v4298_v5 = vrot.slane %v4297_v11, 4  ;;  %v4394_v31 = vsel %vm4393_vm7, %v4378_v28, %v4377_v61  ;;  %v14353_v37 = vunpack.i.l.bf16 %v12108_v20 }
 0x936   :  { %v4285_v57 = vadd.f32 %v4284_v60, %v4283_v59  ;;  %v4294_v51 = vadd.f32 %v4293_v46, %v4292_v36  ;;  %v4281_v24 = vrot.slane %v4280_v44, 1  ;;  %v4379_v13 = vunpack.c.l.b16 %v4334_v55 }
 0x937   :  { %v4244_v30 = vrot.slane %v4243_v9, 2  ;;  %v4299_v12 = vadd.f32 %v4298_v5, %v4297_v11  ;;  %v4192_v4 = vmul.f32 %v14353_v37, %v4096_v25  ;;  %v4060_v50 = vrot.slane %v12302_v32, 1 }
 0x938   :  { %v4286_v39 = vrot.slane %v4285_v57, 2  ;;  %v4295_v29 = vrot.slane %v4294_v51, 1  ;;  %v4282_v15 = vadd.f32 %v4281_v24, %v4280_v44  ;;  %v4396_v2 = vsel %vm4395_vm8, %v4379_v13, %v4394_v31 }
 0x939   :  { %v4245_v36 = vadd.f32 %v4244_v30, %v4243_v9  ;;  %v4300_v48 = vrot.slane %v4299_v12, 2  ;;  %v4208_v10 = vmul.f32 %v4192_v4, %v12081_v18  ;;  %v4061_v34 = vadd.f32 %v4060_v50, %v12302_v32 }
 0x93a   :  { %v4287_v61 = vadd.f32 %v4286_v39, %v4285_v57  ;;  %v4296_v47 = vadd.f32 %v4295_v29, %v4294_v51  ;;  %v4340_v35 = vpack.c.bf16 %v4282_v15, %v4282_v15  ;;  %9851 = vrcp.f32 %v12295_v41 }
 0x93b   :  { %v4246_v59 = vrot.slane %v4245_v36, 1  ;;  %v4301_v17 = vadd.f32 %v4300_v48, %v4299_v12  ;;  %v9850_v0 = vpop.eup %9849  ;;  %v4248_v28 = vsel %vm1090_vm3, %v4208_v10, 0.0  ;;  %9853 = vrcp.f32 %v4061_v34 }
 0x93c   :  { %v4288_v60 = vrot.slane %v4287_v61, 1  ;;  %v4342_v46 = vpack.c.bf16 %v4296_v47, %v4296_v47  ;;  %v4385_v11 = vunpack.c.l.b16 %v4340_v35  ;;  %v4104_v9 = vmul.f32 %v9850_v0, %v12262_v45 }
 0x93d   :  { %v4247_v44 = vadd.f32 %v4246_v59, %v4245_v36  ;;  %v4302_v55 = vrot.slane %v4301_v17, 1  ;;  %v4249_v51 = vrot.slane %v4248_v28, 4  ;;  %v4006_v32 = vsel %vm1090_vm3, %v12284_v58, 0.0 }
 0x93e   :  { %v4289_v5 = vadd.f32 %v4288_v60, %v4287_v61  ;;  %v4387_v57 = vunpack.c.l.b16 %v4342_v46  ;;  %v14354_v41 = vunpack.i.h.bf16 %v12108_v20  ;;  %v4007_v13 = vrot.slane %v4006_v32, 4 }
 0x93f   :  { %v4303_v31 = vadd.f32 %v4302_v55, %v4301_v17  ;;  %v4335_v25 = vpack.c.bf16 %v4247_v44, %v4247_v44  ;;  %v4250_v12 = vadd.f32 %v4249_v51, %v4248_v28  ;;  %v4062_v39 = vsel %vm1090_vm3, %v12290_v26, 0.0 }
 0x940   :  { %v4200_v24 = vmul.f32 %v14354_v41, %v4104_v9  ;;  %v4341_v30 = vpack.c.bf16 %v4289_v5, %v4289_v5  ;;  %v12341_v45 = vmul.f32 %v12206_v21, %v12160_v7  ;;  %v4008_v50 = vadd.f32 %v4007_v13, %v4006_v32 }
 0x941   :  { %v4343_v29 = vpack.c.bf16 %v4303_v31, %v4303_v31  ;;  %v4380_v37 = vunpack.c.l.b16 %v4335_v25  ;;  %v4251_v36 = vrot.slane %v4250_v12, 2  ;;  %v4063_v48 = vrot.slane %v4062_v39, 4 }
 0x942   :  { %v4216_v4 = vmul.f32 %v4200_v24, %v12084_v23  ;;  %v4386_v15 = vunpack.c.l.b16 %v4341_v30  ;;  %v12346_v61 = vmul.f32 %v12259_v62, %v12056_v49  ;;  %v4009_v21 = vrot.slane %v4008_v50, 2 }
 0x943   :  { %v4388_v47 = vunpack.c.l.b16 %v4343_v29  ;;  %v4398_v10 = vsel %vm4397_vm9, %v4380_v37, %v4396_v2  ;;  %v4252_v59 = vadd.f32 %v4251_v36, %v4250_v12  ;;  %v4064_v0 = vadd.f32 %v4063_v48, %v4062_v39 }
 0x944   :  { %v4304_v34 = vsel %vm1090_vm3, %v4216_v4, 0.0  ;;  %v4407_v35 = vsel %vm4393_vm7, %v4386_v15, %v4385_v11  ;;  %v9852_v60 = vpop.eup %9851  ;;  %v4010_v28 = vadd.f32 %v4009_v21, %v4008_v50  ;;  %v4013_v62 = vsel %vm1090_vm3, %v12341_v45, 0.0 }
 0x945   :  { %v4305_v17 = vrot.slane %v4304_v34, 4  ;;  %v4408_v46 = vsel %vm4395_vm8, %v4387_v57, %v4407_v35  ;;  %v4069_v44 = vsel %vm1090_vm3, %v12346_v61, 0.0  ;;  %v9854_v2 = vpop.eup %9853  ;;  %v4253_v9 = vrot.slane %v4252_v59, 1 }
 0x946   :  { %v4409_v55 = vsel %vm4397_vm9, %v4388_v47, %v4408_v46  ;;  %v4097_v11 = vmul.f32 %v9852_v60, %v12250_v3  ;;  %v4105_v51 = vmul.f32 %v9854_v2, %v12269_v19  ;;  %v4011_v32 = vrot.slane %v4010_v28, 1 }
 0x947   :  { %v4306_v5 = vadd.f32 %v4305_v17, %v4304_v34  ;;  %v4065_v31 = vrot.slane %v4064_v0, 2  ;;  %v4014_v25 = vrot.slane %v4013_v62, 4  ;;  %v4254_v57 = vadd.f32 %v4253_v9, %v4252_v59 }
 0x948   :  { %v14355_v24 = vunpack.i.l.bf16 %v12136_v53  ;;  %v4070_v30 = vrot.slane %v4069_v44, 4  ;;  %v14356_v12 = vunpack.i.h.bf16 %v12136_v53  ;;  %v4012_v29 = vadd.f32 %v4011_v32, %v4010_v28 }
 0x949   :  { %v4307_v41 = vrot.slane %v4306_v5, 2  ;;  %v4066_v37 = vadd.f32 %v4065_v31, %v4064_v0  ;;  %v4015_v4 = vadd.f32 %v4014_v25, %v4013_v62  ;;  %v4336_v15 = vpack.c.bf16 %v4254_v57, %v4254_v57 }
 0x94a   :  { %v4193_v13 = vmul.f32 %v14355_v24, %v4097_v11  ;;  %v4201_v39 = vmul.f32 %v14356_v12, %v4105_v51  ;;  %v4071_v19 = vadd.f32 %v4070_v30, %v4069_v44  ;;  %9855 = vrcp.f32 %v4012_v29  ;;  %v12368_v30 = vpop.permute.xlu1 %9428 }
 0x94b   :  { %v4308_v50 = vadd.f32 %v4307_v41, %v4306_v5  ;;  %v4067_v48 = vrot.slane %v4066_v37, 1  ;;  %v4016_v47 = vrot.slane %v4015_v4, 2  ;;  %v4381_v21 = vunpack.c.l.b16 %v4336_v15  ;;  %14357 = vst [vmem:[#allocation21_spill] sm:$0xff] %v12368_v30 }
 0x94c   :  { %v4209_v3 = vmul.f32 %v4193_v13, %v12081_v18  ;;  %v4217_v36 = vmul.f32 %v4201_v39, %v12084_v23  ;;  %v4072_v59 = vrot.slane %v4071_v19, 2 }
 0x94d   :  { %v4309_v34 = vrot.slane %v4308_v50, 1  ;;  %v4068_v0 = vadd.f32 %v4067_v48, %v4066_v37  ;;  %v4017_v46 = vadd.f32 %v4016_v47, %v4015_v4  ;;  %v4400_v62 = vsel %vm4399_vm10, %v4381_v21, %v4398_v10 }
 0x94e   :  { %v4255_v35 = vsel %vm1090_vm3, %v4209_v3, 0.0  ;;  %v4311_v60 = vsel %vm1090_vm3, %v4217_v36, 0.0  ;;  %v4073_v44 = vadd.f32 %v4072_v59, %v4071_v19  ;;  %v14270_v4 = vunpack.i.l.bf16 %v12368_v30  ;;  %v12378_v59 = vpop.permute.xlu0 %9433 }
 0x94f   :  { %v4256_v17 = vrot.slane %v4255_v35, 4  ;;  %v4310_v28 = vadd.f32 %v4309_v34, %v4308_v50  ;;  %v4312_v2 = vrot.slane %v4311_v60, 4  ;;  %9857 = vrcp.f32 %v4068_v0  ;;  %14358 = vst [vmem:[#allocation22_spill] sm:$0xff] %v12378_v59 }
 0x950   :  { %v4018_v5 = vrot.slane %v4017_v46, 1  ;;  %v4074_v32 = vrot.slane %v4073_v44, 1  ;;  %v14268_v47 = vunpack.i.h.bf16 %v12368_v30 }
 0x951   :  { %v4257_v9 = vadd.f32 %v4256_v17, %v4255_v35  ;;  %v4344_v11 = vpack.c.bf16 %v4310_v28, %v4310_v28  ;;  %v4313_v51 = vadd.f32 %v4312_v2, %v4311_v60 }
 0x952   :  { %v4019_v25 = vadd.f32 %v4018_v5, %v4017_v46  ;;  %v4075_v24 = vadd.f32 %v4074_v32, %v4073_v44  ;;  %v14269_v5 = vunpack.i.l.bf16 %v12378_v59  ;;  %v14267_v32 = vunpack.i.h.bf16 %v12378_v59 }
 0x953   :  { %v4258_v31 = vrot.slane %v4257_v9, 2  ;;  %v4389_v57 = vunpack.c.l.b16 %v4344_v11  ;;  %v4314_v41 = vrot.slane %v4313_v51, 2 }
 0x954   :  { %9859 = vrcp.f32 %v4019_v25  ;;  %v9856_v39 = vpop.eup %9855 }
 0x955   :  { %v4259_v13 = vadd.f32 %v4258_v31, %v4257_v9  ;;  %v4410_v12 = vsel %vm4399_vm10, %v4389_v57, %v4409_v55  ;;  %v4315_v10 = vadd.f32 %v4314_v41, %v4313_v51  ;;  %9861 = vrcp.f32 %v4075_v24 }
 0x956   :  { %v4098_v50 = vmul.f32 %v9856_v39, %v12284_v58 }
 0x957   :  { %v4260_v29 = vrot.slane %v4259_v13, 1  ;;  %v4316_v37 = vrot.slane %v4315_v10, 1 }
 0x958   :  { %v4194_v19 = vmul.f32 %v14270_v4, %v4098_v50 }
 0x959   :  { %v4261_v15 = vadd.f32 %v4260_v29, %v4259_v13  ;;  %v4317_v3 = vadd.f32 %v4316_v37, %v4315_v10  ;;  %v9858_v36 = vpop.eup %9857 }
 0x95a   :  { %v4106_v34 = vmul.f32 %v9858_v36, %v12290_v26  ;;  %v4210_v21 = vmul.f32 %v4194_v19, %v12081_v18 }
 0x95b   :  { %v4337_v48 = vpack.c.bf16 %v4261_v15, %v4261_v15  ;;  %v4345_v55 = vpack.c.bf16 %v4317_v3, %v4317_v3 }
 0x95c   :  { %v4202_v58 = vmul.f32 %v14268_v47, %v4106_v34  ;;  %v4262_v60 = vsel %vm1090_vm3, %v4210_v21, 0.0 }
 0x95d   :  { %v4382_v35 = vunpack.c.l.b16 %v4337_v48  ;;  %v4390_v17 = vunpack.c.l.b16 %v4345_v55  ;;  %v4263_v28 = vrot.slane %v4262_v60, 4 }
 0x95e   :  { %v9860_v0 = vpop.eup %9859  ;;  %v4218_v26 = vmul.f32 %v4202_v58, %v12084_v23 }
 0x95f   :  { %v4402_v46 = vsel %vm4401_vm11, %v4382_v35, %v4400_v62  ;;  %v9862_v2 = vpop.eup %9861  ;;  %v4411_v44 = vsel %vm4401_vm11, %v4390_v17, %v4410_v12  ;;  %v4099_v9 = vmul.f32 %v9860_v0, %v12341_v45  ;;  %v4264_v11 = vadd.f32 %v4263_v28, %v4262_v60 }
 0x960   :  { %v4107_v51 = vmul.f32 %v9862_v2, %v12346_v61  ;;  %v4318_v31 = vsel %vm1090_vm3, %v4218_v26, 0.0 }
 0x961   :  { %v4195_v62 = vmul.f32 %v14269_v5, %v4099_v9  ;;  %v4265_v25 = vrot.slane %v4264_v11, 2  ;;  %v4319_v57 = vrot.slane %v4318_v31, 4 }
 0x962   :  { %v4203_v41 = vmul.f32 %v14267_v32, %v4107_v51 }
 0x963   :  { %v4211_v24 = vmul.f32 %v4195_v62, %v12081_v18  ;;  %v4266_v45 = vadd.f32 %v4265_v25, %v4264_v11  ;;  %v4320_v13 = vadd.f32 %v4319_v57, %v4318_v31 }
 0x964   :  { %v4219_v12 = vmul.f32 %v4203_v41, %v12084_v23 }
 0x965   :  { %v4269_v61 = vsel %vm1090_vm3, %v4211_v24, 0.0  ;;  %v4267_v10 = vrot.slane %v4266_v45, 1  ;;  %v4321_v39 = vrot.slane %v4320_v13, 2 }
 0x966   :  { %v4325_v29 = vsel %vm1090_vm3, %v4219_v12, 0.0  ;;  %v4270_v37 = vrot.slane %v4269_v61, 4 }
 0x967   :  { %v4326_v50 = vrot.slane %v4325_v29, 4  ;;  %v4268_v15 = vadd.f32 %v4267_v10, %v4266_v45  ;;  %v4322_v3 = vadd.f32 %v4321_v39, %v4320_v13 }
 0x968   :  { %v4271_v19 = vadd.f32 %v4270_v37, %v4269_v61  ;;  %v14359_v61 = vld [vmem:[#allocation9_spill] sm:$0xff]  ;;  %v14360_v37 = vld [vmem:[#allocation10_spill] sm:$0xff] }
 0x969   :  { %v4327_v36 = vadd.f32 %v4326_v50, %v4325_v29  ;;  %v4323_v48 = vrot.slane %v4322_v3, 1  ;;  %v4338_v55 = vpack.c.bf16 %v4268_v15, %v4268_v15 }
 0x96a   :  { %v4272_v34 = vrot.slane %v4271_v19, 2 }
 0x96b   :  { %v4328_v18 = vrot.slane %v4327_v36, 2  ;;  %v4324_v21 = vadd.f32 %v4323_v48, %v4322_v3  ;;  %v4383_v35 = vunpack.c.l.b16 %v4338_v55 }
 0x96c   :  { %v4273_v23 = vadd.f32 %v4272_v34, %v4271_v19 }
 0x96d   :  { %v4329_v17 = vadd.f32 %v4328_v18, %v4327_v36  ;;  %v4346_v58 = vpack.c.bf16 %v4324_v21, %v4324_v21  ;;  %v4404_v60 = vsel %vm4403_vm12, %v4383_v35, %v4402_v46  ;;  %v8566_v46 = vld [vmem:[%s14242_s13 + $0x9] ss:$0 sm:$0xff] }
 0x96e   :  { %v4274_v0 = vrot.slane %v4273_v23, 1 }
 0x96f   :  { %v4330_v28 = vrot.slane %v4329_v17, 1  ;;  %v4391_v2 = vunpack.c.l.b16 %v4346_v58  ;;  %v9459_v58 = vld [vmem:[#allocation3 + $0xa0] sm:$0xff]  }
 0x970   :  { %v4275_v26 = vadd.f32 %v4274_v0, %v4273_v23 }
 0x971   :  { %v4331_v9 = vadd.f32 %v4330_v28, %v4329_v17  ;;  %v4412_v11 = vsel %vm4403_vm12, %v4391_v2, %v4411_v44 }
 0x972   :  { %v4339_v51 = vpack.c.bf16 %v4275_v26, %v4275_v26 }
 0x973   :  { %v4347_v31 = vpack.c.bf16 %v4331_v9, %v4331_v9 }
 0x974   :  { %v4384_v62 = vunpack.c.l.b16 %v4339_v51 }
 0x975   :  { %v4392_v25 = vunpack.c.l.b16 %v4347_v31 }
 0x976   :  { %v4406_v57 = vsel %vm4405_vm13, %v4384_v62, %v4404_v60  ;;  %v9460_v60 = vld [vmem:[#allocation3 + $0xa8] sm:$0xff]  }
 0x977   :  { %v4413_v41 = vsel %vm4405_vm13, %v4392_v25, %v4412_v11  ;;  %v12428_v25 = vld [vmem:[%s14243_s14 + $0x5] ss:$0 sm:$0xff] }
 0x978   :  { %v4414_v24 = vpack.c.b16 %v4413_v41, %v4406_v57 }
 0x97a   :  { %9136 = vmatmul.mubr.msk.bf16.vlgmr.msra.gmra.mrb[64].mxu0 %vm1090_vm3, %v4414_v24 }
 0x97b   :  { %9143 = vmatprep.mubr.msk.bf16.mxu0 %vm10337_vm4, %v14332_v54  ;;  %9140 = vmatpush3.bf16.msra.mxu0 %v9459_v58 }
 0x97c   :  { %9141 = vmatprep.subr.bf16.mxu0 %v14332_v54 }
 0x97f   :  { %9142 = vmatpush3.bf16.msra.mxu0 %v9460_v60 }
 0x980   :  { %9147 = vmatprep.subr.bf16.mxu0 %v14332_v54 }
 0xa4d   :  { %v4464_v44 = vpop.f32.mrb[64].mxu0 }
 0xa4e   :  { %v4465_v45 = vadd.f32 %v8566_v46, %v4464_v44  ;;  %v9137_v13 = vpop.f32.mrb[65].mxu0 }
 0xa4f   :  { %v4467_v12 = vpop.f32.mrb[66].mxu0 }
 0xa50   :  { %v12410_v10 = vadd.f32 %v4465_v45, %v14359_v61  ;;  %v4468_v39 = vadd.f32 %v8566_v46, %v4467_v12  ;;  %v9138_v29 = vpop.f32.mrb[67].mxu0  ;;  %v12435_v46 = vld [vmem:[%s14244_s15 + $0x5] ss:$0 sm:$0xff]  ;;  %v8571_v12 = vld [vmem:[%s14242_s13 + $0xa] ss:$0 sm:$0xff] }
 0xa52   :  { %v12413_v50 = vadd.f32 %v4468_v39, %v14360_v37  ;;  %v4473_v15 = vsel %vm1090_vm3, %v12410_v10, 0.0 }
 0xa53   :  { %4474 = vadd.xlane.f32.xlu1 %v4473_v15 }
 0xa54   :  { %v4476_v3 = vsel %vm1090_vm3, %v12413_v50, 0.0 }
 0xa55   :  { %4477 = vadd.xlane.f32.xlu0 %v4476_v3 }
 0xae0   :  { %v4475_v19 = vpop.xlane.xlu1 %4474 }
 0xae1   :  { %v4479_v36 = vmul.f32 0.03125, %v4475_v19 }
 0xae2   :  { %v4478_v48 = vpop.xlane.xlu0 %4477 }
 0xae3   :  { %v4481_v55 = vsub.f32 %v12410_v10, %v4479_v36  ;;  %v4480_v34 = vmul.f32 0.03125, %v4478_v48 }
 0xae5   :  { %v4482_v18 = vsub.f32 %v12413_v50, %v4480_v34  ;;  %v4483_v21 = vmul.f32 %v4481_v55, %v4481_v55 }
 0xae7   :  { %v4485_v35 = vsel %vm1090_vm3, %v4483_v21, 0.0  ;;  %v4484_v23 = vmul.f32 %v4482_v18, %v4482_v18 }
 0xae8   :  { %4486 = vadd.xlane.f32.xlu0 %v4485_v35 }
 0xae9   :  { %v4488_v17 = vsel %vm1090_vm3, %v4484_v23, 0.0 }
 0xaea   :  { %4489 = vadd.xlane.f32.xlu1 %v4488_v17 }
 0xb75   :  { %v4487_v0 = vpop.xlane.xlu0 %4486 }
 0xb76   :  { %v4491_v28 = vmul.f32 0.03125, %v4487_v0 }
 0xb77   :  { %v4490_v2 = vpop.xlane.xlu1 %4489 }
 0xb78   :  { %v4493_v26 = vadd.f32 1e-05, %v4491_v28  ;;  %v4492_v9 = vmul.f32 0.03125, %v4490_v2 }
 0xb7a   :  { %9863 = vrsqrt.f32 %v4493_v26  ;;  %v4494_v11 = vadd.f32 1e-05, %v4492_v9 }
 0xb7c   :  { %9865 = vrsqrt.f32 %v4494_v11 }
 0xb84   :  { %v9864_v51 = vpop.eup %9863 }
 0xb85   :  { %v4497_v31 = vmul.f32 %v9864_v51, %v4481_v55 }
 0xb86   :  { %v9866_v62 = vpop.eup %9865 }
 0xb87   :  { %v4499_v57 = vmul.f32 %v12428_v25, %v4497_v31  ;;  %v4498_v41 = vmul.f32 %v9866_v62, %v4482_v18 }
 0xb89   :  { %v4500_v24 = vmul.f32 %v12428_v25, %v4498_v41  ;;  %v4501_v44 = vadd.f32 %v12435_v46, %v4499_v57 }
 0xb8b   :  { %v4502_v45 = vadd.f32 %v12435_v46, %v4500_v24 }
 0xb8d   :  { %v4503_v13 = vpack.c.bf16 %v4502_v45, %v4501_v44 }
 0xb8f   :  { %9144 = vmatmul.mubr.msk.bf16.vlgmr.msra.gmra.mrb[68].mxu0 %vm1090_vm3, %v4503_v13 }
 0xb90   :  { %9151 = vmatprep.mubr.msk.bf16.mxu0 %vm10337_vm4, %v14332_v54 }
 0xc62   :  { %v4566_v39 = vpop.f32.mrb[68].mxu0 }
 0xc63   :  { %v4567_v29 = vadd.f32 %v8571_v12, %v4566_v39  ;;  %v9145_v15 = vpop.f32.mrb[69].mxu0 }
 0xc64   :  { %v4569_v3 = vpop.f32.mrb[70].mxu0 }
 0xc65   :  { %v4573_v19 = vmin.f32 %v4567_v29, 20.0  ;;  %v4570_v36 = vadd.f32 %v8571_v12, %v4569_v3  ;;  %v9146_v48 = vpop.f32.mrb[71].mxu0 }
 0xc67   :  { %v4575_v55 = vmul.f32 1.442695, %v4573_v19  ;;  %v4574_v34 = vmin.f32 %v4570_v36, 20.0 }
 0xc69   :  { %9867 = vpow2.f32 %v4575_v55  ;;  %v4577_v18 = vmul.f32 1.442695, %v4574_v34 }
 0xc6b   :  { %9869 = vpow2.f32 %v4577_v18 }
 0xc73   :  { %v9868_v21 = vpop.eup %9867 }
 0xc74   :  { %v4579_v35 = vadd.f32 2.0, %v9868_v21 }
 0xc75   :  { %v9870_v23 = vpop.eup %9869 }
 0xc76   :  { %v4581_v17 = vmul.f32 %v9868_v21, %v4579_v35  ;;  %v4580_v58 = vadd.f32 2.0, %v9870_v23 }
 0xc78   :  { %v4585_v60 = vadd.f32 2.0, %v4581_v17  ;;  %v4582_v0 = vmul.f32 %v9870_v23, %v4580_v58  ;;  %v4583_v2 = vmul.f32 %v4581_v17, %v4567_v29 }
 0xc7a   :  { %9871 = vrcp.f32 %v4585_v60  ;;  %v4586_v28 = vadd.f32 2.0, %v4582_v0  ;;  %v4584_v11 = vmul.f32 %v4582_v0, %v4570_v36 }
 0xc7c   :  { %9873 = vrcp.f32 %v4586_v28 }
 0xc84   :  { %v9872_v26 = vpop.eup %9871 }
 0xc85   :  { %v4589_v9 = vmul.f32 %v9872_v26, %v4583_v2 }
 0xc86   :  { %v9874_v51 = vpop.eup %9873 }
 0xc87   :  { %v4590_v31 = vmul.f32 %v9874_v51, %v4584_v11  ;;  %v4591_v62 = vadd.f32 %v4589_v9, %v12410_v10  ;;  %v9461_v9 = vld [vmem:[#allocation3 + $0xc0] sm:$0xff]  }
 0xc88   :  { %9156 = vmatpush3.bf16.msra.mxu1 %v9461_v9  ;;  %v9468_v9 = vld [vmem:[#allocation3 + $0xd8] sm:$0xff]  }
 0xc89   :  { %v4593_v57 = vsel %vm1090_vm3, %v4591_v62, 0.0  ;;  %v4592_v41 = vadd.f32 %v4590_v31, %v12413_v50  ;;  %9157 = vmatprep.subr.bf16.mxu1 %v14332_v54 }
 0xc8a   :  { %4594 = vadd.xlane.f32.xlu0 %v4593_v57 }
 0xc8b   :  { %v4596_v24 = vsel %vm1090_vm3, %v4592_v41, 0.0 }
 0xc8c   :  { %4597 = vadd.xlane.f32.xlu1 %v4596_v24 }
 0xd17   :  { %v4595_v44 = vpop.xlane.xlu0 %4594 }
 0xd18   :  { %v4599_v45 = vmul.f32 0.03125, %v4595_v44 }
 0xd19   :  { %v4598_v13 = vpop.xlane.xlu1 %4597 }
 0xd1a   :  { %v4601_v12 = vsub.f32 %v4591_v62, %v4599_v45  ;;  %v4600_v39 = vmul.f32 0.03125, %v4598_v13  ;;  %v9462_v45 = vld [vmem:[#allocation3 + $0xc8] sm:$0xff]   ;;  %v9463_v13 = vld [vmem:[#allocation3 + $0xb0] sm:$0xff]  }
 0xd1b   :  { %9158 = vmatpush3.bf16.msra.mxu1 %v9462_v45  ;;  %9148 = vmatpush3.bf16.msra.mxu0 %v9463_v13 }
 0xd1c   :  { %v4602_v29 = vsub.f32 %v4592_v41, %v4600_v39  ;;  %v4603_v15 = vmul.f32 %v4601_v12, %v4601_v12  ;;  %9149 = vmatprep.subr.bf16.mxu0 %v14332_v54  ;;  %v9465_v39 = vld [vmem:[#allocation3 + $0xe0] sm:$0xff]  }
 0xd1d   :  { %9171 = vmatprep.subr.bf16.mxu1 %v9465_v39 }
 0xd1e   :  { %v4605_v3 = vsel %vm1090_vm3, %v4603_v15, 0.0  ;;  %v4604_v19 = vmul.f32 %v4602_v29, %v4602_v29 }
 0xd1f   :  { %4606 = vadd.xlane.f32.xlu0 %v4605_v3 }
 0xd20   :  { %v4608_v10 = vsel %vm1090_vm3, %v4604_v19, 0.0 }
 0xd21   :  { %4609 = vadd.xlane.f32.xlu1 %v4608_v10 }
 0xdac   :  { %v4607_v36 = vpop.xlane.xlu0 %4606 }
 0xdad   :  { %v4611_v50 = vmul.f32 0.03125, %v4607_v36 }
 0xdae   :  { %v4610_v48 = vpop.xlane.xlu1 %4609 }
 0xdaf   :  { %v4613_v55 = vadd.f32 1e-05, %v4611_v50  ;;  %v4612_v34 = vmul.f32 0.03125, %v4610_v48  ;;  %v8577_v48 = vld [vmem:[%s14243_s14 + $0xb] ss:$0 sm:$0xff] }
 0xdb1   :  { %9875 = vrsqrt.f32 %v4613_v55  ;;  %v4614_v18 = vadd.f32 1e-05, %v4612_v34 }
 0xdb3   :  { %9877 = vrsqrt.f32 %v4614_v18 }
 0xdbb   :  { %v9876_v21 = vpop.eup %9875 }
 0xdbc   :  { %v4617_v35 = vmul.f32 %v9876_v21, %v4601_v12  ;;  %v9464_v12 = vld [vmem:[#allocation3 + $0xb8] sm:$0xff]  }
 0xdbd   :  { %v9878_v23 = vpop.eup %9877  ;;  %9150 = vmatpush3.bf16.msra.mxu0 %v9464_v12 }
 0xdbe   :  { %v4619_v17 = vmul.f32 %v12428_v25, %v4617_v35  ;;  %v4618_v58 = vmul.f32 %v9878_v23, %v4602_v29  ;;  %9163 = vmatprep.subr.bf16.mxu0 %v14332_v54  ;;  %v8578_v35 = vld [vmem:[%s14244_s15 + $0xb] ss:$0 sm:$0xff] }
 0xdc0   :  { %v12453_v60 = vadd.f32 %v12435_v46, %v4619_v17  ;;  %v4620_v0 = vmul.f32 %v12428_v25, %v4618_v58 }
 0xdc2   :  { %14361 = vst [vmem:[#allocation23_spill] sm:$0xff] %v12453_v60  ;;  %v4627_v28 = vsel %vm1090_vm3, %v12453_v60, 0.0  ;;  %v12459_v2 = vadd.f32 %v12435_v46, %v4620_v0  ;;  %v9466_v0 = vld [vmem:[#allocation3 + $0xd0] sm:$0xff]  }
 0xdc3   :  { %4628 = vadd.xlane.f32.xlu0 %v4627_v28 }
 0xdc4   :  { %14362 = vst [vmem:[#allocation24_spill] sm:$0xff] %v12459_v2  ;;  %v4630_v26 = vsel %vm1090_vm3, %v12459_v2, 0.0 }
 0xdc5   :  { %4631 = vadd.xlane.f32.xlu1 %v4630_v26  ;;  %v9467_v26 = vld [vmem:[#allocation3 + $0xe8] sm:$0xff]  }
 0xe50   :  { %v4629_v11 = vpop.xlane.xlu0 %4628 }
 0xe51   :  { %v4633_v51 = vmul.f32 0.03125, %v4629_v11  ;;  %v9469_v11 = vld [vmem:[#allocation3 + $0x100] sm:$0xff]  }
 0xe52   :  { %v4632_v31 = vpop.xlane.xlu1 %4631 }
 0xe53   :  { %v4635_v25 = vsub.f32 %v12453_v60, %v4633_v51  ;;  %v4634_v62 = vmul.f32 0.03125, %v4632_v31  ;;  %v9470_v51 = vld [vmem:[#allocation3 + $0x108] sm:$0xff]  }
 0xe55   :  { %v4636_v57 = vsub.f32 %v12459_v2, %v4634_v62  ;;  %v4637_v41 = vmul.f32 %v4635_v25, %v4635_v25 }
 0xe57   :  { %v4639_v46 = vsel %vm1090_vm3, %v4637_v41, 0.0  ;;  %v4638_v24 = vmul.f32 %v4636_v57, %v4636_v57 }
 0xe58   :  { %4640 = vadd.xlane.f32.xlu0 %v4639_v46 }
 0xe59   :  { %v4642_v44 = vsel %vm1090_vm3, %v4638_v24, 0.0 }
 0xe5a   :  { %4643 = vadd.xlane.f32.xlu1 %v4642_v44 }
 0xee5   :  { %v4641_v29 = vpop.xlane.xlu0 %4640 }
 0xee6   :  { %v4645_v15 = vmul.f32 0.03125, %v4641_v29 }
 0xee7   :  { %v4644_v3 = vpop.xlane.xlu1 %4643 }
 0xee8   :  { %v4647_v19 = vadd.f32 1e-05, %v4645_v15  ;;  %v4646_v10 = vmul.f32 0.03125, %v4644_v3 }
 0xeea   :  { %9879 = vrsqrt.f32 %v4647_v19  ;;  %v4648_v36 = vadd.f32 1e-05, %v4646_v10 }
 0xeec   :  { %9881 = vrsqrt.f32 %v4648_v36 }
 0xef4   :  { %v9880_v50 = vpop.eup %9879 }
 0xef5   :  { %v4651_v55 = vmul.f32 %v9880_v50, %v4635_v25 }
 0xef6   :  { %v9882_v34 = vpop.eup %9881 }
 0xef7   :  { %v4659_v18 = vmul.f32 %v8577_v48, %v4651_v55  ;;  %v4652_v21 = vmul.f32 %v9882_v34, %v4636_v57 }
 0xef9   :  { %v4660_v23 = vmul.f32 %v8577_v48, %v4652_v21  ;;  %v4667_v17 = vadd.f32 %v8578_v35, %v4659_v18 }
 0xefb   :  { %v4668_v58 = vadd.f32 %v8578_v35, %v4660_v23 }
 0xefd   :  { %v4669_v28 = vpack.c.bf16 %v4668_v58, %v4667_v17 }
 0xeff   :  { %9152 = vmatmul.mubr.msk.bf16.vlgmr.msra.gmra.mrb[72].mxu0 %vm1090_vm3, %v4669_v28  ;;  %9160 = vmatmul.mubr.msk.bf16.vlgmr.msra.gmra.mrb[64].mxu1 %vm1090_vm3, %v4669_v28 }
 0xf00   :  { %9164 = vmatpush3.bf16.msra.mxu0 %v9466_v0  ;;  %9172 = vmatpush3.bf16.msra.mxu1 %v9465_v39 }
 0xf01   :  { %9175 = vmatprep.mubr.msk.bf16.mxu1 %vm1090_vm3, %v11594_v63  ;;  %9165 = vmatprep.subr.bf16.mxu0 %v14332_v54 }
 0xf02   :  { %9173 = vmatprep.subr.bf16.mxu1 %v9467_v26  ;;  %9167 = vmatprep.mubr.msk.bf16.mxu0 %vm10337_vm4, %v14332_v54 }
 0xf04   :  { %9166 = vmatpush3.bf16.msra.mxu0 %v9468_v9  ;;  %9174 = vmatpush3.bf16.msra.mxu1 %v9467_v26 }
 0xf05   :  { %9211 = vmatprep.subr.bf16.mxu1 %v9469_v11 }
 0xf07   :  { %9168 = vmatmul.mubr.msk.bf16.vlgmr.msra.gmra.mrb[76].mxu0 %vm1090_vm3, %v4669_v28  ;;  %9176 = vmatmul.mubr.msk.bf16.vlgmr.msra.gmra.mrb[68].mxu1 %vm1090_vm3, %v11589_v43 }
 0xf08   :  { %9179 = vmatprep.mubr.msk.bf16.mxu1 %vm1090_vm3, %v11613_v16  ;;  %9212 = vmatpush3.bf16.msra.mxu1 %v9469_v11 }
 0xf09   :  { %9213 = vmatprep.subr.bf16.mxu1 %v9470_v51 }
 0xf0c   :  { %9214 = vmatpush3.bf16.msra.mxu1 %v9470_v51 }
 0xf0f   :  { %9180 = vmatmul.mubr.msk.bf16.gmra.mrb[72].mxu1 %vm1090_vm3, %v11608_v1 }
 0xf10   :  { %9183 = vmatprep.mubr.msk.bf16.mxu1 %vm1090_vm3, %v11646_v6 }
 0xf17   :  { %9184 = vmatmul.mubr.msk.bf16.gmra.mrb[76].mxu1 %vm1090_vm3, %v11641_v27 }
 0xf18   :  { %9187 = vmatprep.mubr.msk.bf16.mxu1 %vm1090_vm3, %v11662_v14 }
 0xf1f   :  { %9188 = vmatmul.mubr.msk.bf16.gmra.mrb[80].mxu1 %vm1090_vm3, %v11660_v33 }
 0xf20   :  { %9215 = vmatprep.mubr.msk.bf16.mxu1 %vm1090_vm3, %v11594_v63 }
 0xf27   :  { %9216 = vmatmul.mubr.msk.bf16.vlgmr.msra.gmra.mrb[84].mxu1 %vm1090_vm3, %v11589_v43 }
 0xf28   :  { %9219 = vmatprep.mubr.msk.bf16.mxu1 %vm1090_vm3, %v11613_v16 }
 0xf2f   :  { %9220 = vmatmul.mubr.msk.bf16.gmra.mrb[88].mxu1 %vm1090_vm3, %v11608_v1 }
 0xf30   :  { %9223 = vmatprep.mubr.msk.bf16.mxu1 %vm1090_vm3, %v11646_v6 }
 0xf37   :  { %9224 = vmatmul.mubr.msk.bf16.gmra.mrb[92].mxu1 %vm1090_vm3, %v11641_v27  ;;  %v8603_v27 = vld [vmem:[%s14242_s13 + $0xe] ss:$0 sm:$0xff] }
 0xf38   :  { %9227 = vmatprep.mubr.msk.bf16.mxu1 %vm1090_vm3, %v11662_v14 }
 0xf3f   :  { %9228 = vmatmul.mubr.msk.bf16.gmra.mrb[96].mxu1 %vm1090_vm3, %v11660_v33 }
 0xfd2   :  { %v12514_v63 = vpop.f32.mrb[72].mxu0  ;;  %v12516_v43 = vpop.f32.mrb[64].mxu1 }
 0xfd3   :  { %v9153_v16 = vpop.f32.mrb[73].mxu0  ;;  %v9161_v31 = vpop.f32.mrb[65].mxu1 }
 0xfd4   :  { %v12518_v25 = vpop.f32.mrb[74].mxu0  ;;  %v12520_v1 = vpop.f32.mrb[66].mxu1 }
 0xfd5   :  { %v9154_v6 = vpop.f32.mrb[75].mxu0  ;;  %v9162_v62 = vpop.f32.mrb[67].mxu1 }
 0xfda   :  { %v12525_v14 = vpop.f32.mrb[76].mxu0  ;;  %v9177_v57 = vpop.f32.mrb[68].mxu1 }
 0xfdb   :  { %14363 = vst [vmem:[#allocation25_spill] sm:$0xff] %v12525_v14  ;;  %v9169_v33 = vpop.f32.mrb[77].mxu0  ;;  %v5254_v41 = vpop.f32.mrb[69].mxu1  ;;  %v12531_v12 = vadd.f32 %v9177_v57, %v8603_v27 }
 0xfdc   :  { %v12527_v46 = vadd.f32 %v8603_v27, %v5254_v41  ;;  %v12529_v24 = vpop.f32.mrb[78].mxu0  ;;  %v9178_v44 = vpop.f32.mrb[70].mxu1 }
 0xfdd   :  { %14364 = vst [vmem:[#allocation26_spill] sm:$0xff] %v12529_v24  ;;  %v9170_v45 = vpop.f32.mrb[79].mxu0  ;;  %v5257_v13 = vpop.f32.mrb[71].mxu1  ;;  %v12537_v15 = vadd.f32 %v9178_v44, %v8603_v27  ;;  %v5327_v10 = vsel %vm1090_vm3, %v12531_v12, 0.0 }
 0xfde   :  { %v12533_v39 = vadd.f32 %v8603_v27, %v5257_v13  ;;  %v5321_v29 = vsel %vm1090_vm3, %v12527_v46, 0.0 }
 0xfdf   :  { %5322 = vadd.xlane.f32.xlu0 %v5321_v29  ;;  %v5330_v55 = vsel %vm1090_vm3, %v12537_v15, 0.0 }
 0xfe0   :  { %v5324_v3 = vsel %vm1090_vm3, %v12533_v39, 0.0 }
 0xfe1   :  { %5325 = vadd.xlane.f32.xlu1 %v5324_v3 }
 0xfe2   :  { %v9181_v19 = vpop.f32.mrb[72].mxu1 }
 0xfe3   :  { %v5270_v36 = vpop.f32.mrb[73].mxu1  ;;  %5328 = vadd.xlane.f32.xlu0 %v5327_v10  ;;  %v12547_v18 = vadd.f32 %v9181_v19, %v8603_v27 }
 0xfe4   :  { %v12543_v50 = vadd.f32 %v8603_v27, %v5270_v36  ;;  %v9182_v48 = vpop.f32.mrb[74].mxu1 }
 0xfe5   :  { %v5273_v34 = vpop.f32.mrb[75].mxu1  ;;  %5331 = vadd.xlane.f32.xlu1 %v5330_v55  ;;  %v12553_v23 = vadd.f32 %v9182_v48, %v8603_v27  ;;  %v5339_v0 = vsel %vm1090_vm3, %v12547_v18, 0.0 }
 0xfe6   :  { %v12549_v21 = vadd.f32 %v8603_v27, %v5273_v34  ;;  %v5333_v35 = vsel %vm1090_vm3, %v12543_v50, 0.0  ;;  %v8631_v34 = vld [vmem:[%s14242_s13 + $0x10] ss:$0 sm:$0xff] }
 0xfe7   :  { %5334 = vadd.xlane.f32.xlu0 %v5333_v35  ;;  %v5342_v11 = vsel %vm1090_vm3, %v12553_v23, 0.0 }
 0xfe8   :  { %v5336_v17 = vsel %vm1090_vm3, %v12549_v21, 0.0 }
 0xfe9   :  { %5337 = vadd.xlane.f32.xlu1 %v5336_v17 }
 0xfea   :  { %v9185_v58 = vpop.f32.mrb[76].mxu1 }
 0xfeb   :  { %v5286_v28 = vpop.f32.mrb[77].mxu1  ;;  %5340 = vadd.xlane.f32.xlu0 %v5339_v0  ;;  %v12563_v16 = vadd.f32 %v9185_v58, %v8603_v27 }
 0xfec   :  { %v12559_v26 = vadd.f32 %v8603_v27, %v5286_v28  ;;  %v9186_v9 = vpop.f32.mrb[78].mxu1 }
 0xfed   :  { %v5289_v51 = vpop.f32.mrb[79].mxu1  ;;  %5343 = vadd.xlane.f32.xlu1 %v5342_v11  ;;  %v12569_v62 = vadd.f32 %v9186_v9, %v8603_v27  ;;  %v5351_v41 = vsel %vm1090_vm3, %v12563_v16, 0.0 }
 0xfee   :  { %v12565_v31 = vadd.f32 %v8603_v27, %v5289_v51  ;;  %v5345_v6 = vsel %vm1090_vm3, %v12559_v26, 0.0 }
 0xfef   :  { %5346 = vadd.xlane.f32.xlu0 %v5345_v6  ;;  %v5354_v29 = vsel %vm1090_vm3, %v12569_v62, 0.0 }
 0xff0   :  { %v5348_v57 = vsel %vm1090_vm3, %v12565_v31, 0.0 }
 0xff1   :  { %5349 = vadd.xlane.f32.xlu1 %v5348_v57 }
 0xff2   :  { %v9189_v33 = vpop.f32.mrb[80].mxu1 }
 0xff3   :  { %v5302_v44 = vpop.f32.mrb[81].mxu1  ;;  %5352 = vadd.xlane.f32.xlu0 %v5351_v41  ;;  %v12579_v19 = vadd.f32 %v9189_v33, %v8603_v27 }
 0xff4   :  { %v12575_v45 = vadd.f32 %v8603_v27, %v5302_v44  ;;  %v9190_v13 = vpop.f32.mrb[82].mxu1 }
 0xff5   :  { %v5305_v3 = vpop.f32.mrb[83].mxu1  ;;  %5355 = vadd.xlane.f32.xlu1 %v5354_v29  ;;  %v12585_v48 = vadd.f32 %v9190_v13, %v8603_v27  ;;  %v5363_v17 = vsel %vm1090_vm3, %v12579_v19, 0.0 }
 0xff6   :  { %v12581_v10 = vadd.f32 %v8603_v27, %v5305_v3  ;;  %v5357_v36 = vsel %vm1090_vm3, %v12575_v45, 0.0 }
 0xff7   :  { %5358 = vadd.xlane.f32.xlu0 %v5357_v36  ;;  %v5366_v27 = vsel %vm1090_vm3, %v12585_v48, 0.0 }
 0xff8   :  { %v5360_v55 = vsel %vm1090_vm3, %v12581_v10, 0.0 }
 0xff9   :  { %5361 = vadd.xlane.f32.xlu1 %v5360_v55 }
 0xffa   :  { %v9217_v35 = vpop.f32.mrb[84].mxu1 }
 0xffb   :  { %v5930_v58 = vpop.f32.mrb[85].mxu1  ;;  %5364 = vadd.xlane.f32.xlu0 %v5363_v17  ;;  %v12598_v11 = vadd.f32 %v9217_v35, %v8631_v34 }
 0xffc   :  { %v12594_v0 = vadd.f32 %v8631_v34, %v5930_v58  ;;  %v9218_v28 = vpop.f32.mrb[86].mxu1 }
 0xffd   :  { %v5933_v9 = vpop.f32.mrb[87].mxu1  ;;  %5367 = vadd.xlane.f32.xlu1 %v5366_v27  ;;  %v12604_v57 = vadd.f32 %v9218_v28, %v8631_v34  ;;  %v6003_v44 = vsel %vm1090_vm3, %v12598_v11, 0.0 }
 0xffe   :  { %v12600_v51 = vadd.f32 %v8631_v34, %v5933_v9  ;;  %v5997_v6 = vsel %vm1090_vm3, %v12594_v0, 0.0 }
 0xfff   :  { %5998 = vadd.xlane.f32.xlu0 %v5997_v6  ;;  %v6006_v36 = vsel %vm1090_vm3, %v12604_v57, 0.0 }
0x1000   :  { %v6000_v33 = vsel %vm1090_vm3, %v12600_v51, 0.0 }
0x1001   :  { %6001 = vadd.xlane.f32.xlu1 %v6000_v33 }
0x1002   :  { %v9221_v41 = vpop.f32.mrb[88].mxu1 }
0x1003   :  { %v5946_v13 = vpop.f32.mrb[89].mxu1  ;;  %6004 = vadd.xlane.f32.xlu0 %v6003_v44  ;;  %v12614_v35 = vadd.f32 %v9221_v41, %v8631_v34 }
0x1004   :  { %v12610_v29 = vadd.f32 %v8631_v34, %v5946_v13  ;;  %v9222_v3 = vpop.f32.mrb[90].mxu1 }
0x1005   :  { %v5949_v55 = vpop.f32.mrb[91].mxu1  ;;  %6007 = vadd.xlane.f32.xlu1 %v6006_v36  ;;  %v12620_v28 = vadd.f32 %v9222_v3, %v8631_v34  ;;  %v6015_v6 = vsel %vm1090_vm3, %v12614_v35, 0.0 }
0x1006   :  { %v12616_v17 = vadd.f32 %v8631_v34, %v5949_v55  ;;  %v6009_v58 = vsel %vm1090_vm3, %v12610_v29, 0.0 }
0x1007   :  { %6010 = vadd.xlane.f32.xlu0 %v6009_v58  ;;  %v6018_v13 = vsel %vm1090_vm3, %v12620_v28, 0.0 }
0x1008   :  { %v6012_v27 = vsel %vm1090_vm3, %v12616_v17, 0.0 }
0x1009   :  { %6013 = vadd.xlane.f32.xlu1 %v6012_v27 }
0x100a   :  { %v9225_v9 = vpop.f32.mrb[92].mxu1 }
0x100b   :  { %v5962_v33 = vpop.f32.mrb[93].mxu1  ;;  %6016 = vadd.xlane.f32.xlu0 %v6015_v6  ;;  %v12630_v3 = vadd.f32 %v9225_v9, %v8631_v34 }
0x100c   :  { %v12626_v41 = vadd.f32 %v8631_v34, %v5962_v33  ;;  %v9226_v44 = vpop.f32.mrb[94].mxu1 }
0x100d   :  { %v5965_v36 = vpop.f32.mrb[95].mxu1  ;;  %6019 = vadd.xlane.f32.xlu1 %v6018_v13  ;;  %v12636_v27 = vadd.f32 %v9226_v44, %v8631_v34  ;;  %v6027_v32 = vsel %vm1090_vm3, %v12630_v3, 0.0 }
0x100e   :  { %v12632_v55 = vadd.f32 %v8631_v34, %v5965_v36  ;;  %v6021_v58 = vsel %vm1090_vm3, %v12626_v41, 0.0 }
0x100f   :  { %6022 = vadd.xlane.f32.xlu0 %v6021_v58  ;;  %v6030_v36 = vsel %vm1090_vm3, %v12636_v27, 0.0 }
0x1010   :  { %v6024_v6 = vsel %vm1090_vm3, %v12632_v55, 0.0 }
0x1011   :  { %6025 = vadd.xlane.f32.xlu1 %v6024_v6 }
0x1012   :  { %v9229_v33 = vpop.f32.mrb[96].mxu1 }
0x1013   :  { %v5978_v47 = vpop.f32.mrb[97].mxu1  ;;  %6028 = vadd.xlane.f32.xlu0 %v6027_v32  ;;  %v12646_v44 = vadd.f32 %v9229_v33, %v8631_v34 }
0x1014   :  { %v12642_v9 = vadd.f32 %v8631_v34, %v5978_v47  ;;  %v9230_v13 = vpop.f32.mrb[98].mxu1 }
0x1015   :  { %v5981_v5 = vpop.f32.mrb[99].mxu1  ;;  %6031 = vadd.xlane.f32.xlu1 %v6030_v36  ;;  %v12652_v4 = vadd.f32 %v9230_v13, %v8631_v34  ;;  %v6039_v32 = vsel %vm1090_vm3, %v12646_v44, 0.0 }
0x1016   :  { %v12648_v58 = vadd.f32 %v8631_v34, %v5981_v5  ;;  %v6033_v6 = vsel %vm1090_vm3, %v12642_v9, 0.0 }
0x1017   :  { %6034 = vadd.xlane.f32.xlu0 %v6033_v6  ;;  %v6042_v33 = vsel %vm1090_vm3, %v12652_v4, 0.0 }
0x1018   :  { %v6036_v47 = vsel %vm1090_vm3, %v12648_v58, 0.0 }
0x1019   :  { %6037 = vadd.xlane.f32.xlu1 %v6036_v47 }
0x101b   :  { %6040 = vadd.xlane.f32.xlu0 %v6039_v32 }
0x101d   :  { %6043 = vadd.xlane.f32.xlu1 %v6042_v33 }
0x106c   :  { %v5323_v5 = vpop.xlane.xlu0 %5322 }
0x106d   :  { %v5369_v36 = vmul.f32 0.03125, %v5323_v5 }
0x106e   :  { %v5326_v42 = vpop.xlane.xlu1 %5325 }
0x106f   :  { %v12661_v37 = vsub.f32 %v12527_v46, %v5369_v36  ;;  %v5370_v34 = vmul.f32 0.03125, %v5326_v42 }
0x1070   :  { %v5329_v13 = vpop.xlane.xlu0 %5328 }
0x1071   :  { %v12664_v6 = vsub.f32 %v12533_v39, %v5370_v34  ;;  %v5371_v47 = vmul.f32 0.03125, %v5329_v13  ;;  %v5401_v61 = vmul.f32 %v12661_v37, %v12661_v37 }
0x1072   :  { %v5332_v32 = vpop.xlane.xlu1 %5331 }
0x1073   :  { %v12669_v2 = vsub.f32 %v12531_v12, %v5371_v47  ;;  %v5372_v33 = vmul.f32 0.03125, %v5332_v32  ;;  %v5417_v5 = vsel %vm1090_vm3, %v5401_v61, 0.0  ;;  %v5402_v46 = vmul.f32 %v12664_v6, %v12664_v6 }
0x1074   :  { %5418 = vadd.xlane.f32.xlu0 %v5417_v5  ;;  %v5335_v42 = vpop.xlane.xlu0 %5334 }
0x1075   :  { %v12675_v36 = vsub.f32 %v12537_v15, %v5372_v33  ;;  %v5373_v39 = vmul.f32 0.03125, %v5335_v42  ;;  %v5420_v34 = vsel %vm1090_vm3, %v5402_v46, 0.0  ;;  %v5403_v13 = vmul.f32 %v12669_v2, %v12669_v2 }
0x1076   :  { %5421 = vadd.xlane.f32.xlu1 %v5420_v34  ;;  %v5338_v12 = vpop.xlane.xlu1 %5337 }
0x1077   :  { %v12681_v47 = vsub.f32 %v12543_v50, %v5373_v39  ;;  %v5374_v61 = vmul.f32 0.03125, %v5338_v12  ;;  %v5423_v32 = vsel %vm1090_vm3, %v5403_v13, 0.0  ;;  %v5404_v5 = vmul.f32 %v12675_v36, %v12675_v36 }
0x1078   :  { %5424 = vadd.xlane.f32.xlu0 %v5423_v32  ;;  %v5341_v15 = vpop.xlane.xlu0 %5340 }
0x1079   :  { %v12687_v33 = vsub.f32 %v12549_v21, %v5374_v61  ;;  %v5375_v46 = vmul.f32 0.03125, %v5341_v15  ;;  %v5426_v42 = vsel %vm1090_vm3, %v5404_v5, 0.0  ;;  %v5405_v34 = vmul.f32 %v12681_v47, %v12681_v47 }
0x107a   :  { %5427 = vadd.xlane.f32.xlu1 %v5426_v42  ;;  %v5344_v50 = vpop.xlane.xlu1 %5343 }
0x107b   :  { %v12693_v39 = vsub.f32 %v12547_v18, %v5375_v46  ;;  %v5376_v13 = vmul.f32 0.03125, %v5344_v50  ;;  %v5429_v12 = vsel %vm1090_vm3, %v5405_v34, 0.0  ;;  %v5406_v32 = vmul.f32 %v12687_v33, %v12687_v33 }
0x107c   :  { %5430 = vadd.xlane.f32.xlu0 %v5429_v12  ;;  %v5347_v21 = vpop.xlane.xlu0 %5346 }
0x107d   :  { %v12699_v61 = vsub.f32 %v12553_v23, %v5376_v13  ;;  %v5377_v5 = vmul.f32 0.03125, %v5347_v21  ;;  %v5432_v15 = vsel %vm1090_vm3, %v5406_v32, 0.0  ;;  %v5407_v42 = vmul.f32 %v12693_v39, %v12693_v39 }
0x107e   :  { %5433 = vadd.xlane.f32.xlu1 %v5432_v15  ;;  %v5350_v18 = vpop.xlane.xlu1 %5349 }
0x107f   :  { %v12705_v46 = vsub.f32 %v12559_v26, %v5377_v5  ;;  %v5378_v34 = vmul.f32 0.03125, %v5350_v18  ;;  %v5435_v50 = vsel %vm1090_vm3, %v5407_v42, 0.0  ;;  %v5408_v12 = vmul.f32 %v12699_v61, %v12699_v61 }
0x1080   :  { %5436 = vadd.xlane.f32.xlu0 %v5435_v50  ;;  %v5353_v23 = vpop.xlane.xlu0 %5352 }
0x1081   :  { %v12711_v13 = vsub.f32 %v12565_v31, %v5378_v34  ;;  %v5379_v32 = vmul.f32 0.03125, %v5353_v23  ;;  %v5438_v21 = vsel %vm1090_vm3, %v5408_v12, 0.0  ;;  %v5409_v15 = vmul.f32 %v12705_v46, %v12705_v46 }
0x1082   :  { %5439 = vadd.xlane.f32.xlu1 %v5438_v21  ;;  %v5356_v26 = vpop.xlane.xlu1 %5355 }
0x1083   :  { %v12717_v5 = vsub.f32 %v12563_v16, %v5379_v32  ;;  %v5380_v42 = vmul.f32 0.03125, %v5356_v26  ;;  %v5441_v18 = vsel %vm1090_vm3, %v5409_v15, 0.0  ;;  %v5410_v50 = vmul.f32 %v12711_v13, %v12711_v13 }
0x1084   :  { %5442 = vadd.xlane.f32.xlu0 %v5441_v18  ;;  %v5359_v31 = vpop.xlane.xlu0 %5358 }
0x1085   :  { %v12723_v34 = vsub.f32 %v12569_v62, %v5380_v42  ;;  %v5381_v12 = vmul.f32 0.03125, %v5359_v31  ;;  %v5444_v23 = vsel %vm1090_vm3, %v5410_v50, 0.0  ;;  %v5411_v21 = vmul.f32 %v12717_v5, %v12717_v5 }
0x1086   :  { %5445 = vadd.xlane.f32.xlu1 %v5444_v23  ;;  %v5362_v16 = vpop.xlane.xlu1 %5361 }
0x1087   :  { %v12729_v32 = vsub.f32 %v12575_v45, %v5381_v12  ;;  %v5382_v15 = vmul.f32 0.03125, %v5362_v16  ;;  %v5447_v26 = vsel %vm1090_vm3, %v5411_v21, 0.0  ;;  %v5412_v18 = vmul.f32 %v12723_v34, %v12723_v34 }
0x1088   :  { %5448 = vadd.xlane.f32.xlu0 %v5447_v26  ;;  %v5365_v62 = vpop.xlane.xlu0 %5364 }
0x1089   :  { %v12735_v42 = vsub.f32 %v12581_v10, %v5382_v15  ;;  %v5383_v50 = vmul.f32 0.03125, %v5365_v62  ;;  %v5450_v31 = vsel %vm1090_vm3, %v5412_v18, 0.0  ;;  %v5413_v23 = vmul.f32 %v12729_v32, %v12729_v32 }
0x108a   :  { %5451 = vadd.xlane.f32.xlu1 %v5450_v31  ;;  %v5368_v45 = vpop.xlane.xlu1 %5367 }
0x108b   :  { %v12741_v12 = vsub.f32 %v12579_v19, %v5383_v50  ;;  %v5384_v21 = vmul.f32 0.03125, %v5368_v45  ;;  %v5453_v16 = vsel %vm1090_vm3, %v5413_v23, 0.0  ;;  %v5414_v26 = vmul.f32 %v12735_v42, %v12735_v42 }
0x108c   :  { %5454 = vadd.xlane.f32.xlu0 %v5453_v16  ;;  %v5999_v10 = vpop.xlane.xlu0 %5998 }
0x108d   :  { %v12747_v15 = vsub.f32 %v12585_v48, %v5384_v21  ;;  %v6045_v18 = vmul.f32 0.03125, %v5999_v10  ;;  %v5456_v62 = vsel %vm1090_vm3, %v5414_v26, 0.0  ;;  %v5415_v31 = vmul.f32 %v12741_v12, %v12741_v12 }
0x108e   :  { %5457 = vadd.xlane.f32.xlu1 %v5456_v62  ;;  %v6002_v19 = vpop.xlane.xlu1 %6001 }
0x108f   :  { %v12753_v50 = vsub.f32 %v12594_v0, %v6045_v18  ;;  %v6046_v23 = vmul.f32 0.03125, %v6002_v19  ;;  %v5459_v45 = vsel %vm1090_vm3, %v5415_v31, 0.0  ;;  %v5416_v16 = vmul.f32 %v12747_v15, %v12747_v15 }
0x1090   :  { %5460 = vadd.xlane.f32.xlu0 %v5459_v45  ;;  %v6005_v48 = vpop.xlane.xlu0 %6004 }
0x1091   :  { %v12759_v21 = vsub.f32 %v12600_v51, %v6046_v23  ;;  %v6047_v26 = vmul.f32 0.03125, %v6005_v48  ;;  %v5462_v10 = vsel %vm1090_vm3, %v5416_v16, 0.0  ;;  %v6077_v62 = vmul.f32 %v12753_v50, %v12753_v50 }
0x1092   :  { %5463 = vadd.xlane.f32.xlu1 %v5462_v10  ;;  %v6008_v0 = vpop.xlane.xlu1 %6007 }
0x1093   :  { %v12765_v18 = vsub.f32 %v12598_v11, %v6047_v26  ;;  %v6048_v31 = vmul.f32 0.03125, %v6008_v0  ;;  %v6093_v19 = vsel %vm1090_vm3, %v6077_v62, 0.0  ;;  %v6078_v45 = vmul.f32 %v12759_v21, %v12759_v21 }
0x1094   :  { %6094 = vadd.xlane.f32.xlu0 %v6093_v19  ;;  %v6011_v51 = vpop.xlane.xlu0 %6010 }
0x1095   :  { %v12771_v23 = vsub.f32 %v12604_v57, %v6048_v31  ;;  %v6049_v16 = vmul.f32 0.03125, %v6011_v51  ;;  %v6096_v48 = vsel %vm1090_vm3, %v6078_v45, 0.0  ;;  %v6079_v10 = vmul.f32 %v12765_v18, %v12765_v18 }
0x1096   :  { %6097 = vadd.xlane.f32.xlu1 %v6096_v48  ;;  %v6014_v11 = vpop.xlane.xlu1 %6013 }
0x1097   :  { %v12777_v26 = vsub.f32 %v12610_v29, %v6049_v16  ;;  %v6050_v62 = vmul.f32 0.03125, %v6014_v11  ;;  %v6099_v0 = vsel %vm1090_vm3, %v6079_v10, 0.0  ;;  %v6080_v19 = vmul.f32 %v12771_v23, %v12771_v23 }
0x1098   :  { %6100 = vadd.xlane.f32.xlu0 %v6099_v0  ;;  %v6017_v57 = vpop.xlane.xlu0 %6016 }
0x1099   :  { %v12783_v31 = vsub.f32 %v12616_v17, %v6050_v62  ;;  %v6051_v45 = vmul.f32 0.03125, %v6017_v57  ;;  %v6102_v51 = vsel %vm1090_vm3, %v6080_v19, 0.0  ;;  %v6081_v48 = vmul.f32 %v12777_v26, %v12777_v26 }
0x109a   :  { %6103 = vadd.xlane.f32.xlu1 %v6102_v51  ;;  %v6020_v29 = vpop.xlane.xlu1 %6019 }
0x109b   :  { %v12789_v16 = vsub.f32 %v12614_v35, %v6051_v45  ;;  %v6052_v10 = vmul.f32 0.03125, %v6020_v29  ;;  %v6105_v11 = vsel %vm1090_vm3, %v6081_v48, 0.0  ;;  %v6082_v0 = vmul.f32 %v12783_v31, %v12783_v31 }
0x109c   :  { %6106 = vadd.xlane.f32.xlu0 %v6105_v11  ;;  %v6023_v17 = vpop.xlane.xlu0 %6022 }
0x109d   :  { %v12795_v62 = vsub.f32 %v12620_v28, %v6052_v10  ;;  %v6053_v19 = vmul.f32 0.03125, %v6023_v17  ;;  %v6108_v57 = vsel %vm1090_vm3, %v6082_v0, 0.0  ;;  %v6083_v51 = vmul.f32 %v12789_v16, %v12789_v16 }
0x109e   :  { %6109 = vadd.xlane.f32.xlu1 %v6108_v57  ;;  %v6026_v35 = vpop.xlane.xlu1 %6025 }
0x109f   :  { %v12801_v45 = vsub.f32 %v12626_v41, %v6053_v19  ;;  %v6054_v48 = vmul.f32 0.03125, %v6026_v35  ;;  %v6111_v29 = vsel %vm1090_vm3, %v6083_v51, 0.0  ;;  %v6084_v11 = vmul.f32 %v12795_v62, %v12795_v62 }
0x10a0   :  { %6112 = vadd.xlane.f32.xlu0 %v6111_v29  ;;  %v6029_v28 = vpop.xlane.xlu0 %6028 }
0x10a1   :  { %v12807_v10 = vsub.f32 %v12632_v55, %v6054_v48  ;;  %v6055_v0 = vmul.f32 0.03125, %v6029_v28  ;;  %v6114_v17 = vsel %vm1090_vm3, %v6084_v11, 0.0  ;;  %v6085_v57 = vmul.f32 %v12801_v45, %v12801_v45 }
0x10a2   :  { %6115 = vadd.xlane.f32.xlu1 %v6114_v17  ;;  %v6032_v41 = vpop.xlane.xlu1 %6031 }
0x10a3   :  { %v12813_v19 = vsub.f32 %v12630_v3, %v6055_v0  ;;  %v6056_v51 = vmul.f32 0.03125, %v6032_v41  ;;  %v6117_v35 = vsel %vm1090_vm3, %v6085_v57, 0.0  ;;  %v6086_v29 = vmul.f32 %v12807_v10, %v12807_v10 }
0x10a4   :  { %6118 = vadd.xlane.f32.xlu0 %v6117_v35  ;;  %v6035_v55 = vpop.xlane.xlu0 %6034 }
0x10a5   :  { %v12819_v48 = vsub.f32 %v12636_v27, %v6056_v51  ;;  %v6057_v11 = vmul.f32 0.03125, %v6035_v55  ;;  %v6120_v28 = vsel %vm1090_vm3, %v6086_v29, 0.0  ;;  %v6087_v17 = vmul.f32 %v12813_v19, %v12813_v19 }
0x10a6   :  { %6121 = vadd.xlane.f32.xlu1 %v6120_v28  ;;  %v6038_v3 = vpop.xlane.xlu1 %6037 }
0x10a7   :  { %v12825_v0 = vsub.f32 %v12642_v9, %v6057_v11  ;;  %v6058_v57 = vmul.f32 0.03125, %v6038_v3  ;;  %v6123_v41 = vsel %vm1090_vm3, %v6087_v17, 0.0  ;;  %v6088_v35 = vmul.f32 %v12819_v48, %v12819_v48 }
0x10a8   :  { %6124 = vadd.xlane.f32.xlu0 %v6123_v41  ;;  %v6041_v27 = vpop.xlane.xlu0 %6040 }
0x10a9   :  { %14365 = vst [vmem:[#allocation27_spill] sm:$0xff] %v12825_v0  ;;  %v12831_v51 = vsub.f32 %v12648_v58, %v6058_v57  ;;  %v6059_v29 = vmul.f32 0.03125, %v6041_v27  ;;  %v6126_v55 = vsel %vm1090_vm3, %v6088_v35, 0.0  ;;  %v6089_v28 = vmul.f32 %v12825_v0, %v12825_v0  ;;  %v8580_v58 = vld [vmem:[%s14242_s13 + $0xb] ss:$0 sm:$0xff] }
0x10aa   :  { %6127 = vadd.xlane.f32.xlu1 %v6126_v55  ;;  %v6044_v9 = vpop.xlane.xlu1 %6043  ;;  %v8589_v27 = vld [vmem:[%s14242_s13 + $0xc] ss:$0 sm:$0xff] }
0x10ab   :  { %14366 = vst [vmem:[#allocation28_spill] sm:$0xff] %v12831_v51  ;;  %v12837_v11 = vsub.f32 %v12646_v44, %v6059_v29  ;;  %v6060_v17 = vmul.f32 0.03125, %v6044_v9  ;;  %v6129_v3 = vsel %vm1090_vm3, %v6089_v28, 0.0  ;;  %v6090_v41 = vmul.f32 %v12831_v51, %v12831_v51 }
0x10ac   :  { %6130 = vadd.xlane.f32.xlu0 %v6129_v3  ;;  %v12855_v29 = vadd.f32 %v8580_v58, %v12514_v63  ;;  %v12870_v63 = vadd.f32 %v8589_v27, %v12520_v1  ;;  %v12878_v1 = vld [vmem:[#allocation3 + $0x110] sm:$0xff]  }
0x10ad   :  { %14367 = vst [vmem:[#allocation29_spill] sm:$0xff] %v12837_v11  ;;  %v12846_v57 = vsub.f32 %v12652_v4, %v6060_v17  ;;  %v6132_v35 = vsel %vm1090_vm3, %v6090_v41, 0.0  ;;  %v6091_v44 = vmul.f32 %v12837_v11, %v12837_v11  ;;  %v12861_v4 = vadd.f32 %v8589_v27, %v12516_v43 }
0x10ae   :  { %6133 = vadd.xlane.f32.xlu1 %v6132_v35  ;;  %v12865_v17 = vadd.f32 %v8580_v58, %v12518_v25  ;;  %v4743_v3 = vsel %vm1090_vm3, %v12855_v29, 0.0  ;;  %v4876_v35 = vsel %vm1090_vm3, %v12870_v63, 0.0  ;;  %v9471_v25 = vld [vmem:[#allocation3 + $0xf0] sm:$0xff]   ;;  %v9472_v58 = vld [vmem:[#allocation3 + $0xf8] sm:$0xff]  }
0x10af   :  { %14368 = vst [vmem:[#allocation30_spill] sm:$0xff] %v12846_v57  ;;  %v6135_v55 = vsel %vm1090_vm3, %v6091_v44, 0.0  ;;  %v6092_v28 = vmul.f32 %v12846_v57, %v12846_v57  ;;  %v4873_v41 = vsel %vm1090_vm3, %v12861_v4, 0.0  ;;  %9191 = vmatprep.subr.bf16.mxu0 %v9471_v25 }
0x10b0   :  { %6136 = vadd.xlane.f32.xlu0 %v6135_v55  ;;  %v4746_v43 = vsel %vm1090_vm3, %v12865_v17, 0.0  ;;  %9192 = vmatpush3.bf16.msra.mxu0 %v9471_v25 }
0x10b1   :  { %v6138_v9 = vsel %vm1090_vm3, %v6092_v28, 0.0  ;;  %9193 = vmatprep.subr.bf16.mxu0 %v9472_v58 }
0x10b2   :  { %6139 = vadd.xlane.f32.xlu1 %v6138_v9 }
0x10b4   :  { %4744 = vadd.xlane.f32.xlu0 %v4743_v3  ;;  %9194 = vmatpush3.bf16.msra.mxu0 %v9472_v58 }
0x10b5   :  { %9231 = vmatprep.subr.bf16.mxu0 %v12878_v1 }
0x10b6   :  { %4874 = vadd.xlane.f32.xlu1 %v4873_v41 }
0x10b8   :  { %4747 = vadd.xlane.f32.xlu0 %v4746_v43 }
0x10ba   :  { %4877 = vadd.xlane.f32.xlu1 %v4876_v35 }
0x1101   :  { %v5419_v44 = vpop.xlane.xlu0 %5418 }
0x1102   :  { %v5465_v27 = vmul.f32 0.03125, %v5419_v44 }
0x1103   :  { %v5422_v55 = vpop.xlane.xlu1 %5421 }
0x1104   :  { %v5481_v28 = vadd.f32 1e-05, %v5465_v27  ;;  %v5466_v9 = vmul.f32 0.03125, %v5422_v55 }
0x1105   :  { %v5425_v3 = vpop.xlane.xlu0 %5424 }
0x1106   :  { %9883 = vrsqrt.f32 %v5481_v28  ;;  %v5482_v41 = vadd.f32 1e-05, %v5466_v9  ;;  %v5467_v43 = vmul.f32 0.03125, %v5425_v3  ;;  %v12884_v9 = vld [vmem:[%s14243_s14 + $0x8] ss:$0 sm:$0xff] }
0x1107   :  { %v5428_v35 = vpop.xlane.xlu1 %5427 }
0x1108   :  { %9885 = vrsqrt.f32 %v5482_v41  ;;  %v5483_v60 = vadd.f32 1e-05, %v5467_v43  ;;  %v5468_v25 = vmul.f32 0.03125, %v5428_v35  ;;  %v12892_v35 = vld [vmem:[%s14244_s15 + $0x8] ss:$0 sm:$0xff] }
0x1109   :  { %v5431_v56 = vpop.xlane.xlu0 %5430 }
0x110a   :  { %9887 = vrsqrt.f32 %v5483_v60  ;;  %v5484_v58 = vadd.f32 1e-05, %v5468_v25  ;;  %v5469_v24 = vmul.f32 0.03125, %v5431_v56 }
0x110b   :  { %v5434_v53 = vpop.xlane.xlu1 %5433 }
0x110c   :  { %9889 = vrsqrt.f32 %v5484_v58  ;;  %v5485_v59 = vadd.f32 1e-05, %v5469_v24  ;;  %v5470_v20 = vmul.f32 0.03125, %v5434_v53 }
0x110d   :  { %v5437_v44 = vpop.xlane.xlu0 %5436 }
0x110e   :  { %9891 = vrsqrt.f32 %v5485_v59  ;;  %v5486_v27 = vadd.f32 1e-05, %v5470_v20  ;;  %v5471_v55 = vmul.f32 0.03125, %v5437_v44 }
0x110f   :  { %v5440_v30 = vpop.xlane.xlu1 %5439 }
0x1110   :  { %v9884_v28 = vpop.eup %9883  ;;  %9893 = vrsqrt.f32 %v5486_v27  ;;  %v5487_v3 = vadd.f32 1e-05, %v5471_v55  ;;  %v5472_v60 = vmul.f32 0.03125, %v5440_v30 }
0x1111   :  { %v5513_v56 = vmul.f32 %v9884_v28, %v12661_v37  ;;  %v5443_v41 = vpop.xlane.xlu0 %5442 }
0x1112   :  { %v9886_v43 = vpop.eup %9885  ;;  %9895 = vrsqrt.f32 %v5487_v3  ;;  %v5488_v53 = vadd.f32 1e-05, %v5472_v60  ;;  %v5473_v24 = vmul.f32 0.03125, %v5443_v41 }
0x1113   :  { %v5535_v20 = vmul.f32 %v12884_v9, %v5513_v56  ;;  %v5514_v59 = vmul.f32 %v9886_v43, %v12664_v6  ;;  %v5446_v25 = vpop.xlane.xlu1 %5445 }
0x1114   :  { %v9888_v58 = vpop.eup %9887  ;;  %9897 = vrsqrt.f32 %v5488_v53  ;;  %v5489_v30 = vadd.f32 1e-05, %v5473_v24  ;;  %v5474_v44 = vmul.f32 0.03125, %v5446_v25 }
0x1115   :  { %v5536_v37 = vmul.f32 %v12884_v9, %v5514_v59  ;;  %v5515_v27 = vmul.f32 %v9888_v58, %v12669_v2  ;;  %v5449_v55 = vpop.xlane.xlu0 %5448  ;;  %v12897_v6 = vadd.f32 %v12892_v35, %v5535_v20 }
0x1116   :  { %v9890_v28 = vpop.eup %9889  ;;  %v5490_v3 = vadd.f32 1e-05, %v5474_v44  ;;  %v5475_v60 = vmul.f32 0.03125, %v5449_v55  ;;  %9899 = vrsqrt.f32 %v5489_v30 }
0x1117   :  { %v5537_v56 = vmul.f32 %v12884_v9, %v5515_v27  ;;  %v5516_v41 = vmul.f32 %v9890_v28, %v12675_v36  ;;  %v5452_v43 = vpop.xlane.xlu1 %5451  ;;  %v12907_v20 = vadd.f32 %v12892_v35, %v5536_v37  ;;  %v5573_v55 = vmin.f32 %v12897_v6, 20.0 }
0x1118   :  { %v9892_v52 = vpop.eup %9891  ;;  %v5491_v53 = vadd.f32 1e-05, %v5475_v60  ;;  %v5476_v24 = vmul.f32 0.03125, %v5452_v43  ;;  %9901 = vrsqrt.f32 %v5490_v3 }
0x1119   :  { %v12902_v59 = vadd.f32 %v12892_v35, %v5537_v56  ;;  %v5538_v2 = vmul.f32 %v12884_v9, %v5516_v41  ;;  %v5517_v25 = vmul.f32 %v9892_v52, %v12681_v47  ;;  %v5455_v58 = vpop.xlane.xlu0 %5454 }
0x111a   :  { %v9894_v44 = vpop.eup %9893  ;;  %v5492_v27 = vadd.f32 1e-05, %v5476_v24  ;;  %v5477_v36 = vmul.f32 0.03125, %v5455_v58  ;;  %9903 = vrsqrt.f32 %v5491_v53  ;;  %v5574_v58 = vmin.f32 %v12907_v20, 20.0 }
0x111b   :  { %v5575_v30 = vmin.f32 %v12902_v59, 20.0  ;;  %v12912_v28 = vadd.f32 %v12892_v35, %v5538_v2  ;;  %v5539_v60 = vmul.f32 %v12884_v9, %v5517_v25  ;;  %v5518_v56 = vmul.f32 %v9894_v44, %v12687_v33  ;;  %v5458_v52 = vpop.xlane.xlu1 %5457 }
0x111c   :  { %v9896_v47 = vpop.eup %9895  ;;  %v5493_v37 = vadd.f32 1e-05, %v5477_v36  ;;  %v5478_v41 = vmul.f32 0.03125, %v5458_v52  ;;  %9905 = vrsqrt.f32 %v5492_v27  ;;  %v5589_v53 = vmul.f32 1.442695, %v5573_v55 }
0x111d   :  { %v5593_v43 = vmul.f32 1.442695, %v5575_v30  ;;  %v5519_v3 = vmul.f32 %v9896_v47, %v12693_v39  ;;  %v5461_v24 = vpop.xlane.xlu0 %5460  ;;  %v5576_v2 = vmin.f32 %v12912_v28, 20.0  ;;  %v5540_v25 = vmul.f32 %v12884_v9, %v5518_v56 }
0x111e   :  { %v9898_v8 = vpop.eup %9897  ;;  %v5494_v38 = vadd.f32 1e-05, %v5478_v41  ;;  %v5479_v14 = vmul.f32 0.03125, %v5461_v24  ;;  %v12922_v36 = vadd.f32 %v12892_v35, %v5539_v60  ;;  %9907 = vrsqrt.f32 %v5493_v37 }
0x111f   :  { %v5520_v33 = vmul.f32 %v9898_v8, %v12699_v61  ;;  %v5464_v44 = vpop.xlane.xlu1 %5463  ;;  %9909 = vpow2.f32 %v5593_v43  ;;  %v5541_v30 = vmul.f32 %v12884_v9, %v5519_v3  ;;  %v5591_v47 = vmul.f32 1.442695, %v5574_v58 }
0x1120   :  { %v5495_v39 = vadd.f32 1e-05, %v5479_v14  ;;  %v5480_v27 = vmul.f32 0.03125, %v5464_v44  ;;  %v9900_v49 = vpop.eup %9899  ;;  %v5595_v41 = vmul.f32 1.442695, %v5576_v2  ;;  %9911 = vrsqrt.f32 %v5494_v38 }
0x1121   :  { %v6095_v52 = vpop.xlane.xlu0 %6094  ;;  %v5542_v24 = vmul.f32 %v12884_v9, %v5520_v33  ;;  %9913 = vpow2.f32 %v5589_v53  ;;  %v12927_v61 = vadd.f32 %v12892_v35, %v5540_v25  ;;  %v5577_v55 = vmin.f32 %v12922_v36, 20.0 }
0x1122   :  { %v6141_v56 = vmul.f32 0.03125, %v6095_v52  ;;  %v9902_v14 = vpop.eup %9901  ;;  %9915 = vrsqrt.f32 %v5495_v39  ;;  %v5496_v60 = vadd.f32 1e-05, %v5480_v27  ;;  %v12931_v58 = vadd.f32 %v12892_v35, %v5541_v30 }
0x1123   :  { %v6098_v8 = vpop.xlane.xlu1 %6097  ;;  %9917 = vpow2.f32 %v5591_v47  ;;  %v12934_v33 = vadd.f32 %v12892_v35, %v5542_v24  ;;  %v5521_v44 = vmul.f32 %v9900_v49, %v12705_v46  ;;  %v5522_v53 = vmul.f32 %v9902_v14, %v12711_v13 }
0x1124   :  { %v6157_v37 = vadd.f32 1e-05, %v6141_v56  ;;  %v6142_v43 = vmul.f32 0.03125, %v6098_v8  ;;  %v9904_v2 = vpop.eup %9903  ;;  %9919 = vpow2.f32 %v5595_v41  ;;  %v5578_v27 = vmin.f32 %v12927_v61, 20.0 }
0x1125   :  { %v6101_v3 = vpop.xlane.xlu0 %6100  ;;  %v5597_v52 = vmul.f32 1.442695, %v5577_v55  ;;  %9921 = vrsqrt.f32 %v5496_v60  ;;  %v5579_v30 = vmin.f32 %v12931_v58, 20.0  ;;  %v5523_v41 = vmul.f32 %v9904_v2, %v12717_v5 }
0x1126   :  { %v6143_v38 = vmul.f32 0.03125, %v6101_v3  ;;  %v9906_v25 = vpop.eup %9905  ;;  %9923 = vrsqrt.f32 %v6157_v37  ;;  %v6158_v8 = vadd.f32 1e-05, %v6142_v43  ;;  %v5580_v3 = vmin.f32 %v12934_v33, 20.0 }
0x1127   :  { %v6104_v39 = vpop.xlane.xlu1 %6103  ;;  %v5524_v49 = vmul.f32 %v9906_v25, %v12723_v34  ;;  %v5599_v60 = vmul.f32 1.442695, %v5578_v27  ;;  %v5601_v37 = vmul.f32 1.442695, %v5579_v30  ;;  %v12947_v2 = vmul.f32 %v12884_v9, %v5522_v53 }
0x1128   :  { %v6159_v47 = vadd.f32 1e-05, %v6143_v38  ;;  %v6144_v56 = vmul.f32 0.03125, %v6104_v39  ;;  %v9908_v7 = vpop.eup %9907  ;;  %v12944_v39 = vmul.f32 %v12884_v9, %v5521_v44  ;;  %v12950_v34 = vmul.f32 %v12884_v9, %v5523_v41 }
0x1129   :  { %v6107_v24 = vpop.xlane.xlu0 %6106  ;;  %v9910_v14 = vpop.eup %9909  ;;  %v12953_v27 = vmul.f32 %v12884_v9, %v5524_v49  ;;  %v5525_v30 = vmul.f32 %v9908_v7, %v12729_v32 }
0x112a   :  { %9925 = vrsqrt.f32 %v6159_v47  ;;  %v6160_v46 = vadd.f32 1e-05, %v6144_v56  ;;  %v6145_v13 = vmul.f32 0.03125, %v6107_v24  ;;  %v9912_v38 = vpop.eup %9911  ;;  %v5603_v47 = vmul.f32 1.442695, %v5580_v3 }
0x112b   :  { %v6110_v55 = vpop.xlane.xlu1 %6109  ;;  %9927 = vpow2.f32 %v5597_v52  ;;  %v9914_v43 = vpop.eup %9913  ;;  %v5623_v53 = vadd.f32 2.0, %v9910_v14  ;;  %v5526_v3 = vmul.f32 %v9912_v38, %v12735_v42 }
0x112c   :  { %9929 = vrsqrt.f32 %v6160_v46  ;;  %v6146_v5 = vmul.f32 0.03125, %v6110_v55  ;;  %v9916_v56 = vpop.eup %9915  ;;  %v6161_v52 = vadd.f32 1e-05, %v6145_v13  ;;  %v5621_v24 = vadd.f32 2.0, %v9914_v43 }
0x112d   :  { %9931 = vrsqrt.f32 %v6158_v8  ;;  %v6113_v25 = vpop.xlane.xlu0 %6112  ;;  %v9918_v46 = vpop.eup %9917  ;;  %v5527_v49 = vmul.f32 %v9916_v56, %v12741_v12 }
0x112e   :  { %v6147_v44 = vmul.f32 0.03125, %v6113_v25  ;;  %v6162_v55 = vadd.f32 1e-05, %v6146_v5  ;;  %9933 = vpow2.f32 %v5599_v60  ;;  %v9920_v40 = vpop.eup %9919  ;;  %v5622_v8 = vadd.f32 2.0, %v9918_v46 }
0x112f   :  { %v6116_v22 = vpop.xlane.xlu1 %6115  ;;  %9935 = vpow2.f32 %v5601_v37  ;;  %v12958_v13 = vmul.f32 %v9914_v43, %v5621_v24  ;;  %v9922_v25 = vpop.eup %9921  ;;  %v5624_v38 = vadd.f32 2.0, %v9920_v40 }
0x1130   :  { %v6163_v41 = vadd.f32 1e-05, %v6147_v44  ;;  %v6148_v54 = vmul.f32 0.03125, %v6116_v22  ;;  %9937 = vpow2.f32 %v5603_v47  ;;  %v12960_v5 = vmul.f32 %v9918_v46, %v5622_v8  ;;  %v9924_v60 = vpop.eup %9923 }
0x1131   :  { %v6119_v57 = vpop.xlane.xlu0 %6118  ;;  %9939 = vrsqrt.f32 %v6161_v52  ;;  %v12963_v44 = vmul.f32 %v12884_v9, %v5525_v30  ;;  %v5669_v42 = vadd.f32 2.0, %v12958_v13  ;;  %v5639_v47 = vmul.f32 %v9910_v14, %v5623_v53  ;;  %v12980_v14 = vld [vmem:[%s14243_s14 + $0x9] ss:$0 sm:$0xff] }
0x1132   :  { %v6164_v7 = vadd.f32 1e-05, %v6148_v54  ;;  %v6149_v32 = vmul.f32 0.03125, %v6119_v57  ;;  %9941 = vrsqrt.f32 %v6162_v55  ;;  %v12969_v54 = vmul.f32 %v12884_v9, %v5526_v3 }
0x1133   :  { %v6122_v22 = vpop.xlane.xlu1 %6121  ;;  %9943 = vrsqrt.f32 %v6163_v41  ;;  %v5670_v24 = vadd.f32 2.0, %v12960_v5  ;;  %v12974_v30 = vmul.f32 %v12884_v9, %v5527_v49  ;;  %v5528_v55 = vmul.f32 %v9922_v25, %v12747_v15  ;;  %v12987_v49 = vld [vmem:[%s14244_s15 + $0x9] ss:$0 sm:$0xff] }
0x1134   :  { %v9926_v12 = vpop.eup %9925  ;;  %v6165_v37 = vadd.f32 1e-05, %v6149_v32  ;;  %v6150_v43 = vmul.f32 0.03125, %v6122_v22  ;;  %9945 = vrcp.f32 %v5669_v42  ;;  %14369 = vst [vmem:[#allocation31_spill] sm:$0xff] %v12987_v49  ;;  %v5640_v25 = vmul.f32 %v9920_v40, %v5624_v38 }
0x1135   :  { %v12966_v56 = vpop.eup %9927  ;;  %v6191_v57 = vmul.f32 %v9926_v12, %v12765_v18  ;;  %v6125_v52 = vpop.xlane.xlu0 %6124  ;;  %9947 = vrsqrt.f32 %v6164_v7  ;;  %v5671_v22 = vadd.f32 2.0, %v5639_v47 }
0x1136   :  { %v9930_v46 = vpop.eup %9929  ;;  %v6151_v53 = vmul.f32 0.03125, %v6125_v52  ;;  %v6166_v3 = vadd.f32 1e-05, %v6150_v43  ;;  %9949 = vrcp.f32 %v5670_v24  ;;  %v12994_v43 = vmul.f32 %v5639_v47, %v12902_v59 }
0x1137   :  { %v9932_v41 = vpop.eup %9931  ;;  %v6213_v18 = vmul.f32 %v12980_v14, %v6191_v57  ;;  %v6192_v8 = vmul.f32 %v9930_v46, %v12771_v23  ;;  %v6128_v32 = vpop.xlane.xlu1 %6127  ;;  %9951 = vrsqrt.f32 %v6165_v37  ;;  %v12999_v24 = vmul.f32 %v12884_v9, %v5528_v55 }
0x1138   :  { %v6152_v15 = vmul.f32 0.03125, %v6128_v32  ;;  %v9934_v42 = vpop.eup %9933  ;;  %v6167_v57 = vadd.f32 1e-05, %v6151_v53  ;;  %v6189_v37 = vmul.f32 %v9924_v60, %v12753_v50  ;;  %9953 = vrsqrt.f32 %v6166_v3 }
0x1139   :  { %v12990_v7 = vadd.f32 %v12987_v49, %v6213_v18  ;;  %v6214_v12 = vmul.f32 %v12980_v14, %v6192_v8  ;;  %v6131_v23 = vpop.xlane.xlu0 %6130  ;;  %v12996_v52 = vpop.eup %9935  ;;  %v6190_v18 = vmul.f32 %v9932_v41, %v12759_v21  ;;  %9955 = vrcp.f32 %v5671_v22 }
0x113a   :  { %v6168_v40 = vadd.f32 1e-05, %v6152_v15  ;;  %v6153_v38 = vmul.f32 0.03125, %v6131_v23  ;;  %v13002_v46 = vpop.eup %9937  ;;  %v5625_v9 = vadd.f32 2.0, %v12966_v56  ;;  %9957 = vrsqrt.f32 %v6167_v57 }
0x113b   :  { %14370 = vst [vmem:[#allocation32_spill] sm:$0xff] %v12990_v7  ;;  %v6251_v8 = vmin.f32 %v12990_v7, 20.0  ;;  %v13007_v53 = vadd.f32 %v12987_v49, %v6214_v12  ;;  %v6134_v59 = vpop.xlane.xlu1 %6133  ;;  %v9940_v47 = vpop.eup %9939  ;;  %v5626_v21 = vadd.f32 2.0, %v9934_v42  ;;  %v13012_v23 = vmul.f32 %v12980_v14, %v6189_v37 }
0x113c   :  { %v6169_v32 = vadd.f32 1e-05, %v6153_v38  ;;  %v6154_v11 = vmul.f32 0.03125, %v6134_v59  ;;  %v9942_v50 = vpop.eup %9941  ;;  %9959 = vrsqrt.f32 %v6168_v40  ;;  %v13015_v12 = vmul.f32 %v5640_v25, %v12912_v28 }
0x113d   :  { %14371 = vst [vmem:[#allocation33_spill] sm:$0xff] %v13007_v53  ;;  %v6269_v60 = vmul.f32 1.442695, %v6251_v8  ;;  %v6252_v55 = vmin.f32 %v13007_v53, 20.0  ;;  %v6137_v15 = vpop.xlane.xlu0 %6136  ;;  %v9944_v41 = vpop.eup %9943  ;;  %v5653_v8 = vmul.f32 %v12958_v13, %v12897_v6  ;;  %v5672_v7 = vadd.f32 2.0, %v5640_v25 }
0x113e   :  { %v6155_v3 = vmul.f32 0.03125, %v6137_v15  ;;  %v9946_v38 = vpop.eup %9945  ;;  %v6193_v53 = vmul.f32 %v9940_v47, %v12777_v26  ;;  %v6170_v51 = vadd.f32 1e-05, %v6154_v11  ;;  %v5654_v37 = vmul.f32 %v12960_v5, %v12907_v20 }
0x113f   :  { %9961 = vpow2.f32 %v6269_v60  ;;  %v6271_v22 = vmul.f32 1.442695, %v6252_v55  ;;  %v6140_v59 = vpop.xlane.xlu1 %6139  ;;  %v9948_v57 = vpop.eup %9947  ;;  %v13023_v28 = vmul.f32 %v12980_v14, %v6190_v18  ;;  %v5641_v55 = vmul.f32 %v12966_v56, %v5625_v9 }
0x1140   :  { %9963 = vrsqrt.f32 %v6169_v32  ;;  %v9950_v40 = vpop.eup %9949  ;;  %v5642_v15 = vmul.f32 %v9934_v42, %v5626_v21  ;;  %v6171_v13 = vadd.f32 1e-05, %v6155_v3  ;;  %v5701_v25 = vmul.f32 %v9946_v38, %v5653_v8 }
0x1141   :  { %9965 = vpow2.f32 %v6271_v22  ;;  %v4745_v60 = vpop.xlane.xlu0 %4744  ;;  %v9952_v6 = vpop.eup %9951  ;;  %v5702_v0 = vmul.f32 %v9950_v40, %v5654_v37  ;;  %v6194_v26 = vmul.f32 %v9942_v50, %v12783_v31  ;;  %v6195_v11 = vmul.f32 %v9944_v41, %v12789_v16 }
0x1142   :  { %v4749_v49 = vmul.f32 0.03125, %v4745_v60  ;;  %v6156_v47 = vmul.f32 0.03125, %v6140_v59  ;;  %9967 = vrcp.f32 %v5672_v7  ;;  %v13029_v5 = vmul.f32 %v12980_v14, %v6193_v53  ;;  %v9954_v42 = vpop.eup %9953 }
0x1143   :  { %v4875_v20 = vpop.xlane.xlu1 %4874  ;;  %v6196_v18 = vmul.f32 %v9948_v57, %v12795_v62  ;;  %9969 = vrsqrt.f32 %v6170_v51  ;;  %v5717_v56 = vpack.c.bf16 %v5702_v0, %v5701_v25  ;;  %v6197_v32 = vmul.f32 %v9952_v6, %v12801_v45  ;;  %v9956_v50 = vpop.eup %9955 }
0x1144   :  { %v13034_v9 = vsub.f32 %v12855_v29, %v4749_v49  ;;  %v4879_v21 = vmul.f32 0.03125, %v4875_v20  ;;  %v5673_v31 = vadd.f32 2.0, %v5641_v55  ;;  %9971 = vrsqrt.f32 %v6171_v13  ;;  %v9958_v51 = vpop.eup %9957 }
0x1145   :  { %9195 = vmatprep.mubr.msk.bf16.mxu0 %vm1090_vm3, %v5717_v56  ;;  %v5674_v16 = vadd.f32 2.0, %v5642_v15  ;;  %v4748_v7 = vpop.xlane.xlu0 %4747  ;;  %v5627_v53 = vadd.f32 2.0, %v12996_v52  ;;  %v5628_v62 = vadd.f32 2.0, %v13002_v46  ;;  %v13040_v0 = vmul.f32 %v12980_v14, %v6194_v26 }
0x1146   :  { %v13043_v45 = vmul.f32 %v12980_v14, %v6195_v11  ;;  %v6172_v29 = vadd.f32 1e-05, %v6156_v47  ;;  %9973 = vrcp.f32 %v5673_v31  ;;  %v9960_v41 = vpop.eup %9959  ;;  %v13046_v3 = vmul.f32 %v12980_v14, %v6196_v18 }
0x1147   :  { %v4878_v49 = vpop.xlane.xlu1 %4877  ;;  %v5657_v38 = vmul.f32 %v5641_v55, %v12922_v36  ;;  %9975 = vrcp.f32 %v5674_v16  ;;  %v5643_v22 = vmul.f32 %v12996_v52, %v5627_v53  ;;  %v13051_v59 = vsub.f32 %v12861_v4, %v4879_v21  ;;  %v9474_v53 = vld [vmem:[#allocation3 + $0x118] sm:$0xff]  }
0x1148   :  { %v4750_v57 = vmul.f32 0.03125, %v4748_v7  ;;  %v5644_v37 = vmul.f32 %v13002_v46, %v5628_v62  ;;  %v4753_v40 = vmul.f32 %v13034_v9, %v13034_v9  ;;  %v13059_v13 = vmul.f32 %v12980_v14, %v6197_v32 }
0x1149   :  { %v9962_v8 = vpop.eup %9961  ;;  %v4880_v36 = vmul.f32 0.03125, %v4878_v49  ;;  %v5675_v55 = vadd.f32 2.0, %v5643_v22  ;;  %v6198_v52 = vmul.f32 %v9954_v42, %v12807_v10  ;;  %v6199_v4 = vmul.f32 %v9958_v51, %v12813_v19 }
0x114a   :  { %v13056_v60 = vpop.eup %9963  ;;  %v6299_v6 = vadd.f32 2.0, %v9962_v8  ;;  %9977 = vrsqrt.f32 %v6172_v29  ;;  %v5676_v26 = vadd.f32 2.0, %v5644_v37  ;;  %v5658_v46 = vmul.f32 %v5642_v15, %v12927_v61 }
0x114b   :  { %v9966_v25 = vpop.eup %9965  ;;  %9979 = vrcp.f32 %v5675_v55  ;;  %v4755_v47 = vsel %vm1090_vm3, %v4753_v40, 0.0  ;;  %v13068_v56 = vsub.f32 %v12865_v17, %v4750_v57  ;;  %v4883_v10 = vmul.f32 %v13051_v59, %v13051_v59 }
0x114c   :  { %v13063_v11 = vmul.f32 %v9962_v8, %v6299_v6  ;;  %v9968_v20 = vpop.eup %9967  ;;  %v6300_v18 = vadd.f32 2.0, %v9966_v25  ;;  %9981 = vrcp.f32 %v5676_v26  ;;  %4756 = vadd.xlane.f32.xlu0 %v4755_v47  ;;  %v5703_v32 = vmul.f32 %v9956_v50, %v12994_v43 }
0x114d   :  { %v13072_v19 = vpop.eup %9969  ;;  %v5704_v61 = vmul.f32 %v9968_v20, %v13015_v12  ;;  %v13078_v15 = vsub.f32 %v12870_v63, %v4880_v36  ;;  %v13081_v21 = vmul.f32 %v12980_v14, %v6198_v52  ;;  %v13084_v17 = vmul.f32 %v12980_v14, %v6199_v4 }
0x114e   :  { %v6347_v42 = vadd.f32 2.0, %v13063_v11  ;;  %v4885_v31 = vsel %vm1090_vm3, %v4883_v10, 0.0  ;;  %v13089_v16 = vadd.f32 %v12892_v35, %v12944_v39  ;;  %v13091_v7 = vpop.eup %9971  ;;  %v13094_v43 = vmul.f32 %v9960_v41, %v12819_v48 }
0x114f   :  { %v5718_v12 = vpack.c.bf16 %v5704_v61, %v5703_v32  ;;  %v5659_v63 = vmul.f32 %v5643_v22, %v12931_v58  ;;  %v5660_v50 = vmul.f32 %v5644_v37, %v12934_v33  ;;  %4886 = vadd.xlane.f32.xlu1 %v4885_v31  ;;  %v13098_v51 = vmul.f32 %v9966_v25, %v6300_v18  ;;  %v14372_v61 = vld [vmem:[#allocation31_spill] sm:$0xff] }
0x1150   :  { %v9974_v62 = vpop.eup %9973  ;;  %v13102_v29 = vadd.f32 %v12892_v35, %v12947_v2  ;;  %v5581_v39 = vmin.f32 %v13089_v16, 20.0  ;;  %v4754_v48 = vmul.f32 %v13068_v56, %v13068_v56  ;;  %9983 = vrcp.f32 %v6347_v42 }
0x1151   :  { %v9976_v49 = vpop.eup %9975  ;;  %9196 = vmatmul.mubr.msk.bf16.vlgmr.msra.gmra.mrb[80].mxu0 %vm1090_vm3, %v5718_v12  ;;  %v5705_v58 = vmul.f32 %v9974_v62, %v5657_v38  ;;  %v4884_v33 = vmul.f32 %v13078_v15, %v13078_v15  ;;  %v13112_v41 = vadd.f32 %v12892_v35, %v12950_v34  ;;  %v13120_v38 = vadd.f32 %v12892_v35, %v12953_v27 }
0x1152   :  { %9232 = vmatpush3.bf16.msra.mxu0 %v12878_v1  ;;  %v5706_v2 = vmul.f32 %v9976_v49, %v5658_v46  ;;  %v5582_v22 = vmin.f32 %v13102_v29, 20.0  ;;  %v5605_v8 = vmul.f32 1.442695, %v5581_v39  ;;  %v4758_v57 = vsel %vm1090_vm3, %v4754_v48, 0.0  ;;  %v14373_v39 = vld [vmem:[#allocation27_spill] sm:$0xff] }
0x1153   :  { %4759 = vadd.xlane.f32.xlu0 %v4758_v57  ;;  %v4888_v37 = vsel %vm1090_vm3, %v4884_v33, 0.0  ;;  %v5583_v40 = vmin.f32 %v13112_v41, 20.0  ;;  %9233 = vmatprep.subr.bf16.mxu0 %v9474_v53  ;;  %v13125_v34 = vadd.f32 %v12892_v35, %v12963_v44  ;;  %v13131_v55 = vadd.f32 %v12892_v35, %v12969_v54 }
0x1154   :  { %v13127_v1 = vpop.eup %9977  ;;  %v5719_v6 = vpack.c.bf16 %v5706_v2, %v5705_v58  ;;  %9985 = vpow2.f32 %v5605_v8  ;;  %v5607_v36 = vmul.f32 1.442695, %v5582_v22  ;;  %4889 = vadd.xlane.f32.xlu1 %v4888_v37  ;;  %v5584_v27 = vmin.f32 %v13120_v38, 20.0 }
0x1155   :  { %v9980_v25 = vpop.eup %9979  ;;  %v5609_v52 = vmul.f32 1.442695, %v5583_v40  ;;  %v5585_v4 = vmin.f32 %v13125_v34, 20.0  ;;  %v13137_v44 = vadd.f32 %v12892_v35, %v12974_v30  ;;  %v5586_v47 = vmin.f32 %v13131_v55, 20.0 }
0x1156   :  { %v9982_v26 = vpop.eup %9981  ;;  %9199 = vmatprep.mubr.msk.bf16.mxu0 %vm1090_vm3, %v5719_v6  ;;  %v5707_v46 = vmul.f32 %v9980_v25, %v5659_v63  ;;  %9987 = vpow2.f32 %v5607_v36  ;;  %9234 = vmatpush3.bf16.msra.mxu0 %v9474_v53  ;;  %v13143_v54 = vadd.f32 %v12892_v35, %v12999_v24  ;;  %v5611_v18 = vmul.f32 1.442695, %v5584_v27 }
0x1157   :  { %v5708_v20 = vmul.f32 %v9982_v26, %v5660_v50  ;;  %9989 = vpow2.f32 %v5609_v52  ;;  %v5613_v10 = vmul.f32 1.442695, %v5585_v4  ;;  %v5615_v42 = vmul.f32 1.442695, %v5586_v47 }
0x1158   :  { %v5587_v30 = vmin.f32 %v13137_v44, 20.0  ;;  %v5588_v32 = vmin.f32 %v13143_v54, 20.0  ;;  %v13149_v31 = vadd.f32 %v14372_v61, %v13012_v23  ;;  %9991 = vpow2.f32 %v5611_v18 }
0x1159   :  { %v5720_v12 = vpack.c.bf16 %v5708_v20, %v5707_v46  ;;  %v13153_v63 = vadd.f32 %v14372_v61, %v13023_v28  ;;  %v13157_v35 = vadd.f32 %v14372_v61, %v13029_v5  ;;  %9993 = vpow2.f32 %v5613_v10  ;;  %v14374_v5 = vld [vmem:[#allocation28_spill] sm:$0xff] }
0x115a   :  { %v5617_v24 = vmul.f32 1.442695, %v5587_v30  ;;  %v5619_v50 = vmul.f32 1.442695, %v5588_v32  ;;  %v6249_v53 = vmin.f32 %v13149_v31, 20.0  ;;  %v13160_v62 = vpop.eup %9983  ;;  %v6201_v23 = vmul.f32 %v13056_v60, %v14373_v39 }
0x115b   :  { %9200 = vmatmul.mubr.msk.bf16.gmra.mrb[84].mxu0 %vm1090_vm3, %v5720_v12  ;;  %9995 = vpow2.f32 %v5615_v42  ;;  %v6250_v28 = vmin.f32 %v13153_v63, 20.0  ;;  %v13168_v48 = vadd.f32 %v14372_v61, %v13040_v0  ;;  %v6202_v49 = vmul.f32 %v13072_v19, %v14374_v5  ;;  %v14376_v12 = vld [vmem:[#allocation30_spill] sm:$0xff] }
0x115c   :  { %9997 = vpow2.f32 %v5617_v24  ;;  %v6265_v58 = vmul.f32 1.442695, %v6249_v53  ;;  %v6253_v33 = vmin.f32 %v13157_v35, 20.0  ;;  %v13176_v22 = vadd.f32 %v14372_v61, %v13043_v45 }
0x115d   :  { %9999 = vpow2.f32 %v5619_v50  ;;  %v6267_v2 = vmul.f32 1.442695, %v6250_v28  ;;  %v6254_v60 = vmin.f32 %v13168_v48, 20.0  ;;  %v6348_v57 = vadd.f32 2.0, %v13098_v51 }
0x115e   :  { %v9986_v8 = vpop.eup %9985  ;;  %10001 = vpow2.f32 %v6265_v58  ;;  %v6273_v0 = vmul.f32 1.442695, %v6253_v33  ;;  %v13181_v19 = vadd.f32 %v14372_v61, %v13046_v3  ;;  %v6255_v6 = vmin.f32 %v13176_v22, 20.0 }
0x115f   :  { %v5629_v37 = vadd.f32 2.0, %v9986_v8  ;;  %10003 = vpow2.f32 %v6267_v2  ;;  %v6275_v40 = vmul.f32 1.442695, %v6254_v60  ;;  %v13186_v25 = vmul.f32 %v12980_v14, %v13094_v43  ;;  %v14375_v43 = vld [vmem:[#allocation29_spill] sm:$0xff] }
0x1160   :  { %v9988_v36 = vpop.eup %9987  ;;  %v13189_v45 = vmul.f32 %v12980_v14, %v6201_v23  ;;  %10005 = vpow2.f32 %v6273_v0  ;;  %v6256_v27 = vmin.f32 %v13181_v19, 20.0  ;;  %v6277_v26 = vmul.f32 1.442695, %v6255_v6 }
0x1161   :  { %v9990_v52 = vpop.eup %9989  ;;  %v5630_v4 = vadd.f32 2.0, %v9988_v36  ;;  %v5645_v3 = vmul.f32 %v9986_v8, %v5629_v37  ;;  %10007 = vpow2.f32 %v6275_v40  ;;  %v13193_v46 = vmul.f32 %v12980_v14, %v6202_v49 }
0x1162   :  { %10009 = vrcp.f32 %v6348_v57  ;;  %v5631_v47 = vadd.f32 2.0, %v9990_v52  ;;  %v6279_v20 = vmul.f32 1.442695, %v6256_v27  ;;  %v9992_v18 = vpop.eup %9991  ;;  %v6203_v10 = vmul.f32 %v13091_v7, %v14375_v43 }
0x1163   :  { %v5646_v42 = vmul.f32 %v9988_v36, %v5630_v4  ;;  %v5677_v30 = vadd.f32 2.0, %v5645_v3  ;;  %10011 = vpow2.f32 %v6277_v26  ;;  %v9994_v32 = vpop.eup %9993  ;;  %v6204_v24 = vmul.f32 %v13127_v1, %v14376_v12 }
0x1164   :  { %v5632_v50 = vadd.f32 2.0, %v9992_v18  ;;  %v5647_v53 = vmul.f32 %v9990_v52, %v5631_v47  ;;  %10013 = vpow2.f32 %v6279_v20  ;;  %v5633_v28 = vadd.f32 2.0, %v9994_v32 }
0x1165   :  { %v9996_v39 = vpop.eup %9995  ;;  %v5678_v23 = vadd.f32 2.0, %v5646_v42  ;;  %10015 = vrcp.f32 %v5677_v30  ;;  %v13201_v5 = vadd.f32 %v14372_v61, %v13059_v13  ;;  %v13205_v2 = vadd.f32 %v14372_v61, %v13081_v21 }
0x1166   :  { %v9998_v49 = vpop.eup %9997  ;;  %v5648_v7 = vmul.f32 %v9992_v18, %v5632_v50  ;;  %v5679_v58 = vadd.f32 2.0, %v5647_v53  ;;  %v5634_v33 = vadd.f32 2.0, %v9996_v39  ;;  %v13208_v60 = vmul.f32 %v12980_v14, %v6203_v10 }
0x1167   :  { %v10000_v1 = vpop.eup %9999  ;;  %10017 = vrcp.f32 %v5678_v23  ;;  %v5649_v8 = vmul.f32 %v9994_v32, %v5633_v28  ;;  %v5635_v57 = vadd.f32 2.0, %v9998_v49  ;;  %v13211_v37 = vmul.f32 %v12980_v14, %v6204_v24 }
0x1168   :  { %v10002_v0 = vpop.eup %10001  ;;  %v5680_v13 = vadd.f32 2.0, %v5648_v7  ;;  %10019 = vrcp.f32 %v5679_v58  ;;  %v5650_v40 = vmul.f32 %v9996_v39, %v5634_v33  ;;  %v5636_v27 = vadd.f32 2.0, %v10000_v1 }
0x1169   :  { %v10004_v6 = vpop.eup %10003  ;;  %v5681_v36 = vadd.f32 2.0, %v5649_v8  ;;  %v5651_v52 = vmul.f32 %v9998_v49, %v5635_v57  ;;  %v6257_v21 = vmin.f32 %v13201_v5, 20.0  ;;  %v6297_v47 = vadd.f32 2.0, %v10002_v0 }
0x116a   :  { %v10006_v4 = vpop.eup %10005  ;;  %10021 = vrcp.f32 %v5680_v13  ;;  %v5682_v26 = vadd.f32 2.0, %v5650_v40  ;;  %v6258_v20 = vmin.f32 %v13205_v2, 20.0  ;;  %v5661_v43 = vmul.f32 %v5645_v3, %v13089_v16 }
0x116b   :  { %v10008_v18 = vpop.eup %10007  ;;  %10023 = vrcp.f32 %v5681_v36  ;;  %v5652_v14 = vmul.f32 %v10000_v1, %v5636_v27  ;;  %v5683_v10 = vadd.f32 2.0, %v5651_v52  ;;  %v6298_v32 = vadd.f32 2.0, %v10004_v6 }
0x116c   :  { %v13216_v30 = vpop.eup %10009  ;;  %10025 = vrcp.f32 %v5682_v26  ;;  %v6313_v12 = vmul.f32 %v10002_v0, %v6297_v47  ;;  %v6301_v24 = vadd.f32 2.0, %v10006_v4  ;;  %v5662_v39 = vmul.f32 %v5646_v42, %v13102_v29 }
0x116d   :  { %v10012_v50 = vpop.eup %10011  ;;  %v5684_v23 = vadd.f32 2.0, %v5652_v14  ;;  %v6302_v28 = vadd.f32 2.0, %v10008_v18  ;;  %v6281_v49 = vmul.f32 1.442695, %v6257_v21  ;;  %10027 = vrcp.f32 %v5683_v10 }
0x116e   :  { %v10014_v58 = vpop.eup %10013  ;;  %v6314_v33 = vmul.f32 %v10004_v6, %v6298_v32  ;;  %v6345_v57 = vadd.f32 2.0, %v6313_v12  ;;  %v13219_v16 = vmul.f32 %v10006_v4, %v6301_v24  ;;  %v5663_v1 = vmul.f32 %v5647_v53, %v13112_v41 }
0x116f   :  { %v10016_v3 = vpop.eup %10015  ;;  %10029 = vrcp.f32 %v5684_v23  ;;  %v13222_v13 = vmul.f32 %v10008_v18, %v6302_v28  ;;  %v6283_v0 = vmul.f32 1.442695, %v6258_v20  ;;  %v5664_v36 = vmul.f32 %v5648_v7, %v13120_v38 }
0x1170   :  { %v6346_v27 = vadd.f32 2.0, %v6314_v33  ;;  %10031 = vrcp.f32 %v6345_v57  ;;  %v6304_v29 = vadd.f32 2.0, %v10014_v58  ;;  %v5665_v21 = vmul.f32 %v5649_v8, %v13125_v34 }
0x1171   :  { %v10018_v42 = vpop.eup %10017  ;;  %v5666_v6 = vmul.f32 %v5650_v40, %v13131_v55  ;;  %v6349_v4 = vadd.f32 2.0, %v13219_v16  ;;  %v6350_v26 = vadd.f32 2.0, %v13222_v13  ;;  %v5709_v41 = vmul.f32 %v10016_v3, %v5661_v43 }
0x1172   :  { %v10020_v47 = vpop.eup %10019  ;;  %v5710_v53 = vmul.f32 %v10018_v42, %v5662_v39  ;;  %10033 = vrcp.f32 %v6346_v27  ;;  %v6303_v18 = vadd.f32 2.0, %v10012_v50  ;;  %v5667_v20 = vmul.f32 %v5651_v52, %v13137_v44 }
0x1173   :  { %10035 = vrcp.f32 %v6349_v4  ;;  %v13232_v38 = vadd.f32 %v14372_v61, %v13084_v17  ;;  %v13236_v34 = vadd.f32 %v14372_v61, %v13186_v25  ;;  %v5668_v8 = vmul.f32 %v5652_v14, %v13143_v54 }
0x1174   :  { %v10022_v55 = vpop.eup %10021  ;;  %v5721_v7 = vpack.c.bf16 %v5710_v53, %v5709_v41  ;;  %10037 = vrcp.f32 %v6350_v26  ;;  %v13239_v40 = vmul.f32 %v10014_v58, %v6304_v29  ;;  %v5711_v10 = vmul.f32 %v10020_v47, %v5663_v1 }
0x1175   :  { %v10024_v43 = vpop.eup %10023  ;;  %v5712_v32 = vmul.f32 %v10022_v55, %v5664_v36  ;;  %v6329_v44 = vmul.f32 %v6313_v12, %v13149_v31  ;;  %10039 = vpow2.f32 %v6281_v49  ;;  %v13243_v17 = vmul.f32 %v10012_v50, %v6303_v18 }
0x1176   :  { %v10026_v52 = vpop.eup %10025  ;;  %9203 = vmatprep.mubr.msk.bf16.mxu0 %vm1090_vm3, %v5721_v7  ;;  %10041 = vpow2.f32 %v6283_v0  ;;  %v6259_v25 = vmin.f32 %v13232_v38, 20.0  ;;  %v6260_v24 = vmin.f32 %v13236_v34, 20.0  ;;  %v5713_v14 = vmul.f32 %v10024_v43, %v5665_v21 }
0x1177   :  { %v5722_v54 = vpack.c.bf16 %v5712_v32, %v5711_v10  ;;  %v5714_v39 = vmul.f32 %v10026_v52, %v5666_v6  ;;  %v13249_v23 = vadd.f32 %v14372_v61, %v13189_v45  ;;  %v10028_v28 = vpop.eup %10027  ;;  %v6330_v31 = vmul.f32 %v6314_v33, %v13153_v63  ;;  %v14378_v32 = vld [vmem:[#allocation32_spill] sm:$0xff] }
0x1178   :  { %v6352_v12 = vadd.f32 2.0, %v13239_v40  ;;  %v6285_v49 = vmul.f32 1.442695, %v6259_v25  ;;  %v6287_v50 = vmul.f32 1.442695, %v6260_v24  ;;  %v13256_v3 = vadd.f32 %v14372_v61, %v13193_v46 }
0x1179   :  { %v10030_v58 = vpop.eup %10029  ;;  %9204 = vmatmul.mubr.msk.bf16.gmra.mrb[88].mxu0 %vm1090_vm3, %v5722_v54  ;;  %v5723_v57 = vpack.c.bf16 %v5714_v39, %v5713_v14  ;;  %v6261_v1 = vmin.f32 %v13249_v23, 20.0  ;;  %v13261_v45 = vadd.f32 %v14372_v61, %v13208_v60  ;;  %v6351_v33 = vadd.f32 2.0, %v13243_v17 }
0x117a   :  { %v10032_v0 = vpop.eup %10031  ;;  %v5716_v63 = vmul.f32 %v10030_v58, %v5668_v8  ;;  %10043 = vpow2.f32 %v6285_v49  ;;  %v13266_v36 = vadd.f32 %v14372_v61, %v13211_v37  ;;  %v5715_v27 = vmul.f32 %v10028_v28, %v5667_v20  ;;  %v14377_v20 = vld [vmem:[#allocation33_spill] sm:$0xff] }
0x117b   :  { %9207 = vmatprep.mubr.msk.bf16.mxu0 %vm1090_vm3, %v5723_v57  ;;  %10045 = vpow2.f32 %v6287_v50  ;;  %v6262_v46 = vmin.f32 %v13256_v3, 20.0  ;;  %v6289_v29 = vmul.f32 1.442695, %v6261_v1  ;;  %v6377_v21 = vmul.f32 %v10032_v0, %v6329_v44 }
0x117c   :  { %v10034_v42 = vpop.eup %10033  ;;  %10047 = vrcp.f32 %v6352_v12  ;;  %v6263_v60 = vmin.f32 %v13261_v45, 20.0  ;;  %v6264_v6 = vmin.f32 %v13266_v36, 20.0  ;;  %v5724_v26 = vpack.c.bf16 %v5716_v63, %v5715_v27 }
0x117d   :  { %v10036_v4 = vpop.eup %10035  ;;  %v6378_v47 = vmul.f32 %v10034_v42, %v6330_v31  ;;  %10049 = vpow2.f32 %v6289_v29  ;;  %v6291_v61 = vmul.f32 1.442695, %v6262_v46  ;;  %v6332_v55 = vmul.f32 %v13098_v51, %v14377_v20 }
0x117e   :  { %v10038_v37 = vpop.eup %10037  ;;  %10051 = vrcp.f32 %v6351_v33  ;;  %v6293_v41 = vmul.f32 1.442695, %v6263_v60  ;;  %v6295_v53 = vmul.f32 1.442695, %v6264_v6  ;;  %v6334_v43 = vmul.f32 %v13222_v13, %v13168_v48 }
0x117f   :  { %v10040_v18 = vpop.eup %10039  ;;  %v6393_v7 = vpack.c.bf16 %v6378_v47, %v6377_v21  ;;  %10053 = vpow2.f32 %v6291_v61  ;;  %v6331_v44 = vmul.f32 %v13063_v11, %v14378_v32  ;;  %v6380_v52 = vmul.f32 %v13216_v30, %v6332_v55 }
0x1180   :  { %v10042_v8 = vpop.eup %10041  ;;  %v6305_v10 = vadd.f32 2.0, %v10040_v18  ;;  %10055 = vpow2.f32 %v6293_v41  ;;  %v6333_v51 = vmul.f32 %v13219_v16, %v13157_v35  ;;  %v6382_v24 = vmul.f32 %v10038_v37, %v6334_v43 }
0x1181   :  { %9208 = vmatmul.mubr.msk.bf16.gmra.mrb[92].mxu0 %vm1090_vm3, %v5724_v26  ;;  %v6306_v25 = vadd.f32 2.0, %v10042_v8  ;;  %10057 = vpow2.f32 %v6295_v53  ;;  %v6379_v48 = vmul.f32 %v13160_v62, %v6331_v44  ;;  %v6336_v35 = vmul.f32 %v13239_v40, %v13181_v19 }
0x1182   :  { %9235 = vmatprep.mubr.msk.bf16.mxu0 %vm1090_vm3, %v6393_v7  ;;  %v6321_v54 = vmul.f32 %v10040_v18, %v6305_v10  ;;  %v6381_v39 = vmul.f32 %v10036_v4, %v6333_v51  ;;  %v6335_v33 = vmul.f32 %v13243_v17, %v13176_v22 }
0x1183   :  { %v6322_v13 = vmul.f32 %v10042_v8, %v6306_v25  ;;  %v6394_v31 = vpack.c.bf16 %v6380_v52, %v6379_v48 }
0x1184   :  { %v10044_v14 = vpop.eup %10043  ;;  %v6353_v28 = vadd.f32 2.0, %v6321_v54  ;;  %v6395_v50 = vpack.c.bf16 %v6382_v24, %v6381_v39  ;;  %v6337_v18 = vmul.f32 %v6321_v54, %v13201_v5 }
0x1185   :  { %v10046_v11 = vpop.eup %10045  ;;  %v6354_v12 = vadd.f32 2.0, %v6322_v13  ;;  %v6307_v49 = vadd.f32 2.0, %v10044_v14  ;;  %v6338_v20 = vmul.f32 %v6322_v13, %v13205_v2 }
0x1186   :  { %v10048_v30 = vpop.eup %10047  ;;  %10059 = vrcp.f32 %v6353_v28  ;;  %v6308_v58 = vadd.f32 2.0, %v10046_v11 }
0x1187   :  { %v10050_v57 = vpop.eup %10049  ;;  %10061 = vrcp.f32 %v6354_v12  ;;  %v6323_v16 = vmul.f32 %v10044_v14, %v6307_v49  ;;  %v6384_v27 = vmul.f32 %v10048_v30, %v6336_v35 }
0x1188   :  { %v10052_v1 = vpop.eup %10051  ;;  %v6324_v62 = vmul.f32 %v10046_v11, %v6308_v58  ;;  %v6309_v0 = vadd.f32 2.0, %v10050_v57 }
0x1189   :  { %v10054_v63 = vpop.eup %10053  ;;  %9236 = vmatmul.mubr.msk.bf16.vlgmr.msra.gmra.mrb[96].mxu0 %vm1090_vm3, %v6394_v31  ;;  %v6355_v46 = vadd.f32 2.0, %v6323_v16  ;;  %v6383_v40 = vmul.f32 %v10052_v1, %v6335_v33  ;;  %v6339_v44 = vmul.f32 %v6323_v16, %v13232_v38 }
0x118a   :  { %v10056_v29 = vpop.eup %10055  ;;  %9239 = vmatprep.mubr.msk.bf16.mxu0 %vm1090_vm3, %v6395_v50  ;;  %v6356_v42 = vadd.f32 2.0, %v6324_v62  ;;  %v6310_v21 = vadd.f32 2.0, %v10054_v63  ;;  %v6325_v60 = vmul.f32 %v10050_v57, %v6309_v0  ;;  %v6340_v52 = vmul.f32 %v6324_v62, %v13236_v34 }
0x118b   :  { %v10058_v19 = vpop.eup %10057  ;;  %10063 = vrcp.f32 %v6355_v46  ;;  %v6311_v6 = vadd.f32 2.0, %v10056_v29  ;;  %v6396_v47 = vpack.c.bf16 %v6384_v27, %v6383_v40  ;;  %v14379_v50 = vmov 0.0  }
0x118c   :  { %10065 = vrcp.f32 %v6356_v42  ;;  %v6326_v4 = vmul.f32 %v10054_v63, %v6310_v21  ;;  %v6357_v26 = vadd.f32 2.0, %v6325_v60  ;;  %v6312_v61 = vadd.f32 2.0, %v10058_v19  ;;  %v8586_v63 = vld [vmem:[%s14243_s14 + $0x6] ss:$0 sm:$0xff] }
0x118d   :  { %v6327_v37 = vmul.f32 %v10056_v29, %v6311_v6  ;;  %v6341_v54 = vmul.f32 %v6325_v60, %v13249_v23  ;;  %v9475_v23 = vld [vmem:[#allocation3 + $0x120] sm:$0xff]  }
0x118e   :  { %v6358_v41 = vadd.f32 2.0, %v6326_v4  ;;  %10067 = vrcp.f32 %v6357_v26  ;;  %v6328_v22 = vmul.f32 %v10058_v19, %v6312_v61  ;;  %v6342_v48 = vmul.f32 %v6326_v4, %v13256_v3  ;;  %9251 = vmatprep.subr.bf16.mxu1 %v9475_v23  ;;  %v9476_v3 = vld [vmem:[#allocation3 + $0x128] sm:$0xff]   ;;  %v8587_v29 = vld [vmem:[%s14244_s15 + $0x6] ss:$0 sm:$0xff]  ;;  %v8595_v26 = vld [vmem:[%s14243_s14 + $0x7] ss:$0 sm:$0xff] }
0x118f   :  { %v6359_v17 = vadd.f32 2.0, %v6327_v37  ;;  %v6343_v38 = vmul.f32 %v6327_v37, %v13261_v45  ;;  %9252 = vmatpush3.bf16.msra.mxu1 %v9475_v23 }
0x1190   :  { %v10060_v53 = vpop.eup %10059  ;;  %10069 = vrcp.f32 %v6358_v41  ;;  %v6360_v7 = vadd.f32 2.0, %v6328_v22  ;;  %v6344_v34 = vmul.f32 %v6328_v22, %v13266_v36  ;;  %9253 = vmatprep.subr.bf16.mxu1 %v9476_v3  ;;  %v8596_v41 = vld [vmem:[%s14244_s15 + $0x7] ss:$0 sm:$0xff] }
0x1191   :  { %v10062_v55 = vpop.eup %10061  ;;  %9240 = vmatmul.mubr.msk.bf16.gmra.mrb[100].mxu0 %vm1090_vm3, %v6396_v47  ;;  %10071 = vrcp.f32 %v6359_v17  ;;  %v6385_v8 = vmul.f32 %v10060_v53, %v6337_v18 }
0x1192   :  { %v6386_v43 = vmul.f32 %v10062_v55, %v6338_v20  ;;  %10073 = vrcp.f32 %v6360_v7 }
0x1193   :  { %9254 = vmatpush3.bf16.msra.mxu1 %v9476_v3 }
0x1194   :  { %v6397_v10 = vpack.c.bf16 %v6386_v43, %v6385_v8  ;;  %9291 = vmatprep.subr.bf16.mxu1 %v14379_v50 }
0x1195   :  { %v10064_v32 = vpop.eup %10063 }
0x1196   :  { %v10066_v25 = vpop.eup %10065  ;;  %9243 = vmatprep.mubr.msk.bf16.mxu0 %vm1090_vm3, %v6397_v10  ;;  %v6387_v5 = vmul.f32 %v10064_v32, %v6339_v44 }
0x1197   :  { %v6388_v2 = vmul.f32 %v10066_v25, %v6340_v52 }
0x1198   :  { %v10068_v51 = vpop.eup %10067 }
0x1199   :  { %v6398_v24 = vpack.c.bf16 %v6388_v2, %v6387_v5  ;;  %v6389_v39 = vmul.f32 %v10068_v51, %v6341_v54 }
0x119a   :  { %v10070_v13 = vpop.eup %10069 }
0x119b   :  { %v10072_v14 = vpop.eup %10071  ;;  %9244 = vmatmul.mubr.msk.bf16.gmra.mrb[104].mxu0 %vm1090_vm3, %v6398_v24  ;;  %v6390_v28 = vmul.f32 %v10070_v13, %v6342_v48 }
0x119c   :  { %v10074_v11 = vpop.eup %10073  ;;  %v6391_v12 = vmul.f32 %v10072_v14, %v6343_v38 }
0x119d   :  { %v6399_v31 = vpack.c.bf16 %v6390_v28, %v6389_v39  ;;  %v6392_v49 = vmul.f32 %v10074_v11, %v6344_v34 }
0x119f   :  { %9247 = vmatprep.mubr.msk.bf16.mxu0 %vm1090_vm3, %v6399_v31  ;;  %v6400_v30 = vpack.c.bf16 %v6392_v49, %v6391_v12 }
0x11a3   :  { %9248 = vmatmul.mubr.msk.bf16.gmra.mrb[108].mxu0 %vm1090_vm3, %v6400_v30 }
0x11d9   :  { %v4757_v45 = vpop.xlane.xlu0 %4756 }
0x11da   :  { %v4761_v58 = vmul.f32 0.03125, %v4757_v45  ;;  %v14380_v45 = vld [vmem:[#allocation13_spill] sm:$0xff] }
0x11dc   :  { %v4763_v36 = vadd.f32 1e-05, %v4761_v58  ;;  %v4887_v57 = vpop.xlane.xlu1 %4886 }
0x11dd   :  { %v4891_v1 = vmul.f32 0.03125, %v4887_v57 }
0x11de   :  { %10075 = vrsqrt.f32 %v4763_v36 }
0x11df   :  { %v4893_v33 = vadd.f32 1e-05, %v4891_v1 }
0x11e0   :  { %v4760_v35 = vpop.xlane.xlu0 %4759 }
0x11e1   :  { %v4762_v62 = vmul.f32 0.03125, %v4760_v35  ;;  %10077 = vrsqrt.f32 %v4893_v33  ;;  %v4890_v60 = vpop.xlane.xlu1 %4889 }
0x11e3   :  { %v4764_v27 = vadd.f32 1e-05, %v4762_v62 }
0x11e5   :  { %10079 = vrsqrt.f32 %v4764_v27 }
0x11e8   :  { %v10076_v16 = vpop.eup %10075 }
0x11e9   :  { %v4767_v0 = vmul.f32 %v10076_v16, %v13034_v9  ;;  %v4892_v9 = vmul.f32 0.03125, %v4890_v60 }
0x11eb   :  { %v4775_v46 = vmul.f32 %v8586_v63, %v4767_v0  ;;  %v10078_v19 = vpop.eup %10077  ;;  %v4894_v61 = vadd.f32 1e-05, %v4892_v9  ;;  %v14381_v9 = vld [vmem:[#allocation14_spill] sm:$0xff] }
0x11ec   :  { %v4897_v4 = vmul.f32 %v10078_v19, %v13051_v59 }
0x11ed   :  { %v4783_v42 = vadd.f32 %v8587_v29, %v4775_v46 }
0x11ee   :  { %v4905_v37 = vmul.f32 %v8595_v26, %v4897_v4 }
0x11ef   :  { %v4785_v21 = vmin.f32 %v4783_v42, 20.0  ;;  %v10080_v6 = vpop.eup %10079 }
0x11f0   :  { %v4768_v47 = vmul.f32 %v10080_v6, %v13068_v56  ;;  %v4913_v17 = vadd.f32 %v8596_v41, %v4905_v37  ;;  %v13361_v37 = vld [vmem:[%s14242_s13 + $0xf] ss:$0 sm:$0xff] }
0x11f1   :  { %v4787_v40 = vmul.f32 1.442695, %v4785_v21 }
0x11f2   :  { %v4776_v22 = vmul.f32 %v8586_v63, %v4768_v47  ;;  %v4915_v56 = vmin.f32 %v4913_v17, 20.0 }
0x11f3   :  { %10081 = vpow2.f32 %v4787_v40 }
0x11f4   :  { %10083 = vrsqrt.f32 %v4894_v61  ;;  %v4784_v18 = vadd.f32 %v8587_v29, %v4776_v22  ;;  %v4917_v32 = vmul.f32 1.442695, %v4915_v56 }
0x11f6   :  { %v4786_v8 = vmin.f32 %v4784_v18, 20.0  ;;  %10085 = vpow2.f32 %v4917_v32 }
0x11f8   :  { %v4789_v44 = vmul.f32 1.442695, %v4786_v8 }
0x11fa   :  { %10087 = vpow2.f32 %v4789_v44 }
0x11fd   :  { %v10082_v55 = vpop.eup %10081 }
0x11fe   :  { %v4791_v43 = vadd.f32 2.0, %v10082_v55  ;;  %v10084_v10 = vpop.eup %10083 }
0x11ff   :  { %v4898_v5 = vmul.f32 %v10084_v10, %v13078_v15 }
0x1200   :  { %v4793_v52 = vmul.f32 %v10082_v55, %v4791_v43  ;;  %v10086_v14 = vpop.eup %10085 }
0x1201   :  { %v4906_v48 = vmul.f32 %v8595_v26, %v4898_v5  ;;  %v4921_v38 = vadd.f32 2.0, %v10086_v14 }
0x1202   :  { %v4797_v54 = vadd.f32 2.0, %v4793_v52  ;;  %v4795_v12 = vmul.f32 %v4793_v52, %v4783_v42 }
0x1203   :  { %v13336_v13 = vadd.f32 %v8596_v41, %v4906_v48  ;;  %v4923_v31 = vmul.f32 %v10086_v14, %v4921_v38  ;;  %v13383_v48 = vld [vmem:[%s14242_s13 + $0x11] ss:$0 sm:$0xff] }
0x1204   :  { %10089 = vrcp.f32 %v4797_v54  ;;  %v10088_v39 = vpop.eup %10087 }
0x1205   :  { %v4916_v28 = vmin.f32 %v13336_v13, 20.0  ;;  %v4792_v34 = vadd.f32 2.0, %v10088_v39  ;;  %v4927_v23 = vadd.f32 2.0, %v4923_v31  ;;  %v4925_v6 = vmul.f32 %v4923_v31, %v4913_v17 }
0x1207   :  { %v4919_v15 = vmul.f32 1.442695, %v4916_v28  ;;  %v4794_v49 = vmul.f32 %v10088_v39, %v4792_v34 }
0x1209   :  { %10091 = vpow2.f32 %v4919_v15  ;;  %v4798_v3 = vadd.f32 2.0, %v4794_v49  ;;  %v4796_v47 = vmul.f32 %v4794_v49, %v4784_v18 }
0x120a   :  { %10093 = vrcp.f32 %v4927_v23 }
0x120b   :  { %10095 = vrcp.f32 %v4798_v3 }
0x120e   :  { %v10090_v11 = vpop.eup %10089 }
0x120f   :  { %v4801_v30 = vmul.f32 %v10090_v11, %v4795_v12 }
0x1211   :  { %v5008_v58 = vrot.slane %v4801_v30, %v14380_v45  ;;  %v5001_v1 = vcombine.high %v4801_v30, %v4801_v30 }
0x1213   :  { %v5016_v36 = vcombine.high %v5008_v58, %v5008_v58  ;;  %v10092_v35 = vpop.eup %10091  ;;  %v5024_v16 = vrot.slane %v5008_v58, %v14380_v45  ;;  %v5015_v29 = vrot.slane %v5001_v1, %v14380_v45 }
0x1214   :  { %v4922_v27 = vadd.f32 2.0, %v10092_v35  ;;  %v10094_v42 = vpop.eup %10093 }
0x1215   :  { %v5038_v63 = vrot.slane %v5016_v36, %v14380_v45  ;;  %v5046_v46 = vcombine.high %v5024_v16, %v5024_v16  ;;  %v10096_v60 = vpop.eup %10095  ;;  %v5017_v26 = vcombine.high %v5015_v29, %v5015_v29  ;;  %v5031_v41 = vrot.slane %v5015_v29, %v14380_v45 }
0x1216   :  { %v13351_v19 = vmul.f32 %v10092_v35, %v4922_v27  ;;  %v13366_v55 = vmul.f32 %v10094_v42, %v4925_v6  ;;  %v4802_v17 = vmul.f32 %v10096_v60, %v4796_v47  ;;  %v5102_v43 = vrot.slane %v5024_v16, %v14381_v9 }
0x1217   :  { %v5048_v21 = vcombine.high %v5038_v63, %v5038_v63  ;;  %v5110_v4 = vrot.slane %v5046_v46, %v14381_v9  ;;  %v5045_v44 = vrot.slane %v5017_v26, %v14380_v45  ;;  %v5106_v5 = vrot.slane %v5038_v63, %v14381_v9 }
0x1218   :  { %v4928_v18 = vadd.f32 2.0, %v13351_v19  ;;  %v5047_v54 = vcombine.high %v5031_v41, %v5031_v41  ;;  %v5179_v28 = vsub.f32 %v13366_v55, %v5102_v43  ;;  %v5050_v11 = vcombine.high %v4802_v17, %v4802_v17 }
0x1219   :  { %v5114_v56 = vrot.slane %v5048_v21, %v14381_v9  ;;  %v5181_v10 = vsub.f32 %v13366_v55, %v5110_v4  ;;  %v5049_v15 = vcombine.high %v5045_v44, %v5045_v44  ;;  %v5180_v30 = vsub.f32 %v13366_v55, %v5106_v5 }
0x121a   :  { %10097 = vrcp.f32 %v4928_v18  ;;  %v5118_v63 = vrot.slane %v5031_v41, %v14381_v9  ;;  %v5122_v4 = vrot.slane %v5045_v44, %v14381_v9  ;;  %v5064_v26 = vrot.slane %v5050_v11, %v14380_v45 }
0x121b   :  { %v5182_v14 = vsub.f32 %v13366_v55, %v5114_v56  ;;  %v5130_v42 = vrot.slane %v5049_v15, %v14381_v9 }
0x121c   :  { %v5183_v18 = vsub.f32 %v13366_v55, %v5118_v63 }
0x121d   :  { %v5186_v44 = vsub.f32 %v13366_v55, %v5130_v42 }
0x1224   :  { %v13319_v53 = vpop.f32.mrb[80].mxu0 }
0x1225   :  { %v13321_v59 = vpop.f32.mrb[81].mxu0  ;;  %v5817_v32 = vadd.f32 %v13319_v53, %v13361_v37  ;;  %v5057_v53 = vrot.slane %v4802_v17, %v14380_v45 }
0x1226   :  { %v13323_v20 = vpop.f32.mrb[82].mxu0  ;;  %v5809_v52 = vadd.f32 %v13361_v37, %v13321_v59 }
0x1227   :  { %v13325_v7 = vpop.f32.mrb[83].mxu0  ;;  %v5820_v39 = vadd.f32 %v13323_v20, %v13361_v37  ;;  %v6549_v34 = vmul.f32 %v5817_v32, %v5181_v10  ;;  %v5126_v20 = vrot.slane %v5047_v54, %v14381_v9  ;;  %v5065_v36 = vcombine.high %v5057_v53, %v5057_v53 }
0x1228   :  { %v5812_v59 = vadd.f32 %v13361_v37, %v13325_v7  ;;  %v6547_v49 = vmul.f32 %v5809_v52, %v5179_v28  ;;  %v5073_v21 = vrot.slane %v5057_v53, %v14380_v45  ;;  %v5066_v53 = vcombine.high %v5064_v26, %v5064_v26 }
0x1229   :  { %v6550_v58 = vmul.f32 %v5820_v39, %v5182_v14  ;;  %v5185_v41 = vsub.f32 %v13366_v55, %v5126_v20  ;;  %v10098_v14 = vpop.eup %10097  ;;  %v5080_v20 = vrot.slane %v5064_v26, %v14380_v45 }
0x122a   :  { %v6548_v1 = vmul.f32 %v5812_v59, %v5180_v30  ;;  %v5095_v52 = vcombine.high %v5073_v21, %v5073_v21 }
0x122c   :  { %v5142_v30 = vrot.slane %v5095_v52, %v14381_v9 }
0x122e   :  { %v13327_v25 = vpop.f32.mrb[84].mxu0 }
0x122f   :  { %v13330_v2 = vpop.f32.mrb[85].mxu0  ;;  %v5833_v29 = vadd.f32 %v13327_v25, %v13361_v37  ;;  %v5087_v25 = vrot.slane %v5065_v36, %v14380_v45 }
0x1230   :  { %v13332_v51 = vpop.f32.mrb[86].mxu0  ;;  %v5825_v6 = vadd.f32 %v13361_v37, %v13330_v2 }
0x1231   :  { %v13334_v24 = vpop.f32.mrb[87].mxu0  ;;  %v5836_v56 = vadd.f32 %v13332_v51, %v13361_v37  ;;  %v6553_v32 = vmul.f32 %v5833_v29, %v5185_v41  ;;  %v5184_v51 = vsub.f32 %v13366_v55, %v5122_v4  ;;  %v5096_v29 = vcombine.high %v5080_v20, %v5080_v20 }
0x1232   :  { %v5828_v43 = vadd.f32 %v13361_v37, %v13334_v24  ;;  %v6551_v39 = vmul.f32 %v5825_v6, %v5183_v18 }
0x1233   :  { %v6554_v24 = vmul.f32 %v5836_v56, %v5186_v44 }
0x124c   :  { %v13340_v57 = vpop.f32.mrb[88].mxu0 }
0x124d   :  { %v13343_v62 = vpop.f32.mrb[89].mxu0 }
0x124e   :  { %v13345_v0 = vpop.f32.mrb[90].mxu0 }
0x124f   :  { %v13348_v33 = vpop.f32.mrb[91].mxu0 }
0x1254   :  { %v13353_v40 = vpop.f32.mrb[92].mxu0 }
0x1255   :  { %v13356_v61 = vpop.f32.mrb[93].mxu0  ;;  %v5865_v44 = vadd.f32 %v13353_v40, %v13361_v37 }
0x1256   :  { %v13364_v22 = vpop.f32.mrb[94].mxu0 }
0x1257   :  { %v13369_v8 = vpop.f32.mrb[95].mxu0 }
0x125c   :  { %v9237_v38 = vpop.f32.mrb[96].mxu0 }
0x125d   :  { %v6493_v31 = vadd.f32 %v9237_v38, %v13383_v48  ;;  %v6484_v12 = vpop.f32.mrb[97].mxu0  ;;  %v5097_v38 = vcombine.high %v5087_v25, %v5087_v25 }
0x125e   :  { %v6485_v23 = vadd.f32 %v13383_v48, %v6484_v12  ;;  %v9238_v3 = vpop.f32.mrb[98].mxu0  ;;  %v6552_v12 = vmul.f32 %v5828_v43, %v5184_v51 }
0x125f   :  { %v6565_v35 = vadd.f32 %v6549_v34, %v6493_v31  ;;  %v6496_v7 = vadd.f32 %v9238_v3, %v13383_v48  ;;  %v6487_v16 = vpop.f32.mrb[99].mxu0  ;;  %v4926_v31 = vmul.f32 %v13351_v19, %v13336_v13  ;;  %v5094_v13 = vrot.slane %v5066_v53, %v14380_v45 }
0x1260   :  { %v6563_v27 = vadd.f32 %v6547_v49, %v6485_v23  ;;  %v6488_v46 = vadd.f32 %v13383_v48, %v6487_v16  ;;  %v5841_v16 = vadd.f32 %v13361_v37, %v13343_v62  ;;  %v5868_v53 = vadd.f32 %v13364_v22, %v13361_v37 }
0x1261   :  { %v6566_v60 = vadd.f32 %v6550_v58, %v6496_v7  ;;  %v4932_v3 = vmul.f32 %v10098_v14, %v4926_v31  ;;  %v5134_v58 = vrot.slane %v5073_v21, %v14381_v9  ;;  %v5146_v7 = vrot.slane %v5097_v38, %v14381_v9 }
0x1262   :  { %v6564_v47 = vadd.f32 %v6548_v1, %v6488_v46  ;;  %v5138_v1 = vrot.slane %v5087_v25, %v14381_v9  ;;  %v5852_v46 = vadd.f32 %v13345_v0, %v13361_v37  ;;  %v5098_v6 = vcombine.high %v5094_v13, %v5094_v13 }
0x1263   :  { %v6580_v17 = vpack.c.bf16 %v6566_v60, %v6565_v35  ;;  %v5849_v35 = vadd.f32 %v13340_v57, %v13361_v37  ;;  %v5187_v42 = vsub.f32 %v4932_v3, %v5134_v58  ;;  %v5844_v57 = vadd.f32 %v13361_v37, %v13348_v33 }
0x1264   :  { %v6579_v10 = vpack.c.bf16 %v6564_v47, %v6563_v27  ;;  %v9241_v2 = vpop.f32.mrb[100].mxu0  ;;  %v5189_v27 = vsub.f32 %v4932_v3, %v5142_v30  ;;  %v5190_v60 = vsub.f32 %v4932_v3, %v5146_v7  ;;  %v5188_v47 = vsub.f32 %v4932_v3, %v5138_v1  ;;  %v8659_v7 = vld [vmem:[%s14242_s13 + $0x12] ss:$0 sm:$0xff] }
0x1265   :  { %v6509_v5 = vadd.f32 %v9241_v2, %v13383_v48  ;;  %v6500_v54 = vpop.f32.mrb[101].mxu0  ;;  %v6555_v26 = vmul.f32 %v5841_v16, %v5187_v42  ;;  %v5158_v25 = vrot.slane %v5096_v29, %v14381_v9  ;;  %v5162_v52 = vrot.slane %v5098_v6, %v14381_v9 }
0x1266   :  { %v6501_v28 = vadd.f32 %v13383_v48, %v6500_v54  ;;  %v9242_v59 = vpop.f32.mrb[102].mxu0  ;;  %9255 = vmatprep.mubr.msk.bf16.mxu1 %vm1090_vm3, %v6579_v10  ;;  %v6557_v45 = vmul.f32 %v5849_v35, %v5189_v27  ;;  %v6558_v56 = vmul.f32 %v5852_v46, %v5190_v60  ;;  %v6556_v43 = vmul.f32 %v5844_v57, %v5188_v47 }
0x1267   :  { %v6569_v34 = vadd.f32 %v6553_v32, %v6509_v5  ;;  %v6512_v15 = vadd.f32 %v9242_v59, %v13383_v48  ;;  %v6503_v11 = vpop.f32.mrb[103].mxu0  ;;  %9256 = vmatmul.mubr.msk.bf16.vlgmr.msra.gmra.mrb[100].mxu1 %vm1090_vm3, %v6580_v17  ;;  %v5150_v10 = vrot.slane %v5080_v20, %v14381_v9  ;;  %v5857_v54 = vadd.f32 %v13361_v37, %v13356_v61 }
0x1268   :  { %v6567_v49 = vadd.f32 %v6551_v39, %v6501_v28  ;;  %v6504_v55 = vadd.f32 %v13383_v48, %v6503_v11  ;;  %v5154_v14 = vrot.slane %v5094_v13, %v14381_v9  ;;  %v5193_v51 = vsub.f32 %v4932_v3, %v5158_v25 }
0x1269   :  { %v6570_v23 = vadd.f32 %v6554_v24, %v6512_v15  ;;  %v5191_v59 = vsub.f32 %v4932_v3, %v5150_v10  ;;  %v5860_v24 = vadd.f32 %v13361_v37, %v13369_v8  ;;  %v5194_v15 = vsub.f32 %v4932_v3, %v5162_v52 }
0x126a   :  { %v6568_v36 = vadd.f32 %v6552_v12, %v6504_v55  ;;  %v5192_v12 = vsub.f32 %v4932_v3, %v5154_v14 }
0x126b   :  { %v6582_v19 = vpack.c.bf16 %v6570_v23, %v6569_v34  ;;  %v6561_v34 = vmul.f32 %v5865_v44, %v5193_v51  ;;  %v6559_v61 = vmul.f32 %v5857_v54, %v5191_v59  ;;  %v6562_v22 = vmul.f32 %v5868_v53, %v5194_v15 }
0x126c   :  { %v6581_v63 = vpack.c.bf16 %v6568_v36, %v6567_v49  ;;  %v6560_v37 = vmul.f32 %v5860_v24, %v5192_v12 }
0x126e   :  { %v9245_v21 = vpop.f32.mrb[104].mxu0  ;;  %9259 = vmatprep.mubr.msk.bf16.mxu1 %vm1090_vm3, %v6581_v63 }
0x126f   :  { %v6525_v62 = vadd.f32 %v9245_v21, %v13383_v48  ;;  %v6516_v4 = vpop.f32.mrb[105].mxu0  ;;  %9260 = vmatmul.mubr.msk.bf16.gmra.mrb[104].mxu1 %vm1090_vm3, %v6582_v19 }
0x1270   :  { %v6517_v0 = vadd.f32 %v13383_v48, %v6516_v4  ;;  %v9246_v41 = vpop.f32.mrb[106].mxu0 }
0x1271   :  { %v6573_v33 = vadd.f32 %v6557_v45, %v6525_v62  ;;  %v6528_v17 = vadd.f32 %v9246_v41, %v13383_v48  ;;  %v6519_v18 = vpop.f32.mrb[107].mxu0 }
0x1272   :  { %v6571_v2 = vadd.f32 %v6555_v26, %v6517_v0  ;;  %v6520_v32 = vadd.f32 %v13383_v48, %v6519_v18 }
0x1273   :  { %v6574_v5 = vadd.f32 %v6558_v56, %v6528_v17 }
0x1274   :  { %v6572_v39 = vadd.f32 %v6556_v43, %v6520_v32 }
0x1275   :  { %v6584_v28 = vpack.c.bf16 %v6574_v5, %v6573_v33 }
0x1276   :  { %v6583_v38 = vpack.c.bf16 %v6572_v39, %v6571_v2  ;;  %v9249_v40 = vpop.f32.mrb[108].mxu0 }
0x1277   :  { %v6541_v11 = vadd.f32 %v9249_v40, %v13383_v48  ;;  %v6532_v31 = vpop.f32.mrb[109].mxu0 }
0x1278   :  { %v6533_v9 = vadd.f32 %v13383_v48, %v6532_v31  ;;  %v9250_v49 = vpop.f32.mrb[110].mxu0  ;;  %9263 = vmatprep.mubr.msk.bf16.mxu1 %vm1090_vm3, %v6583_v38 }
0x1279   :  { %v6577_v55 = vadd.f32 %v6561_v34, %v6541_v11  ;;  %v6544_v30 = vadd.f32 %v9250_v49, %v13383_v48  ;;  %v6535_v20 = vpop.f32.mrb[111].mxu0  ;;  %9264 = vmatmul.mubr.msk.bf16.gmra.mrb[108].mxu1 %vm1090_vm3, %v6584_v28 }
0x127a   :  { %v6575_v8 = vadd.f32 %v6559_v61, %v6533_v9  ;;  %v6536_v23 = vadd.f32 %v13383_v48, %v6535_v20 }
0x127b   :  { %v6578_v58 = vadd.f32 %v6562_v22, %v6544_v30 }
0x127c   :  { %v6576_v36 = vadd.f32 %v6560_v37, %v6536_v23 }
0x127d   :  { %v6586_v35 = vpack.c.bf16 %v6578_v58, %v6577_v55 }
0x127e   :  { %v6585_v3 = vpack.c.bf16 %v6576_v36, %v6575_v8 }
0x1280   :  { %9267 = vmatprep.mubr.msk.bf16.mxu1 %vm1090_vm3, %v6585_v3 }
0x1281   :  { %9268 = vmatmul.mubr.msk.bf16.gmra.mrb[112].mxu1 %vm1090_vm3, %v6586_v35 }
0x1282   :  { %9295 = vmatprep.mubr.msk.bf16.mxu1 %vm10337_vm4, %v14379_v50 }
0x133a   :  { %v9257_v13 = vpop.f32.mrb[100].mxu1 }
0x133b   :  { %v6670_v19 = vpop.f32.mrb[101].mxu1  ;;  %v13471_v63 = vadd.f32 %v9257_v13, %v8659_v7 }
0x133c   :  { %v13469_v16 = vadd.f32 %v8659_v7, %v6670_v19  ;;  %v9258_v48 = vpop.f32.mrb[102].mxu1 }
0x133d   :  { %v6673_v1 = vpop.f32.mrb[103].mxu1  ;;  %v13477_v29 = vadd.f32 %v9258_v48, %v8659_v7  ;;  %v6743_v21 = vsel %vm1090_vm3, %v13471_v63, 0.0 }
0x133e   :  { %v13473_v27 = vadd.f32 %v8659_v7, %v6673_v1  ;;  %v6737_v46 = vsel %vm1090_vm3, %v13469_v16, 0.0 }
0x133f   :  { %6738 = vadd.xlane.f32.xlu0 %v6737_v46  ;;  %v6746_v62 = vsel %vm1090_vm3, %v13477_v29, 0.0 }
0x1340   :  { %v6740_v42 = vsel %vm1090_vm3, %v13473_v27, 0.0 }
0x1341   :  { %6741 = vadd.xlane.f32.xlu1 %v6740_v42 }
0x1342   :  { %v9261_v57 = vpop.f32.mrb[104].mxu1 }
0x1343   :  { %v6686_v45 = vpop.f32.mrb[105].mxu1  ;;  %6744 = vadd.xlane.f32.xlu0 %v6743_v21  ;;  %v13487_v26 = vadd.f32 %v9261_v57, %v8659_v7 }
0x1344   :  { %v13483_v60 = vadd.f32 %v8659_v7, %v6686_v45  ;;  %v9262_v6 = vpop.f32.mrb[106].mxu1 }
0x1345   :  { %v6689_v4 = vpop.f32.mrb[107].mxu1  ;;  %6747 = vadd.xlane.f32.xlu1 %v6746_v62  ;;  %v13493_v41 = vadd.f32 %v9262_v6, %v8659_v7  ;;  %v6755_v25 = vsel %vm1090_vm3, %v13487_v26, 0.0 }
0x1346   :  { %v13489_v47 = vadd.f32 %v8659_v7, %v6689_v4  ;;  %v6749_v0 = vsel %vm1090_vm3, %v13483_v60, 0.0 }
0x1347   :  { %6750 = vadd.xlane.f32.xlu0 %v6749_v0  ;;  %v6758_v17 = vsel %vm1090_vm3, %v13493_v41, 0.0 }
0x1348   :  { %v6752_v56 = vsel %vm1090_vm3, %v13489_v47, 0.0 }
0x1349   :  { %6753 = vadd.xlane.f32.xlu1 %v6752_v56 }
0x134b   :  { %6756 = vadd.xlane.f32.xlu0 %v6755_v25 }
0x134c   :  { %v9265_v33 = vpop.f32.mrb[108].mxu1 }
0x134d   :  { %v6702_v18 = vpop.f32.mrb[109].mxu1  ;;  %6759 = vadd.xlane.f32.xlu1 %v6758_v17  ;;  %v13503_v32 = vadd.f32 %v9265_v33, %v8659_v7 }
0x134e   :  { %v13501_v43 = vadd.f32 %v8659_v7, %v6702_v18  ;;  %v9266_v10 = vpop.f32.mrb[110].mxu1 }
0x134f   :  { %v6705_v2 = vpop.f32.mrb[111].mxu1  ;;  %v13509_v5 = vadd.f32 %v9266_v10, %v8659_v7  ;;  %v6767_v39 = vsel %vm1090_vm3, %v13503_v32, 0.0 }
0x1350   :  { %v13505_v44 = vadd.f32 %v8659_v7, %v6705_v2  ;;  %v6761_v52 = vsel %vm1090_vm3, %v13501_v43, 0.0 }
0x1351   :  { %6762 = vadd.xlane.f32.xlu0 %v6761_v52  ;;  %v6770_v59 = vsel %vm1090_vm3, %v13509_v5, 0.0 }
0x1352   :  { %v6764_v54 = vsel %vm1090_vm3, %v13505_v44, 0.0 }
0x1353   :  { %6765 = vadd.xlane.f32.xlu1 %v6764_v54 }
0x1354   :  { %v9269_v14 = vpop.f32.mrb[112].mxu1 }
0x1355   :  { %v6718_v51 = vpop.f32.mrb[113].mxu1  ;;  %6768 = vadd.xlane.f32.xlu0 %v6767_v39  ;;  %v13519_v38 = vadd.f32 %v9269_v14, %v8659_v7 }
0x1356   :  { %v13515_v53 = vadd.f32 %v8659_v7, %v6718_v51  ;;  %v9270_v28 = vpop.f32.mrb[114].mxu1 }
0x1357   :  { %v6721_v24 = vpop.f32.mrb[115].mxu1  ;;  %6771 = vadd.xlane.f32.xlu1 %v6770_v59  ;;  %v13525_v15 = vadd.f32 %v9270_v28, %v8659_v7  ;;  %v6779_v31 = vsel %vm1090_vm3, %v13519_v38, 0.0 }
0x1358   :  { %v13521_v40 = vadd.f32 %v8659_v7, %v6721_v24  ;;  %v6773_v34 = vsel %vm1090_vm3, %v13515_v53, 0.0 }
0x1359   :  { %6774 = vadd.xlane.f32.xlu0 %v6773_v34  ;;  %v6782_v61 = vsel %vm1090_vm3, %v13525_v15, 0.0 }
0x135a   :  { %v6776_v11 = vsel %vm1090_vm3, %v13521_v40, 0.0 }
0x135b   :  { %6777 = vadd.xlane.f32.xlu1 %v6776_v11 }
0x135d   :  { %6780 = vadd.xlane.f32.xlu0 %v6779_v31 }
0x135f   :  { %6783 = vadd.xlane.f32.xlu1 %v6782_v61 }
0x13cc   :  { %v6739_v12 = vpop.xlane.xlu0 %6738 }
0x13cd   :  { %v6785_v9 = vmul.f32 0.03125, %v6739_v12 }
0x13ce   :  { %v6742_v49 = vpop.xlane.xlu1 %6741 }
0x13cf   :  { %v13534_v22 = vsub.f32 %v13469_v16, %v6785_v9  ;;  %v6786_v55 = vmul.f32 0.03125, %v6742_v49 }
0x13d0   :  { %v6745_v30 = vpop.xlane.xlu0 %6744 }
0x13d1   :  { %v13537_v20 = vsub.f32 %v13473_v27, %v6786_v55  ;;  %v6787_v37 = vmul.f32 0.03125, %v6745_v30  ;;  %v6817_v8 = vmul.f32 %v13534_v22, %v13534_v22 }
0x13d2   :  { %v6748_v23 = vpop.xlane.xlu1 %6747 }
0x13d3   :  { %v13542_v58 = vsub.f32 %v13471_v63, %v6787_v37  ;;  %v6788_v36 = vmul.f32 0.03125, %v6748_v23  ;;  %v6833_v35 = vsel %vm1090_vm3, %v6817_v8, 0.0  ;;  %v6818_v3 = vmul.f32 %v13537_v20, %v13537_v20 }
0x13d4   :  { %6834 = vadd.xlane.f32.xlu0 %v6833_v35  ;;  %v6751_v7 = vpop.xlane.xlu0 %6750 }
0x13d5   :  { %v13548_v13 = vsub.f32 %v13477_v29, %v6788_v36  ;;  %v6789_v19 = vmul.f32 0.03125, %v6751_v7  ;;  %v6836_v16 = vsel %vm1090_vm3, %v6818_v3, 0.0  ;;  %v6819_v48 = vmul.f32 %v13542_v58, %v13542_v58 }
0x13d6   :  { %6837 = vadd.xlane.f32.xlu1 %v6836_v16  ;;  %v6754_v1 = vpop.xlane.xlu1 %6753 }
0x13d7   :  { %v13554_v63 = vsub.f32 %v13483_v60, %v6789_v19  ;;  %v6790_v27 = vmul.f32 0.03125, %v6754_v1  ;;  %v6839_v46 = vsel %vm1090_vm3, %v6819_v48, 0.0  ;;  %v6820_v42 = vmul.f32 %v13548_v13, %v13548_v13 }
0x13d8   :  { %6840 = vadd.xlane.f32.xlu0 %v6839_v46  ;;  %v6757_v29 = vpop.xlane.xlu0 %6756 }
0x13d9   :  { %v13560_v57 = vsub.f32 %v13489_v47, %v6790_v27  ;;  %v6791_v21 = vmul.f32 0.03125, %v6757_v29  ;;  %v6842_v45 = vsel %vm1090_vm3, %v6820_v42, 0.0  ;;  %v6821_v6 = vmul.f32 %v13554_v63, %v13554_v63  ;;  %v9477_v42 = vld [vmem:[#allocation3 + $0x130] sm:$0xff]   ;;  %v9478_v29 = vld [vmem:[#allocation3 + $0x138] sm:$0xff]  }
0x13da   :  { %6843 = vadd.xlane.f32.xlu1 %v6842_v45  ;;  %v6760_v60 = vpop.xlane.xlu1 %6759  ;;  %9271 = vmatprep.subr.bf16.mxu0 %v9477_v42 }
0x13db   :  { %v13566_v62 = vsub.f32 %v13487_v26, %v6791_v21  ;;  %v6792_v4 = vmul.f32 0.03125, %v6760_v60  ;;  %v6845_v0 = vsel %vm1090_vm3, %v6821_v6, 0.0  ;;  %v6822_v56 = vmul.f32 %v13560_v57, %v13560_v57  ;;  %9272 = vmatpush3.bf16.msra.mxu0 %v9477_v42 }
0x13dc   :  { %6846 = vadd.xlane.f32.xlu0 %v6845_v0  ;;  %9273 = vmatprep.subr.bf16.mxu0 %v9478_v29 }
0x13dd   :  { %v13572_v47 = vsub.f32 %v13493_v41, %v6792_v4  ;;  %v6848_v25 = vsel %vm1090_vm3, %v6822_v56, 0.0  ;;  %v6823_v33 = vmul.f32 %v13566_v62, %v13566_v62 }
0x13de   :  { %v6763_v17 = vpop.xlane.xlu0 %6762  ;;  %6849 = vadd.xlane.f32.xlu1 %v6848_v25 }
0x13df   :  { %v6793_v18 = vmul.f32 0.03125, %v6763_v17  ;;  %v6851_v26 = vsel %vm1090_vm3, %v6823_v33, 0.0  ;;  %v6824_v10 = vmul.f32 %v13572_v47, %v13572_v47  ;;  %9274 = vmatpush3.bf16.msra.mxu0 %v9478_v29 }
0x13e0   :  { %v6766_v2 = vpop.xlane.xlu1 %6765  ;;  %6852 = vadd.xlane.f32.xlu0 %v6851_v26  ;;  %9299 = vmatprep.subr.bf16.mxu0 %v14379_v50 }
0x13e1   :  { %v13581_v52 = vsub.f32 %v13501_v43, %v6793_v18  ;;  %v6794_v41 = vmul.f32 0.03125, %v6766_v2  ;;  %v6854_v54 = vsel %vm1090_vm3, %v6824_v10, 0.0 }
0x13e2   :  { %v6769_v14 = vpop.xlane.xlu0 %6768  ;;  %6855 = vadd.xlane.f32.xlu1 %v6854_v54 }
0x13e3   :  { %v13585_v39 = vsub.f32 %v13505_v44, %v6794_v41  ;;  %v6795_v51 = vmul.f32 0.03125, %v6769_v14  ;;  %v6825_v28 = vmul.f32 %v13581_v52, %v13581_v52 }
0x13e4   :  { %v6772_v59 = vpop.xlane.xlu1 %6771 }
0x13e5   :  { %v13590_v24 = vsub.f32 %v13503_v32, %v6795_v51  ;;  %v6796_v34 = vmul.f32 0.03125, %v6772_v59  ;;  %v6857_v43 = vsel %vm1090_vm3, %v6825_v28, 0.0  ;;  %v6826_v11 = vmul.f32 %v13585_v39, %v13585_v39 }
0x13e6   :  { %6858 = vadd.xlane.f32.xlu0 %v6857_v43  ;;  %v6775_v31 = vpop.xlane.xlu0 %6774  ;;  %v13633_v43 = vld [vmem:[%s14243_s14 + $0xa] ss:$0 sm:$0xff] }
0x13e7   :  { %v13596_v61 = vsub.f32 %v13509_v5, %v6796_v34  ;;  %v6797_v44 = vmul.f32 0.03125, %v6775_v31  ;;  %v6860_v12 = vsel %vm1090_vm3, %v6826_v11, 0.0  ;;  %v6827_v9 = vmul.f32 %v13590_v24, %v13590_v24 }
0x13e8   :  { %6861 = vadd.xlane.f32.xlu1 %v6860_v12  ;;  %v6778_v32 = vpop.xlane.xlu1 %6777 }
0x13e9   :  { %v13602_v49 = vsub.f32 %v13515_v53, %v6797_v44  ;;  %v6798_v55 = vmul.f32 0.03125, %v6778_v32  ;;  %v6863_v30 = vsel %vm1090_vm3, %v6827_v9, 0.0  ;;  %v6828_v37 = vmul.f32 %v13596_v61, %v13596_v61  ;;  %v13639_v9 = vld [vmem:[%s14244_s15 + $0xa] ss:$0 sm:$0xff] }
0x13ea   :  { %6864 = vadd.xlane.f32.xlu0 %v6863_v30  ;;  %v6781_v5 = vpop.xlane.xlu0 %6780 }
0x13eb   :  { %v13608_v8 = vsub.f32 %v13521_v40, %v6798_v55  ;;  %v6799_v23 = vmul.f32 0.03125, %v6781_v5  ;;  %v6866_v36 = vsel %vm1090_vm3, %v6828_v37, 0.0  ;;  %v6829_v35 = vmul.f32 %v13602_v49, %v13602_v49 }
0x13ec   :  { %6867 = vadd.xlane.f32.xlu1 %v6866_v36  ;;  %v6784_v53 = vpop.xlane.xlu1 %6783 }
0x13ed   :  { %v13614_v3 = vsub.f32 %v13519_v38, %v6799_v23  ;;  %v6800_v7 = vmul.f32 0.03125, %v6784_v53  ;;  %v6869_v19 = vsel %vm1090_vm3, %v6829_v35, 0.0  ;;  %v6830_v16 = vmul.f32 %v13608_v8, %v13608_v8 }
0x13ee   :  { %6870 = vadd.xlane.f32.xlu0 %v6869_v19 }
0x13ef   :  { %v13620_v40 = vsub.f32 %v13525_v15, %v6800_v7  ;;  %v6872_v48 = vsel %vm1090_vm3, %v6830_v16, 0.0  ;;  %v6831_v1 = vmul.f32 %v13614_v3, %v13614_v3 }
0x13f0   :  { %6873 = vadd.xlane.f32.xlu1 %v6872_v48 }
0x13f1   :  { %v6875_v27 = vsel %vm1090_vm3, %v6831_v1, 0.0  ;;  %v6832_v38 = vmul.f32 %v13620_v40, %v13620_v40 }
0x13f2   :  { %6876 = vadd.xlane.f32.xlu0 %v6875_v27 }
0x13f3   :  { %v6878_v46 = vsel %vm1090_vm3, %v6832_v38, 0.0 }
0x13f4   :  { %6879 = vadd.xlane.f32.xlu1 %v6878_v46 }
0x1461   :  { %v6835_v15 = vpop.xlane.xlu0 %6834 }
0x1462   :  { %v6881_v21 = vmul.f32 0.03125, %v6835_v15 }
0x1463   :  { %v6838_v45 = vpop.xlane.xlu1 %6837 }
0x1464   :  { %v6897_v6 = vadd.f32 1e-05, %v6881_v21  ;;  %v6882_v60 = vmul.f32 0.03125, %v6838_v45 }
0x1465   :  { %v6841_v4 = vpop.xlane.xlu0 %6840 }
0x1466   :  { %10099 = vrsqrt.f32 %v6897_v6  ;;  %v6898_v0 = vadd.f32 1e-05, %v6882_v60  ;;  %v6883_v56 = vmul.f32 0.03125, %v6841_v4 }
0x1467   :  { %v6844_v25 = vpop.xlane.xlu1 %6843 }
0x1468   :  { %10101 = vrsqrt.f32 %v6898_v0  ;;  %v6899_v33 = vadd.f32 1e-05, %v6883_v56  ;;  %v6884_v17 = vmul.f32 0.03125, %v6844_v25 }
0x1469   :  { %v6847_v18 = vpop.xlane.xlu0 %6846 }
0x146a   :  { %10103 = vrsqrt.f32 %v6899_v33  ;;  %v6900_v26 = vadd.f32 1e-05, %v6884_v17  ;;  %v6885_v10 = vmul.f32 0.03125, %v6847_v18 }
0x146b   :  { %v6850_v2 = vpop.xlane.xlu1 %6849 }
0x146c   :  { %10105 = vrsqrt.f32 %v6900_v26  ;;  %v6901_v41 = vadd.f32 1e-05, %v6885_v10  ;;  %v6886_v54 = vmul.f32 0.03125, %v6850_v2 }
0x146d   :  { %v6853_v14 = vpop.xlane.xlu0 %6852 }
0x146e   :  { %10107 = vrsqrt.f32 %v6901_v41  ;;  %v6902_v51 = vadd.f32 1e-05, %v6886_v54  ;;  %v6887_v28 = vmul.f32 0.03125, %v6853_v14 }
0x146f   :  { %v6856_v59 = vpop.xlane.xlu1 %6855 }
0x1470   :  { %v10100_v34 = vpop.eup %10099  ;;  %10109 = vrsqrt.f32 %v6902_v51  ;;  %v6903_v11 = vadd.f32 1e-05, %v6887_v28  ;;  %v6888_v31 = vmul.f32 0.03125, %v6856_v59 }
0x1471   :  { %v6929_v44 = vmul.f32 %v10100_v34, %v13534_v22 }
0x1472   :  { %v10102_v12 = vpop.eup %10101  ;;  %10111 = vrsqrt.f32 %v6903_v11  ;;  %v6904_v32 = vadd.f32 1e-05, %v6888_v31 }
0x1473   :  { %v6951_v55 = vmul.f32 %v13633_v43, %v6929_v44  ;;  %v6930_v30 = vmul.f32 %v10102_v12, %v13537_v20  ;;  %v6859_v37 = vpop.xlane.xlu0 %6858 }
0x1474   :  { %v10104_v5 = vpop.eup %10103  ;;  %10113 = vrsqrt.f32 %v6904_v32  ;;  %v6889_v23 = vmul.f32 0.03125, %v6859_v37 }
0x1475   :  { %v6952_v36 = vmul.f32 %v13633_v43, %v6930_v30  ;;  %v6931_v22 = vmul.f32 %v10104_v5, %v13542_v58  ;;  %v6862_v35 = vpop.xlane.xlu1 %6861  ;;  %v13646_v53 = vadd.f32 %v13639_v9, %v6951_v55 }
0x1476   :  { %v10106_v7 = vpop.eup %10105  ;;  %v6905_v19 = vadd.f32 1e-05, %v6889_v23  ;;  %v6890_v16 = vmul.f32 0.03125, %v6862_v35 }
0x1477   :  { %v6953_v48 = vmul.f32 %v13633_v43, %v6931_v22  ;;  %v6932_v1 = vmul.f32 %v10106_v7, %v13548_v13  ;;  %v6865_v20 = vpop.xlane.xlu0 %6864  ;;  %v13651_v27 = vadd.f32 %v13639_v9, %v6952_v36  ;;  %v6989_v38 = vmin.f32 %v13646_v53, 20.0 }
0x1478   :  { %v10108_v46 = vpop.eup %10107  ;;  %10115 = vrsqrt.f32 %v6905_v19  ;;  %v6906_v58 = vadd.f32 1e-05, %v6890_v16  ;;  %v6891_v42 = vmul.f32 0.03125, %v6865_v20 }
0x1479   :  { %v13655_v29 = vadd.f32 %v13639_v9, %v6953_v48  ;;  %v6954_v15 = vmul.f32 %v13633_v43, %v6932_v1  ;;  %v6933_v21 = vmul.f32 %v10108_v46, %v13554_v63  ;;  %v6868_v45 = vpop.xlane.xlu1 %6867  ;;  %v6990_v13 = vmin.f32 %v13651_v27, 20.0 }
0x147a   :  { %v10110_v6 = vpop.eup %10109  ;;  %10117 = vrsqrt.f32 %v6906_v58  ;;  %v6907_v60 = vadd.f32 1e-05, %v6891_v42  ;;  %v6892_v4 = vmul.f32 0.03125, %v6868_v45  ;;  %v7005_v0 = vmul.f32 1.442695, %v6989_v38 }
0x147b   :  { %v6991_v56 = vmin.f32 %v13655_v29, 20.0  ;;  %v13662_v25 = vadd.f32 %v13639_v9, %v6954_v15  ;;  %v6955_v33 = vmul.f32 %v13633_v43, %v6933_v21  ;;  %v6934_v17 = vmul.f32 %v10110_v6, %v13560_v57  ;;  %v6871_v18 = vpop.xlane.xlu0 %6870 }
0x147c   :  { %v10112_v26 = vpop.eup %10111  ;;  %10119 = vrsqrt.f32 %v6907_v60  ;;  %v6908_v63 = vadd.f32 1e-05, %v6892_v4  ;;  %v6893_v10 = vmul.f32 0.03125, %v6871_v18  ;;  %v7007_v2 = vmul.f32 1.442695, %v6990_v13 }
0x147d   :  { %v7009_v41 = vmul.f32 1.442695, %v6991_v56  ;;  %v6992_v54 = vmin.f32 %v13662_v25, 20.0  ;;  %v6956_v14 = vmul.f32 %v13633_v43, %v6934_v17  ;;  %v6935_v51 = vmul.f32 %v10112_v26, %v13566_v62  ;;  %v6874_v28 = vpop.xlane.xlu1 %6873 }
0x147e   :  { %v10114_v59 = vpop.eup %10113  ;;  %10121 = vrsqrt.f32 %v6908_v63  ;;  %v6909_v34 = vadd.f32 1e-05, %v6893_v10  ;;  %v6894_v11 = vmul.f32 0.03125, %v6874_v28  ;;  %v13670_v57 = vadd.f32 %v13639_v9, %v6955_v33 }
0x147f   :  { %10123 = vpow2.f32 %v7009_v41  ;;  %v7011_v31 = vmul.f32 1.442695, %v6992_v54  ;;  %v6957_v44 = vmul.f32 %v13633_v43, %v6935_v51  ;;  %v6936_v12 = vmul.f32 %v10114_v59, %v13572_v47  ;;  %v6877_v32 = vpop.xlane.xlu0 %6876 }
0x1480   :  { %10125 = vrsqrt.f32 %v6909_v34  ;;  %v6910_v55 = vadd.f32 1e-05, %v6894_v11  ;;  %v6895_v30 = vmul.f32 0.03125, %v6877_v32  ;;  %v13675_v62 = vadd.f32 %v13639_v9, %v6956_v14 }
0x1481   :  { %10127 = vpow2.f32 %v7011_v31  ;;  %v6958_v37 = vmul.f32 %v13633_v43, %v6936_v12  ;;  %v6880_v5 = vpop.xlane.xlu1 %6879  ;;  %v6993_v23 = vmin.f32 %v13670_v57, 20.0  ;;  %v13680_v36 = vadd.f32 %v13639_v9, %v6957_v44 }
0x1482   :  { %v10116_v22 = vpop.eup %10115  ;;  %10129 = vrsqrt.f32 %v6910_v55  ;;  %v6911_v35 = vadd.f32 1e-05, %v6895_v30  ;;  %v6896_v47 = vmul.f32 0.03125, %v6880_v5  ;;  %v6994_v7 = vmin.f32 %v13675_v62, 20.0 }
0x1483   :  { %v6937_v19 = vmul.f32 %v10116_v22, %v13581_v52  ;;  %10131 = vpow2.f32 %v7005_v0  ;;  %v7013_v16 = vmul.f32 1.442695, %v6993_v23  ;;  %v13685_v48 = vadd.f32 %v13639_v9, %v6958_v37 }
0x1484   :  { %v10118_v1 = vpop.eup %10117  ;;  %10133 = vrsqrt.f32 %v6911_v35  ;;  %v6912_v20 = vadd.f32 1e-05, %v6896_v47  ;;  %v7015_v38 = vmul.f32 1.442695, %v6994_v7  ;;  %v6995_v46 = vmin.f32 %v13680_v36, 20.0 }
0x1485   :  { %v6959_v58 = vmul.f32 %v13633_v43, %v6937_v19  ;;  %v6938_v42 = vmul.f32 %v10118_v1, %v13585_v39  ;;  %10135 = vpow2.f32 %v7007_v2  ;;  %v6996_v15 = vmin.f32 %v13685_v48, 20.0 }
0x1486   :  { %v10120_v21 = vpop.eup %10119  ;;  %10137 = vrsqrt.f32 %v6912_v20  ;;  %v7017_v52 = vmul.f32 1.442695, %v6995_v46 }
0x1487   :  { %v6960_v45 = vmul.f32 %v13633_v43, %v6938_v42  ;;  %v6939_v13 = vmul.f32 %v10120_v21, %v13590_v24  ;;  %10139 = vpow2.f32 %v7013_v16  ;;  %v7019_v6 = vmul.f32 1.442695, %v6996_v15 }
0x1488   :  { %v10122_v60 = vpop.eup %10121  ;;  %10141 = vpow2.f32 %v7015_v38  ;;  %v13694_v4 = vadd.f32 %v13639_v9, %v6959_v58 }
0x1489   :  { %v10124_v0 = vpop.eup %10123  ;;  %v6961_v39 = vmul.f32 %v13633_v43, %v6939_v13  ;;  %v6940_v56 = vmul.f32 %v10122_v60, %v13596_v61  ;;  %10143 = vpow2.f32 %v7017_v52  ;;  %v13699_v33 = vadd.f32 %v13639_v9, %v6960_v45 }
0x148a   :  { %v10126_v17 = vpop.eup %10125  ;;  %v7039_v18 = vadd.f32 2.0, %v10124_v0  ;;  %10145 = vpow2.f32 %v7019_v6  ;;  %v6997_v24 = vmin.f32 %v13694_v4, 20.0 }
0x148b   :  { %v10128_v26 = vpop.eup %10127  ;;  %v6962_v63 = vmul.f32 %v13633_v43, %v6940_v56  ;;  %v6998_v10 = vmin.f32 %v13699_v33, 20.0  ;;  %v6941_v61 = vmul.f32 %v10126_v17, %v13602_v49  ;;  %v13709_v34 = vadd.f32 %v13639_v9, %v6961_v39 }
0x148c   :  { %v10130_v2 = vpop.eup %10129  ;;  %v13704_v41 = vmul.f32 %v10124_v0, %v7039_v18  ;;  %v7040_v54 = vadd.f32 2.0, %v10128_v26  ;;  %v7021_v14 = vmul.f32 1.442695, %v6997_v24 }
0x148d   :  { %v10132_v51 = vpop.eup %10131  ;;  %v6942_v28 = vmul.f32 %v10130_v2, %v13608_v8  ;;  %v7023_v59 = vmul.f32 1.442695, %v6998_v10  ;;  %v6963_v37 = vmul.f32 %v13633_v43, %v6941_v61  ;;  %v13714_v5 = vadd.f32 %v13639_v9, %v6962_v63 }
0x148e   :  { %v10134_v11 = vpop.eup %10133  ;;  %v7056_v31 = vmul.f32 %v10128_v26, %v7040_v54  ;;  %v7037_v44 = vadd.f32 2.0, %v10132_v51  ;;  %v7087_v32 = vadd.f32 2.0, %v13704_v41  ;;  %10147 = vpow2.f32 %v7021_v14 }
0x148f   :  { %v10136_v12 = vpop.eup %10135  ;;  %v6964_v23 = vmul.f32 %v13633_v43, %v6942_v28  ;;  %10149 = vpow2.f32 %v7023_v59  ;;  %v6999_v35 = vmin.f32 %v13709_v34, 20.0  ;;  %v6943_v7 = vmul.f32 %v10134_v11, %v13614_v3 }
0x1490   :  { %v10138_v55 = vpop.eup %10137  ;;  %v7088_v30 = vadd.f32 2.0, %v7056_v31  ;;  %v7038_v49 = vadd.f32 2.0, %v10136_v12  ;;  %v7053_v22 = vmul.f32 %v10132_v51, %v7037_v44  ;;  %v7000_v52 = vmin.f32 %v13714_v5, 20.0 }
0x1491   :  { %v10140_v8 = vpop.eup %10139  ;;  %v6944_v20 = vmul.f32 %v10138_v55, %v13620_v40  ;;  %v7025_v6 = vmul.f32 1.442695, %v6999_v35  ;;  %v6965_v3 = vmul.f32 %v13633_v43, %v6943_v7  ;;  %v13727_v63 = vadd.f32 %v13639_v9, %v6963_v37 }
0x1492   :  { %v10142_v47 = vpop.eup %10141  ;;  %10151 = vrcp.f32 %v7088_v30  ;;  %v7054_v19 = vmul.f32 %v10136_v12, %v7038_v49  ;;  %v7041_v16 = vadd.f32 2.0, %v10140_v8  ;;  %v7085_v38 = vadd.f32 2.0, %v7053_v22 }
0x1493   :  { %v10144_v1 = vpop.eup %10143  ;;  %10153 = vrcp.f32 %v7087_v32  ;;  %v7042_v46 = vadd.f32 2.0, %v10142_v47  ;;  %v6966_v40 = vmul.f32 %v13633_v43, %v6944_v20  ;;  %v7027_v18 = vmul.f32 1.442695, %v7000_v52 }
0x1494   :  { %v10146_v58 = vpop.eup %10145  ;;  %v7086_v42 = vadd.f32 2.0, %v7054_v19  ;;  %v7057_v15 = vmul.f32 %v10140_v8, %v7041_v16  ;;  %v7043_v21 = vadd.f32 2.0, %v10144_v1  ;;  %10155 = vrcp.f32 %v7085_v38 }
0x1495   :  { %v7058_v45 = vmul.f32 %v10142_v47, %v7042_v46  ;;  %v7044_v13 = vadd.f32 2.0, %v10146_v58  ;;  %v13730_v2 = vadd.f32 %v13639_v9, %v6964_v23  ;;  %v13733_v43 = vadd.f32 %v13639_v9, %v6965_v3 }
0x1496   :  { %10157 = vrcp.f32 %v7086_v42  ;;  %v7089_v60 = vadd.f32 2.0, %v7057_v15  ;;  %v13722_v0 = vmul.f32 %v10144_v1, %v7043_v21  ;;  %v7072_v61 = vmul.f32 %v7056_v31, %v13662_v25 }
0x1497   :  { %v7090_v39 = vadd.f32 2.0, %v7058_v45  ;;  %v7060_v56 = vmul.f32 %v10146_v58, %v7044_v13  ;;  %10159 = vpow2.f32 %v7025_v6  ;;  %v7001_v14 = vmin.f32 %v13727_v63, 20.0 }
0x1498   :  { %10161 = vrcp.f32 %v7089_v60  ;;  %v7091_v17 = vadd.f32 2.0, %v13722_v0  ;;  %v10148_v24 = vpop.eup %10147  ;;  %v13738_v51 = vadd.f32 %v13639_v9, %v6966_v40  ;;  %v7002_v44 = vmin.f32 %v13730_v2, 20.0 }
0x1499   :  { %10163 = vrcp.f32 %v7090_v39  ;;  %v7092_v26 = vadd.f32 2.0, %v7060_v56  ;;  %v7045_v10 = vadd.f32 2.0, %v10148_v24  ;;  %v10150_v54 = vpop.eup %10149  ;;  %v7071_v32 = vmul.f32 %v13704_v41, %v13655_v29 }
0x149a   :  { %10165 = vrcp.f32 %v7091_v17  ;;  %v7046_v59 = vadd.f32 2.0, %v10150_v54  ;;  %v7029_v55 = vmul.f32 1.442695, %v7001_v14  ;;  %v7003_v30 = vmin.f32 %v13733_v43, 20.0 }
0x149b   :  { %10167 = vrcp.f32 %v7092_v26  ;;  %v7061_v11 = vmul.f32 %v10148_v24, %v7045_v10  ;;  %v7004_v25 = vmin.f32 %v13738_v51, 20.0  ;;  %v7031_v9 = vmul.f32 1.442695, %v7002_v44 }
0x149c   :  { %v10152_v28 = vpop.eup %10151  ;;  %10169 = vpow2.f32 %v7027_v18  ;;  %v7062_v37 = vmul.f32 %v10150_v54, %v7046_v59  ;;  %v7069_v23 = vmul.f32 %v7053_v22, %v13646_v53  ;;  %v7070_v35 = vmul.f32 %v7054_v19, %v13651_v27 }
0x149d   :  { %v10154_v12 = vpop.eup %10153  ;;  %v7120_v31 = vmul.f32 %v10152_v28, %v7072_v61  ;;  %v7093_v49 = vadd.f32 2.0, %v7061_v11  ;;  %10171 = vpow2.f32 %v7029_v55  ;;  %v7033_v47 = vmul.f32 1.442695, %v7003_v30 }
0x149e   :  { %v10156_v8 = vpop.eup %10155  ;;  %v7119_v16 = vmul.f32 %v10154_v12, %v7071_v32  ;;  %v7094_v1 = vadd.f32 2.0, %v7062_v37  ;;  %v7035_v29 = vmul.f32 1.442695, %v7004_v25  ;;  %v7073_v46 = vmul.f32 %v7057_v15, %v13670_v57 }
0x149f   :  { %10173 = vrcp.f32 %v7093_v49  ;;  %v7117_v20 = vmul.f32 %v10156_v8, %v7069_v23  ;;  %v7074_v21 = vmul.f32 %v7058_v45, %v13675_v62  ;;  %v7076_v19 = vmul.f32 %v7060_v56, %v13685_v48 }
0x14a0   :  { %v10158_v7 = vpop.eup %10157  ;;  %10175 = vpow2.f32 %v7031_v9  ;;  %v7134_v42 = vpack.c.bf16 %v7120_v31, %v7119_v16  ;;  %v7075_v62 = vmul.f32 %v13722_v0, %v13680_v36  ;;  %v7077_v54 = vmul.f32 %v7061_v11, %v13694_v4 }
0x14a1   :  { %v10160_v41 = vpop.eup %10159  ;;  %v7118_v38 = vmul.f32 %v10158_v7, %v7070_v35  ;;  %10177 = vrcp.f32 %v7094_v1  ;;  %v7078_v61 = vmul.f32 %v7062_v37, %v13699_v33 }
0x14a2   :  { %v10162_v58 = vpop.eup %10161  ;;  %v7047_v53 = vadd.f32 2.0, %v10160_v41  ;;  %10179 = vpow2.f32 %v7033_v47 }
0x14a3   :  { %v10164_v27 = vpop.eup %10163  ;;  %v7133_v22 = vpack.c.bf16 %v7118_v38, %v7117_v20  ;;  %v7121_v13 = vmul.f32 %v10162_v58, %v7073_v46  ;;  %10181 = vpow2.f32 %v7035_v29 }
0x14a4   :  { %v10166_v52 = vpop.eup %10165  ;;  %v7122_v6 = vmul.f32 %v10164_v27, %v7074_v21  ;;  %v7063_v3 = vmul.f32 %v10160_v41, %v7047_v53 }
0x14a5   :  { %v10168_v60 = vpop.eup %10167  ;;  %9275 = vmatprep.mubr.msk.bf16.mxu0 %vm1090_vm3, %v7133_v22  ;;  %v7123_v48 = vmul.f32 %v10166_v52, %v7075_v62 }
0x14a6   :  { %v10170_v57 = vpop.eup %10169  ;;  %9276 = vmatmul.mubr.msk.bf16.vlgmr.msra.gmra.mrb[112].mxu0 %vm1090_vm3, %v7134_v42  ;;  %v7135_v15 = vpack.c.bf16 %v7122_v6, %v7121_v13  ;;  %v7124_v45 = vmul.f32 %v10168_v60, %v7076_v19  ;;  %v7095_v39 = vadd.f32 2.0, %v7063_v3  ;;  %v7079_v23 = vmul.f32 %v7063_v3, %v13709_v34 }
0x14a7   :  { %v7048_v40 = vadd.f32 2.0, %v10170_v57  ;;  %v10172_v56 = vpop.eup %10171 }
0x14a8   :  { %9279 = vmatprep.mubr.msk.bf16.mxu0 %vm1090_vm3, %v7135_v15  ;;  %v7136_v24 = vpack.c.bf16 %v7124_v45, %v7123_v48  ;;  %v7049_v26 = vadd.f32 2.0, %v10172_v56  ;;  %10183 = vrcp.f32 %v7095_v39 }
0x14a9   :  { %v7064_v17 = vmul.f32 %v10170_v57, %v7048_v40  ;;  %v10174_v18 = vpop.eup %10173 }
0x14aa   :  { %v10176_v10 = vpop.eup %10175  ;;  %v7065_v0 = vmul.f32 %v10172_v56, %v7049_v26  ;;  %v7125_v44 = vmul.f32 %v10174_v18, %v7077_v54 }
0x14ab   :  { %v7096_v14 = vadd.f32 2.0, %v7064_v17  ;;  %v10178_v28 = vpop.eup %10177  ;;  %v7050_v36 = vadd.f32 2.0, %v10176_v10  ;;  %v7080_v35 = vmul.f32 %v7064_v17, %v13714_v5 }
0x14ac   :  { %v10180_v59 = vpop.eup %10179  ;;  %v7126_v12 = vmul.f32 %v10178_v28, %v7078_v61  ;;  %v7097_v30 = vadd.f32 2.0, %v7065_v0  ;;  %v7081_v41 = vmul.f32 %v7065_v0, %v13727_v63  ;;  %v13773_v63 = vld [vmem:[%s14242_s13 + $0x13] ss:$0 sm:$0xff] }
0x14ad   :  { %10185 = vrcp.f32 %v7096_v14  ;;  %v10182_v32 = vpop.eup %10181  ;;  %v7066_v55 = vmul.f32 %v10176_v10, %v7050_v36  ;;  %v7051_v25 = vadd.f32 2.0, %v10180_v59 }
0x14ae   :  { %9280 = vmatmul.mubr.msk.bf16.gmra.mrb[116].mxu0 %vm1090_vm3, %v7136_v24  ;;  %v7137_v31 = vpack.c.bf16 %v7126_v12, %v7125_v44  ;;  %v7052_v49 = vadd.f32 2.0, %v10182_v32  ;;  %10187 = vrcp.f32 %v7097_v30 }
0x14af   :  { %v7098_v4 = vadd.f32 2.0, %v7066_v55  ;;  %v7067_v33 = vmul.f32 %v10180_v59, %v7051_v25  ;;  %v7082_v20 = vmul.f32 %v7066_v55, %v13730_v2 }
0x14b0   :  { %9283 = vmatprep.mubr.msk.bf16.mxu0 %vm1090_vm3, %v7137_v31  ;;  %v7068_v11 = vmul.f32 %v10182_v32, %v7052_v49 }
0x14b1   :  { %10189 = vrcp.f32 %v7098_v4  ;;  %v7099_v37 = vadd.f32 2.0, %v7067_v33  ;;  %v7083_v21 = vmul.f32 %v7067_v33, %v13733_v43 }
0x14b2   :  { %v7100_v9 = vadd.f32 2.0, %v7068_v11  ;;  %v10184_v8 = vpop.eup %10183  ;;  %v7084_v34 = vmul.f32 %v7068_v11, %v13738_v51 }
0x14b3   :  { %10191 = vrcp.f32 %v7099_v37  ;;  %v7127_v7 = vmul.f32 %v10184_v8, %v7079_v23 }
0x14b4   :  { %10193 = vrcp.f32 %v7100_v9 }
0x14b7   :  { %v10186_v47 = vpop.eup %10185 }
0x14b8   :  { %v7128_v16 = vmul.f32 %v10186_v47, %v7080_v35  ;;  %v10188_v1 = vpop.eup %10187 }
0x14b9   :  { %v7129_v46 = vmul.f32 %v10188_v1, %v7081_v41 }
0x14ba   :  { %v7138_v29 = vpack.c.bf16 %v7128_v16, %v7127_v7 }
0x14bb   :  { %v10190_v38 = vpop.eup %10189 }
0x14bc   :  { %9284 = vmatmul.mubr.msk.bf16.gmra.mrb[120].mxu0 %vm1090_vm3, %v7138_v29  ;;  %v7130_v58 = vmul.f32 %v10190_v38, %v7082_v20 }
0x14bd   :  { %v10192_v42 = vpop.eup %10191 }
0x14be   :  { %v10194_v5 = vpop.eup %10193  ;;  %v7139_v53 = vpack.c.bf16 %v7130_v58, %v7129_v46  ;;  %v7131_v27 = vmul.f32 %v10192_v42, %v7083_v21 }
0x14bf   :  { %v7132_v22 = vmul.f32 %v10194_v5, %v7084_v34 }
0x14c0   :  { %9287 = vmatprep.mubr.msk.bf16.mxu0 %vm1090_vm3, %v7139_v53 }
0x14c1   :  { %v7140_v19 = vpack.c.bf16 %v7132_v22, %v7131_v27 }
0x14c4   :  { %9288 = vmatmul.mubr.msk.bf16.gmra.mrb[124].mxu0 %vm1090_vm3, %v7140_v19 }
0x14c5   :  { %9303 = vmatprep.mubr.msk.bf16.mxu0 %vm10337_vm4, %v14379_v50 }
0x1579   :  { %v9277_v2 = vpop.f32.mrb[112].mxu0 }
0x157a   :  { %v7233_v43 = vadd.f32 %v9277_v2, %v13773_v63  ;;  %v7224_v51 = vpop.f32.mrb[113].mxu0 }
0x157b   :  { %v7225_v52 = vadd.f32 %v13773_v63, %v7224_v51  ;;  %v9278_v13 = vpop.f32.mrb[114].mxu0 }
0x157c   :  { %v7301_v6 = vsel %vm1090_vm3, %v7233_v43, -inf  ;;  %v7236_v3 = vadd.f32 %v9278_v13, %v13773_v63  ;;  %v7227_v60 = vpop.f32.mrb[115].mxu0 }
0x157d   :  { %v7302_v57 = vrot.slane %v7301_v6, 4  ;;  %v7287_v15 = vsel %vm1090_vm3, %v7225_v52, -inf  ;;  %v7228_v62 = vadd.f32 %v13773_v63, %v7227_v60 }
0x157e   :  { %v7288_v45 = vrot.slane %v7287_v15, 4  ;;  %v7308_v40 = vsel %vm1090_vm3, %v7236_v3, -inf }
0x157f   :  { %v7303_v39 = vmax.f32 %v7301_v6, %v7302_v57  ;;  %v7309_v48 = vrot.slane %v7308_v40, 4  ;;  %v7294_v56 = vsel %vm1090_vm3, %v7228_v62, -inf }
0x1580   :  { %v7289_v17 = vmax.f32 %v7287_v15, %v7288_v45  ;;  %v7295_v18 = vrot.slane %v7294_v56, 4 }
0x1581   :  { %v7304_v24 = vrot.slane %v7303_v39, 2  ;;  %v7310_v26 = vmax.f32 %v7308_v40, %v7309_v48  ;;  %v9281_v10 = vpop.f32.mrb[116].mxu0 }
0x1582   :  { %v7290_v54 = vrot.slane %v7289_v17, 2  ;;  %v7296_v61 = vmax.f32 %v7294_v56, %v7295_v18  ;;  %v13784_v14 = vadd.f32 %v9281_v10, %v13773_v63  ;;  %v7240_v28 = vpop.f32.mrb[117].mxu0 }
0x1583   :  { %v7305_v36 = vmax.f32 %v7303_v39, %v7304_v24  ;;  %v7311_v0 = vrot.slane %v7310_v26, 2  ;;  %v13787_v59 = vadd.f32 %v13773_v63, %v7240_v28  ;;  %v9282_v44 = vpop.f32.mrb[118].mxu0 }
0x1584   :  { %v7291_v12 = vmax.f32 %v7289_v17, %v7290_v54  ;;  %v7297_v32 = vrot.slane %v7296_v61, 2  ;;  %v7329_v55 = vsel %vm1090_vm3, %v13784_v14, -inf  ;;  %v13792_v30 = vadd.f32 %v9282_v44, %v13773_v63  ;;  %v7243_v25 = vpop.f32.mrb[119].mxu0 }
0x1585   :  { %v7306_v31 = vrot.slane %v7305_v36, 1  ;;  %v7312_v49 = vmax.f32 %v7310_v26, %v7311_v0  ;;  %v7330_v4 = vrot.slane %v7329_v55, 4  ;;  %v7315_v33 = vsel %vm1090_vm3, %v13787_v59, -inf }
0x1586   :  { %v7292_v11 = vrot.slane %v7291_v12, 1  ;;  %v7298_v37 = vmax.f32 %v7296_v61, %v7297_v32  ;;  %v7316_v9 = vrot.slane %v7315_v33, 4  ;;  %v7336_v8 = vsel %vm1090_vm3, %v13792_v30, -inf }
0x1587   :  { %v7307_v23 = vmax.f32 %v7305_v36, %v7306_v31  ;;  %v7313_v35 = vrot.slane %v7312_v49, 1  ;;  %v7331_v47 = vmax.f32 %v7329_v55, %v7330_v4  ;;  %v7337_v7 = vrot.slane %v7336_v8, 4 }
0x1588   :  { %v7293_v16 = vmax.f32 %v7291_v12, %v7292_v11  ;;  %v7299_v1 = vrot.slane %v7298_v37, 1  ;;  %v7317_v29 = vmax.f32 %v7315_v33, %v7316_v9  ;;  %v13799_v41 = vadd.f32 %v13773_v63, %v7243_v25 }
0x1589   :  { %v7401_v20 = vsub.f32 %v7233_v43, %v7307_v23  ;;  %v7314_v38 = vmax.f32 %v7312_v49, %v7313_v35  ;;  %v7332_v46 = vrot.slane %v7331_v47, 2  ;;  %v7338_v58 = vmax.f32 %v7336_v8, %v7337_v7  ;;  %v14382_v7 = vld [vmem:[#allocation20_spill] sm:$0xff] }
0x158a   :  { %v7399_v42 = vsub.f32 %v7225_v52, %v7293_v16  ;;  %v7300_v21 = vmax.f32 %v7298_v37, %v7299_v1  ;;  %v7318_v34 = vrot.slane %v7317_v29, 2  ;;  %v7322_v5 = vsel %vm1090_vm3, %v13799_v41, -inf }
0x158b   :  { %v7419_v53 = vmul.f32 1.442695, %v7401_v20  ;;  %v7402_v27 = vsub.f32 %v7236_v3, %v7314_v38  ;;  %v7333_v22 = vmax.f32 %v7331_v47, %v7332_v46  ;;  %v7339_v19 = vrot.slane %v7338_v58, 2 }
0x158c   :  { %v7415_v2 = vmul.f32 1.442695, %v7399_v42  ;;  %v7400_v51 = vsub.f32 %v7228_v62, %v7300_v21  ;;  %v7319_v13 = vmax.f32 %v7317_v29, %v7318_v34  ;;  %v7323_v6 = vrot.slane %v7322_v5, 4 }
0x158d   :  { %10195 = vpow2.f32 %v7419_v53  ;;  %v7421_v60 = vmul.f32 1.442695, %v7402_v27  ;;  %v7334_v43 = vrot.slane %v7333_v22, 1  ;;  %v7340_v57 = vmax.f32 %v7338_v58, %v7339_v19 }
0x158e   :  { %10197 = vpow2.f32 %v7415_v2  ;;  %v7417_v15 = vmul.f32 1.442695, %v7400_v51  ;;  %v7320_v52 = vrot.slane %v7319_v13, 1  ;;  %v7324_v45 = vmax.f32 %v7322_v5, %v7323_v6 }
0x158f   :  { %10199 = vpow2.f32 %v7421_v60  ;;  %v7335_v40 = vmax.f32 %v7333_v22, %v7334_v43  ;;  %v7341_v39 = vrot.slane %v7340_v57, 1  ;;  %v9285_v48 = vpop.f32.mrb[120].mxu0  ;;  %v9479_v43 = vld [vmem:[#allocation3 + $0x140] sm:$0xff]  }
0x1590   :  { %10201 = vpow2.f32 %v7417_v15  ;;  %v7321_v3 = vmax.f32 %v7319_v13, %v7320_v52  ;;  %v7325_v56 = vrot.slane %v7324_v45, 2  ;;  %v13804_v17 = vadd.f32 %v9285_v48, %v13773_v63  ;;  %v7256_v62 = vpop.f32.mrb[121].mxu0  ;;  %9292 = vmatpush3.bf16.msra.mxu1 %v9479_v43 }
0x1591   :  { %v7405_v18 = vsub.f32 %v13784_v14, %v7335_v40  ;;  %v7342_v24 = vmax.f32 %v7340_v57, %v7341_v39  ;;  %v13808_v26 = vadd.f32 %v13773_v63, %v7256_v62  ;;  %v9286_v10 = vpop.f32.mrb[122].mxu0  ;;  %9293 = vmatprep.subr.bf16.mxu1 %v14379_v50 }
0x1592   :  { %v7403_v54 = vsub.f32 %v13787_v59, %v7321_v3  ;;  %v7326_v61 = vmax.f32 %v7324_v45, %v7325_v56  ;;  %v7357_v28 = vsel %vm1090_vm3, %v13804_v17, -inf  ;;  %v13814_v36 = vadd.f32 %v9286_v10, %v13773_v63  ;;  %v7259_v0 = vpop.f32.mrb[123].mxu0  ;;  %v9480_v3 = vld [vmem:[#allocation3 + $0x148] sm:$0xff]  }
0x1593   :  { %v7427_v44 = vmul.f32 1.442695, %v7405_v18  ;;  %v7406_v12 = vsub.f32 %v13792_v30, %v7342_v24  ;;  %v7358_v32 = vrot.slane %v7357_v28, 4  ;;  %v7343_v14 = vsel %vm1090_vm3, %v13808_v26, -inf }
0x1594   :  { %v7423_v55 = vmul.f32 1.442695, %v7403_v54  ;;  %v7327_v25 = vrot.slane %v7326_v61, 1  ;;  %v7344_v31 = vrot.slane %v7343_v14, 4  ;;  %v7364_v59 = vsel %vm1090_vm3, %v13814_v36, -inf  ;;  %9294 = vmatpush3.bf16.msra.mxu1 %v9480_v3 }
0x1595   :  { %10203 = vpow2.f32 %v7427_v44  ;;  %v7429_v49 = vmul.f32 1.442695, %v7406_v12  ;;  %v7359_v4 = vmax.f32 %v7357_v28, %v7358_v32  ;;  %v7365_v33 = vrot.slane %v7364_v59, 4 }
0x1596   :  { %10205 = vpow2.f32 %v7423_v55  ;;  %v7328_v11 = vmax.f32 %v7326_v61, %v7327_v25  ;;  %v7345_v37 = vmax.f32 %v7343_v14, %v7344_v31  ;;  %v13822_v9 = vadd.f32 %v13773_v63, %v7259_v0 }
0x1597   :  { %v10196_v30 = vpop.eup %10195  ;;  %10207 = vpow2.f32 %v7429_v49  ;;  %v7360_v8 = vrot.slane %v7359_v4, 2  ;;  %v7366_v23 = vmax.f32 %v7364_v59, %v7365_v33  ;;  %v13824_v35 = vpop.f32.mrb[124].mxu0 }
0x1598   :  { %v10198_v47 = vpop.eup %10197  ;;  %v13827_v16 = vmul.f32 %v10196_v30, %v14382_v7  ;;  %v7404_v1 = vsub.f32 %v13799_v41, %v7328_v11  ;;  %v7346_v29 = vrot.slane %v7345_v37, 2  ;;  %v7350_v20 = vsel %vm1090_vm3, %v13822_v9, -inf  ;;  %v13832_v38 = vpop.f32.mrb[125].mxu0 }
0x1599   :  { %v10200_v46 = vpop.eup %10199  ;;  %v13835_v58 = vmul.f32 %v10198_v47, %v14382_v7  ;;  %v7361_v42 = vmax.f32 %v7359_v4, %v7360_v8  ;;  %v7367_v21 = vrot.slane %v7366_v23, 2  ;;  %v7351_v34 = vrot.slane %v7350_v20, 4  ;;  %v13837_v5 = vpop.f32.mrb[126].mxu0 }
0x159a   :  { %v10202_v53 = vpop.eup %10201  ;;  %v7477_v27 = vsel %vm1090_vm3, %v13827_v16, 0.0  ;;  %v13842_v41 = vmul.f32 %v10200_v46, %v14382_v7  ;;  %v7425_v22 = vmul.f32 1.442695, %v7404_v1  ;;  %v7347_v19 = vmax.f32 %v7345_v37, %v7346_v29  ;;  %v13844_v2 = vpop.f32.mrb[127].mxu0 }
0x159b   :  { %v7478_v51 = vrot.slane %v7477_v27, 4  ;;  %v7463_v13 = vsel %vm1090_vm3, %v13835_v58, 0.0  ;;  %v13849_v6 = vmul.f32 %v10202_v53, %v14382_v7  ;;  %v7362_v60 = vrot.slane %v7361_v42, 1 }
0x159c   :  { %v7464_v57 = vrot.slane %v7463_v13, 4  ;;  %v7484_v15 = vsel %vm1090_vm3, %v13842_v41, 0.0  ;;  %10209 = vpow2.f32 %v7425_v22  ;;  %v7348_v52 = vrot.slane %v7347_v19, 1 }
0x159d   :  { %v7479_v45 = vadd.f32 %v7478_v51, %v7477_v27  ;;  %v7485_v40 = vrot.slane %v7484_v15, 4  ;;  %v7470_v39 = vsel %vm1090_vm3, %v13849_v6, 0.0  ;;  %v7363_v48 = vmax.f32 %v7361_v42, %v7362_v60 }
0x159e   :  { %v7465_v56 = vadd.f32 %v7464_v57, %v7463_v13  ;;  %v7471_v62 = vrot.slane %v7470_v39, 4  ;;  %v7349_v18 = vmax.f32 %v7347_v19, %v7348_v52  ;;  %v7368_v24 = vmax.f32 %v7366_v23, %v7367_v21 }
0x159f   :  { %v10204_v10 = vpop.eup %10203  ;;  %v7480_v54 = vrot.slane %v7479_v45, 2  ;;  %v7486_v61 = vadd.f32 %v7485_v40, %v7484_v15  ;;  %v7409_v28 = vsub.f32 %v13804_v17, %v7363_v48  ;;  %v7352_v0 = vmax.f32 %v7350_v20, %v7351_v34 }
0x15a0   :  { %v10206_v44 = vpop.eup %10205  ;;  %v7466_v12 = vrot.slane %v7465_v56, 2  ;;  %v7472_v32 = vadd.f32 %v7471_v62, %v7470_v39  ;;  %v13858_v14 = vmul.f32 %v10204_v10, %v14382_v7  ;;  %v7407_v55 = vsub.f32 %v13808_v26, %v7349_v18 }
0x15a1   :  { %v10208_v25 = vpop.eup %10207  ;;  %v7481_v31 = vadd.f32 %v7480_v54, %v7479_v45  ;;  %v7487_v59 = vrot.slane %v7486_v61, 2  ;;  %v13862_v49 = vmul.f32 %v10206_v44, %v14382_v7  ;;  %v7435_v4 = vmul.f32 1.442695, %v7409_v28 }
0x15a2   :  { %v7467_v33 = vadd.f32 %v7466_v12, %v7465_v56  ;;  %v7473_v11 = vrot.slane %v7472_v32, 2  ;;  %v7505_v17 = vsel %vm1090_vm3, %v13858_v14, 0.0  ;;  %v13867_v37 = vmul.f32 %v10208_v25, %v14382_v7 }
0x15a3   :  { %v7482_v30 = vrot.slane %v7481_v31, 1  ;;  %v7488_v8 = vadd.f32 %v7487_v59, %v7486_v61  ;;  %v7506_v23 = vrot.slane %v7505_v17, 4  ;;  %v7491_v26 = vsel %vm1090_vm3, %v13862_v49, 0.0 }
0x15a4   :  { %v7468_v47 = vrot.slane %v7467_v33, 1  ;;  %v7474_v1 = vadd.f32 %v7473_v11, %v7472_v32  ;;  %v7492_v29 = vrot.slane %v7491_v26, 4  ;;  %v7512_v20 = vsel %vm1090_vm3, %v13867_v37, 0.0 }
0x15a5   :  { %v7483_v46 = vadd.f32 %v7482_v30, %v7481_v31  ;;  %v7489_v42 = vrot.slane %v7488_v8, 1  ;;  %v7507_v21 = vadd.f32 %v7506_v23, %v7505_v17  ;;  %v7513_v34 = vrot.slane %v7512_v20, 4 }
0x15a6   :  { %v10210_v53 = vpop.eup %10209  ;;  %v7469_v27 = vadd.f32 %v7468_v47, %v7467_v33  ;;  %v7475_v22 = vrot.slane %v7474_v1, 1  ;;  %v7493_v19 = vadd.f32 %v7492_v29, %v7491_v26  ;;  %10211 = vpow2.f32 %v7435_v4  ;;  %v13888_v4 = vld [vmem:[%s14242_s13 + $0xd] ss:$0 sm:$0xff]  ;;  %v14384_v47 = vld [vmem:[#allocation25_spill] sm:$0xff] }
0x15a7   :  { %10213 = vrcp.f32 %v7483_v46  ;;  %v7490_v51 = vadd.f32 %v7489_v42, %v7488_v8  ;;  %v7508_v13 = vrot.slane %v7507_v21, 2  ;;  %v7514_v60 = vadd.f32 %v7513_v34, %v7512_v20 }
0x15a8   :  { %10215 = vrcp.f32 %v7469_v27  ;;  %v7476_v43 = vadd.f32 %v7475_v22, %v7474_v1  ;;  %v7494_v57 = vrot.slane %v7493_v19, 2  ;;  %v13874_v15 = vmul.f32 %v10210_v53, %v14382_v7 }
0x15a9   :  { %10217 = vrcp.f32 %v7490_v51  ;;  %v7509_v52 = vadd.f32 %v7508_v13, %v7507_v21  ;;  %v7515_v45 = vrot.slane %v7514_v60, 2  ;;  %v7431_v40 = vmul.f32 1.442695, %v7407_v55 }
0x15aa   :  { %10219 = vrcp.f32 %v7476_v43  ;;  %v7495_v39 = vadd.f32 %v7494_v57, %v7493_v19  ;;  %v7498_v48 = vsel %vm1090_vm3, %v13874_v15, 0.0  ;;  %v7369_v3 = vrot.slane %v7368_v24, 1  ;;  %v14387_v43 = vld [vmem:[#allocation16_spill] sm:$0xff] }
0x15ab   :  { %v7510_v56 = vrot.slane %v7509_v52, 1  ;;  %v7516_v62 = vadd.f32 %v7515_v45, %v7514_v60  ;;  %v7499_v18 = vrot.slane %v7498_v48, 4  ;;  %10221 = vpow2.f32 %v7431_v40 }
0x15ac   :  { %v7496_v10 = vrot.slane %v7495_v39, 1  ;;  %v7370_v54 = vmax.f32 %v7368_v24, %v7369_v3  ;;  %v7353_v61 = vrot.slane %v7352_v0, 2  ;;  %v13880_v28 = vadd.f32 %v13824_v35, %v13773_v63 }
0x15ad   :  { %v7511_v44 = vadd.f32 %v7510_v56, %v7509_v52  ;;  %v7517_v12 = vrot.slane %v7516_v62, 1  ;;  %v7500_v32 = vadd.f32 %v7499_v18, %v7498_v48  ;;  %v13895_v23 = vadd.f32 %v13773_v63, %v13832_v38  ;;  %v14385_v38 = vld [vmem:[#allocation18_spill] sm:$0xff]  ;;  %v14389_v48 = vld [vmem:[#allocation19_spill] sm:$0xff] }
0x15ae   :  { %v7497_v55 = vadd.f32 %v7496_v10, %v7495_v39  ;;  %v7410_v25 = vsub.f32 %v13814_v36, %v7370_v54  ;;  %v7354_v31 = vmax.f32 %v7352_v0, %v7353_v61  ;;  %v7385_v59 = vsel %vm1090_vm3, %v13880_v28, -inf  ;;  %v14383_v36 = vld [vmem:[#allocation15_spill] sm:$0xff] }
0x15af   :  { %10223 = vrcp.f32 %v7511_v44  ;;  %v7518_v24 = vadd.f32 %v7517_v12, %v7516_v62  ;;  %v7501_v33 = vrot.slane %v7500_v32, 2  ;;  %v7386_v35 = vrot.slane %v7385_v59, 4 }
0x15b0   :  { %v10212_v11 = vpop.eup %10211  ;;  %10225 = vrcp.f32 %v7497_v55  ;;  %v7355_v17 = vrot.slane %v7354_v31, 1  ;;  %v13899_v1 = vadd.f32 %v13888_v4, %v14384_v47  ;;  %v7437_v20 = vmul.f32 1.442695, %v7410_v25 }
0x15b1   :  { %v10214_v30 = vpop.eup %10213  ;;  %10227 = vrcp.f32 %v7518_v24  ;;  %v7502_v8 = vadd.f32 %v7501_v33, %v7500_v32  ;;  %v13891_v0 = vmul.f32 %v10212_v11, %v14383_v36  ;;  %v13905_v53 = vmax.f32 %v7385_v59, %v7386_v35 }
0x15b2   :  { %v10216_v26 = vpop.eup %10215  ;;  %v7593_v29 = vmul.f32 %v10214_v30, %v13827_v16  ;;  %v14386_v22 = vunpack.i.l.bf16 %v14385_v38  ;;  %v13910_v60 = vmax.f32 %v7354_v31, %v7355_v17  ;;  %v14388_v57 = vunpack.i.l.bf16 %v14387_v43 }
0x15b3   :  { %v10218_v46 = vpop.eup %10217  ;;  %v7591_v42 = vmul.f32 %v10216_v26, %v13835_v58  ;;  %v7503_v21 = vrot.slane %v7502_v8, 1  ;;  %v7533_v34 = vsel %vm1090_vm3, %v13891_v0, 0.0  ;;  %v13917_v40 = vsel %vm1090_vm3, %v13895_v23, -inf }
0x15b4   :  { %v10220_v27 = vpop.eup %10219  ;;  %v7609_v19 = vmul.f32 %v14386_v22, %v7593_v29  ;;  %v7594_v51 = vmul.f32 %v10218_v46, %v13842_v41  ;;  %v7534_v13 = vrot.slane %v7533_v34, 4  ;;  %v14390_v3 = vunpack.i.l.bf16 %v14389_v48 }
0x15b5   :  { %v10222_v16 = vpop.eup %10221  ;;  %v7607_v52 = vmul.f32 %v14388_v57, %v7591_v42  ;;  %v7592_v58 = vmul.f32 %v10220_v27, %v13849_v6  ;;  %v7504_v45 = vadd.f32 %v7503_v21, %v7502_v8  ;;  %10229 = vpow2.f32 %v7437_v20  ;;  %v14392_v42 = vld [vmem:[#allocation21_spill] sm:$0xff] }
0x15b6   :  { %v7625_v39 = vmul.f32 %v7609_v19, %v13899_v1  ;;  %v7610_v56 = vmul.f32 %v14390_v3, %v7594_v51  ;;  %v7535_v41 = vadd.f32 %v7534_v13, %v7533_v34  ;;  %v14391_v18 = vunpack.i.h.bf16 %v14387_v43  ;;  %v14394_v51 = vld [vmem:[#allocation11_spill] sm:$0xff] }
0x15b7   :  { %v7623_v62 = vmul.f32 %v7607_v52, %v13899_v1  ;;  %10231 = vrcp.f32 %v7504_v45  ;;  %v7388_v6 = vrot.slane %v13905_v53, 2  ;;  %v7408_v12 = vsub.f32 %v13822_v9, %v13910_v60 }
0x15b8   :  { %v7608_v10 = vmul.f32 %v14391_v18, %v7592_v58  ;;  %v7653_v54 = vsel %vm1090_vm3, %v7625_v39, 0.0  ;;  %v7626_v61 = vmul.f32 %v7610_v56, %v13899_v1  ;;  %v7536_v44 = vrot.slane %v7535_v41, 2 }
0x15b9   :  { %v10224_v32 = vpop.eup %10223  ;;  %v7654_v55 = vrot.slane %v7653_v54, 4  ;;  %v7639_v25 = vsel %vm1090_vm3, %v7623_v62, 0.0  ;;  %v13933_v59 = vmul.f32 %v10222_v16, %v14383_v36  ;;  %v14393_v21 = vunpack.i.l.bf16 %v14392_v42 }
0x15ba   :  { %v7624_v31 = vmul.f32 %v7608_v10, %v13899_v1  ;;  %v10226_v24 = vpop.eup %10225  ;;  %v7640_v33 = vrot.slane %v7639_v25, 4  ;;  %v7660_v35 = vsel %vm1090_vm3, %v7626_v61, 0.0  ;;  %v7597_v11 = vmul.f32 %v10224_v32, %v13858_v14 }
0x15bb   :  { %v7537_v17 = vadd.f32 %v7536_v44, %v7535_v41  ;;  %v10228_v30 = vpop.eup %10227  ;;  %v7655_v8 = vadd.f32 %v7654_v55, %v7653_v54  ;;  %v7661_v26 = vrot.slane %v7660_v35, 4  ;;  %v7595_v29 = vmul.f32 %v10226_v24, %v13862_v49  ;;  %v14396_v49 = vld [vmem:[#allocation22_spill] sm:$0xff] }
0x15bc   :  { %v7646_v47 = vsel %vm1090_vm3, %v7624_v31, 0.0  ;;  %v7641_v20 = vadd.f32 %v7640_v33, %v7639_v25  ;;  %v7613_v34 = vmul.f32 %v14393_v21, %v7597_v11  ;;  %v7598_v27 = vmul.f32 %v10228_v30, %v13867_v37 }
0x15bd   :  { %v7647_v46 = vrot.slane %v7646_v47, 4  ;;  %v7656_v22 = vrot.slane %v7655_v8, 2  ;;  %v7662_v19 = vadd.f32 %v7661_v26, %v7660_v35  ;;  %v14395_v13 = vunpack.i.l.bf16 %v14394_v51 }
0x15be   :  { %v7519_v16 = vsel %vm1090_vm3, %v13933_v59, 0.0  ;;  %v7642_v43 = vrot.slane %v7641_v20, 2  ;;  %v7629_v52 = vmul.f32 %v7613_v34, %v13899_v1  ;;  %v14397_v58 = vunpack.i.l.bf16 %v14396_v49 }
0x15bf   :  { %v7611_v14 = vmul.f32 %v14395_v13, %v7595_v29  ;;  %v7648_v57 = vadd.f32 %v7647_v46, %v7646_v47  ;;  %v7657_v39 = vadd.f32 %v7656_v22, %v7655_v8  ;;  %v7663_v3 = vrot.slane %v7662_v19, 2  ;;  %v10230_v41 = vpop.eup %10229 }
0x15c0   :  { %v7614_v45 = vmul.f32 %v14397_v58, %v7598_v27  ;;  %v7538_v37 = vrot.slane %v7537_v17, 1  ;;  %v7643_v62 = vadd.f32 %v7642_v43, %v7641_v20  ;;  %v7681_v10 = vsel %vm1090_vm3, %v7629_v52, 0.0  ;;  %v14400_v58 = vld [vmem:[#allocation26_spill] sm:$0xff] }
0x15c1   :  { %v7627_v56 = vmul.f32 %v7611_v14, %v13899_v1  ;;  %v7649_v18 = vrot.slane %v7648_v57, 2  ;;  %v10232_v61 = vpop.eup %10231  ;;  %v7658_v44 = vrot.slane %v7657_v39, 1  ;;  %v7664_v32 = vadd.f32 %v7663_v3, %v7662_v19  ;;  %v14398_v14 = vld [vmem:[#allocation12_spill] sm:$0xff] }
0x15c2   :  { %v7630_v54 = vmul.f32 %v7614_v45, %v13899_v1  ;;  %v7682_v55 = vrot.slane %v7681_v10, 4  ;;  %v7644_v31 = vrot.slane %v7643_v62, 1  ;;  %v7539_v26 = vadd.f32 %v7538_v37, %v7537_v17 }
0x15c3   :  { %v7667_v25 = vsel %vm1090_vm3, %v7627_v56, 0.0  ;;  %v7650_v24 = vadd.f32 %v7649_v18, %v7648_v57  ;;  %v7665_v11 = vrot.slane %v7664_v32, 1  ;;  %v13954_v47 = vadd.f32 %v7658_v44, %v7657_v39 }
0x15c4   :  { %v7668_v33 = vrot.slane %v7667_v25, 4  ;;  %v7688_v35 = vsel %vm1090_vm3, %v7630_v54, 0.0  ;;  %v7683_v30 = vadd.f32 %v7682_v55, %v7681_v10  ;;  %v7596_v46 = vmul.f32 %v10232_v61, %v13874_v15 }
0x15c5   :  { %v7689_v8 = vrot.slane %v7688_v35, 4  ;;  %v7651_v29 = vrot.slane %v7650_v24, 1  ;;  %v13957_v21 = vadd.f32 %v7644_v31, %v7643_v62  ;;  %v13959_v34 = vadd.f32 %v7665_v11, %v7664_v32 }
0x15c6   :  { %v7669_v20 = vadd.f32 %v7668_v33, %v7667_v25  ;;  %v7684_v27 = vrot.slane %v7683_v30, 2  ;;  %v14399_v43 = vunpack.i.l.bf16 %v14398_v14  ;;  %v7520_v52 = vrot.slane %v7519_v16, 4 }
0x15c7   :  { %v7690_v22 = vadd.f32 %v7689_v8, %v7688_v35  ;;  %v7652_v19 = vadd.f32 %v7651_v29, %v7650_v24  ;;  %v13965_v17 = vadd.f32 %v13888_v4, %v14400_v58  ;;  %v7433_v15 = vmul.f32 1.442695, %v7408_v12 }
0x15c8   :  { %v7670_v13 = vrot.slane %v7669_v20, 2  ;;  %v7612_v57 = vmul.f32 %v14399_v43, %v7596_v46  ;;  %v7389_v45 = vmax.f32 %v13905_v53, %v7388_v6  ;;  %v7753_v39 = vpack.c.bf16 %v13954_v47, %v13954_v47 }
0x15c9   :  { %v13975_v3 = vadd.f32 %v7684_v27, %v7683_v30  ;;  %v7372_v37 = vrot.slane %v13917_v40, 4  ;;  %v7751_v4 = vpack.c.bf16 %v13957_v21, %v13957_v21  ;;  %v7754_v9 = vpack.c.bf16 %v13959_v34, %v13959_v34 }
0x15ca   :  { %v7628_v56 = vmul.f32 %v7612_v57, %v13899_v1  ;;  %v7691_v60 = vrot.slane %v7690_v22, 2  ;;  %10233 = vrcp.f32 %v7539_v26  ;;  %v7752_v12 = vpack.c.bf16 %v7652_v19, %v7652_v19 }
0x15cb   :  { %v7671_v62 = vadd.f32 %v7670_v13, %v7669_v20  ;;  %v7521_v6 = vadd.f32 %v7520_v52, %v7519_v16  ;;  %v13985_v10 = vmul.f32 %v10230_v41, %v14383_v36  ;;  %10235 = vpow2.f32 %v7433_v15 }
0x15cc   :  { %v7674_v53 = vsel %vm1090_vm3, %v7628_v56, 0.0  ;;  %v7390_v1 = vrot.slane %v7389_v45, 1  ;;  %v7686_v54 = vrot.slane %v13975_v3, 1  ;;  %v7373_v44 = vmax.f32 %v13917_v40, %v7372_v37 }
0x15cd   :  { %v7675_v18 = vrot.slane %v7674_v53, 4  ;;  %v7522_v61 = vrot.slane %v7521_v6, 2  ;;  %v13991_v32 = vadd.f32 %v13837_v5, %v13773_v63  ;;  %v7540_v25 = vsel %vm1090_vm3, %v13985_v10, 0.0 }
0x15ce   :  { %v7391_v16 = vmax.f32 %v7389_v45, %v7390_v1  ;;  %v13997_v41 = vadd.f32 %v13773_v63, %v13844_v2  ;;  %v7672_v31 = vrot.slane %v7671_v62, 1  ;;  %v7541_v33 = vrot.slane %v7540_v25, 4 }
0x15cf   :  { %v7676_v55 = vadd.f32 %v7675_v18, %v7674_v53  ;;  %v7523_v24 = vadd.f32 %v7522_v61, %v7521_v6  ;;  %v7374_v35 = vrot.slane %v7373_v44, 2  ;;  %v7392_v5 = vsel %vm1090_vm3, %v13991_v32, -inf }
0x15d0   :  { %v7413_v40 = vsub.f32 %v13880_v28, %v7391_v16  ;;  %v7378_v30 = vsel %vm1090_vm3, %v13997_v41, -inf  ;;  %v7692_v8 = vadd.f32 %v7691_v60, %v7690_v22  ;;  %v7542_v29 = vadd.f32 %v7541_v33, %v7540_v25 }
0x15d1   :  { %v7677_v11 = vrot.slane %v7676_v55, 2  ;;  %v7524_v26 = vrot.slane %v7523_v24, 1  ;;  %v7375_v20 = vmax.f32 %v7373_v44, %v7374_v35  ;;  %v7393_v2 = vrot.slane %v7392_v5, 4 }
0x15d2   :  { %v7443_v63 = vmul.f32 1.442695, %v7413_v40  ;;  %v7379_v27 = vrot.slane %v7378_v30, 4  ;;  %v7673_v19 = vadd.f32 %v7672_v31, %v7671_v62  ;;  %v7543_v43 = vrot.slane %v7542_v29, 2 }
0x15d3   :  { %v7678_v46 = vadd.f32 %v7677_v11, %v7676_v55  ;;  %v7525_v13 = vadd.f32 %v7524_v26, %v7523_v24  ;;  %v7376_v57 = vrot.slane %v7375_v20, 1  ;;  %v7394_v58 = vmax.f32 %v7392_v5, %v7393_v2 }
0x15d4   :  { %v10234_v52 = vpop.eup %10233  ;;  %10237 = vpow2.f32 %v7443_v63  ;;  %v7380_v15 = vmax.f32 %v7378_v30, %v7379_v27  ;;  %v7544_v22 = vadd.f32 %v7543_v43, %v7542_v29  ;;  %v7797_v60 = vunpack.c.l.b16 %v7752_v12 }
0x15d5   :  { %v7679_v28 = vrot.slane %v7678_v46, 1  ;;  %v7601_v45 = vmul.f32 %v10234_v52, %v13891_v0  ;;  %10239 = vrcp.f32 %v7525_v13  ;;  %v7377_v56 = vmax.f32 %v7375_v20, %v7376_v57  ;;  %v10236_v37 = vpop.eup %10235 }
0x15d6   :  { %v7395_v6 = vrot.slane %v7394_v58, 2  ;;  %v7381_v18 = vrot.slane %v7380_v15, 2  ;;  %v14401_v62 = vunpack.i.h.bf16 %v14385_v38  ;;  %v7545_v61 = vrot.slane %v7544_v22, 1 }
0x15d7   :  { %v7680_v53 = vadd.f32 %v7679_v28, %v7678_v46  ;;  %v14008_v44 = vmul.f32 %v10236_v37, %v14383_v36  ;;  %v7411_v55 = vsub.f32 %v13895_v23, %v7377_v56  ;;  %v7755_v25 = vpack.c.bf16 %v7673_v19, %v7673_v19 }
0x15d8   :  { %v7617_v1 = vmul.f32 %v14401_v62, %v7601_v45  ;;  %v7396_v16 = vmax.f32 %v7394_v58, %v7395_v6  ;;  %v7382_v0 = vmax.f32 %v7380_v15, %v7381_v18  ;;  %v7693_v31 = vrot.slane %v7692_v8, 1  ;;  %v14402_v45 = vld [vmem:[#allocation17_spill] sm:$0xff] }
0x15d9   :  { %v7546_v33 = vadd.f32 %v7545_v61, %v7544_v22  ;;  %v7526_v12 = vsel %vm1090_vm3, %v14008_v44, 0.0  ;;  %v7439_v35 = vmul.f32 1.442695, %v7411_v55  ;;  %v7687_v5 = vadd.f32 %v7686_v54, %v13975_v3 }
0x15da   :  { %v7633_v24 = vmul.f32 %v7617_v1, %v13965_v17  ;;  %v7527_v11 = vrot.slane %v7526_v12, 4  ;;  %v7397_v38 = vrot.slane %v7396_v16, 1  ;;  %v7383_v40 = vrot.slane %v7382_v0, 1 }
0x15db   :  { %v7798_v23 = vunpack.c.l.b16 %v7753_v39  ;;  %v7796_v30 = vunpack.c.l.b16 %v7751_v4  ;;  %10241 = vrcp.f32 %v7546_v33  ;;  %v7756_v26 = vpack.c.bf16 %v7680_v53, %v7680_v53 }
0x15dc   :  { %v7799_v29 = vunpack.c.l.b16 %v7754_v9  ;;  %v7528_v20 = vadd.f32 %v7527_v11, %v7526_v12  ;;  %10243 = vpow2.f32 %v7439_v35  ;;  %v7398_v46 = vmax.f32 %v7396_v16, %v7397_v38 }
0x15dd   :  { %v7800_v63 = vunpack.c.l.b16 %v7755_v25  ;;  %v7384_v2 = vmax.f32 %v7382_v0, %v7383_v40  ;;  %v7694_v3 = vadd.f32 %v7693_v31, %v7692_v8  ;;  %v7812_v54 = vsel %vm4393_vm7, %v7797_v60, %v7796_v30 }
0x15de   :  { %v10238_v47 = vpop.eup %10237  ;;  %v7529_v39 = vrot.slane %v7528_v20, 2  ;;  %v7414_v27 = vsub.f32 %v13991_v32, %v7398_v46  ;;  %v7757_v21 = vpack.c.bf16 %v7687_v5, %v7687_v5  ;;  %v7813_v4 = vsel %vm4395_vm8, %v7798_v23, %v7812_v54 }
0x15df   :  { %v10240_v19 = vpop.eup %10239  ;;  %v14028_v13 = vmul.f32 %v10238_v47, %v14383_v36  ;;  %v7412_v34 = vsub.f32 %v13997_v41, %v7384_v2  ;;  %v7801_v9 = vunpack.c.l.b16 %v7756_v26  ;;  %v7814_v43 = vsel %vm4397_vm9, %v7799_v29, %v7813_v4 }
0x15e0   :  { %v7599_v8 = vmul.f32 %v10240_v19, %v13933_v59  ;;  %v7530_v57 = vadd.f32 %v7529_v39, %v7528_v20  ;;  %v7445_v52 = vmul.f32 1.442695, %v7414_v27  ;;  %v7758_v58 = vpack.c.bf16 %v7694_v3, %v7694_v3 }
0x15e1   :  { %v7561_v28 = vsel %vm1090_vm3, %v14028_v13, 0.0  ;;  %v7441_v32 = vmul.f32 1.442695, %v7412_v34  ;;  %v7815_v15 = vsel %vm4399_vm10, %v7800_v63, %v7814_v43  ;;  %v14403_v22 = vunpack.i.l.bf16 %v14402_v45 }
0x15e2   :  { %v7531_v37 = vrot.slane %v7530_v57, 1  ;;  %v7562_v60 = vrot.slane %v7561_v28, 4  ;;  %10245 = vpow2.f32 %v7445_v52  ;;  %v7802_v41 = vunpack.c.l.b16 %v7757_v21 }
0x15e3   :  { %v7615_v56 = vmul.f32 %v14403_v22, %v7599_v8  ;;  %v7816_v53 = vsel %vm4401_vm11, %v7801_v9, %v7815_v15  ;;  %10247 = vpow2.f32 %v7441_v32  ;;  %v7803_v1 = vunpack.c.l.b16 %v7758_v58 }
0x15e4   :  { %v7532_v6 = vadd.f32 %v7531_v37, %v7530_v57  ;;  %v7563_v18 = vadd.f32 %v7562_v60, %v7561_v28  ;;  %v7817_v61 = vsel %vm4403_vm12, %v7802_v41, %v7816_v53  ;;  %v7709_v12 = vsel %vm1090_vm3, %v7633_v24, 0.0 }
0x15e5   :  { %v7631_v59 = vmul.f32 %v7615_v56, %v13965_v17  ;;  %v10242_v62 = vpop.eup %10241  ;;  %v14047_v33 = vsel %vm4405_vm13, %v7803_v1, %v7817_v61  ;;  %v14404_v35 = vunpack.i.h.bf16 %v14389_v48  ;;  %v7710_v30 = vrot.slane %v7709_v12, 4 }
0x15e6   :  { %v10244_v55 = vpop.eup %10243  ;;  %v7602_v25 = vmul.f32 %v10242_v62, %v13985_v10  ;;  %10249 = vrcp.f32 %v7532_v6  ;;  %v7564_v0 = vrot.slane %v7563_v18, 2  ;;  %v14405_v28 = vunpack.i.h.bf16 %v14402_v45 }
0x15e7   :  { %v7695_v16 = vsel %vm1090_vm3, %v7631_v59, 0.0  ;;  %v14044_v31 = vmul.f32 %v10244_v55, %v14383_v36  ;;  %v7711_v47 = vadd.f32 %v7710_v30, %v7709_v12 }
0x15e8   :  { %v7618_v11 = vmul.f32 %v14404_v35, %v7602_v25  ;;  %v7565_v38 = vadd.f32 %v7564_v0, %v7563_v18  ;;  %v7696_v10 = vrot.slane %v7695_v16, 4 }
0x15e9   :  { %v7547_v40 = vsel %vm1090_vm3, %v14044_v31, 0.0  ;;  %v7712_v52 = vrot.slane %v7711_v47, 2 }
0x15ea   :  { %v7634_v5 = vmul.f32 %v7618_v11, %v13965_v17  ;;  %v7548_v23 = vrot.slane %v7547_v40, 4  ;;  %v7566_v26 = vrot.slane %v7565_v38, 1  ;;  %v7697_v24 = vadd.f32 %v7696_v10, %v7695_v16 }
0x15eb   :  { %v7713_v53 = vadd.f32 %v7712_v52, %v7711_v47  ;;  %v14407_v47 = vunpack.i.h.bf16 %v14394_v51 }
0x15ec   :  { %v7716_v29 = vsel %vm1090_vm3, %v7634_v5, 0.0  ;;  %v7549_v20 = vadd.f32 %v7548_v23, %v7547_v40  ;;  %v10246_v46 = vpop.eup %10245  ;;  %v7567_v2 = vadd.f32 %v7566_v26, %v7565_v38  ;;  %v7698_v43 = vrot.slane %v7697_v24, 2 }
0x15ed   :  { %v7717_v63 = vrot.slane %v7716_v29, 4  ;;  %v14057_v48 = vmul.f32 %v10246_v46, %v14383_v36  ;;  %v10248_v54 = vpop.eup %10247  ;;  %v7714_v12 = vrot.slane %v7713_v53, 1  ;;  %v14406_v40 = vunpack.i.h.bf16 %v14392_v42 }
0x15ee   :  { %v7550_v3 = vrot.slane %v7549_v20, 2  ;;  %10251 = vrcp.f32 %v7567_v2  ;;  %v14062_v19 = vmul.f32 %v10248_v54, %v14383_v36  ;;  %v7699_v41 = vadd.f32 %v7698_v43, %v7697_v24 }
0x15ef   :  { %v7718_v27 = vadd.f32 %v7717_v63, %v7716_v29  ;;  %v7568_v4 = vsel %vm1090_vm3, %v14057_v48, 0.0 }
0x15f0   :  { %v10250_v39 = vpop.eup %10249  ;;  %v7551_v21 = vadd.f32 %v7550_v3, %v7549_v20  ;;  %v7569_v9 = vrot.slane %v7568_v4, 4  ;;  %v7554_v57 = vsel %vm1090_vm3, %v14062_v19, 0.0  ;;  %v7700_v55 = vrot.slane %v7699_v41, 1 }
0x15f1   :  { %v7600_v34 = vmul.f32 %v10250_v39, %v14008_v44  ;;  %v7719_v15 = vrot.slane %v7718_v27, 2  ;;  %v7555_v56 = vrot.slane %v7554_v57, 4  ;;  %v7715_v20 = vadd.f32 %v7714_v12, %v7713_v53 }
0x15f2   :  { %v7552_v8 = vrot.slane %v7551_v21, 1  ;;  %v7570_v58 = vadd.f32 %v7569_v9, %v7568_v4  ;;  %v7701_v23 = vadd.f32 %v7700_v55, %v7699_v41 }
0x15f3   :  { %v7616_v32 = vmul.f32 %v14405_v28, %v7600_v34  ;;  %v7556_v44 = vadd.f32 %v7555_v56, %v7554_v57  ;;  %v7720_v18 = vadd.f32 %v7719_v15, %v7718_v27  ;;  %v7761_v42 = vpack.c.bf16 %v7715_v20, %v7715_v20 }
0x15f4   :  { %v7553_v22 = vadd.f32 %v7552_v8, %v7551_v21  ;;  %v7571_v60 = vrot.slane %v7570_v58, 2  ;;  %v7759_v24 = vpack.c.bf16 %v7701_v23, %v7701_v23 }
0x15f5   :  { %v7632_v37 = vmul.f32 %v7616_v32, %v13965_v17  ;;  %v7557_v1 = vrot.slane %v7556_v44, 2  ;;  %v7721_v11 = vrot.slane %v7720_v18, 1  ;;  %v7806_v57 = vunpack.c.l.b16 %v7761_v42 }
0x15f6   :  { %10253 = vrcp.f32 %v7553_v22  ;;  %v7572_v6 = vadd.f32 %v7571_v60, %v7570_v58  ;;  %v7804_v9 = vunpack.c.l.b16 %v7759_v24 }
0x15f7   :  { %v7702_v59 = vsel %vm1090_vm3, %v7632_v37, 0.0  ;;  %v7558_v0 = vadd.f32 %v7557_v1, %v7556_v44  ;;  %v7722_v63 = vadd.f32 %v7721_v11, %v7720_v18  ;;  %v14408_v37 = vunpack.i.h.bf16 %v14396_v49 }
0x15f8   :  { %v7703_v62 = vrot.slane %v7702_v59, 4  ;;  %v10252_v61 = vpop.eup %10251  ;;  %v7573_v45 = vrot.slane %v7572_v6, 1 }
0x15f9   :  { %v7605_v16 = vmul.f32 %v10252_v61, %v14028_v13  ;;  %v7559_v5 = vrot.slane %v7558_v0, 1  ;;  %v7762_v27 = vpack.c.bf16 %v7722_v63, %v7722_v63 }
0x15fa   :  { %v7704_v25 = vadd.f32 %v7703_v62, %v7702_v59  ;;  %v7574_v35 = vadd.f32 %v7573_v45, %v7572_v6 }
0x15fb   :  { %v7621_v10 = vmul.f32 %v14406_v40, %v7605_v16  ;;  %v7560_v29 = vadd.f32 %v7559_v5, %v7558_v0 }
0x15fc   :  { %v7705_v38 = vrot.slane %v7704_v25, 2  ;;  %10255 = vrcp.f32 %v7574_v35 }
0x15fd   :  { %v7637_v26 = vmul.f32 %v7621_v10, %v13965_v17  ;;  %10257 = vrcp.f32 %v7560_v29 }
0x15fe   :  { %v7706_v30 = vadd.f32 %v7705_v38, %v7704_v25 }
0x15ff   :  { %v7737_v54 = vsel %vm1090_vm3, %v7637_v26, 0.0 }
0x1600   :  { %v10254_v46 = vpop.eup %10253  ;;  %v7707_v2 = vrot.slane %v7706_v30, 1  ;;  %v7738_v4 = vrot.slane %v7737_v54, 4 }
0x1601   :  { %v7603_v13 = vmul.f32 %v10254_v46, %v14044_v31  ;;  %v7807_v31 = vunpack.c.l.b16 %v7762_v27  ;;  %v8687_v27 = vld [vmem:[%s14242_s13 + $0x14] ss:$0 sm:$0xff] }
0x1602   :  { %v7708_v3 = vadd.f32 %v7707_v2, %v7706_v30  ;;  %v7739_v15 = vadd.f32 %v7738_v4, %v7737_v54 }
0x1603   :  { %v7619_v39 = vmul.f32 %v14407_v47, %v7603_v13 }
0x1604   :  { %v7760_v21 = vpack.c.bf16 %v7708_v3, %v7708_v3  ;;  %v7740_v6 = vrot.slane %v7739_v15, 2 }
0x1605   :  { %v7635_v34 = vmul.f32 %v7619_v39, %v13965_v17 }
0x1606   :  { %v7805_v43 = vunpack.c.l.b16 %v7760_v21  ;;  %v10256_v8 = vpop.eup %10255  ;;  %v7741_v49 = vadd.f32 %v7740_v6, %v7739_v15  ;;  %v9482_v6 = vld [vmem:[#allocation3 + $0x158] sm:$0xff]  }
0x1607   :  { %v7723_v52 = vsel %vm1090_vm3, %v7635_v34, 0.0  ;;  %v7606_v32 = vmul.f32 %v10256_v8, %v14057_v48  ;;  %v10258_v22 = vpop.eup %10257  ;;  %v14409_v48 = vunpack.i.h.bf16 %v14398_v14 }
0x1608   :  { %v7724_v28 = vrot.slane %v7723_v52, 4  ;;  %v7819_v58 = vsel %vm4393_vm7, %v7805_v43, %v7804_v9  ;;  %v7604_v44 = vmul.f32 %v10258_v22, %v14062_v19  ;;  %v7742_v38 = vrot.slane %v7741_v49, 1  ;;  %v14410_v43 = vld [vmem:[#allocation23_spill] sm:$0xff] }
0x1609   :  { %v7820_v51 = vsel %vm4395_vm8, %v7806_v57, %v7819_v58  ;;  %v7622_v60 = vmul.f32 %v14408_v37, %v7606_v32  ;;  %v9481_v58 = vld [vmem:[#allocation3 + $0x150] sm:$0xff]  }
0x160a   :  { %v7725_v56 = vadd.f32 %v7724_v28, %v7723_v52  ;;  %v7821_v41 = vsel %vm4397_vm9, %v7807_v31, %v7820_v51  ;;  %v7620_v18 = vmul.f32 %v14409_v48, %v7604_v44  ;;  %v7743_v26 = vadd.f32 %v7742_v38, %v7741_v49  ;;  %v14411_v31 = vld [vmem:[#allocation24_spill] sm:$0xff]  ;;  %9300 = vmatpush3.bf16.msra.mxu0 %v9481_v58 }
0x160b   :  { %v7638_v59 = vmul.f32 %v7622_v60, %v13965_v17  ;;  %9301 = vmatprep.subr.bf16.mxu0 %v14379_v50 }
0x160c   :  { %v7726_v53 = vrot.slane %v7725_v56, 2  ;;  %v7636_v45 = vmul.f32 %v7620_v18, %v13965_v17  ;;  %v7765_v46 = vpack.c.bf16 %v7743_v26, %v7743_v26 }
0x160d   :  { %v7744_v1 = vsel %vm1090_vm3, %v7638_v59, 0.0 }
0x160e   :  { %v7727_v62 = vadd.f32 %v7726_v53, %v7725_v56  ;;  %v7745_v61 = vrot.slane %v7744_v1, 4  ;;  %v7730_v16 = vsel %vm1090_vm3, %v7636_v45, 0.0  ;;  %v7810_v24 = vunpack.c.l.b16 %v7765_v46  ;;  %9302 = vmatpush3.bf16.msra.mxu0 %v9482_v6 }
0x160f   :  { %v7731_v19 = vrot.slane %v7730_v16, 4 }
0x1610   :  { %v7728_v55 = vrot.slane %v7727_v62, 1  ;;  %v7746_v25 = vadd.f32 %v7745_v61, %v7744_v1 }
0x1611   :  { %v7732_v11 = vadd.f32 %v7731_v19, %v7730_v16  ;;  %v14123_v16 = vld [vmem:[%s14243_s14 + $0xb] ss:$0 sm:$0xff] }
0x1612   :  { %v7729_v0 = vadd.f32 %v7728_v55, %v7727_v62  ;;  %v7747_v12 = vrot.slane %v7746_v25, 2 }
0x1613   :  { %v7733_v10 = vrot.slane %v7732_v11, 2 }
0x1614   :  { %v7763_v35 = vpack.c.bf16 %v7729_v0, %v7729_v0  ;;  %v7748_v40 = vadd.f32 %v7747_v12, %v7746_v25 }
0x1615   :  { %v7734_v23 = vadd.f32 %v7733_v10, %v7732_v11 }
0x1616   :  { %v7808_v14 = vunpack.c.l.b16 %v7763_v35  ;;  %v7749_v5 = vrot.slane %v7748_v40, 1  ;;  %v14130_v35 = vld [vmem:[%s14244_s15 + $0xb] ss:$0 sm:$0xff] }
0x1617   :  { %v7735_v17 = vrot.slane %v7734_v23, 1 }
0x1618   :  { %v7822_v30 = vsel %vm4399_vm10, %v7808_v14, %v7821_v41  ;;  %v7750_v29 = vadd.f32 %v7749_v5, %v7748_v40  ;;  %v8692_v14 = vld [vmem:[%s14242_s13 + $0x15] ss:$0 sm:$0xff] }
0x1619   :  { %v7736_v20 = vadd.f32 %v7735_v17, %v7734_v23 }
0x161a   :  { %v7766_v2 = vpack.c.bf16 %v7750_v29, %v7750_v29 }
0x161b   :  { %v7764_v63 = vpack.c.bf16 %v7736_v20, %v7736_v20 }
0x161c   :  { %v7811_v3 = vunpack.c.l.b16 %v7766_v2 }
0x161d   :  { %v7809_v13 = vunpack.c.l.b16 %v7764_v63 }
0x161f   :  { %v7823_v54 = vsel %vm4401_vm11, %v7809_v13, %v7822_v30 }
0x1620   :  { %v7824_v42 = vsel %vm4403_vm12, %v7810_v24, %v7823_v54 }
0x1621   :  { %v7825_v47 = vsel %vm4405_vm13, %v7811_v3, %v7824_v42 }
0x1622   :  { %v7826_v39 = vpack.c.b16 %v7825_v47, %v14047_v33 }
0x1624   :  { %9296 = vmatmul.mubr.msk.bf16.vlgmr.msra.gmra.mrb[116].mxu1 %vm1090_vm3, %v7826_v39 }
0x1625   :  { %9315 = vmatprep.mubr.msk.f32.mxu1 %vm10337_vm4, %v14379_v50 }
0x16f7   :  { %v7876_v21 = vpop.f32.mrb[116].mxu1 }
0x16f8   :  { %v7877_v4 = vadd.f32 %v8687_v27, %v7876_v21  ;;  %v9297_v34 = vpop.f32.mrb[117].mxu1 }
0x16f9   :  { %v7879_v9 = vpop.f32.mrb[118].mxu1 }
0x16fa   :  { %v14106_v8 = vadd.f32 %v7877_v4, %v14410_v43  ;;  %v7880_v57 = vadd.f32 %v8687_v27, %v7879_v9  ;;  %v9298_v52 = vpop.f32.mrb[119].mxu1 }
0x16fc   :  { %v14109_v33 = vadd.f32 %v7880_v57, %v14411_v31  ;;  %v7885_v28 = vsel %vm1090_vm3, %v14106_v8, 0.0 }
0x16fd   :  { %7886 = vadd.xlane.f32.xlu0 %v7885_v28 }
0x16fe   :  { %v7888_v32 = vsel %vm1090_vm3, %v14109_v33, 0.0 }
0x16ff   :  { %7889 = vadd.xlane.f32.xlu1 %v7888_v32 }
0x178a   :  { %v7887_v15 = vpop.xlane.xlu0 %7886 }
0x178b   :  { %v7891_v51 = vmul.f32 0.03125, %v7887_v15 }
0x178c   :  { %v7890_v22 = vpop.xlane.xlu1 %7889 }
0x178d   :  { %v7893_v56 = vsub.f32 %v14106_v8, %v7891_v51  ;;  %v7892_v37 = vmul.f32 0.03125, %v7890_v22 }
0x178f   :  { %v7894_v60 = vsub.f32 %v14109_v33, %v7892_v37  ;;  %v7895_v41 = vmul.f32 %v7893_v56, %v7893_v56 }
0x1791   :  { %v7897_v44 = vsel %vm1090_vm3, %v7895_v41, 0.0  ;;  %v7896_v53 = vmul.f32 %v7894_v60, %v7894_v60 }
0x1792   :  { %7898 = vadd.xlane.f32.xlu0 %v7897_v44 }
0x1793   :  { %v7900_v59 = vsel %vm1090_vm3, %v7896_v53, 0.0 }
0x1794   :  { %7901 = vadd.xlane.f32.xlu1 %v7900_v59 }
0x181f   :  { %v7899_v48 = vpop.xlane.xlu0 %7898 }
0x1820   :  { %v7903_v18 = vmul.f32 0.03125, %v7899_v48 }
0x1821   :  { %v7902_v62 = vpop.xlane.xlu1 %7901 }
0x1822   :  { %v7905_v1 = vadd.f32 1e-05, %v7903_v18  ;;  %v7904_v61 = vmul.f32 0.03125, %v7902_v62 }
0x1824   :  { %10259 = vrsqrt.f32 %v7905_v1  ;;  %v7906_v45 = vadd.f32 1e-05, %v7904_v61 }
0x1826   :  { %10261 = vrsqrt.f32 %v7906_v45 }
0x182e   :  { %v10260_v55 = vpop.eup %10259 }
0x182f   :  { %v7909_v49 = vmul.f32 %v10260_v55, %v7893_v56 }
0x1830   :  { %v10262_v25 = vpop.eup %10261 }
0x1831   :  { %v7911_v0 = vmul.f32 %v14123_v16, %v7909_v49  ;;  %v7910_v19 = vmul.f32 %v10262_v25, %v7894_v60 }
0x1833   :  { %v7912_v12 = vmul.f32 %v14123_v16, %v7910_v19  ;;  %v7913_v11 = vadd.f32 %v14130_v35, %v7911_v0  ;;  %v14412_v0 = vld [vmem:[#allocation9_spill] sm:$0xff] }
0x1835   :  { %v7914_v38 = vadd.f32 %v14130_v35, %v7912_v12  ;;  %v14413_v12 = vld [vmem:[#allocation10_spill] sm:$0xff] }
0x1837   :  { %v7915_v40 = vpack.c.bf16 %v7914_v38, %v7913_v11 }
0x1839   :  { %9304 = vmatmul.mubr.msk.bf16.vlgmr.msra.gmra.mrb[128].mxu0 %vm1090_vm3, %v7915_v40 }
0x183a   :  { %9326 = vmatprep.mubr.msk.f32.mxu0 %vm10337_vm4, %v14379_v50 }
0x190c   :  { %v7978_v10 = vpop.f32.mrb[128].mxu0 }
0x190d   :  { %v7979_v5 = vadd.f32 %v8692_v14, %v7978_v10  ;;  %v9305_v23 = vpop.f32.mrb[129].mxu0 }
0x190e   :  { %v7981_v30 = vpop.f32.mrb[130].mxu0 }
0x190f   :  { %v7985_v26 = vmin.f32 %v7979_v5, 20.0  ;;  %v7982_v17 = vadd.f32 %v8692_v14, %v7981_v30  ;;  %v9306_v29 = vpop.f32.mrb[131].mxu0 }
0x1911   :  { %v7987_v20 = vmul.f32 1.442695, %v7985_v26  ;;  %v7986_v46 = vmin.f32 %v7982_v17, 20.0 }
0x1913   :  { %10263 = vpow2.f32 %v7987_v20  ;;  %v7989_v63 = vmul.f32 1.442695, %v7986_v46 }
0x1915   :  { %10265 = vpow2.f32 %v7989_v63 }
0x191d   :  { %v10264_v2 = vpop.eup %10263 }
0x191e   :  { %v7991_v13 = vadd.f32 2.0, %v10264_v2 }
0x191f   :  { %v10266_v24 = vpop.eup %10265 }
0x1920   :  { %v7993_v3 = vmul.f32 %v10264_v2, %v7991_v13  ;;  %v7992_v54 = vadd.f32 2.0, %v10266_v24 }
0x1922   :  { %v7997_v42 = vadd.f32 2.0, %v7993_v3  ;;  %v7994_v47 = vmul.f32 %v10266_v24, %v7992_v54  ;;  %v7995_v27 = vmul.f32 %v7993_v3, %v7979_v5 }
0x1924   :  { %10267 = vrcp.f32 %v7997_v42  ;;  %v7998_v39 = vadd.f32 2.0, %v7994_v47  ;;  %v7996_v34 = vmul.f32 %v7994_v47, %v7982_v17 }
0x1926   :  { %10269 = vrcp.f32 %v7998_v39 }
0x192e   :  { %v10268_v21 = vpop.eup %10267 }
0x192f   :  { %v8001_v4 = vmul.f32 %v10268_v21, %v7995_v27 }
0x1930   :  { %v10270_v9 = vpop.eup %10269 }
0x1931   :  { %v8002_v43 = vmul.f32 %v10270_v9, %v7996_v34  ;;  %v8003_v57 = vadd.f32 %v8001_v4, %v14106_v8  ;;  %v8107_v34 = vld [vmem:[%s14247_s18] sm:$0xff]  ;;  %v8108_v9 = vld [vmem:[%s14247_s18 + $0x8] sm:$0xff] }
0x1933   :  { %v8005_v52 = vsel %vm1090_vm3, %v8003_v57, 0.0  ;;  %v8004_v31 = vadd.f32 %v8002_v43, %v14109_v33  ;;  %v9345_v43 = vpack.c.bf16 %v8108_v9, %v8107_v34 }
0x1934   :  { %8006 = vadd.xlane.f32.xlu0 %v8005_v52  ;;  %v8110_v52 = vld [vmem:[%s14247_s18 + $0x18] sm:$0xff] }
0x1935   :  { %v8008_v28 = vsel %vm1090_vm3, %v8004_v31, 0.0 }
0x1936   :  { %8009 = vadd.xlane.f32.xlu1 %v8008_v28 }
0x19c1   :  { %v8007_v32 = vpop.xlane.xlu0 %8006 }
0x19c2   :  { %v8011_v58 = vmul.f32 0.03125, %v8007_v32  ;;  %v8700_v32 = vld [vmem:[%s14247_s18 + $0x20] sm:$0xff] }
0x19c3   :  { %v8010_v15 = vpop.xlane.xlu1 %8009 }
0x19c4   :  { %v8013_v51 = vsub.f32 %v8003_v57, %v8011_v58  ;;  %v8012_v22 = vmul.f32 0.03125, %v8010_v15  ;;  %v8109_v57 = vld [vmem:[%s14247_s18 + $0x10] sm:$0xff]  ;;  %v8701_v58 = vld [vmem:[%s14247_s18 + $0x28] sm:$0xff] }
0x19c5   :  { %v9348_v28 = vpack.c.bf16 %v8110_v52, %v8109_v57  ;;  %v9351_v15 = vpack.c.bf16 %v8701_v58, %v8700_v32 }
0x19c6   :  { %v8014_v56 = vsub.f32 %v8004_v31, %v8012_v22  ;;  %v8015_v37 = vmul.f32 %v8013_v51, %v8013_v51  ;;  %v10340_v31 = vmov 0.0|0.0  }
0x19c7   :  { %9344 = vmatprep.subr.bf16.mxu1 %v10340_v31  ;;  %9350 = vmatprep.subr.bf16.mxu0 %v10340_v31 }
0x19c8   :  { %v8017_v60 = vsel %vm1090_vm3, %v8015_v37, 0.0  ;;  %v8016_v41 = vmul.f32 %v8014_v56, %v8014_v56  ;;  %9346 = vmatpush3.bf16.msra.mxu1 %v9345_v43  ;;  %9352 = vmatpush3.bf16.msra.mxu0 %v9351_v15 }
0x19c9   :  { %8018 = vadd.xlane.f32.xlu0 %v8017_v60  ;;  %9347 = vmatprep.subr.bf16.mxu1 %v10340_v31 }
0x19ca   :  { %v8020_v8 = vsel %vm1090_vm3, %v8016_v41, 0.0  ;;  %9353 = vmatprep.subr.bf16.mxu0 %v10340_v31 }
0x19cb   :  { %8021 = vadd.xlane.f32.xlu1 %v8020_v8  ;;  %v8696_v8 = vld [vmem:[%s14245_s16] ss:$0 sm:$0xff] }
0x19cc   :  { %9349 = vmatpush3.bf16.msra.mxu1 %v9348_v28 }
0x19cd   :  { %9356 = vmatprep.subr.bf16.mxu1 %v10340_v31 }
0x1a56   :  { %v8019_v44 = vpop.xlane.xlu0 %8018 }
0x1a57   :  { %v8023_v33 = vmul.f32 0.03125, %v8019_v44 }
0x1a58   :  { %v8022_v53 = vpop.xlane.xlu1 %8021 }
0x1a59   :  { %v8025_v59 = vadd.f32 1e-05, %v8023_v33  ;;  %v8024_v6 = vmul.f32 0.03125, %v8022_v53 }
0x1a5b   :  { %10271 = vrsqrt.f32 %v8025_v59  ;;  %v8026_v48 = vadd.f32 1e-05, %v8024_v6  ;;  %v8697_v59 = vld [vmem:[%s14246_s17] ss:$0 sm:$0xff] }
0x1a5d   :  { %10273 = vrsqrt.f32 %v8026_v48 }
0x1a65   :  { %v10272_v18 = vpop.eup %10271 }
0x1a66   :  { %v8029_v62 = vmul.f32 %v10272_v18, %v8013_v51 }
0x1a67   :  { %v10274_v1 = vpop.eup %10273 }
0x1a68   :  { %v8031_v61 = vmul.f32 %v14123_v16, %v8029_v62  ;;  %v8030_v45 = vmul.f32 %v10274_v1, %v8014_v56  ;;  %v8702_v1 = vld [vmem:[%s14247_s18 + $0x30] sm:$0xff] }
0x1a6a   :  { %v8033_v55 = vadd.f32 %v14130_v35, %v8031_v61  ;;  %v8032_v49 = vmul.f32 %v14123_v16, %v8030_v45  ;;  %v8703_v61 = vld [vmem:[%s14247_s18 + $0x38] sm:$0xff] }
0x1a6b   :  { %v9354_v45 = vpack.c.bf16 %v8703_v61, %v8702_v1 }
0x1a6c   :  { %8035 = vst.msk [vmem:[#allocation6] sm:$0xff] %vm1090_vm3, %v8033_v55  ;;  %v8034_v25 = vadd.f32 %v14130_v35, %v8032_v49  ;;  %v8037_v19 = vadd.f32 %v8033_v55, %v14412_v0  ;;  %v8698_v55 = vld [vmem:[%s14248_s19] ss:$0 sm:$0xff] }
0x1a6d   :  { %9355 = vmatpush3.bf16.msra.mxu0 %v9354_v45 }
0x1a6e   :  { %8036 = vst.msk [vmem:[#allocation6 + $0x8] sm:$0xff] %vm1090_vm3, %v8034_v25  ;;  %v8038_v11 = vadd.f32 %v8034_v25, %v14413_v12  ;;  %v8039_v38 = vmul.f32 %v8037_v19, %v14382_v7  ;;  %v8290_v19 = vld [vmem:[%s14249_s20 + $0x8] sm:$0xff] }
0x1a70   :  { %v8040_v40 = vmul.f32 %v8038_v11, %v14383_v36  ;;  %v8041_v14 = vsel %vm1090_vm3, %v8039_v38, 0.0  ;;  %v8291_v11 = vld [vmem:[%s14249_s20 + $0x10] sm:$0xff]  ;;  %v8292_v38 = vld [vmem:[%s14249_s20 + $0x18] sm:$0xff] }
0x1a71   :  { %v8042_v10 = vrot.slane %v8041_v14, 4 }
0x1a72   :  { %v8048_v5 = vsel %vm1090_vm3, %v8040_v40, 0.0  ;;  %v9360_v40 = vpack.c.bf16 %v8292_v38, %v8291_v11 }
0x1a73   :  { %v8043_v16 = vadd.f32 %v8042_v10, %v8041_v14  ;;  %v8049_v23 = vrot.slane %v8048_v5, 4  ;;  %v8705_v14 = vld [vmem:[%s14248_s19 + $0x1] ss:$0 sm:$0xff] }
0x1a75   :  { %v8044_v30 = vrot.slane %v8043_v16, 2  ;;  %v8050_v26 = vadd.f32 %v8049_v23, %v8048_v5 }
0x1a77   :  { %v8045_v35 = vadd.f32 %v8044_v30, %v8043_v16  ;;  %v8051_v17 = vrot.slane %v8050_v26, 2 }
0x1a79   :  { %v8046_v29 = vrot.slane %v8045_v35, 1  ;;  %v8052_v20 = vadd.f32 %v8051_v17, %v8050_v26 }
0x1a7b   :  { %v8053_v46 = vrot.slane %v8052_v20, 1  ;;  %v8047_v63 = vadd.f32 %v8046_v29, %v8045_v35 }
0x1a7d   :  { %v8054_v2 = vadd.f32 %v8053_v46, %v8052_v20 }
0x1a7f   :  { %v8059_v7 = vsel %vm4393_vm7, %v8054_v2, %v8047_v63 }
0x1a80   :  { %v8062_v36 = vsel %vm8061_vm14, %v8059_v7, 0.0 }
0x1a81   :  { %8063 = vadd.xlane.f32.xlu0 %v8062_v36 }
0x1b0e   :  { %v8064_v13 = vpop.xlane.xlu0 %8063 }
0x1b0f   :  { %v8065_v24 = vmul.f32 0.03125, %v8064_v13 }
0x1b11   :  { %v8067_v3 = vrot.slane %v8065_v24, 1  ;;  %v8070_v54 = vsub.f32 %v8047_v63, %v8065_v24 }
0x1b13   :  { %v8071_v42 = vsub.f32 %v8054_v2, %v8067_v3  ;;  %v8072_v39 = vmul.f32 %v8070_v54, %v8070_v54 }
0x1b15   :  { %v8073_v47 = vmul.f32 %v8071_v42, %v8071_v42 }
0x1b17   :  { %v8076_v27 = vrot.slane %v8073_v47, 7 }
0x1b19   :  { %v8077_v21 = vsel %vm4393_vm7, %v8076_v27, %v8072_v39 }
0x1b1a   :  { %v8079_v4 = vsel %vm8061_vm14, %v8077_v21, 0.0 }
0x1b1b   :  { %8080 = vadd.xlane.f32.xlu1 %v8079_v4 }
0x1ba8   :  { %v8081_v51 = vpop.xlane.xlu1 %8080 }
0x1ba9   :  { %v8082_v22 = vmul.f32 0.03125, %v8081_v51 }
0x1bab   :  { %v8083_v56 = vadd.f32 1e-05, %v8082_v22 }
0x1bad   :  { %10275 = vrsqrt.f32 %v8083_v56 }
0x1bb7   :  { %v10276_v37 = vpop.eup %10275 }
0x1bb8   :  { %v8086_v60 = vrot.slane %v10276_v37, 1  ;;  %v8089_v41 = vmul.f32 %v10276_v37, %v8070_v54 }
0x1bba   :  { %v8090_v44 = vmul.f32 %v8086_v60, %v8071_v42  ;;  %v8097_v33 = vmul.f32 %v8696_v8, %v8089_v41 }
0x1bbc   :  { %v8098_v53 = vmul.f32 %v8696_v8, %v8090_v44  ;;  %v8105_v48 = vadd.f32 %v8697_v59, %v8097_v33 }
0x1bbe   :  { %v8106_v6 = vadd.f32 %v8697_v59, %v8098_v53 }
0x1bc0   :  { %v8120_v18 = vrot.slane %v8106_v6, 7 }
0x1bc2   :  { %v8121_v62 = vsel %vm4393_vm7, %v8120_v18, %v8105_v48 }
0x1bc3   :  { %9316 = vmatmul.mubr.msk.f32.vlgmr.msra.gmra.mrb[120].mxu1 %vm1090_vm3, %v8121_v62 }
0x1bc4   :  { %9337 = vmatprep.mubr.msk.f32.mxu1 %vm10337_vm4, %v14379_v50  ;;  %v8289_v50 = vld [vmem:[%s14249_s20] sm:$0xff]  ;;  %s10341_s20 = smov [#allocation6]  }
0x1bc5   :  { %v9357_v12 = vpack.c.bf16 %v8290_v19, %v8289_v50  ;;  %s8382_s7 = sshll.u32 %s10341_s20, 4  ;;  %s8383_s7 = int_to_ptr.vmem [resolvable:$true] %s8382_s7 }
0x1bc6   :  { %s10307_s19 = scalar_lea.vmem %s8383_s7, 256  ;;  %p10312_p9 = scmp.lt.s32.totalorder %s8383_s7, %s8383_s7 }
0x1bc7   :  { %9358 = vmatpush3.bf16.msra.mxu1 %v9357_v12  ;;  %p10308_p8 = scmp.ne.s32.totalorder %s8383_s7, %s10307_s19  ;;  %p10313_p10 = scmp.lt.s32.totalorder %s10307_s19, %s10307_s19 }
0x1bc8   :  { %9359 = vmatprep.subr.bf16.mxu1 %v10340_v31 }
0x1bc9   :  { %p10314_p11 = por %p10313_p10, %p10312_p9 }
0x1bcb   :  { %9361 = vmatpush3.bf16.msra.mxu1 %v9360_v40  ;;  %p10315_p12 = pnand %p10314_p11, %p10308_p8 }
0x1c96   :  { %v8190_v49 = vpop.f32.mrb[120].mxu1 }
0x1c97   :  { %v8191_v25 = vadd.f32 %v8698_v55, %v8190_v49  ;;  %v9317_v0 = vpop.f32.mrb[121].mxu1 }
0x1c99   :  { %9327 = vmatmul.mubr.msk.f32.vlgmr.msra.gmra.mrb[2].mxu0 %vm1090_vm3, %v8191_v25 }
0x1d6c   :  { %v8276_v10 = vpop.f32.mrb[2].mxu0 }
0x1d6d   :  { %v8277_v5 = vadd.f32 %v8705_v14, %v8276_v10  ;;  %v9328_v16 = vpop.f32.mrb[3].mxu0 }
0x1d6f   :  { %v8280_v23 = vmin.f32 %v8277_v5, 20.0 }
0x1d71   :  { %v8281_v30 = vmul.f32 1.442695, %v8280_v23 }
0x1d73   :  { %10277 = vpow2.f32 %v8281_v30 }
0x1d7d   :  { %v10278_v26 = vpop.eup %10277 }
0x1d7e   :  { %v8283_v35 = vadd.f32 2.0, %v10278_v26 }
0x1d80   :  { %v8284_v17 = vmul.f32 %v10278_v26, %v8283_v35 }
0x1d82   :  { %v8286_v29 = vadd.f32 2.0, %v8284_v17  ;;  %v8285_v20 = vmul.f32 %v8284_v17, %v8277_v5 }
0x1d84   :  { %10279 = vrcp.f32 %v8286_v29 }
0x1d8e   :  { %v10280_v46 = vpop.eup %10279 }
0x1d8f   :  { %v8288_v63 = vmul.f32 %v10280_v46, %v8285_v20 }
0x1d91   :  { %9338 = vmatmul.mubr.msk.f32.vlgmr.msra.gmra.mrb[122].mxu1 %vm1090_vm3, %v8288_v63 }
0x1d92   :  { %10318 = shalt.err (!%p10315_p12)
}
0x1d93   :  { %s10319_s29 = scalar_lea.hbm %s14252_s23, 256 }
0x1d94   :  { %p10320_p13 = scmp.ne.s32.totalorder %s14252_s23, %s10319_s29  ;;  %p10323_p0 = scmp.lt.u32.totalorder %s10319_s29, %s14252_s23 }
0x1d96   :  { %p10325_p1 = pnand %p10323_p0, %p10320_p13 }
0x1d98   :  { %10328 = shalt.err (!%p10325_p1)
}
0x1d99   :  { %s10342_s30 = smov 128   ;;  %s10343_s24 = smov 8   ;;  %v8707_v2 = vld [vmem:[#allocation2] ss:$0 sm:$0xff]  ;;  %vm8373_vm3 = vcmask 1024  }
0x1d9a   :  { %8388 = dma.vmem_to_hbm [thread:$0]  %s8383_s7, 256, %s14252_s23, [#allocation5], %s10342_s30, %s10342_s30, %s10343_s24  }
0x1e64   :  { %v8369_v7 = vpop.f32.mrb[122].mxu1 }
0x1e65   :  { %v8370_v36 = vadd.f32 %v8707_v2, %v8369_v7  ;;  %v9339_v13 = vpop.f32.mrb[123].mxu1 }
0x1e67   :  { %8374 = vst.msk [vmem:[%s14251_s22] sm:$0x3] %vm8373_vm3, %v8370_v36 }
0x1e68   :  { %10331 = dma.done.wait [#allocation5], 256  }
0x1e69   :  { %10332 = vsyncadd [#allocation5], 4294967040 }
0x1e6a   :  { %8394 = vsyncpa [#allocation4], 1 }
0x1e6b   :  { %8395 = vsyncpa [#allocation5], 1 }

</bundles_post_ra>
